<compile_context>
chip_gen: v6e
topology: v6e:2x2x1
jax: 0.10.0
libtpu: 0.0.40
codegen_flags: <defaults>
</compile_context>

<pallas_src>
import functools

import jax
import jax.numpy as jnp
from jax import lax
from jax.experimental import pallas as pl
from jax.experimental.pallas import tpu as pltpu

LANE = 128
_BN_EPS = 1e-5


def _round_up(x, m):
    return (x + m - 1) // m * m


def _pad_last(x, target):
    pad = target - x.shape[-1]
    if pad == 0:
        return x
    return jnp.pad(x, [(0, 0)] * (x.ndim - 1) + [(0, pad)])


def _fold_weight(w, cinp, coutp):
    """(3, 3, cin, cout) f32 -> (3, 3*cinp, coutp) bf16 with kx folded into Cin.

    Folded index is kx*cinp + ci, matching the kernel's concat([x_l, x_c, x_r])
    (x_l holds x[.., j-1]  <->  kx=0 tap)."""
    cin, cout = w.shape[2], w.shape[3]
    wp = jnp.pad(w, ((0, 0), (0, 0), (0, cinp - cin), (0, coutp - cout)))
    return wp.reshape(3, 3 * cinp, coutp).astype(jnp.bfloat16)


def _pick_row_tile(h, w):
    """Largest divisor of h with ~256-512 flat output rows per tile."""
    cap = max(1, min(32, 512 // max(w, 1)))
    best = 1
    for d in range(1, min(cap, h) + 1):
        if h % d == 0:
            best = d
    return best


def _pick_flat_block(total, cap):
    """Largest multiple-of-8 divisor of `total` that is <= cap."""
    best8 = 0
    for d in range(1, min(cap, total) + 1):
        if total % d == 0 and d % 8 == 0:
            best8 = d
    return best8 if best8 else total


def _compiler_params(block_bytes, semantics):
    try:
        cap = int(pltpu.get_tpu_info().vmem_capacity_bytes)
    except Exception:
        cap = 64 << 20          # conservative (v7x per-TC physical VMEM)
    want = int(block_bytes) + (16 << 20)
    limit = max(want, 32 << 20)
    limit = min(limit, int(cap * 0.85), 100 << 20)
    limit = max(limit, 16 << 20)
    return pltpu.CompilerParams(dimension_semantics=semantics,
                                vmem_limit_bytes=limit)


# --------------------------------------------------------------------------- #
# 3x3 conv (pad=1) tile kernel: TH output rows per grid step + BN statistics.
# --------------------------------------------------------------------------- #
def _conv_tile_kernel(*refs, num_groups, fused_bn):
    """Ref layout (inputs, outputs, scratch):
        [scale_ref, shift_ref]                    iff fused_bn, (1, Cin) f32
        per group g: top_halo (1,1,W,Cg), main (1,TH,W,Cg), bot_halo (1,1,W,Cg)
        per group g: w_g  (3, 3*Cg, Coutp) bf16   (kx folded into Cin)
        o_ref     (1, TH, W, Coutp)               raw conv output tile
        stats_ref (1, 1, 2, Coutp) f32            [sum, sum_sq] over this tile
        acc_ref   (TH*W, Coutp) f32               VMEM accumulator scratch
    """
    idx = 0
    if fused_bn:
        scale_ref, shift_ref = refs[0], refs[1]
        idx = 2
    act_refs = refs[idx:idx + 3 * num_groups]
    idx += 3 * num_groups
    w_refs = refs[idx:idx + num_groups]
    idx += num_groups
    o_ref, stats_ref, acc_ref = refs[idx], refs[idx + 1], refs[idx + 2]

    tt = pl.program_id(1)
    nt = pl.num_programs(1)
    th, w, coutp = o_ref.shape[1], o_ref.shape[2], o_ref.shape[3]
    rext = (th + 2) * w

    first = True
    for g in range(num_groups):
        top_ref, mid_ref, bot_ref = act_refs[3 * g:3 * g + 3]
        cg = mid_ref.shape[-1]

        top = top_ref[0, 0].astype(jnp.float32)                   # (W, Cg)
        mid = mid_ref[0].reshape(th * w, cg).astype(jnp.float32)  # (TH*W, Cg)
        bot = bot_ref[0, 0].astype(jnp.float32)                   # (W, Cg)

        if fused_bn:
            # Previous stage's BatchNorm + ReLU fused into this conv's input.
            sc, sh = scale_ref[...], shift_ref[...]
            top = jnp.maximum(top * sc + sh, 0.0)
            mid = jnp.maximum(mid * sc + sh, 0.0)
            bot = jnp.maximum(bot * sc + sh, 0.0)

        # Out-of-image halo rows act as the conv's zero padding (applied AFTER
        # the fused BN, matching zero-padding of the normalized activation).
        top = top * (tt > 0).astype(jnp.float32)
        bot = bot * (tt < nt - 1).astype(jnp.float32)

        ext = jnp.concatenate([top, mid, bot], axis=0)            # (rext, Cg)

        # Column-shifted copies x[.., j-1] / x[.., j+1] with boundary zeros.
        # The shift is done on the flattened rows; cross-row leakage at the
        # seams lands exactly on the masked (j==0 / j==W-1) positions.
        zrow = jnp.zeros((1, cg), jnp.float32)
        x_l = jnp.concatenate([zrow, ext[:rext - 1]], axis=0)
        x_r = jnp.concatenate([ext[1:], zrow], axis=0)
        col = lax.broadcasted_iota(jnp.int32, (rext, cg), 0) % w
        x_l = jnp.where(col > 0, x_l, 0.0)
        x_r = jnp.where(col < w - 1, x_r, 0.0)

        # K = 3*Cin folded operand, bf16 for the MXU.
        ext3 = jnp.concatenate([x_l, ext, x_r], axis=-1).astype(jnp.bfloat16)

        w_ref = w_refs[g]                                         # (3,3Cg,Cout)
        for ky in range(3):
            slab = ext3[ky * w:ky * w + th * w]                   # (TH*W, 3Cg)
            y = jnp.dot(slab, w_ref[ky], preferred_element_type=jnp.float32)
            if first:
                acc_ref[...] = y
                first = False
            else:
                acc_ref[...] += y

    acc = acc_ref[...]
    o_ref[0] = acc.reshape(th, w, coutp).astype(o_ref.dtype)
    s = jnp.sum(acc, axis=0, keepdims=True)                       # (1, Coutp)
    ss = jnp.sum(acc * acc, axis=0, keepdims=True)                # (1, Coutp)
    stats_ref[0, 0] = jnp.concatenate([s, ss], axis=0)


def _conv3x3_bn_stats(xs, ws, out_dtype, scale_shift=None):
    """One 3x3/pad=1 conv over NHWC inputs whose channels are lane-padded.

    xs: list of (N, H, W, Cin_g) bf16 arrays (Cin-split groups of one conv).
    ws: list of (3, 3*Cin_g, Coutp) bf16 folded weights.
    scale_shift: optional (scale, shift), each (1, Cin) f32 -> fused
                 relu(x*scale + shift) applied to the inputs (previous BN+ReLU).
    Returns (z, stats): conv output (N,H,W,Coutp) in `out_dtype` and per-tile
    [sum, sum_sq] statistics (N, H//TH, 2, Coutp) f32.
    """
    num_groups = len(xs)
    n, h, w, _ = xs[0].shape
    coutp = ws[0].shape[-1]
    fused = scale_shift is not None

    th = _pick_row_tile(h, w)
    nt = h // th

    in_specs, operands = [], []
    if fused:
        for arr in scale_shift:
            in_specs.append(pl.BlockSpec((1, arr.shape[-1]),
                                         lambda nn, tt: (0, 0)))
            operands.append(arr)
    for x in xs:
        cg = x.shape[-1]
        # top halo row (clamped), TH-row main tile, bottom halo row (clamped).
        in_specs.append(pl.BlockSpec(
            (1, 1, w, cg),
            lambda nn, tt: (nn, jnp.maximum(tt * th - 1, 0), 0, 0)))
        in_specs.append(pl.BlockSpec(
            (1, th, w, cg), lambda nn, tt: (nn, tt, 0, 0)))
        in_specs.append(pl.BlockSpec(
            (1, 1, w, cg),
            lambda nn, tt: (nn, jnp.minimum(tt * th + th, h - 1), 0, 0)))
        operands += [x, x, x]
    for wt in ws:
        in_specs.append(pl.BlockSpec(wt.shape, lambda nn, tt: (0, 0, 0)))
        operands.append(wt)

    out_shape = [jax.ShapeDtypeStruct((n, h, w, coutp), out_dtype),
                 jax.ShapeDtypeStruct((n, nt, 2, coutp), jnp.float32)]
    out_specs = [pl.BlockSpec((1, th, w, coutp), lambda nn, tt: (nn, tt, 0, 0)),
                 pl.BlockSpec((1, 1, 2, coutp), lambda nn, tt: (nn, tt, 0, 0))]

    # VMEM accounting: double-buffered blocks + generous in-kernel temporaries.
    blk = 0
    for x in xs:
        cg = x.shape[-1]
        blk += 2 * (th + 2) * w * cg * x.dtype.itemsize
        blk += 8 * (th + 2) * w * cg * 4          # f32 / bf16 shifted copies
    for wt in ws:
        blk += 2 * wt.size * wt.dtype.itemsize
    blk += 2 * th * w * coutp * jnp.dtype(out_dtype).itemsize
    blk += th * w * coutp * 4                     # f32 accumulator scratch
    blk += 8 * coutp * 4
    if fused:
        blk += 4 * 4 * scale_shift[0].shape[-1]

    kernel = functools.partial(_conv_tile_kernel, num_groups=num_groups,
                               fused_bn=fused)
    z, stats = pl.pallas_call(
        kernel,
        grid=(n, nt),
        in_specs=in_specs,
        out_specs=out_specs,
        out_shape=out_shape,
        scratch_shapes=[pltpu.VMEM((th * w, coutp), jnp.float32)],
        compiler_params=_compiler_params(blk, ("parallel", "parallel")),
    )(*operands)
    return z, stats


# --------------------------------------------------------------------------- #
# BatchNorm(+ReLU) apply: large-tile elementwise pass over (N*H*W, C).
# --------------------------------------------------------------------------- #
def _bn_relu_kernel(z_ref, scale_ref, shift_ref, o_ref):
    o_ref[...] = jnp.maximum(z_ref[...] * scale_ref[...] + shift_ref[...], 0.0)


def _bn_relu_apply(z, scale, shift):
    n, h, w, c = z.shape
    rows = n * h * w
    zf = z.reshape(rows, c)
    rb = _pick_flat_block(rows, cap=2048)
    blk = (2 * rb * c + 2 * c) * 4
    y = pl.pallas_call(
        _bn_relu_kernel,
        grid=(rows // rb,),
        in_specs=[pl.BlockSpec((rb, c), lambda i: (i, 0)),
                  pl.BlockSpec((1, c), lambda i: (0, 0)),
                  pl.BlockSpec((1, c), lambda i: (0, 0))],
        out_specs=pl.BlockSpec((rb, c), lambda i: (i, 0)),
        out_shape=jax.ShapeDtypeStruct((rows, c), jnp.float32),
        compiler_params=_compiler_params(blk, ("parallel",)),
    )(zf, scale, shift)
    return y.reshape(n, h, w, c)


def _bn_affine_from_stats(stats, gamma_p, beta_p, count):
    """Fold training-mode batch statistics + gamma/beta into per-channel
    scale/shift (f32).  `stats` is (N, NT, 2, C) with [sum, sum_sq] per tile."""
    s = jnp.sum(stats[:, :, 0, :], axis=(0, 1))
    ss = jnp.sum(stats[:, :, 1, :], axis=(0, 1))
    mean = s / count
    var = jnp.maximum(ss / count - mean * mean, 0.0)     # biased (training mode)
    scale = gamma_p * lax.rsqrt(var + _BN_EPS)
    shift = beta_p - mean * scale
    return scale[None, :], shift[None, :]


# --------------------------------------------------------------------------- #
# Plain-JAX glue: gather-free bilinear x2 upsample, parameter init, forward.
# --------------------------------------------------------------------------- #
def _bilinear_matrix(n_in, n_out):
    """(n_out, n_in) align_corners=True interpolation matrix."""
    if n_in == 1:
        return jnp.ones((n_out, 1), jnp.float32)
    pos = jnp.arange(n_out, dtype=jnp.float32) * ((n_in - 1) / (n_out - 1))
    i0 = jnp.floor(pos)
    frac = (pos - i0)[:, None]
    i0 = i0[:, None]
    cols = jnp.arange(n_in, dtype=jnp.float32)[None, :]
    return (jnp.where(cols == i0, 1.0 - frac, 0.0)
            + jnp.where(cols == i0 + 1.0, frac, 0.0))


def init_up_params(key, in_channels, out_channels):
    """Parameters matching Up(in_channels, out_channels, bilinear=True)."""
    mid = in_channels // 2          # DoubleConv(in_channels, out, in // 2)

    def conv_init(k, cin, cout):
        # PyTorch Conv2d default: U(-1/sqrt(fan_in), 1/sqrt(fan_in)), fan_in=cin*9.
        bound = 1.0 / jnp.sqrt(jnp.float32(cin * 9))
        kw, kb = jax.random.split(k)
        w = jax.random.uniform(kw, (3, 3, cin, cout), jnp.float32, -bound, bound)
        b = jax.random.uniform(kb, (cout,), jnp.float32, -bound, bound)
        return w, b

    k1, k2 = jax.random.split(key)
    w1, b1 = conv_init(k1, in_channels, mid)
    w2, b2 = conv_init(k2, mid, out_channels)
    return dict(
        w1=w1, b1=b1, g1=jnp.ones((mid,), jnp.float32),
        be1=jnp.zeros((mid,), jnp.float32),
        w2=w2, b2=b2, g2=jnp.ones((out_channels,), jnp.float32),
        be2=jnp.zeros((out_channels,), jnp.float32),
    )


def up_forward(params, x1, x2):
    """Up.forward(x1, x2). Inputs/outputs are NCHW float32, like PyTorch.

    BatchNorm uses training-mode (biased) batch statistics, matching a fresh
    PyTorch module's training forward (NOT eval with running stats).
    """
    # TODO(synk): only the bilinear=True branch is implemented (the
    # ConvTranspose2d upsampling path of the reference module is omitted).
    n, c2, h, w = x2.shape
    c1 = x1.shape[1]
    mid = params["g1"].shape[0]
    cout = params["g2"].shape[0]
    c2p, c1p = _round_up(c2, LANE), _round_up(c1, LANE)
    midp, coutp = _round_up(mid, LANE), _round_up(cout, LANE)

    # x1: NCHW -> NHWC at low resolution, then a gather-free bilinear x2
    # upsample (align_corners=True) expressed as two tiny interpolation matmuls.
    x1n = jnp.transpose(x1, (0, 2, 3, 1))
    h1, w1 = x1n.shape[1], x1n.shape[2]
    mh = _bilinear_matrix(h1, 2 * h1)
    mw = _bilinear_matrix(w1, 2 * w1)
    x1n = jnp.einsum('oh,nhwc->nowc', mh, x1n)
    x1n = jnp.einsum('ow,nhwc->nhoc', mw, x1n)
    diff_y = h - x1n.shape[1]
    diff_x = w - x1n.shape[2]
    x1n = jnp.pad(x1n, ((0, 0), (diff_y // 2, diff_y - diff_y // 2),
                        (diff_x // 2, diff_x - diff_x // 2), (0, 0)))
    x1n = _pad_last(x1n, c1p).astype(jnp.bfloat16)
    x2n = _pad_last(jnp.transpose(x2, (0, 2, 3, 1)), c2p).astype(jnp.bfloat16)

    # The channel concat is replaced by splitting conv1's weights along Cin
    # (PyTorch concatenates [x2, x1], so x2 taps come first).
    w1_ = params["w1"]                                   # (3, 3, c2 + c1, mid)
    w1a = _fold_weight(w1_[:, :, :c2, :], c2p, midp)
    w1b = _fold_weight(w1_[:, :, c2:, :], c1p, midp)
    w2f = _fold_weight(params["w2"], midp, coutp)
    g1 = _pad_last(params["g1"], midp)
    be1 = _pad_last(params["be1"], midp)
    g2 = _pad_last(params["g2"], coutp)
    be2 = _pad_last(params["be2"], coutp)
    # NOTE: conv biases (params["b1"], params["b2"]) are exactly cancelled by
    # the train-mode BatchNorm mean subtraction, so they are folded away.

    count = n * h * w

    # Stage 1: conv1 (TH-row tiles, 1-row halos) + BN1 statistics; z1 in bf16.
    z1, st1 = _conv3x3_bn_stats([x2n, x1n], [w1a, w1b], out_dtype=jnp.bfloat16)
    scale1, shift1 = _bn_affine_from_stats(st1, g1, be1, count)

    # Stage 2: conv2 with BN1+ReLU1 fused into its input path, + BN2 statistics.
    z2, st2 = _conv3x3_bn_stats([z1], [w2f], out_dtype=jnp.float32,
                                scale_shift=(scale1, shift1))
    scale2, shift2 = _bn_affine_from_stats(st2, g2, be2, count)

    # BN2 + ReLU2 (large-tile elementwise pass), channel slice, back to NCHW.
    y = _bn_relu_apply(z2, scale2, shift2)
    return jnp.transpose(y[:, :, :, :cout], (0, 3, 1, 2))


if __name__ == "__main__":
    key = jax.random.PRNGKey(0)
    kp, kx1, kx2 = jax.random.split(key, 3)

    in_channels, out_channels = 8, 4
    params = init_up_params(kp, in_channels, out_channels)

    # Standard UNet decoder shapes: x1 (coarse) has in_channels//2 channels at
    # half resolution, x2 (skip) has in_channels//2 channels at full resolution.
    x1 = jax.random.normal(kx1, (2, in_channels // 2, 8, 8), jnp.float32)
    x2 = jax.random.normal(kx2, (2, in_channels // 2, 16, 16), jnp.float32)

    out = jax.jit(up_forward)(params, x1, x2)
    out = jax.block_until_ready(out)
    assert out.shape == (2, out_channels, 16, 16), out.shape
    assert bool(jnp.all(jnp.isfinite(out)))
    print("KERNEL_OK")
</pallas_src>

<mosaic_0001>
module attributes {stable_mosaic.version = 11 : i64} {
  func.func @_conv_tile_kernel(%arg0: i32, %arg1: i32, %arg2: memref<1x1x16x128xbf16, #tpu.memory_space<vmem>>, %arg3: memref<1x16x16x128xbf16, #tpu.memory_space<vmem>>, %arg4: memref<1x1x16x128xbf16, #tpu.memory_space<vmem>>, %arg5: memref<1x1x16x128xbf16, #tpu.memory_space<vmem>>, %arg6: memref<1x16x16x128xbf16, #tpu.memory_space<vmem>>, %arg7: memref<1x1x16x128xbf16, #tpu.memory_space<vmem>>, %arg8: memref<3x384x128xbf16, #tpu.memory_space<vmem>>, %arg9: memref<3x384x128xbf16, #tpu.memory_space<vmem>>, %arg10: memref<1x16x16x128xbf16, #tpu.memory_space<vmem>>, %arg11: memref<1x1x2x128xf32, #tpu.memory_space<vmem>>, %arg12: memref<256x128xf32, #tpu.memory_space<vmem>>) attributes {dimension_semantics = [#tpu.dimension_semantics<parallel>, #tpu.dimension_semantics<parallel>], iteration_bounds = array<i64: 2, 1>, scalar_prefetch = 0 : i64, scratch_operands = 1 : i64, tpu.core_type = #tpu.core_type<tc>, window_params = [{transform_indices = @transform_0, window_bounds = array<i64: 1, 1, 16, 128>}, {transform_indices = @transform_1, window_bounds = array<i64: 1, 16, 16, 128>}, {transform_indices = @transform_2, window_bounds = array<i64: 1, 1, 16, 128>}, {transform_indices = @transform_3, window_bounds = array<i64: 1, 1, 16, 128>}, {transform_indices = @transform_4, window_bounds = array<i64: 1, 16, 16, 128>}, {transform_indices = @transform_5, window_bounds = array<i64: 1, 1, 16, 128>}, {pipeline_mode = #tpu.pipeline_mode<synchronous>, transform_indices = @transform_6, window_bounds = array<i64: 3, 384, 128>}, {pipeline_mode = #tpu.pipeline_mode<synchronous>, transform_indices = @transform_7, window_bounds = array<i64: 3, 384, 128>}, {transform_indices = @transform_8, window_bounds = array<i64: 1, 16, 16, 128>}, {transform_indices = @transform_9, window_bounds = array<i64: 1, 1, 2, 128>}]} {
    %c0 = arith.constant 0 : index
    %c0_0 = arith.constant 0 : index
    %c0_1 = arith.constant 0 : index
    %c0_2 = arith.constant 0 : index
    %0 = vector.load %arg2[%c0, %c0_0, %c0_1, %c0_2] : memref<1x1x16x128xbf16, #tpu.memory_space<vmem>>, vector<1x1x16x128xbf16>
    %1 = vector.shape_cast %0 : vector<1x1x16x128xbf16> to vector<16x128xbf16>
    %2 = arith.extf %1 : vector<16x128xbf16> to vector<16x128xf32>
    %c0_3 = arith.constant 0 : index
    %c0_4 = arith.constant 0 : index
    %c0_5 = arith.constant 0 : index
    %c0_6 = arith.constant 0 : index
    %3 = vector.load %arg3[%c0_3, %c0_4, %c0_5, %c0_6] : memref<1x16x16x128xbf16, #tpu.memory_space<vmem>>, vector<1x16x16x128xbf16>
    %4 = vector.shape_cast %3 : vector<1x16x16x128xbf16> to vector<16x16x128xbf16>
    %5 = vector.shape_cast %4 : vector<16x16x128xbf16> to vector<256x128xbf16>
    %6 = arith.extf %5 : vector<256x128xbf16> to vector<256x128xf32>
    %c0_7 = arith.constant 0 : index
    %c0_8 = arith.constant 0 : index
    %c0_9 = arith.constant 0 : index
    %c0_10 = arith.constant 0 : index
    %7 = vector.load %arg4[%c0_7, %c0_8, %c0_9, %c0_10] : memref<1x1x16x128xbf16, #tpu.memory_space<vmem>>, vector<1x1x16x128xbf16>
    %8 = vector.shape_cast %7 : vector<1x1x16x128xbf16> to vector<16x128xbf16>
    %9 = arith.extf %8 : vector<16x128xbf16> to vector<16x128xf32>
    %c0_i32 = arith.constant 0 : i32
    %10 = arith.cmpi sgt, %arg1, %c0_i32 : i32
    %11 = arith.extui %10 : i1 to i32
    %12 = arith.sitofp %11 : i32 to f32
    %13 = vector.broadcast %12 : f32 to vector<16x128xf32>
    %14 = arith.mulf %2, %13 : vector<16x128xf32>
    %c0_i32_11 = arith.constant 0 : i32
    %15 = arith.cmpi slt, %arg1, %c0_i32_11 : i32
    %16 = arith.extui %15 : i1 to i32
    %17 = arith.sitofp %16 : i32 to f32
    %18 = vector.broadcast %17 : f32 to vector<16x128xf32>
    %19 = arith.mulf %9, %18 : vector<16x128xf32>
    %20 = tpu.concatenate %14, %6, %19 in 0 : vector<16x128xf32>, vector<256x128xf32>, vector<16x128xf32> -> vector<288x128xf32>
    %cst = arith.constant 0.000000e+00 : f32
    %21 = vector.broadcast %cst : f32 to vector<1x128xf32>
    %22 = vector.extract_strided_slice %20 {offsets = [0, 0], sizes = [287, 128], strides = [1, 1]} : vector<288x128xf32> to vector<287x128xf32>
    %23 = tpu.concatenate %21, %22 in 0 : vector<1x128xf32>, vector<287x128xf32> -> vector<288x128xf32>
    %24 = vector.extract_strided_slice %20 {offsets = [1, 0], sizes = [287, 128], strides = [1, 1]} : vector<288x128xf32> to vector<287x128xf32>
    %25 = tpu.concatenate %24, %21 in 0 : vector<287x128xf32>, vector<1x128xf32> -> vector<288x128xf32>
    %26 = tpu.iota {dimensions = array<i32: 0>} : vector<288x128xi32>
    %c16_i32 = arith.constant 16 : i32
    %c0_i32_12 = arith.constant 0 : i32
    %27 = arith.cmpi eq, %c16_i32, %c0_i32_12 : i32
    %c1_i32 = arith.constant 1 : i32
    %28 = arith.select %27, %c1_i32, %c16_i32 : i32
    %29 = vector.broadcast %28 : i32 to vector<288x128xi32>
    %30 = arith.remsi %26, %29 : vector<288x128xi32>
    %c0_i32_13 = arith.constant 0 : i32
    %31 = vector.broadcast %c0_i32_13 : i32 to vector<288x128xi32>
    %32 = arith.cmpi ne, %30, %31 : vector<288x128xi32>
    %c0_i32_14 = arith.constant 0 : i32
    %33 = vector.broadcast %c0_i32_14 : i32 to vector<288x128xi32>
    %34 = arith.cmpi slt, %30, %33 : vector<288x128xi32>
    %c0_i32_15 = arith.constant 0 : i32
    %35 = arith.cmpi slt, %28, %c0_i32_15 : i32
    %36 = vector.broadcast %35 : i1 to vector<288x128xi1>
    %37 = vector.broadcast %36 : vector<288x128xi1> to vector<288x128xi1>
    %38 = arith.xori %34, %37 : vector<288x128xi1>
    %39 = arith.andi %38, %32 : vector<288x128xi1>
    %40 = vector.broadcast %28 : i32 to vector<288x128xi32>
    %41 = arith.addi %30, %40 : vector<288x128xi32>
    %42 = arith.select %39, %41, %30 : vector<288x128xi1>, vector<288x128xi32>
    %c0_i32_16 = arith.constant 0 : i32
    %43 = vector.broadcast %c0_i32_16 : i32 to vector<288x128xi32>
    %44 = arith.cmpi sgt, %42, %43 : vector<288x128xi32>
    %cst_17 = arith.constant 0.000000e+00 : f32
    %45 = vector.broadcast %cst_17 : f32 to vector<288x128xf32>
    %46 = arith.select %44, %23, %45 : vector<288x128xi1>, vector<288x128xf32>
    %c15_i32 = arith.constant 15 : i32
    %47 = vector.broadcast %c15_i32 : i32 to vector<288x128xi32>
    %48 = arith.cmpi slt, %42, %47 : vector<288x128xi32>
    %cst_18 = arith.constant 0.000000e+00 : f32
    %49 = vector.broadcast %cst_18 : f32 to vector<288x128xf32>
    %50 = arith.select %48, %25, %49 : vector<288x128xi1>, vector<288x128xf32>
    %51 = tpu.concatenate %46, %20, %50 in 1 : vector<288x128xf32>, vector<288x128xf32>, vector<288x128xf32> -> vector<288x384xf32>
    %52 = arith.truncf %51 : vector<288x384xf32> to vector<288x384xbf16>
    %53 = vector.extract_strided_slice %52 {offsets = [0, 0], sizes = [256, 384], strides = [1, 1]} : vector<288x384xbf16> to vector<256x384xbf16>
    %c0_19 = arith.constant 0 : index
    %c0_20 = arith.constant 0 : index
    %c0_21 = arith.constant 0 : index
    %54 = vector.load %arg8[%c0_19, %c0_20, %c0_21] : memref<3x384x128xbf16, #tpu.memory_space<vmem>>, vector<1x384x128xbf16>
    %55 = vector.shape_cast %54 : vector<1x384x128xbf16> to vector<384x128xbf16>
    %cst_22 = arith.constant dense<0.000000e+00> : vector<256x128xf32>
    %56 = tpu.matmul %53, %55, %cst_22 {dimension_numbers = #tpu.dot_dimension_numbers<[1], [0], [0], [1], [0, 0, 1, 1], [], []>} : vector<256x384xbf16>, vector<384x128xbf16>, vector<256x128xf32> -> vector<256x128xf32>
    %c0_23 = arith.constant 0 : index
    %c0_24 = arith.constant 0 : index
    %57 = vector.load %arg12[%c0_23, %c0_24] : memref<256x128xf32, #tpu.memory_space<vmem>>, vector<256x128xf32>
    tpu.vector_store %arg12[%c0_23, %c0_24], %56 {strides = array<i32>} : memref<256x128xf32, #tpu.memory_space<vmem>>, vector<256x128xf32>,
    %58 = vector.extract_strided_slice %52 {offsets = [16, 0], sizes = [256, 384], strides = [1, 1]} : vector<288x384xbf16> to vector<256x384xbf16>
    %c1 = arith.constant 1 : index
    %c0_25 = arith.constant 0 : index
    %c0_26 = arith.constant 0 : index
    %59 = vector.load %arg8[%c1, %c0_25, %c0_26] : memref<3x384x128xbf16, #tpu.memory_space<vmem>>, vector<1x384x128xbf16>
    %60 = vector.shape_cast %59 : vector<1x384x128xbf16> to vector<384x128xbf16>
    %cst_27 = arith.constant dense<0.000000e+00> : vector<256x128xf32>
    %61 = tpu.matmul %58, %60, %cst_27 {dimension_numbers = #tpu.dot_dimension_numbers<[1], [0], [0], [1], [0, 0, 1, 1], [], []>} : vector<256x384xbf16>, vector<384x128xbf16>, vector<256x128xf32> -> vector<256x128xf32>
    %c0_28 = arith.constant 0 : index
    %c0_29 = arith.constant 0 : index
    %62 = vector.load %arg12[%c0_28, %c0_29] : memref<256x128xf32, #tpu.memory_space<vmem>>, vector<256x128xf32>
    %63 = arith.addf %62, %61 : vector<256x128xf32>
    %c0_30 = arith.constant 0 : index
    %c0_31 = arith.constant 0 : index
    %64 = vector.load %arg12[%c0_30, %c0_31] : memref<256x128xf32, #tpu.memory_space<vmem>>, vector<256x128xf32>
    tpu.vector_store %arg12[%c0_30, %c0_31], %63 {strides = array<i32>} : memref<256x128xf32, #tpu.memory_space<vmem>>, vector<256x128xf32>,
    %65 = vector.extract_strided_slice %52 {offsets = [32, 0], sizes = [256, 384], strides = [1, 1]} : vector<288x384xbf16> to vector<256x384xbf16>
    %c2 = arith.constant 2 : index
    %c0_32 = arith.constant 0 : index
    %c0_33 = arith.constant 0 : index
    %66 = vector.load %arg8[%c2, %c0_32, %c0_33] : memref<3x384x128xbf16, #tpu.memory_space<vmem>>, vector<1x384x128xbf16>
    %67 = vector.shape_cast %66 : vector<1x384x128xbf16> to vector<384x128xbf16>
    %cst_34 = arith.constant dense<0.000000e+00> : vector<256x128xf32>
    %68 = tpu.matmul %65, %67, %cst_34 {dimension_numbers = #tpu.dot_dimension_numbers<[1], [0], [0], [1], [0, 0, 1, 1], [], []>} : vector<256x384xbf16>, vector<384x128xbf16>, vector<256x128xf32> -> vector<256x128xf32>
    %c0_35 = arith.constant 0 : index
    %c0_36 = arith.constant 0 : index
    %69 = vector.load %arg12[%c0_35, %c0_36] : memref<256x128xf32, #tpu.memory_space<vmem>>, vector<256x128xf32>
    %70 = arith.addf %69, %68 : vector<256x128xf32>
    %c0_37 = arith.constant 0 : index
    %c0_38 = arith.constant 0 : index
    %71 = vector.load %arg12[%c0_37, %c0_38] : memref<256x128xf32, #tpu.memory_space<vmem>>, vector<256x128xf32>
    tpu.vector_store %arg12[%c0_37, %c0_38], %70 {strides = array<i32>} : memref<256x128xf32, #tpu.memory_space<vmem>>, vector<256x128xf32>,
    %c0_39 = arith.constant 0 : index
    %c0_40 = arith.constant 0 : index
    %c0_41 = arith.constant 0 : index
    %c0_42 = arith.constant 0 : index
    %72 = vector.load %arg5[%c0_39, %c0_40, %c0_41, %c0_42] : memref<1x1x16x128xbf16, #tpu.memory_space<vmem>>, vector<1x1x16x128xbf16>
    %73 = vector.shape_cast %72 : vector<1x1x16x128xbf16> to vector<16x128xbf16>
    %74 = arith.extf %73 : vector<16x128xbf16> to vector<16x128xf32>
    %c0_43 = arith.constant 0 : index
    %c0_44 = arith.constant 0 : index
    %c0_45 = arith.constant 0 : index
    %c0_46 = arith.constant 0 : index
    %75 = vector.load %arg6[%c0_43, %c0_44, %c0_45, %c0_46] : memref<1x16x16x128xbf16, #tpu.memory_space<vmem>>, vector<1x16x16x128xbf16>
    %76 = vector.shape_cast %75 : vector<1x16x16x128xbf16> to vector<16x16x128xbf16>
    %77 = vector.shape_cast %76 : vector<16x16x128xbf16> to vector<256x128xbf16>
    %78 = arith.extf %77 : vector<256x128xbf16> to vector<256x128xf32>
    %c0_47 = arith.constant 0 : index
    %c0_48 = arith.constant 0 : index
    %c0_49 = arith.constant 0 : index
    %c0_50 = arith.constant 0 : index
    %79 = vector.load %arg7[%c0_47, %c0_48, %c0_49, %c0_50] : memref<1x1x16x128xbf16, #tpu.memory_space<vmem>>, vector<1x1x16x128xbf16>
    %80 = vector.shape_cast %79 : vector<1x1x16x128xbf16> to vector<16x128xbf16>
    %81 = arith.extf %80 : vector<16x128xbf16> to vector<16x128xf32>
    %c0_i32_51 = arith.constant 0 : i32
    %82 = arith.cmpi sgt, %arg1, %c0_i32_51 : i32
    %83 = arith.extui %82 : i1 to i32
    %84 = arith.sitofp %83 : i32 to f32
    %85 = vector.broadcast %84 : f32 to vector<16x128xf32>
    %86 = arith.mulf %74, %85 : vector<16x128xf32>
    %c0_i32_52 = arith.constant 0 : i32
    %87 = arith.cmpi slt, %arg1, %c0_i32_52 : i32
    %88 = arith.extui %87 : i1 to i32
    %89 = arith.sitofp %88 : i32 to f32
    %90 = vector.broadcast %89 : f32 to vector<16x128xf32>
    %91 = arith.mulf %81, %90 : vector<16x128xf32>
    %92 = tpu.concatenate %86, %78, %91 in 0 : vector<16x128xf32>, vector<256x128xf32>, vector<16x128xf32> -> vector<288x128xf32>
    %cst_53 = arith.constant 0.000000e+00 : f32
    %93 = vector.broadcast %cst_53 : f32 to vector<1x128xf32>
    %94 = vector.extract_strided_slice %92 {offsets = [0, 0], sizes = [287, 128], strides = [1, 1]} : vector<288x128xf32> to vector<287x128xf32>
    %95 = tpu.concatenate %93, %94 in 0 : vector<1x128xf32>, vector<287x128xf32> -> vector<288x128xf32>
    %96 = vector.extract_strided_slice %92 {offsets = [1, 0], sizes = [287, 128], strides = [1, 1]} : vector<288x128xf32> to vector<287x128xf32>
    %97 = tpu.concatenate %96, %93 in 0 : vector<287x128xf32>, vector<1x128xf32> -> vector<288x128xf32>
    %98 = tpu.iota {dimensions = array<i32: 0>} : vector<288x128xi32>
    %c16_i32_54 = arith.constant 16 : i32
    %c0_i32_55 = arith.constant 0 : i32
    %99 = arith.cmpi eq, %c16_i32_54, %c0_i32_55 : i32
    %c1_i32_56 = arith.constant 1 : i32
    %100 = arith.select %99, %c1_i32_56, %c16_i32_54 : i32
    %101 = vector.broadcast %100 : i32 to vector<288x128xi32>
    %102 = arith.remsi %98, %101 : vector<288x128xi32>
    %c0_i32_57 = arith.constant 0 : i32
    %103 = vector.broadcast %c0_i32_57 : i32 to vector<288x128xi32>
    %104 = arith.cmpi ne, %102, %103 : vector<288x128xi32>
    %c0_i32_58 = arith.constant 0 : i32
    %105 = vector.broadcast %c0_i32_58 : i32 to vector<288x128xi32>
    %106 = arith.cmpi slt, %102, %105 : vector<288x128xi32>
    %c0_i32_59 = arith.constant 0 : i32
    %107 = arith.cmpi slt, %100, %c0_i32_59 : i32
    %108 = vector.broadcast %107 : i1 to vector<288x128xi1>
    %109 = vector.broadcast %108 : vector<288x128xi1> to vector<288x128xi1>
    %110 = arith.xori %106, %109 : vector<288x128xi1>
    %111 = arith.andi %110, %104 : vector<288x128xi1>
    %112 = vector.broadcast %100 : i32 to vector<288x128xi32>
    %113 = arith.addi %102, %112 : vector<288x128xi32>
    %114 = arith.select %111, %113, %102 : vector<288x128xi1>, vector<288x128xi32>
    %c0_i32_60 = arith.constant 0 : i32
    %115 = vector.broadcast %c0_i32_60 : i32 to vector<288x128xi32>
    %116 = arith.cmpi sgt, %114, %115 : vector<288x128xi32>
    %cst_61 = arith.constant 0.000000e+00 : f32
    %117 = vector.broadcast %cst_61 : f32 to vector<288x128xf32>
    %118 = arith.select %116, %95, %117 : vector<288x128xi1>, vector<288x128xf32>
    %c15_i32_62 = arith.constant 15 : i32
    %119 = vector.broadcast %c15_i32_62 : i32 to vector<288x128xi32>
    %120 = arith.cmpi slt, %114, %119 : vector<288x128xi32>
    %cst_63 = arith.constant 0.000000e+00 : f32
    %121 = vector.broadcast %cst_63 : f32 to vector<288x128xf32>
    %122 = arith.select %120, %97, %121 : vector<288x128xi1>, vector<288x128xf32>
    %123 = tpu.concatenate %118, %92, %122 in 1 : vector<288x128xf32>, vector<288x128xf32>, vector<288x128xf32> -> vector<288x384xf32>
    %124 = arith.truncf %123 : vector<288x384xf32> to vector<288x384xbf16>
    %125 = vector.extract_strided_slice %124 {offsets = [0, 0], sizes = [256, 384], strides = [1, 1]} : vector<288x384xbf16> to vector<256x384xbf16>
    %c0_64 = arith.constant 0 : index
    %c0_65 = arith.constant 0 : index
    %c0_66 = arith.constant 0 : index
    %126 = vector.load %arg9[%c0_64, %c0_65, %c0_66] : memref<3x384x128xbf16, #tpu.memory_space<vmem>>, vector<1x384x128xbf16>
    %127 = vector.shape_cast %126 : vector<1x384x128xbf16> to vector<384x128xbf16>
    %cst_67 = arith.constant dense<0.000000e+00> : vector<256x128xf32>
    %128 = tpu.matmul %125, %127, %cst_67 {dimension_numbers = #tpu.dot_dimension_numbers<[1], [0], [0], [1], [0, 0, 1, 1], [], []>} : vector<256x384xbf16>, vector<384x128xbf16>, vector<256x128xf32> -> vector<256x128xf32>
    %c0_68 = arith.constant 0 : index
    %c0_69 = arith.constant 0 : index
    %129 = vector.load %arg12[%c0_68, %c0_69] : memref<256x128xf32, #tpu.memory_space<vmem>>, vector<256x128xf32>
    %130 = arith.addf %129, %128 : vector<256x128xf32>
    %c0_70 = arith.constant 0 : index
    %c0_71 = arith.constant 0 : index
    %131 = vector.load %arg12[%c0_70, %c0_71] : memref<256x128xf32, #tpu.memory_space<vmem>>, vector<256x128xf32>
    tpu.vector_store %arg12[%c0_70, %c0_71], %130 {strides = array<i32>} : memref<256x128xf32, #tpu.memory_space<vmem>>, vector<256x128xf32>,
    %132 = vector.extract_strided_slice %124 {offsets = [16, 0], sizes = [256, 384], strides = [1, 1]} : vector<288x384xbf16> to vector<256x384xbf16>
    %c1_72 = arith.constant 1 : index
    %c0_73 = arith.constant 0 : index
    %c0_74 = arith.constant 0 : index
    %133 = vector.load %arg9[%c1_72, %c0_73, %c0_74] : memref<3x384x128xbf16, #tpu.memory_space<vmem>>, vector<1x384x128xbf16>
    %134 = vector.shape_cast %133 : vector<1x384x128xbf16> to vector<384x128xbf16>
    %cst_75 = arith.constant dense<0.000000e+00> : vector<256x128xf32>
    %135 = tpu.matmul %132, %134, %cst_75 {dimension_numbers = #tpu.dot_dimension_numbers<[1], [0], [0], [1], [0, 0, 1, 1], [], []>} : vector<256x384xbf16>, vector<384x128xbf16>, vector<256x128xf32> -> vector<256x128xf32>
    %c0_76 = arith.constant 0 : index
    %c0_77 = arith.constant 0 : index
    %136 = vector.load %arg12[%c0_76, %c0_77] : memref<256x128xf32, #tpu.memory_space<vmem>>, vector<256x128xf32>
    %137 = arith.addf %136, %135 : vector<256x128xf32>
    %c0_78 = arith.constant 0 : index
    %c0_79 = arith.constant 0 : index
    %138 = vector.load %arg12[%c0_78, %c0_79] : memref<256x128xf32, #tpu.memory_space<vmem>>, vector<256x128xf32>
    tpu.vector_store %arg12[%c0_78, %c0_79], %137 {strides = array<i32>} : memref<256x128xf32, #tpu.memory_space<vmem>>, vector<256x128xf32>,
    %139 = vector.extract_strided_slice %124 {offsets = [32, 0], sizes = [256, 384], strides = [1, 1]} : vector<288x384xbf16> to vector<256x384xbf16>
    %c2_80 = arith.constant 2 : index
    %c0_81 = arith.constant 0 : index
    %c0_82 = arith.constant 0 : index
    %140 = vector.load %arg9[%c2_80, %c0_81, %c0_82] : memref<3x384x128xbf16, #tpu.memory_space<vmem>>, vector<1x384x128xbf16>
    %141 = vector.shape_cast %140 : vector<1x384x128xbf16> to vector<384x128xbf16>
    %cst_83 = arith.constant dense<0.000000e+00> : vector<256x128xf32>
    %142 = tpu.matmul %139, %141, %cst_83 {dimension_numbers = #tpu.dot_dimension_numbers<[1], [0], [0], [1], [0, 0, 1, 1], [], []>} : vector<256x384xbf16>, vector<384x128xbf16>, vector<256x128xf32> -> vector<256x128xf32>
    %c0_84 = arith.constant 0 : index
    %c0_85 = arith.constant 0 : index
    %143 = vector.load %arg12[%c0_84, %c0_85] : memref<256x128xf32, #tpu.memory_space<vmem>>, vector<256x128xf32>
    %144 = arith.addf %143, %142 : vector<256x128xf32>
    %c0_86 = arith.constant 0 : index
    %c0_87 = arith.constant 0 : index
    %145 = vector.load %arg12[%c0_86, %c0_87] : memref<256x128xf32, #tpu.memory_space<vmem>>, vector<256x128xf32>
    tpu.vector_store %arg12[%c0_86, %c0_87], %144 {strides = array<i32>} : memref<256x128xf32, #tpu.memory_space<vmem>>, vector<256x128xf32>,
    %c0_88 = arith.constant 0 : index
    %c0_89 = arith.constant 0 : index
    %146 = vector.load %arg12[%c0_88, %c0_89] : memref<256x128xf32, #tpu.memory_space<vmem>>, vector<256x128xf32>
    %147 = vector.shape_cast %146 : vector<256x128xf32> to vector<16x16x128xf32>
    %148 = arith.truncf %147 : vector<16x16x128xf32> to vector<16x16x128xbf16>
    %c0_90 = arith.constant 0 : index
    %c0_91 = arith.constant 0 : index
    %c0_92 = arith.constant 0 : index
    %c0_93 = arith.constant 0 : index
    %149 = vector.load %arg10[%c0_90, %c0_91, %c0_92, %c0_93] : memref<1x16x16x128xbf16, #tpu.memory_space<vmem>>, vector<1x16x16x128xbf16>
    %150 = vector.shape_cast %149 : vector<1x16x16x128xbf16> to vector<16x16x128xbf16>
    %151 = vector.shape_cast %148 : vector<16x16x128xbf16> to vector<1x16x16x128xbf16>
    tpu.vector_store %arg10[%c0_90, %c0_91, %c0_92, %c0_93], %151 {strides = array<i32>} : memref<1x16x16x128xbf16, #tpu.memory_space<vmem>>, vector<1x16x16x128xbf16>,
    %cst_94 = arith.constant dense<0.000000e+00> : vector<128xf32>
    %152 = vector.multi_reduction <add>, %146, %cst_94 [0] : vector<256x128xf32> to vector<128xf32>
    %153 = vector.shape_cast %152 : vector<128xf32> to vector<1x128xf32>
    %154 = arith.mulf %146, %146 : vector<256x128xf32>
    %cst_95 = arith.constant dense<0.000000e+00> : vector<128xf32>
    %155 = vector.multi_reduction <add>, %154, %cst_95 [0] : vector<256x128xf32> to vector<128xf32>
    %156 = vector.shape_cast %155 : vector<128xf32> to vector<1x128xf32>
    %157 = tpu.concatenate %153, %156 in 0 : vector<1x128xf32>, vector<1x128xf32> -> vector<2x128xf32>
    %c0_96 = arith.constant 0 : index
    %c0_97 = arith.constant 0 : index
    %c0_98 = arith.constant 0 : index
    %c0_99 = arith.constant 0 : index
    %158 = vector.load %arg11[%c0_96, %c0_97, %c0_98, %c0_99] : memref<1x1x2x128xf32, #tpu.memory_space<vmem>>, vector<1x1x2x128xf32>
    %159 = vector.shape_cast %158 : vector<1x1x2x128xf32> to vector<2x128xf32>
    %160 = vector.shape_cast %157 : vector<2x128xf32> to vector<1x1x2x128xf32>
    tpu.vector_store %arg11[%c0_96, %c0_97, %c0_98, %c0_99], %160 {strides = array<i32>} : memref<1x1x2x128xf32, #tpu.memory_space<vmem>>, vector<1x1x2x128xf32>,
    return
  }
  func.func @transform_0(%arg0: i32, %arg1: i32) -> (i32, i32, i32, i32) {
    %c16_i32 = arith.constant 16 : i32
    %0 = arith.muli %arg1, %c16_i32 : i32
    %c1_i32 = arith.constant 1 : i32
    %1 = arith.subi %0, %c1_i32 : i32
    %c0_i32 = arith.constant 0 : i32
    %2 = arith.maxsi %1, %c0_i32 : i32
    %c0_i32_0 = arith.constant 0 : i32
    %c0_i32_1 = arith.constant 0 : i32
    %c0_i32_2 = arith.constant 0 : i32
    return %arg0, %2, %c0_i32_0, %c0_i32_1 : i32, i32, i32, i32
  }
  func.func @transform_1(%arg0: i32, %arg1: i32) -> (i32, i32, i32, i32) {
    %c0_i32 = arith.constant 0 : i32
    %c0_i32_0 = arith.constant 0 : i32
    %c0_i32_1 = arith.constant 0 : i32
    return %arg0, %arg1, %c0_i32, %c0_i32_0 : i32, i32, i32, i32
  }
  func.func @transform_2(%arg0: i32, %arg1: i32) -> (i32, i32, i32, i32) {
    %c16_i32 = arith.constant 16 : i32
    %0 = arith.muli %arg1, %c16_i32 : i32
    %c16_i32_0 = arith.constant 16 : i32
    %1 = arith.addi %0, %c16_i32_0 : i32
    %c15_i32 = arith.constant 15 : i32
    %2 = arith.minsi %1, %c15_i32 : i32
    %c0_i32 = arith.constant 0 : i32
    %c0_i32_1 = arith.constant 0 : i32
    %c0_i32_2 = arith.constant 0 : i32
    return %arg0, %2, %c0_i32, %c0_i32_1 : i32, i32, i32, i32
  }
  func.func @transform_3(%arg0: i32, %arg1: i32) -> (i32, i32, i32, i32) {
    %c16_i32 = arith.constant 16 : i32
    %0 = arith.muli %arg1, %c16_i32 : i32
    %c1_i32 = arith.constant 1 : i32
    %1 = arith.subi %0, %c1_i32 : i32
    %c0_i32 = arith.constant 0 : i32
    %2 = arith.maxsi %1, %c0_i32 : i32
    %c0_i32_0 = arith.constant 0 : i32
    %c0_i32_1 = arith.constant 0 : i32
    %c0_i32_2 = arith.constant 0 : i32
    return %arg0, %2, %c0_i32_0, %c0_i32_1 : i32, i32, i32, i32
  }
  func.func @transform_4(%arg0: i32, %arg1: i32) -> (i32, i32, i32, i32) {
    %c0_i32 = arith.constant 0 : i32
    %c0_i32_0 = arith.constant 0 : i32
    %c0_i32_1 = arith.constant 0 : i32
    return %arg0, %arg1, %c0_i32, %c0_i32_0 : i32, i32, i32, i32
  }
  func.func @transform_5(%arg0: i32, %arg1: i32) -> (i32, i32, i32, i32) {
    %c16_i32 = arith.constant 16 : i32
    %0 = arith.muli %arg1, %c16_i32 : i32
    %c16_i32_0 = arith.constant 16 : i32
    %1 = arith.addi %0, %c16_i32_0 : i32
    %c15_i32 = arith.constant 15 : i32
    %2 = arith.minsi %1, %c15_i32 : i32
    %c0_i32 = arith.constant 0 : i32
    %c0_i32_1 = arith.constant 0 : i32
    %c0_i32_2 = arith.constant 0 : i32
    return %arg0, %2, %c0_i32, %c0_i32_1 : i32, i32, i32, i32
  }
  func.func @transform_6(%arg0: i32, %arg1: i32) -> (i32, i32, i32) {
    %c0_i32 = arith.constant 0 : i32
    %c0_i32_0 = arith.constant 0 : i32
    %c0_i32_1 = arith.constant 0 : i32
    %c0_i32_2 = arith.constant 0 : i32
    return %c0_i32, %c0_i32_0, %c0_i32_1 : i32, i32, i32
  }
  func.func @transform_7(%arg0: i32, %arg1: i32) -> (i32, i32, i32) {
    %c0_i32 = arith.constant 0 : i32
    %c0_i32_0 = arith.constant 0 : i32
    %c0_i32_1 = arith.constant 0 : i32
    %c0_i32_2 = arith.constant 0 : i32
    return %c0_i32, %c0_i32_0, %c0_i32_1 : i32, i32, i32
  }
  func.func @transform_8(%arg0: i32, %arg1: i32) -> (i32, i32, i32, i32) {
    %c0_i32 = arith.constant 0 : i32
    %c0_i32_0 = arith.constant 0 : i32
    %c0_i32_1 = arith.constant 0 : i32
    return %arg0, %arg1, %c0_i32, %c0_i32_0 : i32, i32, i32, i32
  }
  func.func @transform_9(%arg0: i32, %arg1: i32) -> (i32, i32, i32, i32) {
    %c0_i32 = arith.constant 0 : i32
    %c0_i32_0 = arith.constant 0 : i32
    %c0_i32_1 = arith.constant 0 : i32
    return %arg0, %arg1, %c0_i32, %c0_i32_0 : i32, i32, i32, i32
  }
}

module attributes {stable_mosaic.version = 11 : i64} {
  func.func @_bn_relu_kernel(%arg0: i32, %arg1: memref<512x128xf32, #tpu.memory_space<vmem>>, %arg2: memref<1x128xf32, #tpu.memory_space<vmem>>, %arg3: memref<1x128xf32, #tpu.memory_space<vmem>>, %arg4: memref<512x128xf32, #tpu.memory_space<vmem>>) attributes {dimension_semantics = [#tpu.dimension_semantics<parallel>], iteration_bounds = array<i64: 1>, scalar_prefetch = 0 : i64, scratch_operands = 0 : i64, tpu.core_type = #tpu.core_type<tc>, window_params = [{transform_indices = @transform_0, window_bounds = array<i64: 512, 128>}, {pipeline_mode = #tpu.pipeline_mode<synchronous>, transform_indices = @transform_1, window_bounds = array<i64: 1, 128>}, {pipeline_mode = #tpu.pipeline_mode<synchronous>, transform_indices = @transform_2, window_bounds = array<i64: 1, 128>}, {transform_indices = @transform_3, window_bounds = array<i64: 512, 128>}]} {
    %c0 = arith.constant 0 : index
    %c0_0 = arith.constant 0 : index
    %0 = vector.load %arg1[%c0, %c0_0] : memref<512x128xf32, #tpu.memory_space<vmem>>, vector<512x128xf32>
    %c0_1 = arith.constant 0 : index
    %c0_2 = arith.constant 0 : index
    %1 = vector.load %arg2[%c0_1, %c0_2] : memref<1x128xf32, #tpu.memory_space<vmem>>, vector<1x128xf32>
    %2 = vector.broadcast %1 : vector<1x128xf32> to vector<512x128xf32>
    %3 = arith.mulf %0, %2 : vector<512x128xf32>
    %c0_3 = arith.constant 0 : index
    %c0_4 = arith.constant 0 : index
    %4 = vector.load %arg3[%c0_3, %c0_4] : memref<1x128xf32, #tpu.memory_space<vmem>>, vector<1x128xf32>
    %5 = vector.broadcast %4 : vector<1x128xf32> to vector<512x128xf32>
    %6 = arith.addf %3, %5 : vector<512x128xf32>
    %cst = arith.constant 0.000000e+00 : f32
    %7 = vector.broadcast %cst : f32 to vector<512x128xf32>
    %8 = arith.maximumf %6, %7 : vector<512x128xf32>
    %c0_5 = arith.constant 0 : index
    %c0_6 = arith.constant 0 : index
    %9 = vector.load %arg4[%c0_5, %c0_6] : memref<512x128xf32, #tpu.memory_space<vmem>>, vector<512x128xf32>
    tpu.vector_store %arg4[%c0_5, %c0_6], %8 {strides = array<i32>} : memref<512x128xf32, #tpu.memory_space<vmem>>, vector<512x128xf32>,
    return
  }
  func.func @transform_0(%arg0: i32) -> (i32, i32) {
    %c0_i32 = arith.constant 0 : i32
    %c0_i32_0 = arith.constant 0 : i32
    return %arg0, %c0_i32 : i32, i32
  }
  func.func @transform_1(%arg0: i32) -> (i32, i32) {
    %c0_i32 = arith.constant 0 : i32
    %c0_i32_0 = arith.constant 0 : i32
    %c0_i32_1 = arith.constant 0 : i32
    return %c0_i32, %c0_i32_0 : i32, i32
  }
  func.func @transform_2(%arg0: i32) -> (i32, i32) {
    %c0_i32 = arith.constant 0 : i32
    %c0_i32_0 = arith.constant 0 : i32
    %c0_i32_1 = arith.constant 0 : i32
    return %c0_i32, %c0_i32_0 : i32, i32
  }
  func.func @transform_3(%arg0: i32) -> (i32, i32) {
    %c0_i32 = arith.constant 0 : i32
    %c0_i32_0 = arith.constant 0 : i32
    return %arg0, %c0_i32 : i32, i32
  }
}

module attributes {stable_mosaic.version = 11 : i64} {
  func.func @_conv_tile_kernel(%arg0: i32, %arg1: i32, %arg2: memref<1x128xf32, #tpu.memory_space<vmem>>, %arg3: memref<1x128xf32, #tpu.memory_space<vmem>>, %arg4: memref<1x1x16x128xbf16, #tpu.memory_space<vmem>>, %arg5: memref<1x16x16x128xbf16, #tpu.memory_space<vmem>>, %arg6: memref<1x1x16x128xbf16, #tpu.memory_space<vmem>>, %arg7: memref<3x384x128xbf16, #tpu.memory_space<vmem>>, %arg8: memref<1x16x16x128xf32, #tpu.memory_space<vmem>>, %arg9: memref<1x1x2x128xf32, #tpu.memory_space<vmem>>, %arg10: memref<256x128xf32, #tpu.memory_space<vmem>>) attributes {dimension_semantics = [#tpu.dimension_semantics<parallel>, #tpu.dimension_semantics<parallel>], iteration_bounds = array<i64: 2, 1>, scalar_prefetch = 0 : i64, scratch_operands = 1 : i64, tpu.core_type = #tpu.core_type<tc>, window_params = [{pipeline_mode = #tpu.pipeline_mode<synchronous>, transform_indices = @transform_0, window_bounds = array<i64: 1, 128>}, {pipeline_mode = #tpu.pipeline_mode<synchronous>, transform_indices = @transform_1, window_bounds = array<i64: 1, 128>}, {transform_indices = @transform_2, window_bounds = array<i64: 1, 1, 16, 128>}, {transform_indices = @transform_3, window_bounds = array<i64: 1, 16, 16, 128>}, {transform_indices = @transform_4, window_bounds = array<i64: 1, 1, 16, 128>}, {pipeline_mode = #tpu.pipeline_mode<synchronous>, transform_indices = @transform_5, window_bounds = array<i64: 3, 384, 128>}, {transform_indices = @transform_6, window_bounds = array<i64: 1, 16, 16, 128>}, {transform_indices = @transform_7, window_bounds = array<i64: 1, 1, 2, 128>}]} {
    %c0 = arith.constant 0 : index
    %c0_0 = arith.constant 0 : index
    %c0_1 = arith.constant 0 : index
    %c0_2 = arith.constant 0 : index
    %0 = vector.load %arg4[%c0, %c0_0, %c0_1, %c0_2] : memref<1x1x16x128xbf16, #tpu.memory_space<vmem>>, vector<1x1x16x128xbf16>
    %1 = vector.shape_cast %0 : vector<1x1x16x128xbf16> to vector<16x128xbf16>
    %2 = arith.extf %1 : vector<16x128xbf16> to vector<16x128xf32>
    %c0_3 = arith.constant 0 : index
    %c0_4 = arith.constant 0 : index
    %c0_5 = arith.constant 0 : index
    %c0_6 = arith.constant 0 : index
    %3 = vector.load %arg5[%c0_3, %c0_4, %c0_5, %c0_6] : memref<1x16x16x128xbf16, #tpu.memory_space<vmem>>, vector<1x16x16x128xbf16>
    %4 = vector.shape_cast %3 : vector<1x16x16x128xbf16> to vector<16x16x128xbf16>
    %5 = vector.shape_cast %4 : vector<16x16x128xbf16> to vector<256x128xbf16>
    %6 = arith.extf %5 : vector<256x128xbf16> to vector<256x128xf32>
    %c0_7 = arith.constant 0 : index
    %c0_8 = arith.constant 0 : index
    %c0_9 = arith.constant 0 : index
    %c0_10 = arith.constant 0 : index
    %7 = vector.load %arg6[%c0_7, %c0_8, %c0_9, %c0_10] : memref<1x1x16x128xbf16, #tpu.memory_space<vmem>>, vector<1x1x16x128xbf16>
    %8 = vector.shape_cast %7 : vector<1x1x16x128xbf16> to vector<16x128xbf16>
    %9 = arith.extf %8 : vector<16x128xbf16> to vector<16x128xf32>
    %c0_11 = arith.constant 0 : index
    %c0_12 = arith.constant 0 : index
    %10 = vector.load %arg2[%c0_11, %c0_12] : memref<1x128xf32, #tpu.memory_space<vmem>>, vector<1x128xf32>
    %c0_13 = arith.constant 0 : index
    %c0_14 = arith.constant 0 : index
    %11 = vector.load %arg3[%c0_13, %c0_14] : memref<1x128xf32, #tpu.memory_space<vmem>>, vector<1x128xf32>
    %12 = vector.broadcast %10 : vector<1x128xf32> to vector<16x128xf32>
    %13 = arith.mulf %2, %12 : vector<16x128xf32>
    %14 = vector.broadcast %11 : vector<1x128xf32> to vector<16x128xf32>
    %15 = arith.addf %13, %14 : vector<16x128xf32>
    %cst = arith.constant 0.000000e+00 : f32
    %16 = vector.broadcast %cst : f32 to vector<16x128xf32>
    %17 = arith.maximumf %15, %16 : vector<16x128xf32>
    %18 = vector.broadcast %10 : vector<1x128xf32> to vector<256x128xf32>
    %19 = arith.mulf %6, %18 : vector<256x128xf32>
    %20 = vector.broadcast %11 : vector<1x128xf32> to vector<256x128xf32>
    %21 = arith.addf %19, %20 : vector<256x128xf32>
    %cst_15 = arith.constant 0.000000e+00 : f32
    %22 = vector.broadcast %cst_15 : f32 to vector<256x128xf32>
    %23 = arith.maximumf %21, %22 : vector<256x128xf32>
    %24 = vector.broadcast %10 : vector<1x128xf32> to vector<16x128xf32>
    %25 = arith.mulf %9, %24 : vector<16x128xf32>
    %26 = vector.broadcast %11 : vector<1x128xf32> to vector<16x128xf32>
    %27 = arith.addf %25, %26 : vector<16x128xf32>
    %cst_16 = arith.constant 0.000000e+00 : f32
    %28 = vector.broadcast %cst_16 : f32 to vector<16x128xf32>
    %29 = arith.maximumf %27, %28 : vector<16x128xf32>
    %c0_i32 = arith.constant 0 : i32
    %30 = arith.cmpi sgt, %arg1, %c0_i32 : i32
    %31 = arith.extui %30 : i1 to i32
    %32 = arith.sitofp %31 : i32 to f32
    %33 = vector.broadcast %32 : f32 to vector<16x128xf32>
    %34 = arith.mulf %17, %33 : vector<16x128xf32>
    %c0_i32_17 = arith.constant 0 : i32
    %35 = arith.cmpi slt, %arg1, %c0_i32_17 : i32
    %36 = arith.extui %35 : i1 to i32
    %37 = arith.sitofp %36 : i32 to f32
    %38 = vector.broadcast %37 : f32 to vector<16x128xf32>
    %39 = arith.mulf %29, %38 : vector<16x128xf32>
    %40 = tpu.concatenate %34, %23, %39 in 0 : vector<16x128xf32>, vector<256x128xf32>, vector<16x128xf32> -> vector<288x128xf32>
    %cst_18 = arith.constant 0.000000e+00 : f32
    %41 = vector.broadcast %cst_18 : f32 to vector<1x128xf32>
    %42 = vector.extract_strided_slice %40 {offsets = [0, 0], sizes = [287, 128], strides = [1, 1]} : vector<288x128xf32> to vector<287x128xf32>
    %43 = tpu.concatenate %41, %42 in 0 : vector<1x128xf32>, vector<287x128xf32> -> vector<288x128xf32>
    %44 = vector.extract_strided_slice %40 {offsets = [1, 0], sizes = [287, 128], strides = [1, 1]} : vector<288x128xf32> to vector<287x128xf32>
    %45 = tpu.concatenate %44, %41 in 0 : vector<287x128xf32>, vector<1x128xf32> -> vector<288x128xf32>
    %46 = tpu.iota {dimensions = array<i32: 0>} : vector<288x128xi32>
    %c16_i32 = arith.constant 16 : i32
    %c0_i32_19 = arith.constant 0 : i32
    %47 = arith.cmpi eq, %c16_i32, %c0_i32_19 : i32
    %c1_i32 = arith.constant 1 : i32
    %48 = arith.select %47, %c1_i32, %c16_i32 : i32
    %49 = vector.broadcast %48 : i32 to vector<288x128xi32>
    %50 = arith.remsi %46, %49 : vector<288x128xi32>
    %c0_i32_20 = arith.constant 0 : i32
    %51 = vector.broadcast %c0_i32_20 : i32 to vector<288x128xi32>
    %52 = arith.cmpi ne, %50, %51 : vector<288x128xi32>
    %c0_i32_21 = arith.constant 0 : i32
    %53 = vector.broadcast %c0_i32_21 : i32 to vector<288x128xi32>
    %54 = arith.cmpi slt, %50, %53 : vector<288x128xi32>
    %c0_i32_22 = arith.constant 0 : i32
    %55 = arith.cmpi slt, %48, %c0_i32_22 : i32
    %56 = vector.broadcast %55 : i1 to vector<288x128xi1>
    %57 = vector.broadcast %56 : vector<288x128xi1> to vector<288x128xi1>
    %58 = arith.xori %54, %57 : vector<288x128xi1>
    %59 = arith.andi %58, %52 : vector<288x128xi1>
    %60 = vector.broadcast %48 : i32 to vector<288x128xi32>
    %61 = arith.addi %50, %60 : vector<288x128xi32>
    %62 = arith.select %59, %61, %50 : vector<288x128xi1>, vector<288x128xi32>
    %c0_i32_23 = arith.constant 0 : i32
    %63 = vector.broadcast %c0_i32_23 : i32 to vector<288x128xi32>
    %64 = arith.cmpi sgt, %62, %63 : vector<288x128xi32>
    %cst_24 = arith.constant 0.000000e+00 : f32
    %65 = vector.broadcast %cst_24 : f32 to vector<288x128xf32>
    %66 = arith.select %64, %43, %65 : vector<288x128xi1>, vector<288x128xf32>
    %c15_i32 = arith.constant 15 : i32
    %67 = vector.broadcast %c15_i32 : i32 to vector<288x128xi32>
    %68 = arith.cmpi slt, %62, %67 : vector<288x128xi32>
    %cst_25 = arith.constant 0.000000e+00 : f32
    %69 = vector.broadcast %cst_25 : f32 to vector<288x128xf32>
    %70 = arith.select %68, %45, %69 : vector<288x128xi1>, vector<288x128xf32>
    %71 = tpu.concatenate %66, %40, %70 in 1 : vector<288x128xf32>, vector<288x128xf32>, vector<288x128xf32> -> vector<288x384xf32>
    %72 = arith.truncf %71 : vector<288x384xf32> to vector<288x384xbf16>
    %73 = vector.extract_strided_slice %72 {offsets = [0, 0], sizes = [256, 384], strides = [1, 1]} : vector<288x384xbf16> to vector<256x384xbf16>
    %c0_26 = arith.constant 0 : index
    %c0_27 = arith.constant 0 : index
    %c0_28 = arith.constant 0 : index
    %74 = vector.load %arg7[%c0_26, %c0_27, %c0_28] : memref<3x384x128xbf16, #tpu.memory_space<vmem>>, vector<1x384x128xbf16>
    %75 = vector.shape_cast %74 : vector<1x384x128xbf16> to vector<384x128xbf16>
    %cst_29 = arith.constant dense<0.000000e+00> : vector<256x128xf32>
    %76 = tpu.matmul %73, %75, %cst_29 {dimension_numbers = #tpu.dot_dimension_numbers<[1], [0], [0], [1], [0, 0, 1, 1], [], []>} : vector<256x384xbf16>, vector<384x128xbf16>, vector<256x128xf32> -> vector<256x128xf32>
    %c0_30 = arith.constant 0 : index
    %c0_31 = arith.constant 0 : index
    %77 = vector.load %arg10[%c0_30, %c0_31] : memref<256x128xf32, #tpu.memory_space<vmem>>, vector<256x128xf32>
    tpu.vector_store %arg10[%c0_30, %c0_31], %76 {strides = array<i32>} : memref<256x128xf32, #tpu.memory_space<vmem>>, vector<256x128xf32>,
    %78 = vector.extract_strided_slice %72 {offsets = [16, 0], sizes = [256, 384], strides = [1, 1]} : vector<288x384xbf16> to vector<256x384xbf16>
    %c1 = arith.constant 1 : index
    %c0_32 = arith.constant 0 : index
    %c0_33 = arith.constant 0 : index
    %79 = vector.load %arg7[%c1, %c0_32, %c0_33] : memref<3x384x128xbf16, #tpu.memory_space<vmem>>, vector<1x384x128xbf16>
    %80 = vector.shape_cast %79 : vector<1x384x128xbf16> to vector<384x128xbf16>
    %cst_34 = arith.constant dense<0.000000e+00> : vector<256x128xf32>
    %81 = tpu.matmul %78, %80, %cst_34 {dimension_numbers = #tpu.dot_dimension_numbers<[1], [0], [0], [1], [0, 0, 1, 1], [], []>} : vector<256x384xbf16>, vector<384x128xbf16>, vector<256x128xf32> -> vector<256x128xf32>
    %c0_35 = arith.constant 0 : index
    %c0_36 = arith.constant 0 : index
    %82 = vector.load %arg10[%c0_35, %c0_36] : memref<256x128xf32, #tpu.memory_space<vmem>>, vector<256x128xf32>
    %83 = arith.addf %82, %81 : vector<256x128xf32>
    %c0_37 = arith.constant 0 : index
    %c0_38 = arith.constant 0 : index
    %84 = vector.load %arg10[%c0_37, %c0_38] : memref<256x128xf32, #tpu.memory_space<vmem>>, vector<256x128xf32>
    tpu.vector_store %arg10[%c0_37, %c0_38], %83 {strides = array<i32>} : memref<256x128xf32, #tpu.memory_space<vmem>>, vector<256x128xf32>,
    %85 = vector.extract_strided_slice %72 {offsets = [32, 0], sizes = [256, 384], strides = [1, 1]} : vector<288x384xbf16> to vector<256x384xbf16>
    %c2 = arith.constant 2 : index
    %c0_39 = arith.constant 0 : index
    %c0_40 = arith.constant 0 : index
    %86 = vector.load %arg7[%c2, %c0_39, %c0_40] : memref<3x384x128xbf16, #tpu.memory_space<vmem>>, vector<1x384x128xbf16>
    %87 = vector.shape_cast %86 : vector<1x384x128xbf16> to vector<384x128xbf16>
    %cst_41 = arith.constant dense<0.000000e+00> : vector<256x128xf32>
    %88 = tpu.matmul %85, %87, %cst_41 {dimension_numbers = #tpu.dot_dimension_numbers<[1], [0], [0], [1], [0, 0, 1, 1], [], []>} : vector<256x384xbf16>, vector<384x128xbf16>, vector<256x128xf32> -> vector<256x128xf32>
    %c0_42 = arith.constant 0 : index
    %c0_43 = arith.constant 0 : index
    %89 = vector.load %arg10[%c0_42, %c0_43] : memref<256x128xf32, #tpu.memory_space<vmem>>, vector<256x128xf32>
    %90 = arith.addf %89, %88 : vector<256x128xf32>
    %c0_44 = arith.constant 0 : index
    %c0_45 = arith.constant 0 : index
    %91 = vector.load %arg10[%c0_44, %c0_45] : memref<256x128xf32, #tpu.memory_space<vmem>>, vector<256x128xf32>
    tpu.vector_store %arg10[%c0_44, %c0_45], %90 {strides = array<i32>} : memref<256x128xf32, #tpu.memory_space<vmem>>, vector<256x128xf32>,
    %c0_46 = arith.constant 0 : index
    %c0_47 = arith.constant 0 : index
    %92 = vector.load %arg10[%c0_46, %c0_47] : memref<256x128xf32, #tpu.memory_space<vmem>>, vector<256x128xf32>
    %93 = vector.shape_cast %92 : vector<256x128xf32> to vector<16x16x128xf32>
    %c0_48 = arith.constant 0 : index
    %c0_49 = arith.constant 0 : index
    %c0_50 = arith.constant 0 : index
    %c0_51 = arith.constant 0 : index
    %94 = vector.load %arg8[%c0_48, %c0_49, %c0_50, %c0_51] : memref<1x16x16x128xf32, #tpu.memory_space<vmem>>, vector<1x16x16x128xf32>
    %95 = vector.shape_cast %94 : vector<1x16x16x128xf32> to vector<16x16x128xf32>
    %96 = vector.shape_cast %93 : vector<16x16x128xf32> to vector<1x16x16x128xf32>
    tpu.vector_store %arg8[%c0_48, %c0_49, %c0_50, %c0_51], %96 {strides = array<i32>} : memref<1x16x16x128xf32, #tpu.memory_space<vmem>>, vector<1x16x16x128xf32>,
    %cst_52 = arith.constant dense<0.000000e+00> : vector<128xf32>
    %97 = vector.multi_reduction <add>, %92, %cst_52 [0] : vector<256x128xf32> to vector<128xf32>
    %98 = vector.shape_cast %97 : vector<128xf32> to vector<1x128xf32>
    %99 = arith.mulf %92, %92 : vector<256x128xf32>
    %cst_53 = arith.constant dense<0.000000e+00> : vector<128xf32>
    %100 = vector.multi_reduction <add>, %99, %cst_53 [0] : vector<256x128xf32> to vector<128xf32>
    %101 = vector.shape_cast %100 : vector<128xf32> to vector<1x128xf32>
    %102 = tpu.concatenate %98, %101 in 0 : vector<1x128xf32>, vector<1x128xf32> -> vector<2x128xf32>
    %c0_54 = arith.constant 0 : index
    %c0_55 = arith.constant 0 : index
    %c0_56 = arith.constant 0 : index
    %c0_57 = arith.constant 0 : index
    %103 = vector.load %arg9[%c0_54, %c0_55, %c0_56, %c0_57] : memref<1x1x2x128xf32, #tpu.memory_space<vmem>>, vector<1x1x2x128xf32>
    %104 = vector.shape_cast %103 : vector<1x1x2x128xf32> to vector<2x128xf32>
    %105 = vector.shape_cast %102 : vector<2x128xf32> to vector<1x1x2x128xf32>
    tpu.vector_store %arg9[%c0_54, %c0_55, %c0_56, %c0_57], %105 {strides = array<i32>} : memref<1x1x2x128xf32, #tpu.memory_space<vmem>>, vector<1x1x2x128xf32>,
    return
  }
  func.func @transform_0(%arg0: i32, %arg1: i32) -> (i32, i32) {
    %c0_i32 = arith.constant 0 : i32
    %c0_i32_0 = arith.constant 0 : i32
    %c0_i32_1 = arith.constant 0 : i32
    return %c0_i32, %c0_i32_0 : i32, i32
  }
  func.func @transform_1(%arg0: i32, %arg1: i32) -> (i32, i32) {
    %c0_i32 = arith.constant 0 : i32
    %c0_i32_0 = arith.constant 0 : i32
    %c0_i32_1 = arith.constant 0 : i32
    return %c0_i32, %c0_i32_0 : i32, i32
  }
  func.func @transform_2(%arg0: i32, %arg1: i32) -> (i32, i32, i32, i32) {
    %c16_i32 = arith.constant 16 : i32
    %0 = arith.muli %arg1, %c16_i32 : i32
    %c1_i32 = arith.constant 1 : i32
    %1 = arith.subi %0, %c1_i32 : i32
    %c0_i32 = arith.constant 0 : i32
    %2 = arith.maxsi %1, %c0_i32 : i32
    %c0_i32_0 = arith.constant 0 : i32
    %c0_i32_1 = arith.constant 0 : i32
    %c0_i32_2 = arith.constant 0 : i32
    return %arg0, %2, %c0_i32_0, %c0_i32_1 : i32, i32, i32, i32
  }
  func.func @transform_3(%arg0: i32, %arg1: i32) -> (i32, i32, i32, i32) {
    %c0_i32 = arith.constant 0 : i32
    %c0_i32_0 = arith.constant 0 : i32
    %c0_i32_1 = arith.constant 0 : i32
    return %arg0, %arg1, %c0_i32, %c0_i32_0 : i32, i32, i32, i32
  }
  func.func @transform_4(%arg0: i32, %arg1: i32) -> (i32, i32, i32, i32) {
    %c16_i32 = arith.constant 16 : i32
    %0 = arith.muli %arg1, %c16_i32 : i32
    %c16_i32_0 = arith.constant 16 : i32
    %1 = arith.addi %0, %c16_i32_0 : i32
    %c15_i32 = arith.constant 15 : i32
    %2 = arith.minsi %1, %c15_i32 : i32
    %c0_i32 = arith.constant 0 : i32
    %c0_i32_1 = arith.constant 0 : i32
    %c0_i32_2 = arith.constant 0 : i32
    return %arg0, %2, %c0_i32, %c0_i32_1 : i32, i32, i32, i32
  }
  func.func @transform_5(%arg0: i32, %arg1: i32) -> (i32, i32, i32) {
    %c0_i32 = arith.constant 0 : i32
    %c0_i32_0 = arith.constant 0 : i32
    %c0_i32_1 = arith.constant 0 : i32
    %c0_i32_2 = arith.constant 0 : i32
    return %c0_i32, %c0_i32_0, %c0_i32_1 : i32, i32, i32
  }
  func.func @transform_6(%arg0: i32, %arg1: i32) -> (i32, i32, i32, i32) {
    %c0_i32 = arith.constant 0 : i32
    %c0_i32_0 = arith.constant 0 : i32
    %c0_i32_1 = arith.constant 0 : i32
    return %arg0, %arg1, %c0_i32, %c0_i32_0 : i32, i32, i32, i32
  }
  func.func @transform_7(%arg0: i32, %arg1: i32) -> (i32, i32, i32, i32) {
    %c0_i32 = arith.constant 0 : i32
    %c0_i32_0 = arith.constant 0 : i32
    %c0_i32_1 = arith.constant 0 : i32
    return %arg0, %arg1, %c0_i32, %c0_i32_0 : i32, i32, i32, i32
  }
}

</mosaic_0001>

<bundles_post_ra>
// kernel: up_forward.5
= control target key start
LH: loop header
LB: loop body
LE: loop exit
PB: predicated region body
PF: predicated region fallthrough
CT: control target
= control target key end

     0   :  { %s896_s0 = inlined_call_operand.vmem [shape: f32[512,128], index: 0, kind: input, shape index: {}]   ;;  %s897_s1 = inlined_call_operand.vmem [shape: f32[1,128], index: 1, kind: input, shape index: {}]   ;;  %s898_s2 = inlined_call_operand.vmem [shape: f32[1,128], index: 2, kind: input, shape index: {}]   ;;  %s899_s3 = inlined_call_operand.vmem [shape: f32[512,128], index: 3, kind: output, shape index: {}]  }
   0x1   :  { %v14_v0 = vld [vmem:[%s896_s0] sm:$0xff]  ;;  %v15_v4 = vld [vmem:[%s896_s0 + $0x8] sm:$0xff]  ;;  %v16_v5 = vld [vmem:[%s896_s0 + $0x10] sm:$0xff] }
   0x2   :  { %v380_v1 = vld [vmem:[%s897_s1] ss:$0 sm:$0xff]  ;;  %v17_v6 = vld [vmem:[%s896_s0 + $0x18] sm:$0xff]  ;;  %v19_v11 = vld [vmem:[%s896_s0 + $0x28] sm:$0xff] }
   0x3   :  { %v385_v2 = vld [vmem:[%s898_s2] ss:$0 sm:$0xff]  ;;  %v85_v3 = vmul.f32 %v380_v1, %v14_v0  ;;  %v86_v7 = vmul.f32 %v380_v1, %v15_v4  ;;  %v87_v8 = vmul.f32 %v380_v1, %v16_v5  ;;  %v88_v9 = vmul.f32 %v380_v1, %v17_v6  ;;  %v20_v12 = vld [vmem:[%s896_s0 + $0x30] sm:$0xff]  ;;  %v21_v17 = vld [vmem:[%s896_s0 + $0x38] sm:$0xff] }
   0x4   :  { %v18_v10 = vld [vmem:[%s896_s0 + $0x20] sm:$0xff]  ;;  %v90_v15 = vmul.f32 %v380_v1, %v19_v11  ;;  %v91_v16 = vmul.f32 %v380_v1, %v20_v12  ;;  %v92_v21 = vmul.f32 %v380_v1, %v21_v17  ;;  %v23_v27 = vld [vmem:[%s896_s0 + $0x48] sm:$0xff]  ;;  %v24_v28 = vld [vmem:[%s896_s0 + $0x50] sm:$0xff] }
   0x5   :  { %v156_v13 = vadd.f32 %v385_v2, %v85_v3  ;;  %v89_v14 = vmul.f32 %v380_v1, %v18_v10  ;;  %v157_v18 = vadd.f32 %v385_v2, %v86_v7  ;;  %v158_v19 = vadd.f32 %v385_v2, %v87_v8  ;;  %v22_v22 = vld [vmem:[%s896_s0 + $0x40] sm:$0xff]  ;;  %v25_v29 = vld [vmem:[%s896_s0 + $0x58] sm:$0xff]  ;;  %v27_v35 = vld [vmem:[%s896_s0 + $0x68] sm:$0xff] }
   0x6   :  { %v159_v20 = vadd.f32 %v385_v2, %v88_v9  ;;  %v161_v25 = vadd.f32 %v385_v2, %v90_v15  ;;  %v162_v26 = vadd.f32 %v385_v2, %v91_v16  ;;  %v163_v33 = vadd.f32 %v385_v2, %v92_v21  ;;  %v26_v34 = vld [vmem:[%s896_s0 + $0x60] sm:$0xff]  ;;  %v28_v36 = vld [vmem:[%s896_s0 + $0x70] sm:$0xff]  ;;  %v29_v41 = vld [vmem:[%s896_s0 + $0x78] sm:$0xff] }
   0x7   :  { %v220_v23 = vmax.f32 %v156_v13, 0.0  ;;  %v160_v24 = vadd.f32 %v385_v2, %v89_v14  ;;  %v221_v30 = vmax.f32 %v157_v18, 0.0  ;;  %v222_v31 = vmax.f32 %v158_v19, 0.0  ;;  %v30_v54 = vld [vmem:[%s896_s0 + $0x80] sm:$0xff]  ;;  %v31_v59 = vld [vmem:[%s896_s0 + $0x88] sm:$0xff]  ;;  %v32_v60 = vld [vmem:[%s896_s0 + $0x90] sm:$0xff] }
   0x8   :  { %v223_v32 = vmax.f32 %v159_v20, 0.0  ;;  %v225_v38 = vmax.f32 %v161_v25, 0.0  ;;  %v226_v39 = vmax.f32 %v162_v26, 0.0  ;;  %v93_v40 = vmul.f32 %v380_v1, %v22_v22  ;;  %v33_v61 = vld [vmem:[%s896_s0 + $0x98] sm:$0xff]  ;;  %v34_v4 = vld [vmem:[%s896_s0 + $0xa0] sm:$0xff]  ;;  %v35_v5 = vld [vmem:[%s896_s0 + $0xa8] sm:$0xff] }
   0x9   :  { %284 = vst [vmem:[%s899_s3] sm:$0xff] %v220_v23  ;;  %v224_v37 = vmax.f32 %v160_v24, 0.0  ;;  %285 = vst [vmem:[%s899_s3 + $0x8] sm:$0xff] %v221_v30  ;;  %v227_v42 = vmax.f32 %v163_v33, 0.0  ;;  %v94_v43 = vmul.f32 %v380_v1, %v23_v27  ;;  %v95_v44 = vmul.f32 %v380_v1, %v24_v28  ;;  %v36_v6 = vld [vmem:[%s896_s0 + $0xb0] sm:$0xff]  ;;  %v37_v11 = vld [vmem:[%s896_s0 + $0xb8] sm:$0xff] }
   0xa   :  { %286 = vst [vmem:[%s899_s3 + $0x10] sm:$0xff] %v222_v31  ;;  %287 = vst [vmem:[%s899_s3 + $0x18] sm:$0xff] %v223_v32  ;;  %v96_v45 = vmul.f32 %v380_v1, %v25_v29  ;;  %v164_v46 = vadd.f32 %v385_v2, %v93_v40  ;;  %v97_v47 = vmul.f32 %v380_v1, %v26_v34  ;;  %v38_v24 = vld [vmem:[%s896_s0 + $0xc0] sm:$0xff]  ;;  %v39_v29 = vld [vmem:[%s896_s0 + $0xc8] sm:$0xff] }
   0xb   :  { %288 = vst [vmem:[%s899_s3 + $0x20] sm:$0xff] %v224_v37  ;;  %289 = vst [vmem:[%s899_s3 + $0x28] sm:$0xff] %v225_v38  ;;  %v98_v48 = vmul.f32 %v380_v1, %v27_v35  ;;  %v99_v49 = vmul.f32 %v380_v1, %v28_v36  ;;  %v165_v50 = vadd.f32 %v385_v2, %v94_v43  ;;  %v40_v30 = vld [vmem:[%s896_s0 + $0xd0] sm:$0xff]  ;;  %v41_v31 = vld [vmem:[%s896_s0 + $0xd8] sm:$0xff] }
   0xc   :  { %290 = vst [vmem:[%s899_s3 + $0x30] sm:$0xff] %v226_v39  ;;  %291 = vst [vmem:[%s899_s3 + $0x38] sm:$0xff] %v227_v42  ;;  %v166_v51 = vadd.f32 %v385_v2, %v95_v44  ;;  %v167_v52 = vadd.f32 %v385_v2, %v96_v45  ;;  %v100_v53 = vmul.f32 %v380_v1, %v29_v41  ;;  %v228_v55 = vmax.f32 %v164_v46, 0.0  ;;  %v42_v36 = vld [vmem:[%s896_s0 + $0xe0] sm:$0xff]  ;;  %v43_v37 = vld [vmem:[%s896_s0 + $0xe8] sm:$0xff] }
   0xd   :  { %v168_v56 = vadd.f32 %v385_v2, %v97_v47  ;;  %v169_v57 = vadd.f32 %v385_v2, %v98_v48  ;;  %v170_v58 = vadd.f32 %v385_v2, %v99_v49  ;;  %v229_v62 = vmax.f32 %v165_v50, 0.0  ;;  %v44_v38 = vld [vmem:[%s896_s0 + $0xf0] sm:$0xff]  ;;  %v45_v43 = vld [vmem:[%s896_s0 + $0xf8] sm:$0xff] }
   0xe   :  { %v230_v63 = vmax.f32 %v166_v51, 0.0  ;;  %v231_v0 = vmax.f32 %v167_v52, 0.0  ;;  %v171_v3 = vadd.f32 %v385_v2, %v100_v53  ;;  %292 = vst [vmem:[%s899_s3 + $0x40] sm:$0xff] %v228_v55  ;;  %v101_v10 = vmul.f32 %v380_v1, %v30_v54 }
   0xf   :  { %v232_v7 = vmax.f32 %v168_v56, 0.0  ;;  %v233_v8 = vmax.f32 %v169_v57, 0.0  ;;  %v234_v9 = vmax.f32 %v170_v58, 0.0  ;;  %293 = vst [vmem:[%s899_s3 + $0x48] sm:$0xff] %v229_v62  ;;  %v102_v13 = vmul.f32 %v380_v1, %v31_v59  ;;  %v46_v56 = vld [vmem:[%s896_s0 + $0x100] sm:$0xff]  ;;  %v48_v62 = vld [vmem:[%s896_s0 + $0x110] sm:$0xff] }
  0x10   :  { %294 = vst [vmem:[%s899_s3 + $0x50] sm:$0xff] %v230_v63  ;;  %295 = vst [vmem:[%s899_s3 + $0x58] sm:$0xff] %v231_v0  ;;  %v235_v12 = vmax.f32 %v171_v3, 0.0  ;;  %v103_v14 = vmul.f32 %v380_v1, %v32_v60  ;;  %v104_v15 = vmul.f32 %v380_v1, %v33_v61  ;;  %v172_v16 = vadd.f32 %v385_v2, %v101_v10  ;;  %v47_v61 = vld [vmem:[%s896_s0 + $0x108] sm:$0xff]  ;;  %v49_v63 = vld [vmem:[%s896_s0 + $0x118] sm:$0xff] }
  0x11   :  { %296 = vst [vmem:[%s899_s3 + $0x60] sm:$0xff] %v232_v7  ;;  %297 = vst [vmem:[%s899_s3 + $0x68] sm:$0xff] %v233_v8  ;;  %v105_v17 = vmul.f32 %v380_v1, %v34_v4  ;;  %v106_v18 = vmul.f32 %v380_v1, %v35_v5  ;;  %v107_v19 = vmul.f32 %v380_v1, %v36_v6  ;;  %v50_v6 = vld [vmem:[%s896_s0 + $0x120] sm:$0xff]  ;;  %v51_v7 = vld [vmem:[%s896_s0 + $0x128] sm:$0xff] }
  0x12   :  { %298 = vst [vmem:[%s899_s3 + $0x70] sm:$0xff] %v234_v9  ;;  %299 = vst [vmem:[%s899_s3 + $0x78] sm:$0xff] %v235_v12  ;;  %v173_v20 = vadd.f32 %v385_v2, %v102_v13  ;;  %v174_v21 = vadd.f32 %v385_v2, %v103_v14  ;;  %v175_v22 = vadd.f32 %v385_v2, %v104_v15  ;;  %v236_v25 = vmax.f32 %v172_v16, 0.0  ;;  %v52_v8 = vld [vmem:[%s896_s0 + $0x130] sm:$0xff]  ;;  %v53_v13 = vld [vmem:[%s896_s0 + $0x138] sm:$0xff] }
  0x13   :  { %v108_v23 = vmul.f32 %v380_v1, %v37_v11  ;;  %v176_v26 = vadd.f32 %v385_v2, %v105_v17  ;;  %v177_v27 = vadd.f32 %v385_v2, %v106_v18  ;;  %v178_v28 = vadd.f32 %v385_v2, %v107_v19 }
  0x14   :  { %v237_v32 = vmax.f32 %v173_v20, 0.0  ;;  %v238_v33 = vmax.f32 %v174_v21, 0.0  ;;  %v239_v34 = vmax.f32 %v175_v22, 0.0  ;;  %300 = vst [vmem:[%s899_s3 + $0x80] sm:$0xff] %v236_v25  ;;  %v109_v42 = vmul.f32 %v380_v1, %v38_v24 }
  0x15   :  { %v179_v35 = vadd.f32 %v385_v2, %v108_v23  ;;  %v240_v39 = vmax.f32 %v176_v26, 0.0  ;;  %v241_v40 = vmax.f32 %v177_v27, 0.0  ;;  %v242_v41 = vmax.f32 %v178_v28, 0.0  ;;  %v54_v26 = vld [vmem:[%s896_s0 + $0x140] sm:$0xff] }
  0x16   :  { %301 = vst [vmem:[%s899_s3 + $0x88] sm:$0xff] %v237_v32  ;;  %302 = vst [vmem:[%s899_s3 + $0x90] sm:$0xff] %v238_v33  ;;  %v110_v45 = vmul.f32 %v380_v1, %v39_v29  ;;  %v111_v46 = vmul.f32 %v380_v1, %v40_v30  ;;  %v112_v47 = vmul.f32 %v380_v1, %v41_v31  ;;  %v55_v31 = vld [vmem:[%s896_s0 + $0x148] sm:$0xff]  ;;  %v56_v32 = vld [vmem:[%s896_s0 + $0x150] sm:$0xff] }
  0x17   :  { %303 = vst [vmem:[%s899_s3 + $0x98] sm:$0xff] %v239_v34  ;;  %v243_v44 = vmax.f32 %v179_v35, 0.0  ;;  %304 = vst [vmem:[%s899_s3 + $0xa0] sm:$0xff] %v240_v39  ;;  %v180_v48 = vadd.f32 %v385_v2, %v109_v42  ;;  %v113_v49 = vmul.f32 %v380_v1, %v42_v36  ;;  %v114_v50 = vmul.f32 %v380_v1, %v43_v37  ;;  %v57_v33 = vld [vmem:[%s896_s0 + $0x158] sm:$0xff]  ;;  %v59_v39 = vld [vmem:[%s896_s0 + $0x168] sm:$0xff] }
  0x18   :  { %305 = vst [vmem:[%s899_s3 + $0xa8] sm:$0xff] %v241_v40  ;;  %306 = vst [vmem:[%s899_s3 + $0xb0] sm:$0xff] %v242_v41  ;;  %v115_v51 = vmul.f32 %v380_v1, %v44_v38  ;;  %v181_v52 = vadd.f32 %v385_v2, %v110_v45  ;;  %v182_v53 = vadd.f32 %v385_v2, %v111_v46  ;;  %v58_v38 = vld [vmem:[%s896_s0 + $0x160] sm:$0xff]  ;;  %v60_v40 = vld [vmem:[%s896_s0 + $0x170] sm:$0xff] }
  0x19   :  { %307 = vst [vmem:[%s899_s3 + $0xb8] sm:$0xff] %v243_v44  ;;  %v183_v54 = vadd.f32 %v385_v2, %v112_v47  ;;  %v116_v55 = vmul.f32 %v380_v1, %v45_v43  ;;  %v244_v57 = vmax.f32 %v180_v48, 0.0  ;;  %v184_v58 = vadd.f32 %v385_v2, %v113_v49  ;;  %v61_v45 = vld [vmem:[%s896_s0 + $0x178] sm:$0xff] }
  0x1a   :  { %v185_v59 = vadd.f32 %v385_v2, %v114_v50  ;;  %v186_v60 = vadd.f32 %v385_v2, %v115_v51  ;;  %v245_v0 = vmax.f32 %v181_v52, 0.0  ;;  %v246_v3 = vmax.f32 %v182_v53, 0.0 }
  0x1b   :  { %v247_v4 = vmax.f32 %v183_v54, 0.0  ;;  %v187_v5 = vadd.f32 %v385_v2, %v116_v55  ;;  %308 = vst [vmem:[%s899_s3 + $0xc0] sm:$0xff] %v244_v57  ;;  %v248_v9 = vmax.f32 %v184_v58, 0.0  ;;  %v117_v12 = vmul.f32 %v380_v1, %v46_v56  ;;  %v62_v58 = vld [vmem:[%s896_s0 + $0x180] sm:$0xff] }
  0x1c   :  { %v249_v10 = vmax.f32 %v185_v59, 0.0  ;;  %v250_v11 = vmax.f32 %v186_v60, 0.0  ;;  %309 = vst [vmem:[%s899_s3 + $0xc8] sm:$0xff] %v245_v0  ;;  %310 = vst [vmem:[%s899_s3 + $0xd0] sm:$0xff] %v246_v3  ;;  %v118_v15 = vmul.f32 %v380_v1, %v47_v61  ;;  %v119_v16 = vmul.f32 %v380_v1, %v48_v62  ;;  %v64_v0 = vld [vmem:[%s896_s0 + $0x190] sm:$0xff]  ;;  %v65_v3 = vld [vmem:[%s896_s0 + $0x198] sm:$0xff] }
  0x1d   :  { %311 = vst [vmem:[%s899_s3 + $0xd8] sm:$0xff] %v247_v4  ;;  %v251_v14 = vmax.f32 %v187_v5, 0.0  ;;  %v120_v17 = vmul.f32 %v380_v1, %v49_v63  ;;  %312 = vst [vmem:[%s899_s3 + $0xe0] sm:$0xff] %v248_v9  ;;  %v188_v18 = vadd.f32 %v385_v2, %v117_v12  ;;  %v121_v19 = vmul.f32 %v380_v1, %v50_v6  ;;  %v63_v63 = vld [vmem:[%s896_s0 + $0x188] sm:$0xff] }
  0x1e   :  { %313 = vst [vmem:[%s899_s3 + $0xe8] sm:$0xff] %v249_v10  ;;  %314 = vst [vmem:[%s899_s3 + $0xf0] sm:$0xff] %v250_v11  ;;  %v122_v20 = vmul.f32 %v380_v1, %v51_v7  ;;  %v123_v21 = vmul.f32 %v380_v1, %v52_v8  ;;  %v189_v22 = vadd.f32 %v385_v2, %v118_v15  ;;  %v66_v8 = vld [vmem:[%s896_s0 + $0x1a0] sm:$0xff]  ;;  %v67_v9 = vld [vmem:[%s896_s0 + $0x1a8] sm:$0xff] }
  0x1f   :  { %315 = vst [vmem:[%s899_s3 + $0xf8] sm:$0xff] %v251_v14  ;;  %v190_v23 = vadd.f32 %v385_v2, %v119_v16  ;;  %v191_v24 = vadd.f32 %v385_v2, %v120_v17  ;;  %v124_v25 = vmul.f32 %v380_v1, %v53_v13  ;;  %v252_v27 = vmax.f32 %v188_v18, 0.0  ;;  %v68_v10 = vld [vmem:[%s896_s0 + $0x1b0] sm:$0xff]  ;;  %v69_v15 = vld [vmem:[%s896_s0 + $0x1b8] sm:$0xff] }
  0x20   :  { %v192_v28 = vadd.f32 %v385_v2, %v121_v19  ;;  %v193_v29 = vadd.f32 %v385_v2, %v122_v20  ;;  %v194_v30 = vadd.f32 %v385_v2, %v123_v21  ;;  %v253_v34 = vmax.f32 %v189_v22, 0.0 }
  0x21   :  { %v254_v35 = vmax.f32 %v190_v23, 0.0  ;;  %v255_v36 = vmax.f32 %v191_v24, 0.0  ;;  %v195_v37 = vadd.f32 %v385_v2, %v124_v25  ;;  %316 = vst [vmem:[%s899_s3 + $0x100] sm:$0xff] %v252_v27  ;;  %v125_v44 = vmul.f32 %v380_v1, %v54_v26 }
  0x22   :  { %v256_v41 = vmax.f32 %v192_v28, 0.0  ;;  %v257_v42 = vmax.f32 %v193_v29, 0.0  ;;  %v258_v43 = vmax.f32 %v194_v30, 0.0  ;;  %317 = vst [vmem:[%s899_s3 + $0x108] sm:$0xff] %v253_v34  ;;  %v126_v47 = vmul.f32 %v380_v1, %v55_v31  ;;  %v70_v28 = vld [vmem:[%s896_s0 + $0x1c0] sm:$0xff]  ;;  %v72_v34 = vld [vmem:[%s896_s0 + $0x1d0] sm:$0xff] }
  0x23   :  { %318 = vst [vmem:[%s899_s3 + $0x110] sm:$0xff] %v254_v35  ;;  %319 = vst [vmem:[%s899_s3 + $0x118] sm:$0xff] %v255_v36  ;;  %v259_v46 = vmax.f32 %v195_v37, 0.0  ;;  %v127_v48 = vmul.f32 %v380_v1, %v56_v32  ;;  %v128_v49 = vmul.f32 %v380_v1, %v57_v33  ;;  %v196_v50 = vadd.f32 %v385_v2, %v125_v44  ;;  %v71_v33 = vld [vmem:[%s896_s0 + $0x1c8] sm:$0xff]  ;;  %v73_v35 = vld [vmem:[%s896_s0 + $0x1d8] sm:$0xff] }
  0x24   :  { %320 = vst [vmem:[%s899_s3 + $0x120] sm:$0xff] %v256_v41  ;;  %321 = vst [vmem:[%s899_s3 + $0x128] sm:$0xff] %v257_v42  ;;  %v129_v51 = vmul.f32 %v380_v1, %v58_v38  ;;  %v130_v52 = vmul.f32 %v380_v1, %v59_v39  ;;  %v131_v53 = vmul.f32 %v380_v1, %v60_v40  ;;  %v74_v40 = vld [vmem:[%s896_s0 + $0x1e0] sm:$0xff]  ;;  %v75_v41 = vld [vmem:[%s896_s0 + $0x1e8] sm:$0xff] }
  0x25   :  { %322 = vst [vmem:[%s899_s3 + $0x130] sm:$0xff] %v258_v43  ;;  %323 = vst [vmem:[%s899_s3 + $0x138] sm:$0xff] %v259_v46  ;;  %v197_v54 = vadd.f32 %v385_v2, %v126_v47  ;;  %v198_v55 = vadd.f32 %v385_v2, %v127_v48  ;;  %v199_v56 = vadd.f32 %v385_v2, %v128_v49  ;;  %v260_v59 = vmax.f32 %v196_v50, 0.0  ;;  %v76_v42 = vld [vmem:[%s896_s0 + $0x1f0] sm:$0xff]  ;;  %v77_v47 = vld [vmem:[%s896_s0 + $0x1f8] sm:$0xff] }
  0x26   :  { %v132_v57 = vmul.f32 %v380_v1, %v61_v45  ;;  %v200_v60 = vadd.f32 %v385_v2, %v129_v51  ;;  %v201_v61 = vadd.f32 %v385_v2, %v130_v52  ;;  %v202_v62 = vadd.f32 %v385_v2, %v131_v53 }
  0x27   :  { %v261_v4 = vmax.f32 %v197_v54, 0.0  ;;  %v262_v5 = vmax.f32 %v198_v55, 0.0  ;;  %v263_v6 = vmax.f32 %v199_v56, 0.0  ;;  %324 = vst [vmem:[%s899_s3 + $0x140] sm:$0xff] %v260_v59  ;;  %v133_v14 = vmul.f32 %v380_v1, %v62_v58 }
  0x28   :  { %v203_v7 = vadd.f32 %v385_v2, %v132_v57  ;;  %v264_v11 = vmax.f32 %v200_v60, 0.0  ;;  %v265_v12 = vmax.f32 %v201_v61, 0.0  ;;  %v266_v13 = vmax.f32 %v202_v62, 0.0 }
  0x29   :  { %325 = vst [vmem:[%s899_s3 + $0x148] sm:$0xff] %v261_v4  ;;  %326 = vst [vmem:[%s899_s3 + $0x150] sm:$0xff] %v262_v5  ;;  %v134_v17 = vmul.f32 %v380_v1, %v63_v63  ;;  %v135_v18 = vmul.f32 %v380_v1, %v64_v0  ;;  %v136_v19 = vmul.f32 %v380_v1, %v65_v3 }
  0x2a   :  { %327 = vst [vmem:[%s899_s3 + $0x158] sm:$0xff] %v263_v6  ;;  %v267_v16 = vmax.f32 %v203_v7, 0.0  ;;  %328 = vst [vmem:[%s899_s3 + $0x160] sm:$0xff] %v264_v11  ;;  %v204_v20 = vadd.f32 %v385_v2, %v133_v14  ;;  %v137_v21 = vmul.f32 %v380_v1, %v66_v8  ;;  %v138_v22 = vmul.f32 %v380_v1, %v67_v9 }
  0x2b   :  { %329 = vst [vmem:[%s899_s3 + $0x168] sm:$0xff] %v265_v12  ;;  %330 = vst [vmem:[%s899_s3 + $0x170] sm:$0xff] %v266_v13  ;;  %v139_v23 = vmul.f32 %v380_v1, %v68_v10  ;;  %v205_v24 = vadd.f32 %v385_v2, %v134_v17  ;;  %v206_v25 = vadd.f32 %v385_v2, %v135_v18 }
  0x2c   :  { %331 = vst [vmem:[%s899_s3 + $0x178] sm:$0xff] %v267_v16  ;;  %v207_v26 = vadd.f32 %v385_v2, %v136_v19  ;;  %v140_v27 = vmul.f32 %v380_v1, %v69_v15  ;;  %v268_v29 = vmax.f32 %v204_v20, 0.0  ;;  %v208_v30 = vadd.f32 %v385_v2, %v137_v21 }
  0x2d   :  { %v209_v31 = vadd.f32 %v385_v2, %v138_v22  ;;  %v210_v32 = vadd.f32 %v385_v2, %v139_v23  ;;  %v269_v36 = vmax.f32 %v205_v24, 0.0  ;;  %v270_v37 = vmax.f32 %v206_v25, 0.0 }
  0x2e   :  { %v271_v38 = vmax.f32 %v207_v26, 0.0  ;;  %v211_v39 = vadd.f32 %v385_v2, %v140_v27  ;;  %332 = vst [vmem:[%s899_s3 + $0x180] sm:$0xff] %v268_v29  ;;  %v272_v43 = vmax.f32 %v208_v30, 0.0  ;;  %v141_v46 = vmul.f32 %v380_v1, %v70_v28 }
  0x2f   :  { %v273_v44 = vmax.f32 %v209_v31, 0.0  ;;  %v274_v45 = vmax.f32 %v210_v32, 0.0  ;;  %333 = vst [vmem:[%s899_s3 + $0x188] sm:$0xff] %v269_v36  ;;  %334 = vst [vmem:[%s899_s3 + $0x190] sm:$0xff] %v270_v37  ;;  %v142_v49 = vmul.f32 %v380_v1, %v71_v33  ;;  %v143_v50 = vmul.f32 %v380_v1, %v72_v34 }
  0x30   :  { %335 = vst [vmem:[%s899_s3 + $0x198] sm:$0xff] %v271_v38  ;;  %v275_v48 = vmax.f32 %v211_v39, 0.0  ;;  %v144_v51 = vmul.f32 %v380_v1, %v73_v35  ;;  %336 = vst [vmem:[%s899_s3 + $0x1a0] sm:$0xff] %v272_v43  ;;  %v212_v52 = vadd.f32 %v385_v2, %v141_v46  ;;  %v145_v53 = vmul.f32 %v380_v1, %v74_v40 }
  0x31   :  { %337 = vst [vmem:[%s899_s3 + $0x1a8] sm:$0xff] %v273_v44  ;;  %338 = vst [vmem:[%s899_s3 + $0x1b0] sm:$0xff] %v274_v45  ;;  %v146_v54 = vmul.f32 %v380_v1, %v75_v41  ;;  %v147_v55 = vmul.f32 %v380_v1, %v76_v42  ;;  %v213_v56 = vadd.f32 %v385_v2, %v142_v49 }
  0x32   :  { %339 = vst [vmem:[%s899_s3 + $0x1b8] sm:$0xff] %v275_v48  ;;  %v214_v57 = vadd.f32 %v385_v2, %v143_v50  ;;  %v215_v58 = vadd.f32 %v385_v2, %v144_v51  ;;  %v148_v59 = vmul.f32 %v380_v1, %v77_v47  ;;  %v276_v60 = vmax.f32 %v212_v52, 0.0 }
  0x33   :  { %v216_v61 = vadd.f32 %v385_v2, %v145_v53  ;;  %v217_v62 = vadd.f32 %v385_v2, %v146_v54  ;;  %v218_v63 = vadd.f32 %v385_v2, %v147_v55  ;;  %v277_v0 = vmax.f32 %v213_v56, 0.0 }
  0x34   :  { %v278_v3 = vmax.f32 %v214_v57, 0.0  ;;  %v279_v4 = vmax.f32 %v215_v58, 0.0  ;;  %v219_v5 = vadd.f32 %v385_v2, %v148_v59  ;;  %340 = vst [vmem:[%s899_s3 + $0x1c0] sm:$0xff] %v276_v60 }
  0x35   :  { %v280_v6 = vmax.f32 %v216_v61, 0.0  ;;  %v281_v7 = vmax.f32 %v217_v62, 0.0  ;;  %v282_v8 = vmax.f32 %v218_v63, 0.0  ;;  %341 = vst [vmem:[%s899_s3 + $0x1c8] sm:$0xff] %v277_v0 }
  0x36   :  { %342 = vst [vmem:[%s899_s3 + $0x1d0] sm:$0xff] %v278_v3  ;;  %343 = vst [vmem:[%s899_s3 + $0x1d8] sm:$0xff] %v279_v4  ;;  %v283_v1 = vmax.f32 %v219_v5, 0.0 }
  0x37   :  { %344 = vst [vmem:[%s899_s3 + $0x1e0] sm:$0xff] %v280_v6  ;;  %345 = vst [vmem:[%s899_s3 + $0x1e8] sm:$0xff] %v281_v7 }
  0x38   :  { %346 = vst [vmem:[%s899_s3 + $0x1f0] sm:$0xff] %v282_v8  ;;  %347 = vst [vmem:[%s899_s3 + $0x1f8] sm:$0xff] %v283_v1 }

// kernel: up_forward.4
= control target key start
LH: loop header
LB: loop body
LE: loop exit
PB: predicated region body
PF: predicated region fallthrough
CT: control target
= control target key end

     0   :  { %s5012_s24 = smov 0   ;;  %s5014_s25 = smov 0   ;;  %s6887_s0 = inlined_call_operand.vmem [shape: f32[1,128], index: 0, kind: input, shape index: {}]   ;;  %s6888_s1 = inlined_call_operand.vmem [shape: f32[1,128], index: 1, kind: input, shape index: {}]   ;;  %s6889_s2 = inlined_call_operand.vmem [shape: bf16[2,16,16,128], index: 2, kind: input, shape index: {}, may-alias: {2,3,4}]   ;;  %s6890_s3 = inlined_call_operand.vmem [shape: bf16[2,16,16,128], index: 3, kind: input, shape index: {}, may-alias: {2,3,4}]   ;;  %s6891_s4 = inlined_call_operand.vmem [shape: bf16[2,16,16,128], index: 4, kind: input, shape index: {}, may-alias: {2,3,4}]   ;;  %s6892_s5 = inlined_call_operand.vmem [shape: bf16[3,384,128], index: 5, kind: input, shape index: {}]   ;;  %s6893_s6 = inlined_call_operand.vmem [shape: f32[2,16,16,128], index: 6, kind: output, shape index: {0}]   ;;  %s6894_s7 = inlined_call_operand.vmem [shape: f32[2,1,2,128], index: 7, kind: output, shape index: {1}]  }
   0x1   :  { %s5016_s26 = smov 0  }
   0x2 LB: > { %s30_s27 = sadd.s32 1, %s4965_s25  ;;  %p3717_p0 = scmp.ge.s32.totalorder %s4969_s26, 1  ;;  %s4969_s26 = sphi %s5016_s26, %s18_s26   ;;  %s4965_s25 = sphi %s5014_s25, %s7320_s25   ;;  %s4961_s24 = sphi %s5012_s24, %s7319_s24  }
   0x3   : > { %p32_p1 = scmp.ge.s32.totalorder %s30_s27, 2  ;;  %p328_p2 = scmp.lt.s32.totalorder %s4969_s26, 3 }
   0x5   : > { %s7322_s27 = smov (%p32_p1, %s30_s27), 0  ;;  %p329_p3 = pnand %p3717_p0, %p328_p2 }
   0x7   : > { %332 = sbr.rel (%p329_p3) target bundleno = 561 (0x231), region = 44 }
   0xc   : > { %v4873_v0 = vld [vmem:[%s6892_s5 + $0x78] sm:$0xff]   ;;  %v4875_v2 = vld [vmem:[%s6892_s5 + $0x70] sm:$0xff]   ;;  %p407_p4 = scmp.lt.s32.totalorder %s4961_s24, 1  ;;  %v927_v4 = vlaneseq  ;;  %v4877_v5 = vld [vmem:[%s6892_s5 + $0x68] sm:$0xff]   ;;  %vm6913_vm0 = vcmask 1040384   ;;  %vm6962_vm5 = vmmov 1  }
   0xd   : > { %v4874_v1 = vld [vmem:[%s6892_s5 + $0x38] sm:$0xff]   ;;  %4280 = vmatprep.subr.bf16.mxu0 %v4873_v0  ;;  %4832 = vmatprep.subr.bf16.mxu1 %v4873_v0  ;;  %v4876_v3 = vld [vmem:[%s6892_s5 + $0x30] sm:$0xff]   ;;  %v4878_v6 = vld [vmem:[%s6892_s5 + $0x28] sm:$0xff]   ;;  %v7031_v27 = vmov 0  ;;  %vm6912_vm8 = vcmask 1046528  }
   0xe   : > { %4281 = vmatpush3.bf16.msra.mxu0 %v4874_v1  ;;  %4840 = vmatpush3.bf16.msra.mxu1 %v4874_v1  ;;  %s7324_s24 = smov (!%p407_p4, %s4961_s24), 1  ;;  %v5050_v7 = vshrl.u32 %v927_v4, 7  ;;  %v4879_v8 = vld [vmem:[%s6892_s5 + $0x60] sm:$0xff]   ;;  %v4881_v11 = vld [vmem:[%s6892_s5 + $0x58] sm:$0xff]   ;;  %v4883_v16 = vld [vmem:[%s6892_s5 + $0x50] sm:$0xff]  }
   0xf   : > { %4282 = vmatprep.subr.bf16.mxu0 %v4875_v2  ;;  %4833 = vmatprep.subr.bf16.mxu1 %v4875_v2  ;;  %s5056_s19 = sshll.u32 %s7324_s24, 7  ;;  %v4880_v9 = vld [vmem:[%s6892_s5 + $0x20] sm:$0xff]   ;;  %v4882_v14 = vld [vmem:[%s6892_s5 + $0x18] sm:$0xff]   ;;  %v4884_v30 = vld [vmem:[%s6892_s5 + $0x10] sm:$0xff]   ;;  %s4191_s8 = sshll.u32 %s7324_s24, 8 }
  0x10   : > { %v952_v10 = vadd.s32 192, %v5050_v7  ;;  %s415_s30 = scalar_lea.vmem %s6889_s2, %s5056_s19  ;;  %v5070_v12 = vadd.s32 16, %v5050_v7  ;;  %s5076_s10 = scalar_lea.vmem %s6890_s3, %s5056_s19  ;;  %v968_v13 = vand.u32 15, %v5050_v7  ;;  %v5088_v18 = vld [vmem:[%s6887_s0] ss:$0 sm:$0xff]  ;;  %v5091_v19 = vadd.s32 208, %v5050_v7 }
  0x11   : > { %v4193_v17 = vld [vmem:[%s415_s30] sm:$0xff]   ;;  %v4275_v22 = vld [vmem:[%s5076_s10 + $0x58] sm:$0xff]   ;;  %v5105_v28 = vld [vmem:[%s5076_s10 + $0x50] sm:$0xff]   ;;  %v5108_v29 = vadd.s32 32, %v5050_v7  ;;  %s4190_s30 = sadd.s32 120, %s5056_s19  ;;  %s6717_s12 = scalar_lea.vmem %s6893_s6, %s4191_s8 }
  0x12   : > { %4283 = vmatpush3.bf16.msra.mxu0 %v4876_v3  ;;  %4841 = vmatpush3.bf16.msra.mxu1 %v4876_v3  ;;  %v1136_v15 = vand.u32 15, %v952_v10  ;;  %v4194_v20 = vunpack.c.l.bf16 %v4193_v17  ;;  %v4195_v21 = vunpack.c.h.bf16 %v4193_v17  ;;  %v982_v23 = vand.u32 15, %v5070_v12  ;;  %v5098_v24 = vld [vmem:[%s6888_s1] ss:$0 sm:$0xff]  ;;  %v4885_v35 = vld [vmem:[%s6892_s5 + $0x48] sm:$0xff]   ;;  %v4889_v10 = vld [vmem:[%s6892_s5 + $0xb8] sm:$0xff]  }
  0x13   : > { %4284 = vmatprep.subr.bf16.mxu0 %v4877_v5  ;;  %4834 = vmatprep.subr.bf16.mxu1 %v4877_v5  ;;  %v4242_v25 = vunpack.c.l.bf16 %v4275_v22  ;;  %v4243_v26 = vunpack.c.h.bf16 %v4275_v22  ;;  %vm5100_vm1 = vcmp.gt.s32.totalorder %v968_v13, 0  ;;  %v4239_v33 = vunpack.c.h.bf16 %v5105_v28  ;;  %v4197_v43 = vld [vmem:[%s5076_s10] sm:$0xff]   ;;  %v4886_v50 = vld [vmem:[%s6892_s5 + $0x8] sm:$0xff]   ;;  %s3726_s19 = sshll.u32 %s7324_s24, 1 }
  0x14   : > { %v547_v31 = vmul.f32 %v4194_v20, %v5088_v18  ;;  %v548_v32 = vmul.f32 %v4195_v21, %v5088_v18  ;;  %vm5116_vm2 = vcmp.gt.s32.totalorder %v1136_v15, 0  ;;  %v1150_v38 = vand.u32 15, %v5091_v19  ;;  %v4276_v49 = vld [vmem:[%s5076_s10 + $0x60] sm:$0xff]   ;;  %v4265_v19 = vld [vmem:[%s5076_s10 + $0x8] sm:$0xff]   ;;  %vm5196_vm6 = vmpackc.low %vm6962_vm5, %vm5100_vm1  ;;  %s465_s15 = scalar_lea.vmem %s6894_s7, %s3726_s19 }
  0x15   : > { %v581_v36 = vmul.f32 %v4242_v25, %v5088_v18  ;;  %v582_v37 = vmul.f32 %v4243_v26, %v5088_v18  ;;  %v580_v42 = vmul.f32 %v4239_v33, %v5088_v18  ;;  %v996_v44 = vand.u32 15, %v5108_v29  ;;  %v4887_v51 = vld [vmem:[%s6892_s5 + $0x40] sm:$0xff]   ;;  %vm5209_vm7 = vmpackc.low %vm6962_vm5, %vm5116_vm2  ;;  %v4277_v34 = vld [vmem:[%s5076_s10 + $0x68] sm:$0xff]  }
  0x16   : > { %4285 = vmatpush3.bf16.msra.mxu0 %v4878_v6  ;;  %4842 = vmatpush3.bf16.msra.mxu1 %v4878_v6  ;;  %v555_v40 = vadd.f32 %v5098_v24, %v547_v31  ;;  %v556_v41 = vadd.f32 %v5098_v24, %v548_v32  ;;  %v4198_v47 = vunpack.c.l.bf16 %v4197_v43  ;;  %v4199_v48 = vunpack.c.h.bf16 %v4197_v43  ;;  %v4888_v0 = vld [vmem:[%s6892_s5] sm:$0xff]  }
  0x17   : > { %4286 = vmatprep.subr.bf16.mxu0 %v4879_v8  ;;  %4835 = vmatprep.subr.bf16.mxu1 %v4879_v8  ;;  %v613_v45 = vadd.f32 %v5098_v24, %v581_v36  ;;  %v614_v46 = vadd.f32 %v5098_v24, %v582_v37  ;;  %v612_v54 = vadd.f32 %v5098_v24, %v580_v42  ;;  %v4246_v55 = vunpack.c.l.bf16 %v4276_v49  ;;  %v4893_v22 = vld [vmem:[%s6892_s5 + $0xa0] sm:$0xff]  }
  0x18   : > { %v557_v52 = vmax.f32 %v555_v40, 0.0  ;;  %v558_v53 = vmax.f32 %v556_v41, 0.0  ;;  %v559_v58 = vmul.f32 %v4198_v47, %v5088_v18  ;;  %v560_v59 = vmul.f32 %v4199_v48, %v5088_v18  ;;  %v4894_v47 = vld [vmem:[%s6892_s5 + $0x170] sm:$0xff]  }
  0x19   : > { %v5142_v56 = vmax.f32 %v613_v45, 0.0  ;;  %v5144_v57 = vmax.f32 %v614_v46, 0.0  ;;  %v5152_v62 = vmax.f32 %v612_v54, 0.0  ;;  %v4247_v63 = vunpack.c.h.bf16 %v4276_v49 }
  0x1a   : > { %4287 = vmatpush3.bf16.msra.mxu0 %v4880_v9  ;;  %4843 = vmatpush3.bf16.msra.mxu1 %v4880_v9  ;;  %v5148_v60 = vmul.f32 0.0, %v557_v52  ;;  %v5150_v61 = vmul.f32 0.0, %v558_v53  ;;  %v591_v4 = vadd.f32 %v5098_v24, %v559_v58  ;;  %vm5174_vm3 = vcmp.gt.s32.totalorder %v982_v23, 0  ;;  %v4892_v58 = vld [vmem:[%s6892_s5 + $0xa8] sm:$0xff]  }
  0x1b   : > { %4288 = vmatprep.subr.bf16.mxu0 %v4881_v11  ;;  %4836 = vmatprep.subr.bf16.mxu1 %v4881_v11  ;;  %v5159_v1 = vpack.c.bf16 %v5144_v57, %v5142_v56  ;;  %v757_v2 = vrot.slane %v5142_v56, 7  ;;  %v759_v3 = vrot.slane %v5144_v57, 7  ;;  %v4890_v11 = vld [vmem:[%s6892_s5 + $0x178] sm:$0xff]   ;;  %vm5185_vm4 = vcmp.gt.s32.totalorder %v1150_v38, 0  ;;  %v4891_v38 = vld [vmem:[%s6892_s5 + $0xb0] sm:$0xff]   ;;  %vm5282_vm10 = vmpackc.low %vm6962_vm5, %vm5174_vm3 }
  0x1c   : > { %v710_v5 = vrot.slane %v5148_v60, 7  ;;  %v711_v6 = vrot.slane %v5150_v61, 7  ;;  %v819_v8 = vrot.slane %v5148_v60, 1  ;;  %v820_v9 = vrot.slane %v5150_v61, 1  ;;  %vm5293_vm11 = vmpackc.low %vm6962_vm5, %vm5185_vm4 }
  0x1d   : > { %7024 = vst [vmem:[#allocation3_spill] sm:$0xff] %v5159_v1  ;;  %v1541_v13 = vpack.c.bf16 %v5150_v61, %v5148_v60  ;;  %v760_v15 = vsel %vm6913_vm0, %v757_v2, %v759_v3  ;;  %1914 = vmatprep.mubr.bf16.mxu1 %v5159_v1  ;;  %v5200_v23 = vmax.f32 %v591_v4, 0.0  ;;  %v583_v25 = vmul.f32 %v4246_v55, %v5088_v18 }
  0x1e   : > { %4289 = vmatpush3.bf16.msra.mxu0 %v4882_v14  ;;  %4844 = vmatpush3.bf16.msra.mxu1 %v4882_v14  ;;  %v6895_v14 = vrot.slane %v5152_v62, 7  ;;  %v712_v20 = vsel %vm6913_vm0, %v710_v5, %v711_v6  ;;  %v817_v21 = vsel %vm6913_vm0, 0.0, %v710_v5  ;;  %v7032_v27 = vsel %vm5209_vm7, 4294967295, %v7031_v27 }
  0x1f   : > { %4290 = vmatprep.subr.bf16.mxu0 %v4883_v16  ;;  %4837 = vmatprep.subr.bf16.mxu1 %v4883_v16  ;;  %v592_v16 = vadd.f32 %v5098_v24, %v560_v59  ;;  %v3754_v26 = vpack.c.bf16 %v712_v20, %v817_v21  ;;  %7033 = vst [vmem:[#allocation4_spill] sm:$0xff] %v7032_v27  ;;  %v713_v36 = vrot.slane %v5200_v23, 7  ;;  %v4202_v37 = vunpack.c.l.bf16 %v4265_v19 }
  0x20   : > { %1818 = vmatprep.mubr.bf16.mxu0 %v1541_v13  ;;  %v584_v32 = vmul.f32 %v4247_v63, %v5088_v18  ;;  %v4203_v48 = vunpack.c.h.bf16 %v4265_v19  ;;  %v4250_v52 = vunpack.c.l.bf16 %v4277_v34  ;;  %v4251_v53 = vunpack.c.h.bf16 %v4277_v34  ;;  %v4928_v19 = vld [vmem:[%s6892_s5 + $0x1a8] sm:$0xff]  }
  0x21   : > { %v5213_v31 = vmax.f32 %v592_v16, 0.0  ;;  %v714_v46 = vsel %vm6913_vm0, %v711_v6, %v713_v36  ;;  %v561_v49 = vmul.f32 %v4202_v37, %v5088_v18  ;;  %v4898_v6 = vld [vmem:[%s6892_s5 + $0x168] sm:$0xff]   ;;  %vm5273_vm9 = vcmp.gt.s32.totalorder %v996_v44, 0  ;;  %v4266_v16 = vld [vmem:[%s5076_s10 + $0x10] sm:$0xff]  }
  0x22   : > { %4291 = vmatpush3.bf16.msra.mxu0 %v4884_v30  ;;  %4845 = vmatpush3.bf16.msra.mxu1 %v4884_v30  ;;  %v758_v30 = vsel %vm6913_vm0, %v6895_v14, %v757_v2  ;;  %v616_v42 = vadd.f32 %v5098_v24, %v584_v32  ;;  %v562_v59 = vmul.f32 %v4203_v48, %v5088_v18  ;;  %v956_v44 = vadd.s32 224, %v5050_v7  ;;  %v4278_v37 = vld [vmem:[%s5076_s10 + $0x70] sm:$0xff]   ;;  %vm5360_vm13 = vmpackc.low %vm6962_vm5, %vm5273_vm9 }
  0x23   : > { %4292 = vmatprep.subr.bf16.mxu0 %v4885_v35  ;;  %4838 = vmatprep.subr.bf16.mxu1 %v4885_v35  ;;  %v5216_v33 = vpack.c.bf16 %v760_v15, %v758_v30  ;;  %v615_v35 = vadd.f32 %v5098_v24, %v583_v25  ;;  %v824_v40 = vrot.slane %v5213_v31, 1  ;;  %v5227_v41 = vpack.c.bf16 %v5213_v31, %v5200_v23 }
  0x24   : > { %v715_v43 = vrot.slane %v5213_v31, 7  ;;  %v593_v63 = vadd.f32 %v5098_v24, %v561_v49  ;;  %v585_v4 = vmul.f32 %v4250_v52, %v5088_v18  ;;  %v586_v5 = vmul.f32 %v4251_v53, %v5088_v18 }
  0x25   : > { %7034 = vst [vmem:[#allocation5_spill] sm:$0xff] %v5216_v33  ;;  %v5231_v45 = vmax.f32 %v615_v35, 0.0  ;;  %v7040_v12 = vmov 0  ;;  %v1164_v35 = vand.u32 15, %v956_v44  ;;  %v4207_v53 = vunpack.c.h.bf16 %v4266_v16 }
  0x26   : > { %4293 = vmatpush3.bf16.msra.mxu0 %v4886_v50  ;;  %4846 = vmatpush3.bf16.msra.mxu1 %v4886_v50  ;;  %v5243_v50 = vmax.f32 %v616_v42, 0.0  ;;  %v5269_v13 = vmax.f32 %v593_v63, 0.0  ;;  %v617_v20 = vadd.f32 %v5098_v24, %v585_v4  ;;  %v618_v29 = vadd.f32 %v5098_v24, %v586_v5  ;;  %v4267_v63 = vld [vmem:[%s5076_s10 + $0x18] sm:$0xff]  }
  0x27   : > { %4294 = vmatprep.subr.bf16.mxu0 %v4887_v51  ;;  %4839 = vmatprep.subr.bf16.mxu1 %v4887_v51  ;;  %v716_v51 = vsel %vm6913_vm0, %v713_v36, %v715_v43  ;;  %v761_v55 = vrot.slane %v5231_v45, 7  ;;  %v7041_v12 = vsel %vm5293_vm11, 4294967295, %v7040_v12  ;;  %v4206_v36 = vunpack.c.l.bf16 %v4266_v16  ;;  %v7233_v16 = vld [vmem:[#allocation4_spill] sm:$0xff] }
  0x28   : > { %v5246_v54 = vpack.c.bf16 %v716_v51, %v714_v46  ;;  %v763_v2 = vrot.slane %v5243_v50, 7  ;;  %7042 = vst [vmem:[#allocation7_spill] sm:$0xff] %v7041_v12  ;;  %v717_v30 = vrot.slane %v5269_v13, 7  ;;  %v5306_v17 = vmax.f32 %v617_v20, 0.0  ;;  %v4902_v51 = vld [vmem:[%s6892_s5 + $0x160] sm:$0xff]  }
  0x29   : > { %v5308_v32 = vmax.f32 %v618_v29, 0.0  ;;  %vm5336_vm12 = vcmp.gt.s32.totalorder %v1164_v35, 0  ;;  %v7050_v44 = vmov 0  ;;  %v958_v35 = vadd.s32 240, %v5050_v7 }
  0x2a   : > { %4295 = vmatpush3.bf16.msra.mxu0 %v4888_v0  ;;  %4847 = vmatpush3.bf16.msra.mxu1 %v4888_v0  ;;  %v5257_v0 = vpack.c.bf16 %v5243_v50, %v5231_v45  ;;  %v718_v42 = vsel %vm6913_vm0, %v715_v43, %v717_v30  ;;  %v765_v48 = vrot.slane %v5306_v17, 7  ;;  %vm5372_vm14 = vmpackc.low %vm6962_vm5, %vm5336_vm12  ;;  %v4907_v43 = vld [vmem:[%s6892_s5 + $0x158] sm:$0xff]   ;;  %v822_v14 = vrot.slane %v5200_v23, 1 }
  0x2b   : > { %4688 = vmatprep.subr.bf16.mxu1 %v4889_v10  ;;  %4736 = vmatprep.subr.bf16.mxu0 %v4890_v11  ;;  %v767_v49 = vrot.slane %v5308_v32, 7  ;;  %v7051_v44 = vsel %vm5372_vm14, 4294967295, %v7050_v44  ;;  %v936_v61 = vadd.s32 64, %v5050_v7 }
  0x2c   : > { %7035 = vst [vmem:[#allocation6_spill] sm:$0xff] %v5257_v0  ;;  %v766_v5 = vsel %vm6913_vm0, %v763_v2, %v765_v48  ;;  %7052 = vst [vmem:[#allocation11_spill] sm:$0xff] %v7051_v44 }
  0x2d   : > { %3755 = vmatmul.mubr.msk.bf16.vlgmr.msra.gmra.mxu0 %vm5196_vm6, %v3754_v26  ;;  %3791 = vmatmul.mubr.msk.bf16.vlgmr.msra.gmra.mxu1 %vm5209_vm7, %v5216_v33  ;;  %v826_v26 = vrot.slane %v5269_v13, 1 }
  0x2e   : > { %4689 = vmatpush3.bf16.msra.mxu1 %v4889_v10  ;;  %4737 = vmatpush3.bf16.msra.mxu0 %v4890_v11  ;;  %v762_v10 = vsel %vm6913_vm0, %v759_v3, %v761_v55  ;;  %v594_v11 = vadd.f32 %v5098_v24, %v562_v59  ;;  %v764_v3 = vsel %vm6913_vm0, %v761_v55, %v763_v2  ;;  %v4254_v59 = vunpack.c.l.bf16 %v4278_v37 }
  0x2f   : > { %4690 = vmatprep.subr.bf16.mxu1 %v4891_v38  ;;  %1826 = vmatprep.mubr.bf16.mxu0 %v5227_v41  ;;  %v5297_v21 = vpack.c.bf16 %v764_v3, %v762_v10  ;;  %v5316_v34 = vsel %vm6912_vm8, %v824_v40, %v826_v26  ;;  %v563_v55 = vmul.f32 %v4206_v36, %v5088_v18  ;;  %v4895_v10 = vld [vmem:[%s6892_s5 + $0x98] sm:$0xff]   ;;  %v4210_v36 = vunpack.c.l.bf16 %v4267_v63 }
  0x30   : > { %4738 = vmatprep.subr.bf16.mxu0 %v4894_v47  ;;  %1922 = vmatprep.mubr.bf16.mxu1 %v5257_v0  ;;  %v5302_v25 = vmax.f32 %v594_v11, 0.0  ;;  %v4255_v11 = vunpack.c.h.bf16 %v4278_v37  ;;  %v564_v2 = vmul.f32 %v4207_v53, %v5088_v18  ;;  %v587_v29 = vmul.f32 %v4254_v59, %v5088_v18 }
  0x31   : > { %7043 = vst [vmem:[#allocation8_spill] sm:$0xff] %v5297_v21  ;;  %v595_v20 = vadd.f32 %v5098_v24, %v563_v55  ;;  %v565_v59 = vmul.f32 %v4210_v36, %v5088_v18  ;;  %v943_v0 = vadd.s32 120, %v5050_v7 }
  0x32   : > { %4691 = vmatpush3.bf16.msra.mxu1 %v4891_v38  ;;  %4739 = vmatpush3.bf16.msra.mxu0 %v4894_v47  ;;  %v5320_v38 = vpack.c.bf16 %v5302_v25, %v5269_v13  ;;  %v719_v46 = vrot.slane %v5302_v25, 7  ;;  %v5332_v47 = vpack.c.bf16 %v5308_v32, %v5306_v17  ;;  %v588_v15 = vmul.f32 %v4255_v11, %v5088_v18 }
  0x33   : > { %4692 = vmatprep.subr.bf16.mxu1 %v4892_v58  ;;  %4740 = vmatprep.subr.bf16.mxu0 %v4898_v6  ;;  %v596_v37 = vadd.f32 %v5098_v24, %v564_v2 }
  0x34   : > { %7044 = vst [vmem:[#allocation9_spill] sm:$0xff] %v5332_v47  ;;  %v720_v52 = vsel %vm6913_vm0, %v717_v30, %v719_v46  ;;  %v934_v30 = vadd.s32 48, %v5050_v7  ;;  %v620_v53 = vadd.f32 %v5098_v24, %v588_v15  ;;  %v597_v15 = vadd.f32 %v5098_v24, %v565_v59 }
  0x35   : > { %3758 = vmatmul.mubr.msk.bf16.gmra.mxu0 %vm5282_vm10, %v5246_v54  ;;  %3794 = vmatmul.mubr.msk.bf16.gmra.mxu1 %vm5293_vm11, %v5297_v21  ;;  %v5348_v4 = vpack.c.bf16 %v720_v52, %v718_v42  ;;  %v5380_v42 = vmax.f32 %v595_v20, 0.0  ;;  %v4896_v52 = vld [vmem:[%s6892_s5 + $0x90] sm:$0xff]   ;;  %v821_v59 = vsel %vm6912_vm8, %v819_v8, %v820_v9  ;;  %v4899_v8 = vld [vmem:[%s6892_s5 + $0x80] sm:$0xff]   ;;  %v7060_v20 = vmov 0 }
  0x36   : > { %4693 = vmatpush3.bf16.msra.mxu1 %v4892_v58  ;;  %1834 = vmatprep.mubr.bf16.mxu0 %v5320_v38  ;;  %v768_v58 = vsel %vm6913_vm0, %v765_v48, %v767_v49  ;;  %v4211_v48 = vunpack.c.h.bf16 %v4267_v63  ;;  %v1010_v55 = vand.u32 15, %v934_v30  ;;  %v5403_v2 = vmax.f32 %v620_v53, 0.0  ;;  %v4910_v30 = vld [vmem:[%s6892_s5 + $0x150] sm:$0xff]  }
  0x37   : > { %4694 = vmatprep.subr.bf16.mxu1 %v4893_v22  ;;  %1930 = vmatprep.mubr.bf16.mxu1 %v5332_v47  ;;  %v5364_v3 = vpack.c.bf16 %v768_v58, %v766_v5  ;;  %v5391_v5 = vmax.f32 %v596_v37, 0.0  ;;  %v721_v63 = vrot.slane %v5380_v42, 7 }
  0x38   : > { %4741 = vmatpush3.bf16.msra.mxu0 %v4898_v6  ;;  %v619_v6 = vadd.f32 %v5098_v24, %v587_v29  ;;  %v566_v11 = vmul.f32 %v4211_v48, %v5088_v18  ;;  %vm5405_vm15 = vcmp.gt.s32.totalorder %v1010_v55, 0  ;;  %v6896_v53 = vrot.slane %v5403_v2, 7 }
  0x39   : > { %7049 = vst [vmem:[#allocation10_spill] sm:$0xff] %v5364_v3  ;;  %4742 = vmatprep.subr.bf16.mxu0 %v4902_v51  ;;  %v722_v36 = vsel %vm6913_vm0, %v719_v46, %v721_v63  ;;  %v723_v37 = vrot.slane %v5391_v5, 7  ;;  %v5433_v55 = vmax.f32 %v597_v15, 0.0  ;;  %vm5450_vm2 = vmpackc.low %vm6962_vm5, %vm5405_vm15 }
  0x3a   : > { %4695 = vmatpush3.bf16.msra.mxu1 %v4893_v22  ;;  %v1178_v22 = vand.u32 15, %v958_v35  ;;  %v5393_v58 = vmax.f32 %v619_v6, 0.0  ;;  %v5422_v35 = vpack.c.bf16 %v5391_v5, %v5380_v42 }
  0x3b   : > { %4696 = vmatprep.subr.bf16.mxu1 %v4895_v10  ;;  %v724_v46 = vsel %vm6913_vm0, %v721_v63, %v723_v37  ;;  %v7058_v63 = vmov 0  ;;  %v834_v39 = vrot.slane %v5433_v55, 1 }
  0x3c   : > { %4743 = vmatpush3.bf16.msra.mxu0 %v4902_v51  ;;  %vm5409_vm1 = vcmp.gt.s32.totalorder %v1178_v22, 0  ;;  %v4897_v51 = vld [vmem:[%s6892_s5 + $0x88] sm:$0xff]   ;;  %v769_v6 = vrot.slane %v5393_v58, 7  ;;  %v5429_v48 = vpack.c.bf16 %v5403_v2, %v5393_v58  ;;  %v7059_v63 = vsel %vm5450_vm2, 4294967295, %v7058_v63 }
  0x3d   : > { %3761 = vmatmul.mubr.msk.bf16.gmra.mxu0 %vm5360_vm13, %v5348_v4  ;;  %3797 = vmatmul.mubr.msk.bf16.gmra.mxu1 %vm5372_vm14, %v5364_v3  ;;  %vm5469_vm3 = vmpackc.low %vm6962_vm5, %vm5409_vm1  ;;  %v4270_v3 = vld [vmem:[%s5076_s10 + $0x30] sm:$0xff]   ;;  %vm7089_vm14 = vcmask 1046528  }
  0x3e   : > { %4697 = vmatpush3.bf16.msra.mxu1 %v4895_v10  ;;  %4744 = vmatprep.subr.bf16.mxu0 %v4907_v43  ;;  %7057 = vst [vmem:[#allocation12_spill] sm:$0xff] %v5429_v48  ;;  %v598_v10 = vadd.f32 %v5098_v24, %v566_v11  ;;  %v770_v22 = vsel %vm6913_vm0, %v767_v49, %v769_v6  ;;  %v929_v49 = vadd.s32 8, %v5050_v7  ;;  %v7061_v20 = vsel %vm5469_vm3, 4294967295, %v7060_v20 }
  0x3f   : > { %4698 = vmatprep.subr.bf16.mxu1 %v4896_v52  ;;  %1842 = vmatprep.mubr.bf16.mxu0 %v5422_v35  ;;  %v5454_v11 = vpack.c.bf16 %v724_v46, %v722_v36  ;;  %v772_v60 = vsel %vm6913_vm0, %v769_v6, %v6896_v53  ;;  %7062 = vst [vmem:[#allocation13_spill] sm:$0xff] %v7061_v20  ;;  %v832_v53 = vrot.slane %v5391_v5, 1 }
  0x40   : > { %4745 = vmatpush3.bf16.msra.mxu0 %v4907_v43  ;;  %1938 = vmatprep.mubr.bf16.mxu1 %v5429_v48  ;;  %v5462_v23 = vmax.f32 %v598_v10, 0.0  ;;  %v4268_v43 = vld [vmem:[%s5076_s10 + $0x20] sm:$0xff]   ;;  %v5473_v15 = vpack.c.bf16 %v772_v60, %v770_v22  ;;  %v823_v36 = vsel %vm6912_vm8, %v820_v9, %v822_v14  ;;  %v825_v6 = vsel %vm6912_vm8, %v822_v14, %v824_v40  ;;  %v4915_v14 = vld [vmem:[%s6892_s5 + $0x148] sm:$0xff]  }
  0x41   : > { %4746 = vmatprep.subr.bf16.mxu0 %v4910_v30  ;;  %v725_v10 = vrot.slane %v5433_v55, 7  ;;  %v975_v29 = vand.u32 15, %v929_v49  ;;  %v3802_v46 = vpack.c.bf16 %v823_v36, %v821_v59  ;;  %v931_v9 = vadd.s32 24, %v5050_v7 }
  0x42   : > { %4699 = vmatpush3.bf16.msra.mxu1 %v4896_v52  ;;  %7063 = vst [vmem:[#allocation14_spill] sm:$0xff] %v5473_v15  ;;  %v5484_v52 = vpack.c.bf16 %v5462_v23, %v5433_v55  ;;  %v6897_v22 = vrot.slane %v5462_v23, 7  ;;  %v5491_v31 = vpack.c.bf16 %v5316_v34, %v825_v6  ;;  %v4900_v34 = vld [vmem:[%s6892_s5 + $0x138] sm:$0xff]   ;;  %v1024_v59 = vand.u32 15, %v936_v61 }
  0x43   : > { %4700 = vmatprep.subr.bf16.mxu1 %v4897_v51  ;;  %v726_v60 = vsel %vm6913_vm0, %v723_v37, %v725_v10  ;;  %vm1469_vm4 = vcmp.lt.s32.totalorder %v975_v29, 15  ;;  %v4215_v37 = vunpack.c.h.bf16 %v4268_v43  ;;  %v989_v36 = vand.u32 15, %v931_v9  ;;  %v4269_v9 = vld [vmem:[%s5076_s10 + $0x28] sm:$0xff]  }
  0x44   : > { %4747 = vmatpush3.bf16.msra.mxu0 %v4910_v30  ;;  %v728_v40 = vsel %vm6913_vm0, %v725_v10, %v6897_v22  ;;  %v4214_v30 = vunpack.c.l.bf16 %v4268_v43  ;;  %vm3801_vm6 = vmpackc.low %vm1469_vm4, %vm6962_vm5  ;;  %v828_v6 = vrot.slane %v5302_v25, 1  ;;  %v5516_v10 = vld [vmem:[%s6892_s5 + $0x140] sm:$0xff]   ;;  %v830_v29 = vrot.slane %v5380_v42, 1  ;;  %v4901_v25 = vld [vmem:[%s6892_s5 + $0xf8] sm:$0xff]  }
  0x45   : > { %3764 = vmatmul.mubr.msk.bf16.gmra.mxu0 %vm5450_vm2, %v5454_v11  ;;  %3800 = vmatmul.mubr.msk.bf16.gmra.mxu1 %vm5469_vm3, %v5473_v15  ;;  %v5510_v49 = vpack.c.bf16 %v728_v40, %v726_v60  ;;  %v568_v43 = vmul.f32 %v4215_v37, %v5088_v18  ;;  %v933_v61 = vadd.s32 40, %v5050_v7  ;;  %vm1404_vm9 = vcmp.gt.s32.totalorder %v1024_v59, 0 }
  0x46   : > { %4701 = vmatpush3.bf16.msra.mxu1 %v4897_v51  ;;  %1850 = vmatprep.mubr.bf16.mxu0 %v5484_v52  ;;  %v567_v51 = vmul.f32 %v4214_v30, %v5088_v18  ;;  %vm1471_vm12 = vcmp.lt.s32.totalorder %v989_v36, 15  ;;  %v829_v60 = vsel %vm6912_vm8, %v826_v26, %v828_v6  ;;  %vm5531_vm15 = vmpackc.low %vm6962_vm5, %vm1404_vm9  ;;  %v7064_v40 = vmov 0 }
  0x47   : > { %4702 = vmatprep.subr.bf16.mxu1 %v4899_v8  ;;  %4704 = vmatprep.mubr.msk.bf16.mxu1 %vm3801_vm6, %v3802_v46  ;;  %v938_v46 = vadd.s32 80, %v5050_v7  ;;  %v7065_v40 = vsel %vm5531_vm15, 4294967295, %v7064_v40  ;;  %v600_v30 = vadd.f32 %v5098_v24, %v568_v43  ;;  %v831_v37 = vsel %vm6912_vm8, %v828_v6, %v830_v29  ;;  %vm5539_vm1 = vmpackc.low %vm1471_vm12, %vm6962_vm5 }
  0x48   : > { %4748 = vmatprep.subr.bf16.mxu0 %v4915_v14  ;;  %7066 = vst [vmem:[#allocation15_spill] sm:$0xff] %v7065_v40  ;;  %v599_v42 = vadd.f32 %v5098_v24, %v567_v51  ;;  %v1003_v59 = vand.u32 15, %v933_v61  ;;  %v5543_v26 = vpack.c.bf16 %v831_v37, %v829_v60  ;;  %v4903_v51 = vld [vmem:[%s6892_s5 + $0x130] sm:$0xff]   ;;  %v935_v6 = vadd.s32 56, %v5050_v7 }
  0x49   : > { %4749 = vmatpush3.bf16.msra.mxu0 %v4915_v14  ;;  %v1038_v36 = vand.u32 15, %v938_v46  ;;  %v5551_v14 = vmax.f32 %v600_v30, 0.0  ;;  %v833_v55 = vsel %vm6912_vm8, %v830_v29, %v832_v53  ;;  %v835_v61 = vsel %vm6912_vm8, %v832_v53, %v834_v39  ;;  %v4922_v30 = vld [vmem:[%s6892_s5 + $0x1f8] sm:$0xff]  }
  0x4a   : > { %4703 = vmatpush3.bf16.msra.mxu1 %v4899_v8  ;;  %4750 = vmatprep.subr.bf16.mxu0 %v5516_v10  ;;  %v631_v8 = vmax.f32 %v599_v42, 0.0  ;;  %vm1473_vm4 = vcmp.lt.s32.totalorder %v1003_v59, 15  ;;  %v4218_v60 = vunpack.c.l.bf16 %v4269_v9  ;;  %v1017_v53 = vand.u32 15, %v935_v6  ;;  %v4905_v6 = vld [vmem:[%s6892_s5 + $0x128] sm:$0xff]  }
  0x4b   : > { %4416 = vmatprep.subr.bf16.mxu1 %v4900_v34  ;;  %vm5555_vm6 = vmpackc.low %vm1473_vm4, %vm6962_vm5  ;;  %vm5559_vm9 = vcmp.gt.s32.totalorder %v1038_v36, 0  ;;  %v4904_v34 = vld [vmem:[%s6892_s5 + $0xf0] sm:$0xff]   ;;  %v731_v29 = vrot.slane %v5551_v14, 7  ;;  %v5584_v37 = vpack.c.bf16 %v835_v61, %v833_v55  ;;  %v4219_v59 = vunpack.c.h.bf16 %v4269_v9 }
  0x4c   : > { %v5575_v46 = vpack.c.bf16 %v5551_v14, %v631_v8  ;;  %v729_v42 = vrot.slane %v631_v8, 7  ;;  %v569_v36 = vmul.f32 %v4218_v60, %v5088_v18  ;;  %v836_v22 = vrot.slane %v5462_v23, 1  ;;  %vm5610_vm4 = vmpackc.low %vm6962_vm5, %vm5559_vm9 }
  0x4d   : > { %3767 = vmatmul.mubr.msk.bf16.gmra.mxu0 %vm5531_vm15, %v5510_v49  ;;  %4705 = vmatmul.mubr.msk.bf16.vlgmr.msra.gmra.mxu1 %vm5539_vm1, %v5491_v31  ;;  %vm5596_vm12 = vcmp.lt.s32.totalorder %v1017_v53, 15  ;;  %v838_v9 = vrot.slane %v631_v8, 1  ;;  %v570_v60 = vmul.f32 %v4219_v59, %v5088_v18  ;;  %v840_v8 = vrot.slane %v5551_v14, 1 }
  0x4e   : > { %7073 = vst [vmem:[#allocation16_spill] sm:$0xff] %v5575_v46  ;;  %4417 = vmatpush3.bf16.msra.mxu1 %v4901_v25  ;;  %4708 = vmatprep.mubr.msk.bf16.mxu1 %vm5555_vm6, %v5543_v26  ;;  %v7074_v25 = vrot.slane %v5462_v23, 7  ;;  %v732_v15 = vsel %vm6913_vm0, %v729_v42, %v731_v29  ;;  %v601_v48 = vadd.f32 %v5098_v24, %v569_v36  ;;  %v7078_v23 = vmov 0  ;;  %vm5624_vm9 = vmpackc.low %vm5596_vm12, %vm6962_vm5 }
  0x4f   : > { %1858 = vmatprep.mubr.bf16.mxu0 %v5575_v46  ;;  %4418 = vmatprep.subr.bf16.mxu1 %v4903_v51  ;;  %v837_v44 = vsel %vm6912_vm8, %v834_v39, %v836_v22  ;;  %v7079_v23 = vsel %vm5610_vm4, 4294967295, %v7078_v23  ;;  %v839_v51 = vsel %vm6912_vm8, %v836_v22, %v838_v9  ;;  %v4906_v39 = vld [vmem:[%s6892_s5 + $0xe8] sm:$0xff]   ;;  %v602_v22 = vadd.f32 %v5098_v24, %v570_v60  ;;  %v5637_v60 = vld [vmem:[%s5076_s10 + $0x38] sm:$0xff]  }
  0x50   : > { %v730_v20 = vsel %vm6913_vm0, %v7074_v25, %v729_v42  ;;  %4751 = vmatpush3.bf16.msra.mxu0 %v5516_v10  ;;  %7080 = vst [vmem:[#allocation18_spill] sm:$0xff] %v7079_v23  ;;  %v633_v5 = vmax.f32 %v601_v48, 0.0  ;;  %v5629_v42 = vpack.c.bf16 %v839_v51, %v837_v44  ;;  %v939_v14 = vadd.s32 88, %v5050_v7  ;;  %v4908_v25 = vld [vmem:[%s6892_s5 + $0x120] sm:$0xff]  }
  0x51   : > { %v5600_v61 = vpack.c.bf16 %v732_v15, %v730_v20  ;;  %v937_v20 = vadd.s32 72, %v5050_v7  ;;  %v940_v15 = vadd.s32 96, %v5050_v7  ;;  %4552 = vmatprep.subr.bf16.mxu0 %v4922_v30  ;;  %v841_v30 = vsel %vm6912_vm8, %v838_v9, %v840_v8 }
  0x52   : > { %4419 = vmatpush3.bf16.msra.mxu1 %v4904_v34  ;;  %v4222_v36 = vunpack.c.l.bf16 %v4270_v3  ;;  %v634_v55 = vmax.f32 %v602_v22, 0.0  ;;  %v733_v47 = vrot.slane %v633_v5, 7  ;;  %v842_v34 = vrot.slane %v633_v5, 1 }
  0x53   : > { %7077 = vst [vmem:[#allocation17_spill] sm:$0xff] %v5600_v61  ;;  %v1031_v53 = vand.u32 15, %v937_v20  ;;  %v1052_v59 = vand.u32 15, %v940_v15  ;;  %4420 = vmatprep.subr.bf16.mxu1 %v4905_v6  ;;  %v1045_v12 = vand.u32 15, %v939_v14  ;;  %v4223_v48 = vunpack.c.h.bf16 %v4270_v3  ;;  %v4909_v14 = vld [vmem:[%s6892_s5 + $0xe0] sm:$0xff]  }
  0x54   : > { %v571_v6 = vmul.f32 %v4222_v36, %v5088_v18  ;;  %v5650_v9 = vpack.c.bf16 %v634_v55, %v633_v5  ;;  %vm7088_vm3 = vcmask 1040384   ;;  %v735_v15 = vrot.slane %v634_v55, 7 }
  0x55   : > { %3770 = vmatmul.mubr.msk.bf16.gmra.mxu0 %vm5610_vm4, %v5600_v61  ;;  %4709 = vmatmul.mubr.msk.bf16.gmra.mxu1 %vm5624_vm9, %v5584_v37  ;;  %vm1477_vm12 = vcmp.lt.s32.totalorder %v1031_v53, 15  ;;  %vm5645_vm8 = vcmp.gt.s32.totalorder %v1052_v59, 0  ;;  %v734_v20 = vsel %vm7088_vm3, %v731_v29, %v733_v47  ;;  %v843_v22 = vsel %vm7089_vm14, %v840_v8, %v842_v34  ;;  %v4911_v8 = vld [vmem:[%s6892_s5 + $0x118] sm:$0xff]   ;;  %vm7092_vm14 = vmmov %vm7088_vm3 }
  0x56   : > { %7085 = vst [vmem:[#allocation19_spill] sm:$0xff] %v5650_v9  ;;  %vm5653_vm0 = vmpackc.low %vm1477_vm12, %vm6962_vm5  ;;  %4421 = vmatpush3.bf16.msra.mxu1 %v4906_v39  ;;  %vm5665_vm11 = vcmp.lt.s32.totalorder %v1045_v12, 15  ;;  %v5669_v5 = vpack.c.bf16 %v843_v22, %v841_v30  ;;  %v572_v29 = vmul.f32 %v4223_v48, %v5088_v18  ;;  %v603_v53 = vadd.f32 %v5098_v24, %v571_v6 }
  0x57   : > { %4712 = vmatprep.mubr.msk.bf16.mxu1 %vm5653_vm0, %v5629_v42  ;;  %4422 = vmatprep.subr.bf16.mxu1 %v4908_v25  ;;  %v736_v39 = vsel %vm7092_vm14, %v733_v47, %v735_v15  ;;  %v844_v12 = vrot.slane %v634_v55, 1  ;;  %v941_v59 = vadd.s32 104, %v5050_v7  ;;  %v942_v30 = vadd.s32 112, %v5050_v7  ;;  %vm5683_vm3 = vmpackc.low %vm6962_vm5, %vm5645_vm8 }
  0x58   : > { %1866 = vmatprep.mubr.bf16.mxu0 %v5650_v9  ;;  %v7093_v36 = vmov 0  ;;  %v5687_v25 = vpack.c.bf16 %v736_v39, %v734_v20  ;;  %v604_v48 = vadd.f32 %v5098_v24, %v572_v29  ;;  %v635_v6 = vmax.f32 %v603_v53, 0.0  ;;  %vm5694_vm12 = vmpackc.low %vm5665_vm11, %vm6962_vm5  ;;  %v4272_v20 = vld [vmem:[%s5076_s10 + $0x40] sm:$0xff]   ;;  %v4912_v29 = vld [vmem:[%s6892_s5 + $0xd8] sm:$0xff]  }
  0x59   : > { %v7094_v36 = vsel %vm5683_vm3, 4294967295, %v7093_v36  ;;  %v4226_v22 = vunpack.c.l.bf16 %v5637_v60  ;;  %v7097_v47 = vmov 0  ;;  %vm7099_vm14 = vcmask 1046528  }
  0x5a   : > { %7095 = vst [vmem:[#allocation20_spill] sm:$0xff] %v7094_v36  ;;  %7096 = vst [vmem:[#allocation21_spill] sm:$0xff] %v5687_v25  ;;  %v7098_v47 = vsel %vm5694_vm12, 4294967295, %v7097_v47  ;;  %v845_v55 = vsel %vm7099_vm14, %v842_v34, %v844_v12  ;;  %v1059_v44 = vand.u32 15, %v941_v59  ;;  %v1066_v21 = vand.u32 15, %v942_v30  ;;  %4423 = vmatpush3.bf16.msra.mxu1 %v4909_v14  ;;  %v4913_v34 = vld [vmem:[%s6892_s5 + $0x110] sm:$0xff]  }
  0x5b   : > { %v636_v53 = vmax.f32 %v604_v48, 0.0  ;;  %v846_v39 = vrot.slane %v635_v6, 1  ;;  %v737_v27 = vrot.slane %v635_v6, 7  ;;  %v573_v3 = vmul.f32 %v4226_v22, %v5088_v18  ;;  %4424 = vmatprep.subr.bf16.mxu1 %v4911_v8  ;;  %v4914_v48 = vld [vmem:[%s6892_s5 + $0xd0] sm:$0xff]   ;;  %v5732_v22 = vld [vmem:[%s5076_s10 + $0x48] sm:$0xff]  }
  0x5c   : > { %vm1481_vm8 = vcmp.lt.s32.totalorder %v1059_v44, 15  ;;  %vm5708_vm11 = vcmp.gt.s32.totalorder %v1066_v21, 0  ;;  %v1073_v14 = vand.u32 15, %v943_v0  ;;  %v4227_v30 = vunpack.c.h.bf16 %v5637_v60 }
  0x5d   : > { %3773 = vmatmul.mubr.msk.bf16.gmra.mxu0 %vm5683_vm3, %v5687_v25  ;;  %4713 = vmatmul.mubr.msk.bf16.gmra.mxu1 %vm5694_vm12, %v5669_v5  ;;  %v5722_v18 = vpack.c.bf16 %v636_v53, %v635_v6  ;;  %v847_v21 = vsel %vm7099_vm14, %v844_v12, %v846_v39  ;;  %vm5726_vm7 = vmpackc.low %vm1481_vm8, %vm6962_vm5  ;;  %v7103_v0 = vmov 0  ;;  %vm7105_vm4 = vcmask 1040384  }
  0x5e   : > { %v7104_v0 = vsel %vm5726_vm7, 4294967295, %v7103_v0  ;;  %v738_v60 = vsel %vm7105_vm4, %v735_v15, %v737_v27  ;;  %v739_v8 = vrot.slane %v636_v53, 7  ;;  %v5734_v44 = vpack.c.bf16 %v847_v21, %v845_v55  ;;  %4425 = vmatpush3.bf16.msra.mxu1 %v4912_v29  ;;  %vm7108_vm8 = vmmov %vm7105_vm4  ;;  %v5746_v15 = vld [vmem:[%s6887_s0] ss:$0 sm:$0xff] }
  0x5f   : > { %7102 = vst [vmem:[#allocation22_spill] sm:$0xff] %v5722_v18  ;;  %v605_v33 = vadd.f32 %v5098_v24, %v573_v3  ;;  %v848_v1 = vrot.slane %v636_v53, 1  ;;  %vm5737_vm3 = vcmp.lt.s32.totalorder %v1073_v14, 15  ;;  %1874 = vmatprep.mubr.bf16.mxu0 %v5722_v18  ;;  %v574_v55 = vmul.f32 %v5746_v15, %v4227_v30  ;;  %4426 = vmatprep.subr.bf16.mxu1 %v4913_v34  ;;  %v4916_v53 = vld [vmem:[%s6892_s5 + $0x108] sm:$0xff]   ;;  %vm7110_vm4 = vmmov %vm7099_vm14  ;;  %v5763_v30 = vld [vmem:[%s6888_s1] ss:$0 sm:$0xff] }
  0x60   : > { %v740_v12 = vsel %vm7108_vm8, %v737_v27, %v739_v8  ;;  %v4230_v21 = vunpack.c.l.bf16 %v4272_v20  ;;  %v945_v24 = vadd.s32 136, %v5050_v7  ;;  %4716 = vmatprep.mubr.msk.bf16.mxu1 %vm5726_vm7, %v5734_v44  ;;  %v944_v14 = vadd.s32 128, %v5050_v7  ;;  %vm5773_vm14 = vmpackc.low %vm6962_vm5, %vm5708_vm11 }
  0x61   : > { %v5756_v27 = vpack.c.bf16 %v740_v12, %v738_v60  ;;  %v637_v29 = vmax.f32 %v605_v33, 0.0  ;;  %v849_v3 = vsel %vm7110_vm4, %v846_v39, %v848_v1  ;;  %v606_v34 = vadd.f32 %v5763_v30, %v574_v55  ;;  %v4917_v60 = vld [vmem:[%s6892_s5 + $0xc8] sm:$0xff]   ;;  %vm7116_vm11 = vmmov %vm7110_vm4 }
  0x62   : > { %v575_v18 = vmul.f32 %v5746_v15, %v4230_v21  ;;  %v1087_v36 = vand.u32 15, %v945_v24  ;;  %v4231_v25 = vunpack.c.h.bf16 %v4272_v20  ;;  %v7111_v33 = vmov 0  ;;  %4427 = vmatpush3.bf16.msra.mxu1 %v4914_v48  ;;  %v4919_v20 = vld [vmem:[%s6892_s5 + $0x100] sm:$0xff]   ;;  %vm5793_vm4 = vmpackc.low %vm5737_vm3, %vm6962_vm5 }
  0x63   : > { %7109 = vst [vmem:[#allocation23_spill] sm:$0xff] %v5756_v27  ;;  %v7112_v33 = vsel %vm5773_vm14, 4294967295, %v7111_v33  ;;  %v850_v39 = vrot.slane %v637_v29, 1  ;;  %v741_v12 = vrot.slane %v637_v29, 7  ;;  %v1080_v9 = vand.u32 15, %v944_v14  ;;  %4428 = vmatprep.subr.bf16.mxu1 %v4916_v53 }
  0x64   : > { %7113 = vst [vmem:[#allocation24_spill] sm:$0xff] %v7112_v33  ;;  %v4234_v55 = vunpack.c.l.bf16 %v5732_v22  ;;  %v5781_v21 = vmax.f32 %v606_v34, 0.0  ;;  %v607_v24 = vadd.f32 %v5763_v30, %v575_v18  ;;  %vm5784_vm8 = vcmp.lt.s32.totalorder %v1087_v36, 15 }
  0x65   : > { %v576_v23 = vmul.f32 %v5746_v15, %v4231_v25  ;;  %v851_v14 = vsel %vm7116_vm11, %v848_v1, %v850_v39  ;;  %v7117_v48 = vmov 0  ;;  %vm7119_vm15 = vcmask 1040384   ;;  %3776 = vmatmul.mubr.msk.bf16.gmra.mxu0 %vm5773_vm14, %v5756_v27  ;;  %vm5836_vm3 = vmpackc.low %vm5784_vm8, %vm6962_vm5 }
  0x66   : > { %v7118_v48 = vsel %vm5793_vm4, 4294967295, %v7117_v48  ;;  %v742_v34 = vsel %vm7119_vm15, %v739_v8, %v741_v12  ;;  %vm5798_vm2 = vcmp.gt.s32.totalorder %v1080_v9, 0  ;;  %v577_v36 = vmul.f32 %v5746_v15, %v4234_v55  ;;  %4429 = vmatpush3.bf16.msra.mxu1 %v4917_v60  ;;  %vm7123_vm15 = vmmov %vm7116_vm11  ;;  %v5831_v60 = vld [vmem:[%s6892_s5 + $0x238] sm:$0xff]  }
  0x67   : > { %v5806_v1 = vpack.c.bf16 %v851_v14, %v849_v3  ;;  %v5809_v25 = vpack.c.bf16 %v5781_v21, %v637_v29  ;;  %v639_v6 = vmax.f32 %v607_v24, 0.0  ;;  %v852_v53 = vrot.slane %v5781_v21, 1  ;;  %v4920_v3 = vld [vmem:[%s6892_s5 + $0xc0] sm:$0xff]   ;;  %4430 = vmatprep.subr.bf16.mxu1 %v4919_v20  ;;  %vm5855_vm8 = vmpackc.low %vm6962_vm5, %vm5798_vm2 }
  0x68   : > { %v743_v8 = vrot.slane %v5781_v21, 7  ;;  %v608_v9 = vadd.f32 %v5763_v30, %v576_v23  ;;  %v609_v61 = vadd.f32 %v5763_v30, %v577_v36  ;;  %v947_v55 = vadd.s32 152, %v5050_v7  ;;  %vm7133_vm2 = vmmov %vm7123_vm15 }
  0x69   : > { %7122 = vst [vmem:[#allocation25_spill] sm:$0xff] %v5809_v25  ;;  %4717 = vmatmul.mubr.msk.bf16.gmra.mxu1 %vm5793_vm4, %v5806_v1  ;;  %1882 = vmatprep.mubr.bf16.mxu0 %v5809_v25  ;;  %v853_v29 = vsel %vm7123_vm15, %v850_v39, %v852_v53  ;;  %v854_v21 = vrot.slane %v639_v6, 1  ;;  %v4235_v23 = vunpack.c.h.bf16 %v5732_v22  ;;  %v7124_v24 = vunpack.c.l.bf16 %v5105_v28 }
  0x6a   : > { %v7125_v36 = vmov 0  ;;  %vm7127_vm11 = vcmask 1040384   ;;  %v5841_v25 = vmax.f32 %v608_v9, 0.0  ;;  %v5843_v22 = vmax.f32 %v609_v61, 0.0  ;;  %4431 = vmatpush3.bf16.msra.mxu1 %v4920_v3 }
  0x6b   : > { %v579_v14 = vmul.f32 %v5746_v15, %v7124_v24  ;;  %v7126_v36 = vsel %vm5836_vm3, 4294967295, %v7125_v36  ;;  %v744_v39 = vsel %vm7127_vm11, %v741_v12, %v743_v8  ;;  %v1101_v28 = vand.u32 15, %v947_v55  ;;  %4784 = vmatprep.subr.bf16.mxu1 %v5831_v60 }
  0x6c   : > { %v855_v24 = vsel %vm7123_vm15, %v852_v53, %v854_v21  ;;  %v5846_v33 = vpack.c.bf16 %v744_v39, %v742_v34  ;;  %v578_v27 = vmul.f32 %v5746_v15, %v4235_v23  ;;  %v7129_v12 = vmov 0  ;;  %vm7134_vm15 = vmmov %vm7133_vm2 }
  0x6d   : > { %v611_v59 = vadd.f32 %v5763_v30, %v579_v14  ;;  %v5850_v46 = vpack.c.bf16 %v855_v24, %v853_v29  ;;  %v7130_v12 = vsel %vm5855_vm8, 4294967295, %v7129_v12  ;;  %v856_v61 = vrot.slane %v5841_v25, 1 }
  0x6e   : > { %7128 = vst [vmem:[#allocation26_spill] sm:$0xff] %v5846_v33  ;;  %7131 = vst [vmem:[#allocation27_spill] sm:$0xff] %v7130_v12  ;;  %v858_v20 = vrot.slane %v5843_v22, 1  ;;  %vm1487_vm11 = vcmp.lt.s32.totalorder %v1101_v28, 15  ;;  %v5862_v34 = vpack.c.bf16 %v5841_v25, %v639_v6  ;;  %v610_v53 = vadd.f32 %v5763_v30, %v578_v27  ;;  %3779 = vmatmul.mubr.msk.bf16.gmra.mxu0 %vm5855_vm8, %v5846_v33 }
  0x6f   : > { %v5865_v9 = vmax.f32 %v611_v59, 0.0  ;;  %v949_v18 = vadd.s32 168, %v5050_v7  ;;  %4720 = vmatprep.mubr.msk.bf16.mxu1 %vm5836_vm3, %v5850_v46  ;;  %v857_v55 = vsel %vm7133_vm2, %v854_v21, %v856_v61  ;;  %vm5875_vm14 = vmpackc.low %vm1487_vm11, %vm6962_vm5  ;;  %v7135_v3 = vmov 0 }
  0x70   : > { %7132 = vst [vmem:[#allocation28_spill] sm:$0xff] %v5862_v34  ;;  %v859_v29 = vsel %vm7134_vm15, %v856_v61, %v858_v20  ;;  %v7136_v3 = vsel %vm5875_vm14, 4294967295, %v7135_v3  ;;  %v745_v27 = vrot.slane %v639_v6, 7  ;;  %v747_v23 = vrot.slane %v5841_v25, 7  ;;  %1890 = vmatprep.mubr.bf16.mxu0 %v5862_v34 }
  0x71   : > { %v5883_v14 = vpack.c.bf16 %v859_v29, %v857_v55  ;;  %v5885_v39 = vmax.f32 %v610_v53, 0.0  ;;  %v862_v21 = vrot.slane %v5865_v9, 1  ;;  %v1115_v28 = vand.u32 15, %v949_v18 }
  0x72   : > { %vm7137_vm11 = vcmask 1040384   ;;  %v946_v6 = vadd.s32 144, %v5050_v7  ;;  %v864_v25 = vrot.slane %v5152_v62, 1  ;;  %v866_v18 = vrot.slane %v5142_v56, 1 }
  0x73   : > { %v746_v24 = vsel %vm7137_vm11, %v743_v8, %v745_v27  ;;  %vm7138_vm2 = vmmov %vm7137_vm11  ;;  %4721 = vmatmul.mubr.msk.bf16.gmra.mxu1 %vm5875_vm14, %v5883_v14  ;;  %v860_v61 = vrot.slane %v5885_v39, 1  ;;  %vm1489_vm15 = vcmp.lt.s32.totalorder %v1115_v28, 15  ;;  %vm7140_vm5 = vcmask 1046528  }
  0x74   : > { %v748_v59 = vsel %vm7138_vm2, %v745_v27, %v747_v23  ;;  %v1094_v55 = vand.u32 15, %v946_v6  ;;  %v865_v8 = vsel %vm7140_vm5, %v862_v21, %v864_v25  ;;  %v951_v29 = vadd.s32 184, %v5050_v7  ;;  %vm7142_vm11 = vmmov %vm7140_vm5 }
  0x75   : > { %v5897_v53 = vpack.c.bf16 %v748_v59, %v746_v24  ;;  %v5904_v27 = vpack.c.bf16 %v5885_v39, %v5843_v22  ;;  %v861_v34 = vsel %vm7142_vm11, %v858_v20, %v860_v61  ;;  %vm7143_vm2 = vmmov %vm7140_vm5  ;;  %vm7144_vm8 = vmmov 1  }
  0x76   : > { %v863_v12 = vsel %vm7143_vm2, %v860_v61, %v862_v21  ;;  %vm5909_vm14 = vmpackc.low %vm1489_vm15, %vm7144_vm8  ;;  %v7145_v28 = vmov 0  ;;  %v868_v24 = vrot.slane %v5144_v57, 1  ;;  %vm1414_vm5 = vcmp.gt.s32.totalorder %v1094_v55, 0 }
  0x77   : > { %7139 = vst [vmem:[#allocation29_spill] sm:$0xff] %v5897_v53  ;;  %7141 = vst [vmem:[#allocation30_spill] sm:$0xff] %v5904_v27  ;;  %v7146_v28 = vsel %vm5909_vm14, 4294967295, %v7145_v28  ;;  %v5915_v59 = vpack.c.bf16 %v863_v12, %v861_v34  ;;  %v1129_v6 = vand.u32 15, %v951_v29  ;;  %v7148_v20 = vmov 0 }
  0x78   : > { %vm7147_vm3 = vmmov %vm7143_vm2  ;;  %v870_v61 = vrot.slane %v5231_v45, 1  ;;  %v953_v40 = vadd.s32 200, %v5050_v7  ;;  %v751_v57 = vrot.slane %v5885_v39, 7  ;;  %v948_v12 = vadd.s32 160, %v5050_v7 }
  0x79   : > { %v867_v56 = vsel %vm7147_vm3, %v864_v25, %v866_v18  ;;  %vm5920_vm4 = vmpackc.low %vm7144_vm8, %vm1414_vm5  ;;  %v749_v25 = vrot.slane %v5843_v22, 7  ;;  %4724 = vmatprep.mubr.msk.bf16.mxu1 %vm5909_vm14, %v5915_v59  ;;  %vm1491_vm3 = vcmp.lt.s32.totalorder %v1129_v6, 15  ;;  %v872_v34 = vrot.slane %v5243_v50, 1 }
  0x7a   : > { %v5917_v33 = vpack.c.bf16 %v867_v56, %v865_v8  ;;  %v7149_v20 = vsel %vm5920_vm4, 4294967295, %v7148_v20  ;;  %vm7151_vm11 = vmmov %vm7143_vm2  ;;  %3782 = vmatmul.mubr.msk.bf16.gmra.mxu0 %vm5920_vm4, %v5897_v53  ;;  %v7152_v45 = vmov 0  ;;  %v871_v22 = vsel %vm7143_vm2, %v868_v24, %v870_v61 }
  0x7b   : > { %7150 = vst [vmem:[#allocation31_spill] sm:$0xff] %v7149_v20  ;;  %v869_v21 = vsel %vm7151_vm11, %v866_v18, %v868_v24  ;;  %vm5938_vm15 = vmpackc.low %vm1491_vm3, %vm7144_vm8  ;;  %v1143_v18 = vand.u32 15, %v953_v40  ;;  %vm7154_vm5 = vcmask 1040384   ;;  %v874_v39 = vrot.slane %v5306_v17, 1  ;;  %1898 = vmatprep.mubr.bf16.mxu0 %v5904_v27  ;;  %v4279_v24 = vld [vmem:[%s5076_s10 + $0x78] sm:$0xff]   ;;  %s443_s10 = scalar_lea.vmem %s6891_s4, %s4190_s30 }
  0x7c   : > { %v7153_v45 = vsel %vm5938_vm15, 4294967295, %v7152_v45  ;;  %v750_v55 = vsel %vm7154_vm5, %v747_v23, %v749_v25  ;;  %v5946_v50 = vpack.c.bf16 %v871_v22, %v869_v21  ;;  %vm7155_vm11 = vmmov %vm7154_vm5  ;;  %v1108_v29 = vand.u32 15, %v948_v12  ;;  %4725 = vmatmul.mubr.msk.bf16.gmra.mxu1 %vm5938_vm15, %v5917_v33 }
  0x7d   : > { %v752_v8 = vsel %vm7155_vm11, %v749_v25, %v751_v57  ;;  %vm7156_vm4 = vmmov %vm7143_vm2  ;;  %vm1493_vm3 = vcmp.lt.s32.totalorder %v1143_v18, 15  ;;  %v875_v40 = vsel %vm7143_vm2, %v872_v34, %v874_v39  ;;  %v955_v23 = vadd.s32 216, %v5050_v7 }
  0x7e   : > { %v873_v56 = vsel %vm7156_vm4, %v870_v61, %v872_v34  ;;  %vm5957_vm5 = vmpackc.low %vm1493_vm3, %vm7144_vm8  ;;  %v7157_v17 = vmov 0  ;;  %vm1416_vm14 = vcmp.gt.s32.totalorder %v1108_v29, 0  ;;  %v5961_v6 = vpack.c.bf16 %v752_v8, %v750_v55 }
  0x7f   : > { %v7158_v17 = vsel %vm5957_vm5, 4294967295, %v7157_v17  ;;  %v5963_v21 = vpack.c.bf16 %v875_v40, %v873_v56  ;;  %v876_v61 = vrot.slane %v5308_v32, 1  ;;  %4728 = vmatprep.mubr.msk.bf16.mxu1 %vm5957_vm5, %v5946_v50  ;;  %v1157_v25 = vand.u32 15, %v955_v23  ;;  %vm5973_vm4 = vmpackc.low %vm7144_vm8, %vm1416_vm14 }
  0x80   : > { %7159 = vst [vmem:[#allocation32_spill] sm:$0xff] %v7158_v17  ;;  %v878_v12 = vrot.slane %v5393_v58, 1  ;;  %v957_v34 = vadd.s32 232, %v5050_v7  ;;  %v753_v22 = vrot.slane %v5865_v9, 7  ;;  %v7161_v18 = vmov 0  ;;  %vm7163_vm11 = vmmov %vm7143_vm2 }
  0x81   : > { %7160 = vst [vmem:[#allocation33_spill] sm:$0xff] %v5963_v21  ;;  %v7162_v18 = vsel %vm5973_vm4, 4294967295, %v7161_v18  ;;  %v5979_v55 = vpack.c.bf16 %v5152_v62, %v5865_v9  ;;  %v877_v32 = vsel %vm7163_vm11, %v874_v39, %v876_v61  ;;  %v950_v8 = vadd.s32 176, %v5050_v7 }
  0x82   : > { %v4258_v29 = vunpack.c.l.bf16 %v4279_v24  ;;  %vm1495_vm3 = vcmp.lt.s32.totalorder %v1157_v25, 15  ;;  %v879_v58 = vsel %vm7143_vm2, %v876_v61, %v878_v12  ;;  %v1171_v56 = vand.u32 15, %v957_v34  ;;  %3785 = vmatmul.mubr.msk.bf16.gmra.mxu0 %vm5973_vm4, %v5961_v6 }
  0x83   : > { %vm7164_vm5 = vcmask 1040384   ;;  %vm5986_vm14 = vmpackc.low %vm1495_vm3, %vm7144_vm8  ;;  %v7165_v23 = vmov 0  ;;  %v5990_v27 = vpack.c.bf16 %v879_v58, %v877_v32  ;;  %v7169_v9 = vrot.slane %v5152_v62, 7  ;;  %1906 = vmatprep.mubr.bf16.mxu0 %v5979_v55 }
  0x84   : > { %v754_v40 = vsel %vm7164_vm5, %v751_v57, %v753_v22  ;;  %v7166_v23 = vsel %vm5986_vm14, 4294967295, %v7165_v23  ;;  %vm7170_vm15 = vmmov %vm7164_vm5  ;;  %v1122_v20 = vand.u32 15, %v950_v8  ;;  %v589_v53 = vmul.f32 %v5746_v15, %v4258_v29  ;;  %4729 = vmatmul.mubr.msk.bf16.gmra.mxu1 %vm5986_vm14, %v5963_v21 }
  0x85   : > { %7167 = vst [vmem:[#allocation34_spill] sm:$0xff] %v7166_v23  ;;  %7168 = vst [vmem:[#allocation35_spill] sm:$0xff] %v5990_v27  ;;  %v756_v39 = vsel %vm7170_vm15, %v753_v22, %v7169_v9  ;;  %vm1497_vm11 = vcmp.lt.s32.totalorder %v1171_v56, 15  ;;  %v959_v61 = vadd.s32 248, %v5050_v7  ;;  %v7171_v25 = vmov 0 }
  0x86   : > { %v5999_v57 = vpack.c.bf16 %v756_v39, %v754_v40  ;;  %vm6004_vm5 = vmpackc.low %vm1497_vm11, %vm7144_vm8  ;;  %v621_v62 = vadd.f32 %v5763_v30, %v589_v53  ;;  %v880_v34 = vrot.slane %v5403_v2, 1  ;;  %v4259_v22 = vunpack.c.h.bf16 %v4279_v24 }
  0x87   : > { %v7172_v25 = vsel %vm6004_vm5, 4294967295, %v7171_v25  ;;  %vm1418_vm15 = vcmp.gt.s32.totalorder %v1122_v20, 0  ;;  %v1185_v32 = vand.u32 15, %v959_v61  ;;  %4732 = vmatprep.mubr.msk.bf16.mxu1 %vm6004_vm5, %v5990_v27  ;;  %vm7176_vm11 = vcmask 1046528  }
  0x88   : > { %7173 = vst [vmem:[#allocation36_spill] sm:$0xff] %v7172_v25  ;;  %v6016_v8 = vmax.f32 %v621_v62, 0.0  ;;  %v590_v29 = vmul.f32 %v5746_v15, %v4259_v22  ;;  %vm6020_vm2 = vmpackc.low %vm7144_vm8, %vm1418_vm15  ;;  %v881_v24 = vsel %vm7176_vm11, %v878_v12, %v880_v34  ;;  %v7178_v9 = vmov 0 }
  0x89   : > { %vm1499_vm3 = vcmp.lt.s32.totalorder %v1185_v32, 15  ;;  %vm7177_vm4 = vmmov %vm7176_vm11  ;;  %v7182_v62 = vrot.slane %v5403_v2, 7  ;;  %v4923_v2 = vld [vmem:[%s6892_s5 + $0x1b8] sm:$0xff]   ;;  %v4924_v32 = vld [vmem:[%s6892_s5 + $0x1f0] sm:$0xff]   ;;  %vm7188_vm11 = vnez %v7136_v3 }
  0x8a   : > { %v6999_v58 = vrot.slane %v6016_v8, 1  ;;  %v622_v20 = vadd.f32 %v5763_v30, %v590_v29  ;;  %v773_v56 = vrot.slane %v6016_v8, 7  ;;  %vm6032_vm5 = vmpackc.low %vm1499_vm3, %vm7144_vm8  ;;  %3788 = vmatmul.mubr.msk.bf16.gmra.mxu0 %vm6020_vm2, %v5999_v57  ;;  %v4925_v29 = vld [vmem:[%s6892_s5 + $0x1b0] sm:$0xff]   ;;  %vm7187_vm3 = vnez %v7126_v36 }
  0x8b   : > { %v7179_v9 = vsel %vm6032_vm5, 4294967295, %v7178_v9  ;;  %4752 = vmatprep.mubr.msk.bf16.mxu0 %vm5539_vm1, %v5491_v31  ;;  %vm7186_vm1 = vnez %v7059_v63 }
  0x8c   : > { %v883_v40 = vsel %vm7177_vm4, %v880_v34, %v6999_v58  ;;  %7180 = vst [vmem:[#allocation37_spill] sm:$0xff] %v7179_v9  ;;  %v6036_v39 = vmax.f32 %v622_v20, 0.0  ;;  %vm7183_vm4 = vcmask 1040384   ;;  %v4931_v20 = vld [vmem:[%s6892_s5 + $0x228] sm:$0xff]  }
  0x8d   : > { %v6041_v12 = vpack.c.bf16 %v883_v40, %v881_v24  ;;  %v774_v34 = vsel %vm7183_vm4, %v7182_v62, %v773_v56  ;;  %vm7184_vm15 = vmmov %vm7183_vm4  ;;  %v4927_v24 = vld [vmem:[%s6892_s5 + $0x1e8] sm:$0xff]   ;;  %v4932_v40 = vld [vmem:[%s6892_s5 + $0x1d8] sm:$0xff]  }
  0x8e   : > { %v6048_v61 = vpack.c.bf16 %v6036_v39, %v6016_v8  ;;  %v6998_v22 = vrot.slane %v6036_v39, 7  ;;  %v4941_v62 = vld [vmem:[%s6892_s5 + $0x218] sm:$0xff]  }
  0x8f   : > { %7181 = vst [vmem:[#allocation38_spill] sm:$0xff] %v6041_v12  ;;  %4733 = vmatmul.mubr.msk.bf16.gmra.mxu1 %vm6032_vm5, %v6041_v12 }
  0x90   : > { %2365 = vmatprep.mubr.bf16.mxu1 %v5227_v41  ;;  %v776_v31 = vsel %vm7184_vm15, %v773_v56, %v6998_v22  ;;  %v4926_v41 = vld [vmem:[%s6892_s5 + $0x230] sm:$0xff]   ;;  %v4930_v56 = vld [vmem:[%s6892_s5 + $0x1a0] sm:$0xff]   ;;  %vm7192_vm15 = vnez %v7146_v28 }
  0x91   : > { %v6061_v13 = vpack.c.bf16 %v776_v31, %v774_v34  ;;  %v4933_v34 = vld [vmem:[%s6892_s5 + $0x198] sm:$0xff]   ;;  %v4934_v31 = vld [vmem:[%s6892_s5 + $0x1d0] sm:$0xff]  }
  0x92   : > { %4753 = vmatmul.mubr.msk.bf16.vlgmr.msra.gmra.mxu0 %vm5555_vm6, %v5543_v26 }
  0x93   : > { %4553 = vmatpush3.bf16.msra.mxu0 %v4923_v2  ;;  %4756 = vmatprep.mubr.msk.bf16.mxu0 %vm5624_vm9, %v5584_v37  ;;  %v4942_v2 = vld [vmem:[%s6892_s5 + $0x210] sm:$0xff]  }
  0x94   : > { %4554 = vmatprep.subr.bf16.mxu0 %v4924_v32  ;;  %v4935_v32 = vld [vmem:[%s6892_s5 + $0x190] sm:$0xff]  }
  0x97   : > { %3923 = vmatmul.mubr.msk.bf16.vlgmr.msra.gmra.mxu1 %vm5282_vm10, %v5246_v54  ;;  %4555 = vmatpush3.bf16.msra.mxu0 %v4925_v29  ;;  %v4929_v54 = vld [vmem:[%s6892_s5 + $0x1e0] sm:$0xff]   ;;  %vm7185_vm10 = vnez %v7118_v48  ;;  %v4943_v29 = vld [vmem:[%s6892_s5 + $0x208] sm:$0xff]  }
  0x98   : > { %4785 = vmatpush3.bf16.msra.mxu1 %v5831_v60  ;;  %2373 = vmatprep.mubr.bf16.mxu1 %v5320_v38  ;;  %v4936_v60 = vld [vmem:[%s6892_s5 + $0x220] sm:$0xff]  }
  0x99   : > { %4786 = vmatprep.subr.bf16.mxu1 %v4926_v41  ;;  %4556 = vmatprep.subr.bf16.mxu0 %v4927_v24  ;;  %v4938_v24 = vld [vmem:[%s6892_s5 + $0x188] sm:$0xff]  }
  0x9a   : > { %4757 = vmatmul.mubr.msk.bf16.gmra.mxu0 %vm5653_vm0, %v5629_v42 }
  0x9b   : > { %4760 = vmatprep.mubr.msk.bf16.mxu0 %vm5694_vm12, %v5669_v5  ;;  %4557 = vmatpush3.bf16.msra.mxu0 %v4928_v19  ;;  %v4939_v19 = vld [vmem:[%s6892_s5 + $0x1c0] sm:$0xff]  }
  0x9c   : > { %4787 = vmatpush3.bf16.msra.mxu1 %v4926_v41  ;;  %4558 = vmatprep.subr.bf16.mxu0 %v4929_v54  ;;  %v4937_v41 = vld [vmem:[%s6892_s5 + $0x1c8] sm:$0xff]   ;;  %v4944_v54 = vld [vmem:[%s6892_s5 + $0x200] sm:$0xff]  }
  0x9d   : > { %4788 = vmatprep.subr.bf16.mxu1 %v4931_v20 }
  0x9f   : > { %3926 = vmatmul.mubr.msk.bf16.gmra.mxu1 %vm5360_vm13, %v5348_v4  ;;  %4559 = vmatpush3.bf16.msra.mxu0 %v4930_v56  ;;  %v4940_v56 = vld [vmem:[%s6892_s5 + $0x180] sm:$0xff]  }
  0xa0   : > { %2381 = vmatprep.mubr.bf16.mxu1 %v5422_v35  ;;  %4789 = vmatpush3.bf16.msra.mxu1 %v4931_v20  ;;  %v4261_v20 = vld [vmem:[%s443_s10] sm:$0xff]  }
  0xa1   : > { %4790 = vmatprep.subr.bf16.mxu1 %v4936_v60  ;;  %4560 = vmatprep.subr.bf16.mxu0 %v4932_v40  ;;  %v7189_v40 = vld [vmem:[#allocation15_spill] sm:$0xff] }
  0xa2   : > { %4761 = vmatmul.mubr.msk.bf16.gmra.mxu0 %vm5726_vm7, %v5734_v44  ;;  %vm7190_vm4 = vnez %v7189_v40 }
  0xa3   : > { %4764 = vmatprep.mubr.msk.bf16.mxu0 %vm7185_vm10, %v5806_v1  ;;  %4561 = vmatpush3.bf16.msra.mxu0 %v4933_v34  ;;  %vm7198_vm10 = vnez %v7158_v17 }
  0xa4   : > { %4791 = vmatpush3.bf16.msra.mxu1 %v4936_v60  ;;  %4562 = vmatprep.subr.bf16.mxu0 %v4934_v31  ;;  %v4262_v60 = vunpack.c.l.bf16 %v4261_v20 }
  0xa5   : > { %4792 = vmatprep.subr.bf16.mxu1 %v4941_v62 }
  0xa6   : > { %v655_v34 = vmul.f32 %v5746_v15, %v4262_v60  ;;  %v961_v60 = vadd.s32 264, %v5050_v7 }
  0xa7   : > { %3929 = vmatmul.mubr.msk.bf16.gmra.mxu1 %vm7186_vm1, %v5454_v11  ;;  %4563 = vmatpush3.bf16.msra.mxu0 %v4935_v32  ;;  %v7195_v32 = vld [vmem:[#allocation18_spill] sm:$0xff] }
  0xa8   : > { %2389 = vmatprep.mubr.bf16.mxu1 %v5484_v52  ;;  %4793 = vmatpush3.bf16.msra.mxu1 %v4941_v62  ;;  %v7191_v62 = vld [vmem:[#allocation16_spill] sm:$0xff]  ;;  %v657_v31 = vadd.f32 %v5763_v30, %v655_v34  ;;  %v4263_v34 = vunpack.c.h.bf16 %v4261_v20  ;;  %v1199_v17 = vand.u32 15, %v961_v60  ;;  %v7208_v60 = vld [vmem:[#allocation23_spill] sm:$0xff] }
  0xa9   : > { %4794 = vmatprep.subr.bf16.mxu1 %v4942_v2  ;;  %4564 = vmatprep.subr.bf16.mxu0 %v4937_v41  ;;  %v7197_v41 = vld [vmem:[#allocation19_spill] sm:$0xff] }
  0xaa   : > { %4765 = vmatmul.mubr.msk.bf16.gmra.mxu0 %vm7187_vm3, %v5850_v46  ;;  %vm7196_vm3 = vnez %v7195_v32  ;;  %v656_v58 = vmul.f32 %v5746_v15, %v4263_v34  ;;  %v7209_v34 = vld [vmem:[#allocation24_spill] sm:$0xff]  ;;  %vm1501_vm12 = vcmp.lt.s32.totalorder %v1199_v17, 15 }
  0xab   : > { %4768 = vmatprep.mubr.msk.bf16.mxu0 %vm7188_vm11, %v5883_v14  ;;  %4565 = vmatpush3.bf16.msra.mxu0 %v4938_v24  ;;  %vm7193_vm11 = vnez %v7153_v45  ;;  %vm7210_vm7 = vnez %v7209_v34 }
  0xac   : > { %4795 = vmatpush3.bf16.msra.mxu1 %v4942_v2  ;;  %4566 = vmatprep.subr.bf16.mxu0 %v4939_v19  ;;  %v7194_v2 = vld [vmem:[#allocation17_spill] sm:$0xff]  ;;  %v658_v23 = vadd.f32 %v5763_v30, %v656_v58 }
  0xad   : > { %4796 = vmatprep.subr.bf16.mxu1 %v4943_v29  ;;  %v7200_v19 = vld [vmem:[#allocation21_spill] sm:$0xff] }
  0xae   : > { %v660_v15 = vmax.f32 %v658_v23, 0.0  ;;  %v7211_v30 = vld [vmem:[#allocation25_spill] sm:$0xff] }
  0xaf   : > { %3932 = vmatmul.mubr.msk.bf16.gmra.mxu1 %vm7190_vm4, %v5510_v49  ;;  %4567 = vmatpush3.bf16.msra.mxu0 %v4940_v56  ;;  %v7203_v56 = vld [vmem:[#allocation22_spill] sm:$0xff] }
  0xb0   : > { %2397 = vmatprep.mubr.bf16.mxu1 %v7191_v62  ;;  %4797 = vmatpush3.bf16.msra.mxu1 %v4943_v29  ;;  %v659_v29 = vmax.f32 %v657_v31, 0.0  ;;  %v884_v31 = vrot.slane %v6036_v39, 1  ;;  %v6219_v58 = vmul.f32 0.0, %v660_v15  ;;  %v7223_v15 = vld [vmem:[#allocation27_spill] sm:$0xff] }
  0xb1   : > { %4798 = vmatprep.subr.bf16.mxu1 %v4944_v54 }
  0xb2   : > { %4769 = vmatmul.mubr.msk.bf16.gmra.mxu0 %vm7192_vm15, %v5915_v59  ;;  %v6192_v24 = vmul.f32 0.0, %v659_v29  ;;  %v7205_v29 = vrot.slane %v6016_v8, 1  ;;  %7212 = vst [vmem:[#allocation16_spill] sm:$0xff] %v6219_v58  ;;  %v7214_v8 = vmov 0 }
  0xb3   : > { %4772 = vmatprep.mubr.msk.bf16.mxu0 %vm7193_vm11, %v5917_v33 }
  0xb4   : > { %4799 = vmatpush3.bf16.msra.mxu1 %v4944_v54  ;;  %7199 = vst [vmem:[#allocation15_spill] sm:$0xff] %v6192_v24  ;;  %v7201_v54 = vld [vmem:[#allocation20_spill] sm:$0xff]  ;;  %v7008_v22 = vrot.slane %v6192_v24, 1  ;;  %v777_v23 = vrot.slane %v6192_v24, 7 }
  0xb5   : > { %vm7202_vm11 = vnez %v7201_v54 }
  0xb7   : > { %3935 = vmatmul.mubr.msk.bf16.gmra.mxu1 %vm7196_vm3, %v7194_v2 }
  0xb8   : > { %2405 = vmatprep.mubr.bf16.mxu1 %v7197_v41 }
  0xba   : > { %4773 = vmatmul.mubr.msk.bf16.gmra.mxu0 %vm7198_vm10, %v5946_v50  ;;  %vm7206_vm10 = vcmask 1046528  }
  0xbb   : > { %4776 = vmatprep.mubr.msk.bf16.mxu0 %vm5986_vm14, %v5963_v21  ;;  %vm7204_vm14 = vnez %v7172_v25  ;;  %v885_v20 = vsel %vm7206_vm10, %v7205_v29, %v884_v31  ;;  %vm7207_vm15 = vmmov %vm7206_vm10  ;;  %v779_v29 = vrot.slane %v6219_v58, 7  ;;  %vm7218_vm10 = vcmask 1040384  }
  0xbc   : > { %v887_v21 = vsel %vm7207_vm15, %v884_v31, %v7008_v22  ;;  %v7217_v31 = vrot.slane %v6036_v39, 7  ;;  %vm7220_vm15 = vmmov %vm7218_vm10  ;;  %v7225_v39 = vld [vmem:[#allocation28_spill] sm:$0xff] }
  0xbd   : > { %v6221_v9 = vpack.c.bf16 %v887_v21, %v885_v20  ;;  %v6236_v17 = vsel %vm7220_vm15, %v777_v23, %v779_v29  ;;  %v7222_v20 = vld [vmem:[#allocation26_spill] sm:$0xff]  ;;  %v7226_v29 = vld [vmem:[#allocation29_spill] sm:$0xff]  ;;  %vm7230_vm15 = vnez %v7162_v18 }
  0xbe   : > { %v6233_v22 = vsel %vm7218_vm10, %v7217_v31, %v777_v23  ;;  %7221 = vst [vmem:[#allocation21_spill] sm:$0xff] %v6236_v17  ;;  %v7227_v23 = vld [vmem:[#allocation31_spill] sm:$0xff]  ;;  %v7229_v31 = vld [vmem:[#allocation30_spill] sm:$0xff] }
  0xbf   : > { %3938 = vmatmul.mubr.msk.bf16.gmra.mxu1 %vm7202_vm11, %v7200_v19  ;;  %7213 = vst [vmem:[#allocation17_spill] sm:$0xff] %v6221_v9  ;;  %7219 = vst [vmem:[#allocation19_spill] sm:$0xff] %v6233_v22  ;;  %vm7228_vm10 = vnez %v7227_v23 }
  0xc0   : > { %2413 = vmatprep.mubr.bf16.mxu1 %v7203_v56 }
  0xc2   : > { %4777 = vmatmul.mubr.msk.bf16.gmra.mxu0 %vm7204_vm14, %v5990_v27 }
  0xc3   : > { %4780 = vmatprep.mubr.msk.bf16.mxu0 %vm6032_vm5, %v6041_v12  ;;  %vm6224_vm5 = vmpackc.low %vm1501_vm12, %vm7144_vm8  ;;  %vm7224_vm12 = vnez %v7223_v15 }
  0xc4   : > { %v7215_v8 = vsel %vm6224_vm5, 4294967295, %v7214_v8 }
  0xc5   : > { %7216 = vst [vmem:[#allocation18_spill] sm:$0xff] %v7215_v8 }
  0xc7   : > { %3941 = vmatmul.mubr.msk.bf16.gmra.mxu1 %vm7210_vm7, %v7208_v60 }
  0xc8   : > { %2421 = vmatprep.mubr.bf16.mxu1 %v7211_v30 }
  0xca   : > { %4781 = vmatmul.mubr.msk.bf16.gmra.mxu0 %vm6224_vm5, %v6221_v9 }
  0xcb   : > { %2976 = vmatprep.mubr.bf16.mxu0 %v5320_v38  ;;  %v7231_v38 = vld [vmem:[#allocation3_spill] sm:$0xff] }
  0xcf   : > { %3944 = vmatmul.mubr.msk.bf16.gmra.mxu1 %vm7224_vm12, %v7222_v20 }
  0xd0   : > { %2429 = vmatprep.mubr.bf16.mxu1 %v7225_v39 }
  0xd2   : > { %4091 = vmatmul.mubr.msk.bf16.vlgmr.msra.gmra.mxu0 %vm5360_vm13, %v5348_v4  ;;  %v7232_v4 = vld [vmem:[#allocation5_spill] sm:$0xff]  ;;  %vm7234_vm13 = vnez %v7233_v16 }
  0xd3   : > { %2984 = vmatprep.mubr.bf16.mxu0 %v5422_v35  ;;  %v7235_v35 = vld [vmem:[#allocation6_spill] sm:$0xff] }
  0xd7   : > { %3947 = vmatmul.mubr.msk.bf16.gmra.mxu1 %vm7228_vm10, %v7226_v29 }
  0xd8   : > { %2437 = vmatprep.mubr.bf16.mxu1 %v7229_v31 }
  0xda   : > { %4094 = vmatmul.mubr.msk.bf16.gmra.mxu0 %vm7186_vm1, %v5454_v11 }
  0xdb   : > { %2992 = vmatprep.mubr.bf16.mxu0 %v5484_v52  ;;  %v7236_v52 = vld [vmem:[#allocation8_spill] sm:$0xff] }
  0xdf   : > { %3950 = vmatmul.mubr.msk.bf16.gmra.mxu1 %vm7230_vm15, %v5961_v6 }
  0xe0   : > { %2445 = vmatprep.mubr.bf16.mxu1 %v5979_v55 }
  0xe2   : > { %4097 = vmatmul.mubr.msk.bf16.gmra.mxu0 %vm7190_vm4, %v5510_v49  ;;  %v7237_v49 = vld [vmem:[#allocation7_spill] sm:$0xff] }
  0xe3   : > { %3000 = vmatprep.mubr.bf16.mxu0 %v7191_v62  ;;  %vm7238_vm1 = vnez %v7237_v49 }
  0xe7   : > { %3953 = vmatmul.mubr.msk.bf16.gmra.mxu1 %vm6020_vm2, %v5999_v57 }
  0xe8   : > { %2453 = vmatprep.mubr.bf16.mxu1 %v7231_v38 }
  0xea   : > { %4100 = vmatmul.mubr.msk.bf16.gmra.mxu0 %vm7196_vm3, %v7194_v2 }
  0xeb   : > { %3008 = vmatprep.mubr.bf16.mxu0 %v7197_v41  ;;  %v7240_v41 = vld [vmem:[#allocation9_spill] sm:$0xff] }
  0xed   : > { %v4296_v63 = vpop.f32.mrf.mxu0  ;;  %v4368_v11 = vpop.f32.mrf.mxu1 }
  0xef   : > { %3956 = vmatmul.mubr.msk.bf16.gmra.mxu1 %vm7234_vm13, %v7232_v4  ;;  %v4297_v40 = vpop.f32.mrf.mxu0  ;;  %v4369_v62 = vpop.f32.mrf.mxu1 }
  0xf0   : > { %2461 = vmatprep.mubr.bf16.mxu1 %v7235_v35  ;;  %v6287_v2 = vadd.f32 %v4297_v40, %v4296_v63  ;;  %v6289_v32 = vadd.f32 %v4369_v62, %v4368_v11  ;;  %v7242_v63 = vld [vmem:[#allocation10_spill] sm:$0xff]  ;;  %v7243_v11 = vld [vmem:[#allocation11_spill] sm:$0xff] }
  0xf1   : > { %v4299_v21 = vpop.f32.mrf.mxu0  ;;  %v4371_v22 = vpop.f32.mrf.mxu1  ;;  %vm7244_vm3 = vnez %v7243_v11 }
  0xf2   : > { %4103 = vmatmul.mubr.msk.bf16.gmra.mxu0 %vm7202_vm11, %v7200_v19  ;;  %7239 = vst [vmem:[#allocation20_spill] sm:$0xff] %v6289_v32 }
  0xf3   : > { %3016 = vmatprep.mubr.bf16.mxu0 %v7203_v56  ;;  %v4300_v17 = vpop.f32.mrf.mxu0  ;;  %v4372_v8 = vpop.f32.mrf.mxu1 }
  0xf4   : > { %v6292_v54 = vadd.f32 %v4300_v17, %v4299_v21  ;;  %v6294_v19 = vadd.f32 %v4372_v8, %v4371_v22  ;;  %v7246_v17 = vld [vmem:[#allocation12_spill] sm:$0xff]  ;;  %v960_v21 = vadd.s32 256, %v5050_v7 }
  0xf5   : > { %v4302_v56 = vpop.f32.mrf.mxu0  ;;  %v4374_v9 = vpop.f32.mrf.mxu1 }
  0xf6   : > { %7241 = vst [vmem:[#allocation22_spill] sm:$0xff] %v6294_v19 }
  0xf7   : > { %3959 = vmatmul.mubr.msk.bf16.gmra.mxu1 %vm7238_vm1, %v7236_v52  ;;  %v4303_v40 = vpop.f32.mrf.mxu0  ;;  %v4375_v62 = vpop.f32.mrf.mxu1 }
  0xf8   : > { %2469 = vmatprep.mubr.bf16.mxu1 %v7240_v41  ;;  %v4304_v32 = vadd.f32 %v4303_v40, %v4302_v56  ;;  %v6303_v12 = vadd.f32 %v4375_v62, %v4374_v9  ;;  %v1192_v56 = vand.u32 15, %v960_v21  ;;  %v7248_v9 = vld [vmem:[#allocation14_spill] sm:$0xff]  ;;  %v7249_v40 = vld [vmem:[#allocation13_spill] sm:$0xff] }
  0xf9   : > { %v4305_v22 = vpop.f32.mrf.mxu0  ;;  %v4377_v8 = vpop.f32.mrf.mxu1 }
  0xfa   : > { %4106 = vmatmul.mubr.msk.bf16.gmra.mxu0 %vm7210_vm7, %v7208_v60  ;;  %7245 = vst [vmem:[#allocation23_spill] sm:$0xff] %v6303_v12  ;;  %vm7250_vm7 = vnez %v7249_v40  ;;  %vm1428_vm11 = vcmp.gt.s32.totalorder %v1192_v56, 0 }
  0xfb   : > { %3024 = vmatprep.mubr.bf16.mxu0 %v7211_v30  ;;  %v4306_v19 = vpop.f32.mrf.mxu0  ;;  %v4378_v34 = vpop.f32.mrf.mxu1  ;;  %vm6322_vm4 = vmpackc.low %vm7144_vm8, %vm1428_vm11 }
  0xfc   : > { %v4307_v60 = vadd.f32 %v4306_v19, %v4305_v22  ;;  %v6307_v58 = vadd.f32 %v4378_v34, %v4377_v8 }
  0xfd   : > { %v4308_v30 = vpop.f32.mrf.mxu0  ;;  %v4380_v24 = vpop.f32.mrf.mxu1 }
  0xfe   : > { %7247 = vst [vmem:[#allocation24_spill] sm:$0xff] %v6307_v58 }
  0xff   : > { %3962 = vmatmul.mubr.msk.bf16.gmra.mxu1 %vm7244_vm3, %v7242_v63  ;;  %v4309_v62 = vpop.f32.mrf.mxu0  ;;  %v4381_v12 = vpop.f32.mrf.mxu1 }
 0x100   : > { %2477 = vmatprep.mubr.bf16.mxu1 %v7246_v17  ;;  %v4310_v25 = vadd.f32 %v4309_v62, %v4308_v30  ;;  %v6316_v27 = vadd.f32 %v4381_v12, %v4380_v24 }
 0x101   : > { %v4311_v19 = vpop.f32.mrf.mxu0  ;;  %v4383_v22 = vpop.f32.mrf.mxu1 }
 0x102   : > { %4109 = vmatmul.mubr.msk.bf16.gmra.mxu0 %vm7224_vm12, %v7222_v20  ;;  %vm7257_vm12 = vnez %v7136_v3 }
 0x103   : > { %3032 = vmatprep.mubr.bf16.mxu0 %v7225_v39  ;;  %v4312_v8 = vpop.f32.mrf.mxu0  ;;  %v4384_v15 = vpop.f32.mrf.mxu1 }
 0x104   : > { %v4313_v20 = vadd.f32 %v4312_v8, %v4311_v19  ;;  %v6319_v21 = vadd.f32 %v4384_v15, %v4383_v22 }
 0x105   : > { %v4314_v34 = vpop.f32.mrf.mxu0  ;;  %v4386_v58 = vpop.f32.mrf.mxu1 }
 0x107   : > { %3965 = vmatmul.mubr.msk.bf16.gmra.mxu1 %vm7250_vm7, %v7248_v9  ;;  %v4315_v12 = vpop.f32.mrf.mxu0  ;;  %v4387_v24 = vpop.f32.mrf.mxu1 }
 0x108   : > { %2485 = vmatprep.mubr.bf16.mxu1 %v6048_v61  ;;  %v4316_v30 = vadd.f32 %v4315_v12, %v4314_v34  ;;  %v6333_v56 = vadd.f32 %v4387_v24, %v4386_v58 }
 0x109   : > { %v4317_v62 = vpop.f32.mrf.mxu0  ;;  %v4389_v19 = vpop.f32.mrf.mxu1 }
 0x10a   : > { %4112 = vmatmul.mubr.msk.bf16.gmra.mxu0 %vm7228_vm10, %v7226_v29  ;;  %vm7258_vm10 = vnez %v7146_v28 }
 0x10b   : > { %3040 = vmatprep.mubr.bf16.mxu0 %v7229_v31  ;;  %v4318_v22 = vpop.f32.mrf.mxu0  ;;  %v4390_v23 = vpop.f32.mrf.mxu1 }
 0x10c   : > { %v4319_v29 = vadd.f32 %v4318_v22, %v4317_v62  ;;  %v6338_v8 = vadd.f32 %v4390_v23, %v4389_v19 }
 0x10d   : > { %v4320_v31 = vpop.f32.mrf.mxu0  ;;  %v4706_v15 = vpop.f32.mrf.mxu1 }
 0x10e   : > { %v6343_v34 = vadd.f32 %v4706_v15, %v4304_v32 }
 0x10f   : > { %3968 = vmatmul.mubr.msk.bf16.gmra.mxu1 %vm6322_vm4, %v6061_v13  ;;  %v1981_v43 = vpop.f32.mrf.mxu1 }
 0x110   : > { %4800 = vmatprep.mubr.msk.bf16.mxu1 %vm5555_vm6, %v5543_v26  ;;  %v4321_v26 = vpop.f32.mrf.mxu0  ;;  %v6350_v12 = vadd.f32 %v6287_v2, %v1981_v43  ;;  %vm7254_vm6 = vnez %v7104_v0 }
 0x111   : > { %v4322_v58 = vadd.f32 %v4321_v26, %v4320_v31 }
 0x112   : > { %4115 = vmatmul.mubr.msk.bf16.gmra.mxu0 %vm7230_vm15, %v5961_v6  ;;  %v4323_v18 = vpop.f32.mrf.mxu0  ;;  %v4707_v6 = vpop.f32.mrf.mxu1  ;;  %vm7259_vm15 = vnez %v7153_v45 }
 0x113   : > { %3048 = vmatprep.mubr.bf16.mxu0 %v5979_v55  ;;  %v6355_v32 = vadd.f32 %v4707_v6, %v4307_v60 }
 0x114   : > { %v4324_v24 = vpop.f32.mrf.mxu0  ;;  %v1984_v55 = vpop.f32.mrf.mxu1 }
 0x115   : > { %v4325_v62 = vadd.f32 %v4324_v24, %v4323_v18  ;;  %v6358_v10 = vadd.f32 %v6292_v54, %v1984_v55 }
 0x116   : > { %v4710_v19 = vpop.f32.mrf.mxu1 }
 0x117   : > { %4801 = vmatmul.mubr.msk.bf16.vlgmr.msra.gmra.mxu1 %vm5624_vm9, %v5584_v37  ;;  %v4326_v37 = vpop.f32.mrf.mxu0  ;;  %v6363_v2 = vadd.f32 %v4710_v19, %v4316_v30  ;;  %vm7255_vm9 = vnez %v7118_v48 }
 0x118   : > { %4804 = vmatprep.mubr.msk.bf16.mxu1 %vm5653_vm0, %v5629_v42  ;;  %vm7253_vm0 = vnez %v7098_v47  ;;  %v1997_v51 = vpop.f32.mrf.mxu1 }
 0x119   : > { %v4327_v42 = vpop.f32.mrf.mxu0  ;;  %v6369_v22 = vadd.f32 %v4310_v25, %v1997_v51 }
 0x11a   : > { %4118 = vmatmul.mubr.msk.bf16.gmra.mxu0 %vm6020_vm2, %v5999_v57  ;;  %v4328_v60 = vadd.f32 %v4327_v42, %v4326_v37  ;;  %v4711_v53 = vpop.f32.mrf.mxu1  ;;  %vm7256_vm2 = vnez %v7126_v36  ;;  %v7260_v42 = vld [vmem:[#allocation32_spill] sm:$0xff] }
 0x11b   : > { %3056 = vmatprep.mubr.bf16.mxu0 %v7231_v38  ;;  %v4329_v54 = vpop.f32.mrf.mxu0  ;;  %v6374_v57 = vadd.f32 %v4711_v53, %v4319_v29 }
 0x11c   : > { %v2000_v23 = vpop.f32.mrf.mxu1 }
 0x11d   : > { %v4330_v30 = vpop.f32.mrf.mxu0  ;;  %v6376_v31 = vadd.f32 %v4313_v20, %v2000_v23  ;;  %v7262_v23 = vld [vmem:[#allocation33_spill] sm:$0xff] }
 0x11e   : > { %v4331_v38 = vadd.f32 %v4330_v30, %v4329_v54 }
 0x11f   : > { %4805 = vmatmul.mubr.msk.bf16.gmra.mxu1 %vm7253_vm0, %v5669_v5  ;;  %v4332_v47 = vpop.f32.mrf.mxu0  ;;  %v4714_v5 = vpop.f32.mrf.mxu1 }
 0x120   : > { %4808 = vmatprep.mubr.msk.bf16.mxu1 %vm7254_vm6, %v5734_v44  ;;  %v6381_v25 = vadd.f32 %v4714_v5, %v4328_v60 }
 0x121   : > { %v4333_v0 = vpop.f32.mrf.mxu0  ;;  %v2013_v44 = vpop.f32.mrf.mxu1 }
 0x122   : > { %4121 = vmatmul.mubr.msk.bf16.gmra.mxu0 %vm7234_vm13, %v7232_v4  ;;  %v4334_v29 = vadd.f32 %v4333_v0, %v4332_v47  ;;  %v6387_v15 = vadd.f32 %v4322_v58, %v2013_v44  ;;  %vm7261_vm13 = vnez %v7260_v42  ;;  %v962_v47 = vadd.s32 272, %v5050_v7  ;;  %v7265_v0 = vld [vmem:[#allocation35_spill] sm:$0xff] }
 0x123   : > { %3064 = vmatprep.mubr.bf16.mxu0 %v7235_v35  ;;  %v4335_v20 = vpop.f32.mrf.mxu0  ;;  %v4715_v16 = vpop.f32.mrf.mxu1 }
 0x124   : > { %v6392_v4 = vadd.f32 %v4715_v16, %v4331_v38  ;;  %v7268_v16 = vld [vmem:[#allocation16_spill] sm:$0xff] }
 0x125   : > { %v4336_v26 = vpop.f32.mrf.mxu0  ;;  %v2016_v43 = vpop.f32.mrf.mxu1 }
 0x126   : > { %v4337_v35 = vadd.f32 %v4336_v26, %v4335_v20  ;;  %v6394_v18 = vadd.f32 %v4325_v62, %v2016_v43 }
 0x127   : > { %4809 = vmatmul.mubr.msk.bf16.gmra.mxu1 %vm7255_vm9, %v5806_v1  ;;  %v4338_v48 = vpop.f32.mrf.mxu0 }
 0x128   : > { %4812 = vmatprep.mubr.msk.bf16.mxu1 %vm7256_vm2, %v5850_v46 }
 0x129   : > { %v4718_v1 = vpop.f32.mrf.mxu1  ;;  %v4339_v46 = vpop.f32.mrf.mxu0 }
 0x12a   : > { %4124 = vmatmul.mubr.msk.bf16.gmra.mxu0 %vm7238_vm1, %v7236_v52  ;;  %v4340_v36 = vadd.f32 %v4339_v46, %v4338_v48  ;;  %v1206_v48 = vand.u32 15, %v962_v47  ;;  %v888_v46 = vrot.slane %v7268_v16, 1 }
 0x12b   : > { %3072 = vmatprep.mubr.bf16.mxu0 %v7240_v41  ;;  %v2029_v58 = vpop.f32.mrf.mxu1  ;;  %v4341_v6 = vpop.f32.mrf.mxu0 }
 0x12c   : > { %v6406_v24 = vadd.f32 %v4718_v1, %v4340_v36  ;;  %v6408_v55 = vadd.f32 %v4334_v29, %v2029_v58 }
 0x12d   : > { %v4719_v52 = vpop.f32.mrf.mxu1  ;;  %v4342_v49 = vpop.f32.mrf.mxu0 }
 0x12e   : > { %v4343_v41 = vadd.f32 %v4342_v49, %v4341_v6  ;;  %v7269_v49 = vld [vmem:[#allocation38_spill] sm:$0xff] }
 0x12f   : > { %4813 = vmatmul.mubr.msk.bf16.gmra.mxu1 %vm7257_vm12, %v5883_v14  ;;  %v2032_v62 = vpop.f32.mrf.mxu1  ;;  %v4344_v37 = vpop.f32.mrf.mxu0 }
 0x130   : > { %4816 = vmatprep.mubr.msk.bf16.mxu1 %vm7258_vm10, %v5915_v59  ;;  %v6413_v3 = vadd.f32 %v4719_v52, %v4343_v41  ;;  %v6415_v14 = vadd.f32 %v4337_v35, %v2032_v62  ;;  %v7270_v41 = vld [vmem:[#allocation37_spill] sm:$0xff] }
 0x131   : > { %v4345_v59 = vpop.f32.mrf.mxu0 }
 0x132   : > { %4127 = vmatmul.mubr.msk.bf16.gmra.mxu0 %vm7244_vm3, %v7242_v63  ;;  %v4346_v19 = vadd.f32 %v4345_v59, %v4344_v37  ;;  %vm1430_vm3 = vcmp.gt.s32.totalorder %v1206_v48, 0  ;;  %v7272_v37 = vld [vmem:[#allocation23_spill] sm:$0xff] }
 0x133   : > { %3080 = vmatprep.mubr.bf16.mxu0 %v7246_v17  ;;  %v4722_v28 = vpop.f32.mrf.mxu1  ;;  %v4347_v11 = vpop.f32.mrf.mxu0  ;;  %vm4134_vm0 = vmpackc.low %vm7144_vm8, %vm1430_vm3 }
 0x135   : > { %v2045_v51 = vpop.f32.mrf.mxu1  ;;  %v4348_v54 = vpop.f32.mrf.mxu0 }
 0x136   : > { %v6424_v63 = vadd.f32 %v4346_v19, %v2045_v51  ;;  %v4349_v53 = vadd.f32 %v4348_v54, %v4347_v11  ;;  %v7273_v19 = vld [vmem:[#allocation17_spill] sm:$0xff] }
 0x137   : > { %4817 = vmatmul.mubr.msk.bf16.gmra.mxu1 %vm7259_vm15, %v5917_v33  ;;  %v4723_v60 = vpop.f32.mrf.mxu1 }
 0x138   : > { %4820 = vmatprep.mubr.msk.bf16.mxu1 %vm7261_vm13, %v5946_v50  ;;  %v7263_v50 = vld [vmem:[#allocation34_spill] sm:$0xff] }
 0x139   : > { %v2048_v30 = vpop.f32.mrf.mxu1  ;;  %vm7264_vm1 = vnez %v7263_v50 }
 0x13a   : > { %v4350_v17 = vpop.f32.mrf.mxu0  ;;  %4130 = vmatmul.mubr.msk.bf16.gmra.mxu0 %vm7250_vm7, %v7248_v9  ;;  %v6429_v33 = vadd.f32 %v4349_v53, %v2048_v30  ;;  %v963_v9 = vadd.s32 280, %v5050_v7  ;;  %vm7276_vm7 = vcmask 1046528   ;;  %v7278_v53 = vld [vmem:[#allocation20_spill] sm:$0xff] }
 0x13b   : > { %3088 = vmatprep.mubr.bf16.mxu0 %v6048_v61  ;;  %v7267_v61 = vld [vmem:[#allocation15_spill] sm:$0xff]  ;;  %vm7277_vm11 = vmmov %vm7276_vm7 }
 0x13c   : > { %v4726_v45 = vpop.f32.mrf.mxu1  ;;  %v4351_v38 = vpop.f32.mrf.mxu0  ;;  %v1592_v26 = vpack.c.bf16 %v7268_v16, %v7267_v61  ;;  %v1213_v6 = vand.u32 15, %v963_v9  ;;  %v926_v51 = vsel %vm7277_vm11, %v888_v46, 0.0  ;;  %v7281_v9 = vld [vmem:[#allocation19_spill] sm:$0xff]  ;;  %v7283_v16 = vld [vmem:[#allocation22_spill] sm:$0xff] }
 0x13d   : > { %v4352_v5 = vadd.f32 %v4351_v38, %v4350_v17  ;;  %v7279_v38 = vld [vmem:[#allocation24_spill] sm:$0xff] }
 0x13e   : > { %v2061_v29 = vpop.f32.mrf.mxu1  ;;  %v4353_v40 = vpop.f32.mrf.mxu0 }
 0x13f   : > { %4821 = vmatmul.mubr.msk.bf16.gmra.mxu1 %vm7264_vm1, %v7262_v23  ;;  %v6440_v20 = vadd.f32 %v4722_v28, %v4352_v5 }
 0x140   : > { %4824 = vmatprep.mubr.msk.bf16.mxu1 %vm7204_vm14, %v7265_v0  ;;  %v4727_v43 = vpop.f32.mrf.mxu1  ;;  %v4354_v35 = vpop.f32.mrf.mxu0  ;;  %vm7271_vm14 = vnez %v7270_v41 }
 0x141   : > { %v4355_v1 = vadd.f32 %v4354_v35, %v4353_v40  ;;  %v7280_v40 = vld [vmem:[#allocation21_spill] sm:$0xff] }
 0x142   : > { %v2064_v36 = vpop.f32.mrf.mxu1  ;;  %v4356_v58 = vpop.f32.mrf.mxu0  ;;  %4133 = vmatmul.mubr.msk.bf16.gmra.mxu0 %vm6322_vm4, %v6061_v13  ;;  %v7275_v13 = vrot.slane %v7267_v61, 1  ;;  %vm1503_vm4 = vcmp.lt.s32.totalorder %v1213_v6, 15 }
 0x143   : > { %v6448_v52 = vadd.f32 %v4723_v60, %v4355_v1  ;;  %3096 = vmatprep.mubr.bf16.mxu0 %v1592_v26 }
 0x144   : > { %v4730_v7 = vpop.f32.mrf.mxu1  ;;  %v4357_v62 = vpop.f32.mrf.mxu0  ;;  %v889_v39 = vsel %vm7276_vm7, %v7275_v13, %v888_v46 }
 0x145   : > { %v6454_v28 = vadd.f32 %v4730_v7, %v7272_v37  ;;  %v4358_v59 = vadd.f32 %v4357_v62, %v4356_v58  ;;  %v4183_v50 = vpack.c.bf16 %v926_v51, %v889_v39 }
 0x146   : > { %v2077_v11 = vpop.f32.mrf.mxu1  ;;  %v4359_v60 = vpop.f32.mrf.mxu0 }
 0x147   : > { %4825 = vmatmul.mubr.msk.bf16.gmra.mxu1 %vm7271_vm14, %v7269_v49  ;;  %v6463_v54 = vadd.f32 %v4358_v59, %v2061_v29  ;;  %v6466_v30 = vadd.f32 %v7278_v53, %v2077_v11  ;;  %v7282_v29 = vpack.c.bf16 %v7280_v40, %v7281_v9 }
 0x148   : > { %4828 = vmatprep.mubr.msk.bf16.mxu1 %vm6224_vm5, %v7273_v19  ;;  %v4731_v17 = vpop.f32.mrf.mxu1  ;;  %v4360_v23 = vpop.f32.mrf.mxu0  ;;  %vm4182_vm5 = vmpackc.low %vm1503_vm4, %vm7144_vm8  ;;  %vm7318_vm8 = vcmask 1040384  }
 0x149   : > { %v6470_v47 = vadd.f32 %v4731_v17, %v7279_v38  ;;  %v4361_v5 = vadd.f32 %v4360_v23, %v4359_v60 }
 0x14a   : > { %v2080_v0 = vpop.f32.mrf.mxu1  ;;  %v4362_v44 = vpop.f32.mrf.mxu0  ;;  %4136 = vmatmul.mubr.msk.bf16.gmra.mxu0 %vm4134_vm0, %v7282_v29 }
 0x14b   : > { %v6476_v61 = vadd.f32 %v4361_v5, %v2064_v36  ;;  %v6479_v26 = vadd.f32 %v7283_v16, %v2080_v0 }
 0x14c   : > { %v4363_v48 = vpop.f32.mrf.mxu0 }
 0x14d   : > { %v4364_v46 = vadd.f32 %v4363_v48, %v4362_v44 }
 0x14e   : > { %v4365_v6 = vpop.f32.mrf.mxu0 }
 0x14f   : > { %v4734_v35 = vpop.f32.mrf.mxu1  ;;  %4829 = vmatmul.mubr.msk.bf16.gmra.mxu1 %vm4182_vm5, %v4183_v50  ;;  %v6484_v7 = vadd.f32 %v4726_v45, %v4364_v46 }
 0x150   : > { %v6482_v1 = vadd.f32 %v4734_v35, %v6333_v56  ;;  %v4366_v36 = vpop.f32.mrf.mxu0 }
 0x151   : > { %v2093_v58 = vpop.f32.mrf.mxu1  ;;  %v4367_v37 = vadd.f32 %v4366_v36, %v4365_v6 }
 0x152   : > { %7284 = vst [vmem:[#allocation25_spill] sm:$0xff] %v6482_v1  ;;  %v6487_v49 = vadd.f32 %v6316_v27, %v2093_v58  ;;  %v4754_v19 = vpop.f32.mrf.mxu0 }
 0x153   : > { %v4735_v41 = vpop.f32.mrf.mxu1  ;;  %v6492_v42 = vadd.f32 %v4727_v43, %v4367_v37 }
 0x154   : > { %v6490_v62 = vadd.f32 %v4735_v41, %v6338_v8  ;;  %v2528_v39 = vpop.f32.mrf.mxu0 }
 0x155   : > { %v2096_v59 = vpop.f32.mrf.mxu1 }
 0x156   : > { %7285 = vst [vmem:[#allocation26_spill] sm:$0xff] %v6490_v62  ;;  %v6495_v56 = vadd.f32 %v6319_v21, %v2096_v59  ;;  %v4755_v51 = vpop.f32.mrf.mxu0 }
 0x157   : > { %v4432_v13 = vpop.f32.mrf.mxu1 }
 0x158   : > { %v2531_v60 = vpop.f32.mrf.mxu0 }
 0x159   : > { %v4433_v45 = vpop.f32.mrf.mxu1 }
 0x15a   : > { %v4434_v11 = vadd.f32 %v4433_v45, %v4432_v13  ;;  %v4758_v23 = vpop.f32.mrf.mxu0 }
 0x15b   : > { %v4435_v27 = vpop.f32.mrf.mxu1 }
 0x15c   : > { %v2529_v53 = vadd.f32 %v4434_v11, %v2528_v39  ;;  %v2544_v43 = vpop.f32.mrf.mxu0 }
 0x15d   : > { %v4436_v17 = vpop.f32.mrf.mxu1 }
 0x15e   : > { %v6498_v8 = vadd.f32 %v2529_v53, %v6350_v12  ;;  %v4437_v50 = vadd.f32 %v4436_v17, %v4435_v27  ;;  %v4759_v21 = vpop.f32.mrf.mxu0 }
 0x15f   : > { %v4438_v38 = vpop.f32.mrf.mxu1 }
 0x160   : > { %v2532_v5 = vadd.f32 %v4437_v50, %v2531_v60  ;;  %v2547_v29 = vpop.f32.mrf.mxu0 }
 0x161   : > { %v4439_v0 = vpop.f32.mrf.mxu1 }
 0x162   : > { %v6501_v44 = vadd.f32 %v2532_v5, %v6358_v10  ;;  %v4440_v40 = vadd.f32 %v4439_v0, %v4438_v38  ;;  %v4762_v48 = vpop.f32.mrf.mxu0 }
 0x163   : > { %v4441_v9 = vpop.f32.mrf.mxu1 }
 0x164   : > { %v2537_v16 = vadd.f32 %v4754_v19, %v4440_v40  ;;  %v2560_v6 = vpop.f32.mrf.mxu0 }
 0x165   : > { %v4442_v35 = vpop.f32.mrf.mxu1 }
 0x166   : > { %v4443_v46 = vadd.f32 %v4442_v35, %v4441_v9  ;;  %v6504_v58 = vadd.f32 %v2537_v16, %v6343_v34  ;;  %v4763_v37 = vpop.f32.mrf.mxu0 }
 0x167   : > { %v4444_v12 = vpop.f32.mrf.mxu1 }
 0x168   : > { %v2540_v41 = vadd.f32 %v4755_v51, %v4443_v46  ;;  %v2563_v39 = vpop.f32.mrf.mxu0 }
 0x169   : > { %v4445_v36 = vpop.f32.mrf.mxu1 }
 0x16a   : > { %v4446_v59 = vadd.f32 %v4445_v36, %v4444_v12  ;;  %v6507_v13 = vadd.f32 %v2540_v41, %v6355_v32  ;;  %v6509_v19 = vpop.f32.mrf.mxu0 }
 0x16b   : > { %v4447_v10 = vpop.f32.mrf.mxu1 }
 0x16c   : > { %v2545_v45 = vadd.f32 %v4446_v59, %v2544_v43  ;;  %v2576_v53 = vpop.f32.mrf.mxu0 }
 0x16d   : > { %v4448_v11 = vpop.f32.mrf.mxu1 }
 0x16e   : > { %v4449_v27 = vadd.f32 %v4448_v11, %v4447_v10  ;;  %v6512_v60 = vadd.f32 %v2545_v45, %v6369_v22  ;;  %v6514_v50 = vpop.f32.mrf.mxu0 }
 0x16f   : > { %v4450_v34 = vpop.f32.mrf.mxu1 }
 0x170   : > { %v2548_v17 = vadd.f32 %v4449_v27, %v2547_v29  ;;  %v2579_v0 = vpop.f32.mrf.mxu0 }
 0x171   : > { %v4451_v51 = vpop.f32.mrf.mxu1 }
 0x172   : > { %v4452_v38 = vadd.f32 %v4451_v51, %v4450_v34  ;;  %v6517_v32 = vadd.f32 %v2548_v17, %v6376_v31  ;;  %v6519_v9 = vpop.f32.mrf.mxu0 }
 0x173   : > { %v4453_v5 = vpop.f32.mrf.mxu1 }
 0x174   : > { %v2553_v43 = vadd.f32 %v4758_v23, %v4452_v38  ;;  %v6524_v46 = vpop.f32.mrf.mxu0 }
 0x175   : > { %v4454_v40 = vpop.f32.mrf.mxu1 }
 0x176   : > { %v4455_v16 = vadd.f32 %v4454_v40, %v4453_v5  ;;  %v6522_v22 = vadd.f32 %v2553_v43, %v6363_v2  ;;  %v6526_v41 = vpop.f32.mrf.mxu0 }
 0x177   : > { %v4456_v35 = vpop.f32.mrf.mxu1 }
 0x178   : > { %v2556_v29 = vadd.f32 %v4759_v21, %v4455_v16  ;;  %v6531_v23 = vpop.f32.mrf.mxu0 }
 0x179   : > { %v4457_v12 = vpop.f32.mrf.mxu1 }
 0x17a   : > { %v4458_v36 = vadd.f32 %v4457_v12, %v4456_v35  ;;  %v6529_v31 = vadd.f32 %v2556_v29, %v6374_v57  ;;  %v6533_v11 = vpop.f32.mrf.mxu0 }
 0x17b   : > { %v4459_v59 = vpop.f32.mrf.mxu1 }
 0x17c   : > { %v2561_v10 = vadd.f32 %v4458_v36, %v2560_v6  ;;  %v6538_v21 = vpop.f32.mrf.mxu0 }
 0x17d   : > { %v4460_v45 = vpop.f32.mrf.mxu1 }
 0x17e   : > { %v4461_v2 = vadd.f32 %v4460_v45, %v4459_v59  ;;  %v6536_v27 = vadd.f32 %v2561_v10, %v6387_v15  ;;  %v6540_v38 = vpop.f32.mrf.mxu0 }
 0x17f   : > { %v4462_v34 = vpop.f32.mrf.mxu1 }
 0x180   : > { %v2564_v17 = vadd.f32 %v4461_v2, %v2563_v39  ;;  %v6545_v6 = vpop.f32.mrf.mxu0 }
 0x181   : > { %v4463_v51 = vpop.f32.mrf.mxu1 }
 0x182   : > { %v4464_v57 = vadd.f32 %v4463_v51, %v4462_v34  ;;  %v6543_v5 = vadd.f32 %v2564_v17, %v6394_v18  ;;  %v6547_v35 = vpop.f32.mrf.mxu0 }
 0x183   : > { %v4465_v43 = vpop.f32.mrf.mxu1 }
 0x184   : > { %v2569_v40 = vadd.f32 %v4762_v48, %v4464_v57  ;;  %v6552_v39 = vpop.f32.mrf.mxu0 }
 0x185   : > { %v4466_v16 = vpop.f32.mrf.mxu1 }
 0x186   : > { %v4467_v15 = vadd.f32 %v4466_v16, %v4465_v43  ;;  %v6550_v29 = vadd.f32 %v2569_v40, %v6381_v25  ;;  %v6554_v10 = vpop.f32.mrf.mxu0 }
 0x187   : > { %v4468_v12 = vpop.f32.mrf.mxu1 }
 0x188   : > { %v2572_v36 = vadd.f32 %v4763_v37, %v4467_v15  ;;  %v6559_v48 = vpop.f32.mrf.mxu0 }
 0x189   : > { %v4469_v59 = vpop.f32.mrf.mxu1 }
 0x18a   : > { %v4470_v18 = vadd.f32 %v4469_v59, %v4468_v12  ;;  %v6557_v45 = vadd.f32 %v2572_v36, %v6392_v4  ;;  %v6561_v51 = vpop.f32.mrf.mxu0 }
 0x18b   : > { %v4471_v2 = vpop.f32.mrf.mxu1  ;;  %7286 = vst [vmem:[#allocation27_spill] sm:$0xff] %v6561_v51 }
 0x18c   : > { %v2577_v34 = vadd.f32 %v4470_v18, %v2576_v53  ;;  %v6566_v37 = vpop.f32.mrf.mxu0 }
 0x18d   : > { %v4472_v17 = vpop.f32.mrf.mxu1 }
 0x18e   : > { %v4473_v25 = vadd.f32 %v4472_v17, %v4471_v2  ;;  %v6564_v57 = vadd.f32 %v2577_v34, %v6408_v55  ;;  %v6568_v15 = vpop.f32.mrf.mxu0 }
 0x18f   : > { %v4474_v43 = vpop.f32.mrf.mxu1  ;;  %7287 = vst [vmem:[#allocation28_spill] sm:$0xff] %v6568_v15 }
 0x190   : > { %v2580_v40 = vadd.f32 %v4473_v25, %v2579_v0  ;;  %v6573_v53 = vpop.f32.mrf.mxu0 }
 0x191   : > { %v4475_v16 = vpop.f32.mrf.mxu1 }
 0x192   : > { %v4476_v4 = vadd.f32 %v4475_v16, %v4474_v43  ;;  %v6571_v12 = vadd.f32 %v2580_v40, %v6415_v14  ;;  %v4568_v2 = vpop.f32.mrf.mxu0 }
 0x193   : > { %v4477_v36 = vpop.f32.mrf.mxu1 }
 0x194   : > { %v2585_v59 = vadd.f32 %v6509_v19, %v4476_v4  ;;  %v4569_v0 = vpop.f32.mrf.mxu0 }
 0x195   : > { %v4478_v18 = vpop.f32.mrf.mxu1  ;;  %v6580_v62 = vadd.f32 %v4569_v0, %v4568_v2 }
 0x196   : > { %v4479_v55 = vadd.f32 %v4478_v18, %v4477_v36  ;;  %v6577_v34 = vadd.f32 %v2585_v59, %v6406_v24  ;;  %v4571_v14 = vpop.f32.mrf.mxu0 }
 0x197   : > { %v4480_v17 = vpop.f32.mrf.mxu1 }
 0x198   : > { %v2588_v25 = vadd.f32 %v6514_v50, %v4479_v55  ;;  %v4572_v19 = vpop.f32.mrf.mxu0 }
 0x199   : > { %v4481_v43 = vpop.f32.mrf.mxu1  ;;  %v6586_v36 = vadd.f32 %v4572_v19, %v4571_v14 }
 0x19a   : > { %v4482_v40 = vadd.f32 %v4481_v43, %v4480_v17  ;;  %v6583_v16 = vadd.f32 %v2588_v25, %v6413_v3  ;;  %v6588_v59 = vpop.f32.mrf.mxu0 }
 0x19b   : > { %v4483_v15 = vpop.f32.mrf.mxu1 }
 0x19c   : > { %v2593_v4 = vadd.f32 %v4482_v40, %v6524_v46  ;;  %v6593_v55 = vpop.f32.mrf.mxu0 }
 0x19d   : > { %v4484_v24 = vpop.f32.mrf.mxu1 }
 0x19e   : > { %v4485_v18 = vadd.f32 %v4484_v24, %v4483_v15  ;;  %v6591_v50 = vadd.f32 %v2593_v4, %v6424_v63  ;;  %v6596_v0 = vpop.f32.mrf.mxu0 }
 0x19f   : > { %v4486_v2 = vpop.f32.mrf.mxu1 }
 0x1a0   : > { %v2596_v17 = vadd.f32 %v4485_v18, %v6531_v23  ;;  %v6601_v14 = vpop.f32.mrf.mxu0 }
 0x1a1   : > { %v4487_v3 = vpop.f32.mrf.mxu1 }
 0x1a2   : > { %v4488_v25 = vadd.f32 %v4487_v3, %v4486_v2  ;;  %v6599_v46 = vadd.f32 %v2596_v17, %v6429_v33  ;;  %v6604_v63 = vpop.f32.mrf.mxu0 }
 0x1a3   : > { %v4489_v43 = vpop.f32.mrf.mxu1 }
 0x1a4   : > { %v2601_v15 = vadd.f32 %v6519_v9, %v4488_v25  ;;  %v6609_v24 = vpop.f32.mrf.mxu0 }
 0x1a5   : > { %v4490_v40 = vpop.f32.mrf.mxu1 }
 0x1a6   : > { %v4491_v19 = vadd.f32 %v4490_v40, %v4489_v43  ;;  %v6607_v4 = vadd.f32 %v2601_v15, %v6440_v20  ;;  %v6612_v33 = vpop.f32.mrf.mxu0 }
 0x1a7   : > { %v4492_v23 = vpop.f32.mrf.mxu1 }
 0x1a8   : > { %v2604_v18 = vadd.f32 %v6526_v41, %v4491_v19  ;;  %v6617_v25 = vpop.f32.mrf.mxu0 }
 0x1a9   : > { %v4493_v2 = vpop.f32.mrf.mxu1 }
 0x1aa   : > { %v4494_v17 = vadd.f32 %v4493_v2, %v4492_v23  ;;  %v6615_v3 = vadd.f32 %v2604_v18, %v6448_v52  ;;  %v6620_v20 = vpop.f32.mrf.mxu0 }
 0x1ab   : > { %v4495_v9 = vpop.f32.mrf.mxu1 }
 0x1ac   : > { %v2609_v43 = vadd.f32 %v4494_v17, %v6538_v21  ;;  %v6625_v19 = vpop.f32.mrf.mxu0 }
 0x1ad   : > { %v4496_v40 = vpop.f32.mrf.mxu1 }
 0x1ae   : > { %v4497_v15 = vadd.f32 %v4496_v40, %v4495_v9  ;;  %v6623_v1 = vadd.f32 %v2609_v43, %v6463_v54  ;;  %v6628_v52 = vpop.f32.mrf.mxu0 }
 0x1af   : > { %v4498_v41 = vpop.f32.mrf.mxu1 }
 0x1b0   : > { %7288 = vst [vmem:[#allocation29_spill] sm:$0xff] %v6623_v1  ;;  %v2612_v23 = vadd.f32 %v4497_v15, %v6545_v6  ;;  %v6633_v17 = vpop.f32.mrf.mxu0 }
 0x1b1   : > { %v4499_v2 = vpop.f32.mrf.mxu1 }
 0x1b2   : > { %v4500_v18 = vadd.f32 %v4499_v2, %v4498_v41  ;;  %v6631_v51 = vadd.f32 %v2612_v23, %v6476_v61  ;;  %v6636_v54 = vpop.f32.mrf.mxu0 }
 0x1b3   : > { %v4501_v21 = vpop.f32.mrf.mxu1 }
 0x1b4   : > { %7289 = vst [vmem:[#allocation31_spill] sm:$0xff] %v6631_v51  ;;  %v2617_v9 = vadd.f32 %v6533_v11, %v4500_v18  ;;  %v6641_v15 = vpop.f32.mrf.mxu0 }
 0x1b5   : > { %v4502_v40 = vpop.f32.mrf.mxu1 }
 0x1b6   : > { %v4503_v43 = vadd.f32 %v4502_v40, %v4501_v21  ;;  %v6639_v1 = vadd.f32 %v2617_v9, %v6484_v7  ;;  %v6644_v61 = vpop.f32.mrf.mxu0 }
 0x1b7   : > { %v4504_v6 = vpop.f32.mrf.mxu1 }
 0x1b8   : > { %7290 = vst [vmem:[#allocation30_spill] sm:$0xff] %v6639_v1  ;;  %v2620_v41 = vadd.f32 %v6540_v38, %v4503_v43  ;;  %v6649_v18 = vpop.f32.mrf.mxu0 }
 0x1b9   : > { %v4505_v2 = vpop.f32.mrf.mxu1 }
 0x1ba   : > { %v4506_v23 = vadd.f32 %v4505_v2, %v4504_v6  ;;  %v6647_v51 = vadd.f32 %v2620_v41, %v6492_v42  ;;  %v6652_v7 = vpop.f32.mrf.mxu0 }
 0x1bb   : > { %v4507_v11 = vpop.f32.mrf.mxu1 }
 0x1bc   : > { %7291 = vst [vmem:[#allocation3_spill] sm:$0xff] %v6647_v51  ;;  %v2625_v21 = vadd.f32 %v4506_v23, %v6552_v39  ;;  %v6657_v43 = vpop.f32.mrf.mxu0 }
 0x1bd   : > { %v4508_v40 = vpop.f32.mrf.mxu1 }
 0x1be   : > { %v4509_v9 = vadd.f32 %v4508_v40, %v4507_v11  ;;  %v6655_v1 = vadd.f32 %v2625_v21, %v6466_v30  ;;  %v6660_v42 = vpop.f32.mrf.mxu0 }
 0x1bf   : > { %v4510_v38 = vpop.f32.mrf.mxu1 }
 0x1c0   : > { %7292 = vst [vmem:[#allocation5_spill] sm:$0xff] %v6655_v1  ;;  %v2628_v6 = vadd.f32 %v4509_v9, %v6559_v48  ;;  %v6665_v23 = vpop.f32.mrf.mxu0 }
 0x1c1   : > { %v4511_v2 = vpop.f32.mrf.mxu1 }
 0x1c2   : > { %v4512_v41 = vadd.f32 %v4511_v2, %v4510_v38  ;;  %v6663_v51 = vadd.f32 %v2628_v6, %v6479_v26  ;;  %v6668_v30 = vpop.f32.mrf.mxu0 }
 0x1c3   : > { %v4513_v39 = vpop.f32.mrf.mxu1 }
 0x1c4   : > { %7293 = vst [vmem:[#allocation4_spill] sm:$0xff] %v6663_v51  ;;  %v2633_v11 = vadd.f32 %v6547_v35, %v4512_v41  ;;  %v6673_v9 = vpop.f32.mrf.mxu0 }
 0x1c5   : > { %v4514_v40 = vpop.f32.mrf.mxu1 }
 0x1c6   : > { %v4515_v21 = vadd.f32 %v4514_v40, %v4513_v39  ;;  %v6671_v1 = vadd.f32 %v2633_v11, %v6454_v28  ;;  %v6676_v26 = vpop.f32.mrf.mxu0 }
 0x1c7   : > { %v4516_v48 = vpop.f32.mrf.mxu1 }
 0x1c8   : > { %7294 = vst [vmem:[#allocation6_spill] sm:$0xff] %v6671_v1  ;;  %v2636_v38 = vadd.f32 %v6554_v10, %v4515_v21  ;;  %v6681_v41 = vpop.f32.mrf.mxu0 }
 0x1c9   : > { %v4517_v2 = vpop.f32.mrf.mxu1 }
 0x1ca   : > { %v4518_v6 = vadd.f32 %v4517_v2, %v4516_v48  ;;  %v6679_v51 = vadd.f32 %v2636_v38, %v6470_v47  ;;  %v6684_v11 = vpop.f32.mrf.mxu0 }
 0x1cb   : > { %v4519_v35 = vpop.f32.mrf.mxu1 }
 0x1cc   : > { %7295 = vst [vmem:[#allocation8_spill] sm:$0xff] %v6679_v51  ;;  %v2641_v39 = vadd.f32 %v4518_v6, %v6566_v37  ;;  %v6691_v21 = vpop.f32.mrf.mxu0 }
 0x1cd   : > { %v4520_v28 = vpop.f32.mrf.mxu1 }
 0x1ce   : > { %v4521_v40 = vadd.f32 %v4520_v28, %v4519_v35  ;;  %v6687_v1 = vadd.f32 %v2641_v39, %v6487_v49  ;;  %v6696_v38 = vpop.f32.mrf.mxu0  ;;  %v4576_v39 = vadd.f32 %v6593_v55, %v6588_v59 }
 0x1cf   : > { %v6689_v10 = vpop.f32.mrf.mxu1 }
 0x1d0   : > { %7296 = vst [vmem:[#allocation7_spill] sm:$0xff] %v6687_v1  ;;  %v2644_v47 = vadd.f32 %v4521_v40, %v6573_v53  ;;  %v6703_v6 = vpop.f32.mrf.mxu0 }
 0x1d1   : > { %v6694_v48 = vpop.f32.mrf.mxu1 }
 0x1d2   : > { %7297 = vst [vmem:[#allocation9_spill] sm:$0xff] %v6694_v48  ;;  %v6699_v2 = vadd.f32 %v2644_v47, %v6495_v56  ;;  %v6707_v49 = vpop.f32.mrf.mxu0  ;;  %v4588_v48 = vadd.f32 %v6625_v19, %v6620_v20  ;;  %v4585_v19 = vadd.f32 %v6617_v25, %v6612_v33 }
 0x1d3   : > { %v6701_v37 = vpop.f32.mrf.mxu1 }
 0x1d4   : > { %7298 = vst [vmem:[#allocation10_spill] sm:$0xff] %v6699_v2  ;;  %7299 = vst [vmem:[#allocation11_spill] sm:$0xff] %v6701_v37  ;;  %v6712_v28 = vpop.f32.mrf.mxu0  ;;  %v4579_v2 = vadd.f32 %v6601_v14, %v6596_v0 }
 0x1d5   : > { %v6705_v35 = vpop.f32.mrf.mxu1 }
 0x1d6   : > { %7300 = vst [vmem:[#allocation12_spill] sm:$0xff] %v6705_v35  ;;  %v6719_v47 = vpop.f32.mrf.mxu0 }
 0x1d7   : > { %v4802_v53 = vpop.f32.mrf.mxu1 }
 0x1d8   : > { %v3148_v40 = vadd.f32 %v4802_v53, %v4576_v39  ;;  %v6725_v39 = vpop.f32.mrf.mxu0 }
 0x1d9   : > { %v3139_v56 = vpop.f32.mrf.mxu1 }
 0x1da   : > { %v3300_v1 = vadd.f32 %v3148_v40, %v6504_v58  ;;  %v3140_v59 = vadd.f32 %v6580_v62, %v3139_v56  ;;  %v6729_v37 = vpop.f32.mrf.mxu0  ;;  %v4582_v40 = vadd.f32 %v6609_v24, %v6604_v63  ;;  %v4591_v63 = vadd.f32 %v6633_v17, %v6628_v52 }
 0x1db   : > { %v4803_v55 = vpop.f32.mrf.mxu1 }
 0x1dc   : > { %3396 = vst [vmem:[%s6717_s12 + $0x10] sm:$0xff] %v3300_v1  ;;  %v3298_v53 = vadd.f32 %v3140_v59, %v6498_v8  ;;  %v3151_v51 = vadd.f32 %v4803_v55, %v4579_v2  ;;  %v6736_v14 = vpop.f32.mrf.mxu0 }
 0x1dd   : > { %v3142_v35 = vpop.f32.mrf.mxu1 }
 0x1de   : > { %3394 = vst [vmem:[%s6717_s12] sm:$0xff] %v3298_v53  ;;  %v3301_v58 = vadd.f32 %v3151_v51, %v6507_v13  ;;  %v3143_v0 = vadd.f32 %v6586_v36, %v3142_v35  ;;  %v3463_v56 = vmul.f32 %v3298_v53, %v3298_v53  ;;  %v6742_v55 = vpop.f32.mrf.mxu0 }
 0x1df   : > { %v4806_v62 = vpop.f32.mrf.mxu1 }
 0x1e0   : > { %3397 = vst [vmem:[%s6717_s12 + $0x18] sm:$0xff] %v3301_v58  ;;  %v3299_v8 = vadd.f32 %v3143_v0, %v6501_v44  ;;  %v3164_v2 = vadd.f32 %v4806_v62, %v4588_v48  ;;  %v6750_v24 = vpop.f32.mrf.mxu0  ;;  %v3465_v48 = vmul.f32 %v3300_v1, %v3300_v1  ;;  %v3466_v33 = vmul.f32 %v3301_v58, %v3301_v58 }
 0x1e1   : > { %v3155_v59 = vpop.f32.mrf.mxu1 }
 0x1e2   : > { %3395 = vst [vmem:[%s6717_s12 + $0x8] sm:$0xff] %v3299_v8  ;;  %v3426_v20 = vadd.f32 %v3299_v8, %v3298_v53  ;;  %v3464_v13 = vmul.f32 %v3299_v8, %v3299_v8  ;;  %v3304_v51 = vadd.f32 %v3164_v2, %v6522_v22  ;;  %v3156_v36 = vadd.f32 %v4582_v40, %v3155_v59  ;;  %v6756_v8 = vpop.f32.mrf.mxu0 }
 0x1e3   : > { %v4807_v44 = vpop.f32.mrf.mxu1  ;;  %v4600_v22 = vadd.f32 %v6657_v43, %v6652_v7 }
 0x1e4   : > { %v3427_v35 = vadd.f32 %v3426_v20, %v3300_v1  ;;  %v3495_v0 = vadd.f32 %v3464_v13, %v3463_v56  ;;  %3400 = vst [vmem:[%s6717_s12 + $0x30] sm:$0xff] %v3304_v51  ;;  %v3302_v53 = vadd.f32 %v3156_v36, %v6512_v60  ;;  %v3167_v62 = vadd.f32 %v4807_v44, %v4591_v63  ;;  %v6760_v59 = vpop.f32.mrf.mxu0 }
 0x1e5   : > { %v3158_v40 = vpop.f32.mrf.mxu1  ;;  %v4594_v13 = vadd.f32 %v6641_v15, %v6636_v54  ;;  %v4603_v36 = vadd.f32 %v6665_v23, %v6660_v42  ;;  %v3469_v15 = vmul.f32 %v3304_v51, %v3304_v51 }
 0x1e6   : > { %v3496_v25 = vadd.f32 %v3495_v0, %v3465_v48  ;;  %3398 = vst [vmem:[%s6717_s12 + $0x20] sm:$0xff] %v3302_v53  ;;  %v3428_v52 = vadd.f32 %v3427_v35, %v3301_v58  ;;  %v3159_v17 = vadd.f32 %v4585_v19, %v3158_v40  ;;  %v3467_v2 = vmul.f32 %v3302_v53, %v3302_v53  ;;  %v6768_v19 = vpop.f32.mrf.mxu0 }
 0x1e7   : > { %v3305_v1 = vadd.f32 %v3167_v62, %v6529_v31  ;;  %v4810_v56 = vpop.f32.mrf.mxu1 }
 0x1e8   : > { %v3429_v60 = vadd.f32 %v3428_v52, %v3302_v53  ;;  %v3497_v20 = vadd.f32 %v3496_v25, %v3466_v33  ;;  %v3303_v7 = vadd.f32 %v3159_v17, %v6517_v32  ;;  %v3180_v43 = vadd.f32 %v4810_v56, %v4600_v22  ;;  %v6774_v54 = vpop.f32.mrf.mxu0 }
 0x1e9   : > { %3401 = vst [vmem:[%s6717_s12 + $0x38] sm:$0xff] %v3305_v1  ;;  %v3171_v58 = vpop.f32.mrf.mxu1  ;;  %v4597_v32 = vadd.f32 %v6649_v18, %v6644_v61  ;;  %v3470_v22 = vmul.f32 %v3305_v1, %v3305_v1  ;;  %v4606_v52 = vadd.f32 %v6673_v9, %v6668_v30 }
 0x1ea   : > { %v3498_v31 = vadd.f32 %v3497_v20, %v3467_v2  ;;  %3399 = vst [vmem:[%s6717_s12 + $0x28] sm:$0xff] %v3303_v7  ;;  %v3430_v63 = vadd.f32 %v3429_v60, %v3303_v7  ;;  %v3468_v44 = vmul.f32 %v3303_v7, %v3303_v7  ;;  %v3308_v48 = vadd.f32 %v3180_v43, %v6550_v29  ;;  %v6778_v33 = vpop.f32.mrf.mxu0 }
 0x1eb   : > { %v3172_v35 = vadd.f32 %v4594_v13, %v3171_v58  ;;  %v4811_v0 = vpop.f32.mrf.mxu1 }
 0x1ec   : > { %v3431_v42 = vadd.f32 %v3430_v63, %v3304_v51  ;;  %v3499_v23 = vadd.f32 %v3498_v31, %v3468_v44  ;;  %3404 = vst [vmem:[%s6717_s12 + $0x50] sm:$0xff] %v3308_v48  ;;  %v3183_v53 = vadd.f32 %v4811_v0, %v4603_v36  ;;  %v4612_v51 = vadd.f32 %v6691_v21, %v6684_v11  ;;  %v6786_v2 = vpop.f32.mrf.mxu0 }
 0x1ed   : > { %v3306_v62 = vadd.f32 %v3172_v35, %v6536_v27  ;;  %v3174_v40 = vpop.f32.mrf.mxu1  ;;  %v3473_v13 = vmul.f32 %v3308_v48, %v3308_v48  ;;  %v4609_v44 = vadd.f32 %v6681_v41, %v6676_v26 }
 0x1ee   : > { %v3500_v29 = vadd.f32 %v3499_v23, %v3469_v15  ;;  %v3432_v25 = vadd.f32 %v3431_v42, %v3305_v1  ;;  %v3309_v61 = vadd.f32 %v3183_v53, %v6557_v45  ;;  %v3175_v18 = vadd.f32 %v4597_v32, %v3174_v40  ;;  %v6792_v43 = vpop.f32.mrf.mxu0 }
 0x1ef   : > { %3402 = vst [vmem:[%s6717_s12 + $0x40] sm:$0xff] %v3306_v62  ;;  %v4814_v17 = vpop.f32.mrf.mxu1  ;;  %v3471_v56 = vmul.f32 %v3306_v62, %v3306_v62  ;;  %v4615_v45 = vadd.f32 %v6703_v6, %v6696_v38  ;;  %v4624_v32 = vadd.f32 %v6736_v14, %v6729_v37 }
 0x1f0   : > { %v3433_v27 = vadd.f32 %v3432_v25, %v3306_v62  ;;  %v3501_v60 = vadd.f32 %v3500_v29, %v3470_v22  ;;  %3405 = vst [vmem:[%s6717_s12 + $0x58] sm:$0xff] %v3309_v61  ;;  %v3307_v1 = vadd.f32 %v3175_v18, %v6543_v5  ;;  %v3196_v20 = vadd.f32 %v4814_v17, %v4612_v51  ;;  %v6796_v31 = vpop.f32.mrf.mxu0 }
 0x1f1   : > { %v3187_v7 = vpop.f32.mrf.mxu1 }
 0x1f2   : > { %v3502_v30 = vadd.f32 %v3501_v60, %v3471_v56  ;;  %3403 = vst [vmem:[%s6717_s12 + $0x48] sm:$0xff] %v3307_v1  ;;  %v3434_v9 = vadd.f32 %v3433_v27, %v3307_v1  ;;  %v3472_v11 = vmul.f32 %v3307_v1, %v3307_v1  ;;  %v3188_v21 = vadd.f32 %v4606_v52, %v3187_v7  ;;  %v6804_v0 = vpop.f32.mrf.mxu0 }
 0x1f3   : > { %v3312_v36 = vadd.f32 %v3196_v20, %v6577_v34  ;;  %v4815_v58 = vpop.f32.mrf.mxu1  ;;  %v3474_v34 = vmul.f32 %v3309_v61, %v3309_v61  ;;  %v4636_v1 = vadd.f32 %v6786_v2, %v6778_v33 }
 0x1f4   : > { %v3435_v5 = vadd.f32 %v3434_v9, %v3308_v48  ;;  %v3503_v63 = vadd.f32 %v3502_v30, %v3472_v11  ;;  %v3310_v38 = vadd.f32 %v3188_v21, %v6564_v57  ;;  %v3199_v6 = vadd.f32 %v4815_v58, %v4615_v45  ;;  %v6810_v41 = vpop.f32.mrf.mxu0 }
 0x1f5   : > { %3408 = vst [vmem:[%s6717_s12 + $0x70] sm:$0xff] %v3312_v36  ;;  %v3190_v35 = vpop.f32.mrf.mxu1  ;;  %v4618_v57 = vadd.f32 %v6712_v28, %v6707_v49  ;;  %v4630_v9 = vadd.f32 %v6760_v59, %v6756_v8  ;;  %v4639_v58 = vadd.f32 %v6796_v31, %v6792_v43 }
 0x1f6   : > { %v3504_v15 = vadd.f32 %v3503_v63, %v3473_v13  ;;  %3406 = vst [vmem:[%s6717_s12 + $0x60] sm:$0xff] %v3310_v38  ;;  %v3436_v42 = vadd.f32 %v3435_v5, %v3309_v61  ;;  %v3313_v48 = vadd.f32 %v3199_v6, %v6583_v16  ;;  %v3191_v23 = vadd.f32 %v4609_v44, %v3190_v35  ;;  %v6814_v29 = vpop.f32.mrf.mxu0  ;;  %v7301_v63 = vld [vmem:[#allocation30_spill] sm:$0xff]  ;;  %v7302_v35 = vld [vmem:[#allocation29_spill] sm:$0xff] }
 0x1f7   : > { %v4818_v26 = vpop.f32.mrf.mxu1  ;;  %v3475_v14 = vmul.f32 %v3310_v38, %v3310_v38  ;;  %v4627_v16 = vadd.f32 %v6750_v24, %v6742_v55  ;;  %v3477_v55 = vmul.f32 %v3312_v36, %v3312_v36 }
 0x1f8   : > { %v3437_v37 = vadd.f32 %v3436_v42, %v3310_v38  ;;  %v3505_v53 = vadd.f32 %v3504_v15, %v3474_v34  ;;  %3409 = vst [vmem:[%s6717_s12 + $0x78] sm:$0xff] %v3313_v48  ;;  %v3212_v22 = vadd.f32 %v4818_v26, %v4624_v32  ;;  %v3311_v62 = vadd.f32 %v3191_v23, %v6571_v12  ;;  %v6820_v51 = vpop.f32.mrf.mxu0  ;;  %v7303_v26 = vld [vmem:[#allocation3_spill] sm:$0xff] }
 0x1f9   : > { %v3203_v40 = vpop.f32.mrf.mxu1  ;;  %v4621_v12 = vadd.f32 %v6725_v39, %v6719_v47  ;;  %v3478_v7 = vmul.f32 %v3313_v48, %v3313_v48  ;;  %v4633_v32 = vadd.f32 %v6774_v54, %v6768_v19 }
 0x1fa   : > { %v3506_v49 = vadd.f32 %v3505_v53, %v3475_v14  ;;  %v3316_v28 = vadd.f32 %v3212_v22, %v6607_v4  ;;  %v3204_v25 = vadd.f32 %v4618_v57, %v3203_v40  ;;  %3407 = vst [vmem:[%s6717_s12 + $0x68] sm:$0xff] %v3311_v62  ;;  %v3438_v61 = vadd.f32 %v3437_v37, %v3311_v62  ;;  %v4646_v60 = vpop.f32.mrf.mxu0 }
 0x1fb   : > { %v3476_v18 = vmul.f32 %v3311_v62, %v3311_v62  ;;  %v4819_v52 = vpop.f32.mrf.mxu1  ;;  %v4642_v40 = vadd.f32 %v6810_v41, %v6804_v0 }
 0x1fc   : > { %3412 = vst [vmem:[%s6717_s12 + $0x90] sm:$0xff] %v3316_v28  ;;  %v3314_v17 = vadd.f32 %v3204_v25, %v6591_v50  ;;  %v3215_v27 = vadd.f32 %v4819_v52, %v4627_v16  ;;  %v3439_v24 = vadd.f32 %v3438_v61, %v3312_v36  ;;  %v4647_v50 = vpop.f32.mrf.mxu0  ;;  %v3481_v42 = vmul.f32 %v3316_v28, %v3316_v28  ;;  %v7304_v16 = vld [vmem:[#allocation31_spill] sm:$0xff]  ;;  %v7305_v25 = vld [vmem:[#allocation9_spill] sm:$0xff] }
 0x1fd   : > { %v3507_v56 = vadd.f32 %v3506_v49, %v3476_v18  ;;  %v3206_v4 = vpop.f32.mrf.mxu1  ;;  %v4648_v23 = vadd.f32 %v4647_v50, %v4646_v60  ;;  %v4524_v61 = vadd.f32 %v7305_v25, %v6689_v10  ;;  %v4645_v10 = vadd.f32 %v6820_v51, %v6814_v29 }
 0x1fe   : > { %3410 = vst [vmem:[%s6717_s12 + $0x80] sm:$0xff] %v3314_v17  ;;  %v3317_v45 = vadd.f32 %v3215_v27, %v6615_v3  ;;  %v3207_v20 = vadd.f32 %v4621_v12, %v3206_v4  ;;  %v3440_v39 = vadd.f32 %v3439_v24, %v3313_v48  ;;  %v3479_v33 = vmul.f32 %v3314_v17, %v3314_v17  ;;  %v4649_v3 = vpop.f32.mrf.mxu0 }
 0x1ff   : > { %v3508_v47 = vadd.f32 %v3507_v56, %v3477_v55  ;;  %v4822_v30 = vpop.f32.mrf.mxu1  ;;  %v7306_v56 = vld [vmem:[#allocation6_spill] sm:$0xff] }
 0x200   : > { %3413 = vst [vmem:[%s6717_s12 + $0x98] sm:$0xff] %v3317_v45  ;;  %v3315_v11 = vadd.f32 %v3207_v20, %v6599_v46  ;;  %v3228_v21 = vadd.f32 %v4822_v30, %v4636_v1  ;;  %v3441_v13 = vadd.f32 %v3440_v39, %v3314_v17  ;;  %v4650_v46 = vpop.f32.mrf.mxu0  ;;  %v3482_v53 = vmul.f32 %v3317_v45, %v3317_v45  ;;  %v7307_v20 = vld [vmem:[#allocation5_spill] sm:$0xff]  ;;  %v7308_v39 = vld [vmem:[#allocation27_spill] sm:$0xff] }
 0x201   : > { %v3509_v2 = vadd.f32 %v3508_v47, %v3478_v7  ;;  %v3219_v36 = vpop.f32.mrf.mxu1  ;;  %v4651_v55 = vadd.f32 %v4650_v46, %v4649_v3  ;;  %v2649_v30 = vadd.f32 %v7308_v39, %v4524_v61  ;;  %v7311_v3 = vld [vmem:[#allocation8_spill] sm:$0xff] }
 0x202   : > { %3411 = vst [vmem:[%s6717_s12 + $0x88] sm:$0xff] %v3315_v11  ;;  %v3480_v5 = vmul.f32 %v3315_v11, %v3315_v11  ;;  %v3320_v38 = vadd.f32 %v3228_v21, %v7301_v63  ;;  %v3220_v6 = vadd.f32 %v4630_v9, %v3219_v36  ;;  %v3442_v59 = vadd.f32 %v3441_v13, %v3315_v11  ;;  %v4652_v57 = vpop.f32.mrf.mxu0 }
 0x203   : > { %v3510_v8 = vadd.f32 %v3509_v2, %v3479_v33  ;;  %v4823_v44 = vpop.f32.mrf.mxu1  ;;  %v7309_v33 = vld [vmem:[#allocation11_spill] sm:$0xff]  ;;  %v7310_v2 = vld [vmem:[#allocation12_spill] sm:$0xff] }
 0x204   : > { %3416 = vst [vmem:[%s6717_s12 + $0xb0] sm:$0xff] %v3320_v38  ;;  %v3318_v34 = vadd.f32 %v3220_v6, %v7302_v35  ;;  %v3231_v15 = vadd.f32 %v4823_v44, %v4639_v58  ;;  %v3443_v43 = vadd.f32 %v3442_v59, %v3316_v28  ;;  %v4653_v54 = vpop.f32.mrf.mxu0  ;;  %v3485_v50 = vmul.f32 %v3320_v38, %v3320_v38  ;;  %v7312_v44 = vld [vmem:[#allocation4_spill] sm:$0xff] }
 0x205   : > { %v3511_v31 = vadd.f32 %v3510_v8, %v3480_v5  ;;  %v3222_v48 = vpop.f32.mrf.mxu1  ;;  %v4527_v36 = vadd.f32 %v7310_v2, %v7309_v33  ;;  %v4654_v59 = vadd.f32 %v4653_v54, %v4652_v57 }
 0x206   : > { %3414 = vst [vmem:[%s6717_s12 + $0xa0] sm:$0xff] %v3318_v34  ;;  %v3321_v37 = vadd.f32 %v3231_v15, %v7303_v26  ;;  %v3223_v14 = vadd.f32 %v4633_v32, %v3222_v48  ;;  %v3444_v62 = vadd.f32 %v3443_v43, %v3317_v45  ;;  %v3483_v52 = vmul.f32 %v3318_v34, %v3318_v34  ;;  %v4655_v27 = vpop.f32.mrf.mxu0  ;;  %v7313_v32 = vld [vmem:[#allocation25_spill] sm:$0xff]  ;;  %v7314_v48 = vld [vmem:[#allocation28_spill] sm:$0xff] }
 0x207   : > { %v3512_v22 = vadd.f32 %v3511_v31, %v3481_v42  ;;  %v4826_v19 = vpop.f32.mrf.mxu1  ;;  %v2717_v35 = vadd.f32 %v2649_v30, %v7313_v32 }
 0x208   : > { %3417 = vst [vmem:[%s6717_s12 + $0xb8] sm:$0xff] %v3321_v37  ;;  %v3319_v49 = vadd.f32 %v3223_v14, %v7304_v16  ;;  %v3244_v28 = vadd.f32 %v4826_v19, %v4648_v23  ;;  %v3445_v18 = vadd.f32 %v3444_v62, %v3318_v34  ;;  %v4656_v45 = vpop.f32.mrf.mxu0  ;;  %v3486_v29 = vmul.f32 %v3321_v37, %v3321_v37 }
 0x209   : > { %v3513_v12 = vadd.f32 %v3512_v22, %v3482_v53  ;;  %v3235_v17 = vpop.f32.mrf.mxu1  ;;  %v2652_v23 = vadd.f32 %v7314_v48, %v4527_v36  ;;  %v4657_v19 = vadd.f32 %v4656_v45, %v4655_v27 }
 0x20a   : > { %3415 = vst [vmem:[%s6717_s12 + $0xa8] sm:$0xff] %v3319_v49  ;;  %v3484_v24 = vmul.f32 %v3319_v49, %v3319_v49  ;;  %v3324_v4 = vadd.f32 %v3244_v28, %v7306_v56  ;;  %v3236_v60 = vadd.f32 %v4642_v40, %v3235_v17  ;;  %v3446_v41 = vadd.f32 %v3445_v18, %v3319_v49  ;;  %v4658_v13 = vpop.f32.mrf.mxu0  ;;  %v7315_v40 = vld [vmem:[#allocation7_spill] sm:$0xff] }
 0x20b   : > { %v3514_v0 = vadd.f32 %v3513_v12, %v3483_v52  ;;  %v4827_v1 = vpop.f32.mrf.mxu1  ;;  %v7316_v52 = vld [vmem:[#allocation26_spill] sm:$0xff] }
 0x20c   : > { %3420 = vst [vmem:[%s6717_s12 + $0xd0] sm:$0xff] %v3324_v4  ;;  %v3322_v7 = vadd.f32 %v3236_v60, %v7307_v20  ;;  %v3247_v47 = vadd.f32 %v4827_v1, %v4651_v55  ;;  %v3447_v9 = vadd.f32 %v3446_v41, %v3320_v38  ;;  %v4659_v8 = vpop.f32.mrf.mxu0  ;;  %v3489_v28 = vmul.f32 %v3324_v4, %v3324_v4 }
 0x20d   : > { %v3515_v11 = vadd.f32 %v3514_v0, %v3484_v24  ;;  %v3238_v21 = vpop.f32.mrf.mxu1  ;;  %v4660_v46 = vadd.f32 %v4659_v8, %v4658_v13  ;;  %v2718_v12 = vadd.f32 %v2652_v23, %v7316_v52  ;;  %v7317_v0 = vld [vmem:[#allocation10_spill] sm:$0xff] }
 0x20e   : > { %3418 = vst [vmem:[%s6717_s12 + $0xc0] sm:$0xff] %v3322_v7  ;;  %v3325_v58 = vadd.f32 %v3247_v47, %v7311_v3  ;;  %v3239_v5 = vadd.f32 %v4645_v10, %v3238_v21  ;;  %v3448_v63 = vadd.f32 %v3447_v9, %v3321_v37  ;;  %v3487_v15 = vmul.f32 %v3322_v7, %v3322_v7  ;;  %v4661_v31 = vpop.f32.mrf.mxu0 }
 0x20f   : > { %v3516_v51 = vadd.f32 %v3515_v11, %v3485_v50  ;;  %v4830_v6 = vpop.f32.mrf.mxu1 }
 0x210   : > { %3421 = vst [vmem:[%s6717_s12 + $0xd8] sm:$0xff] %v3325_v58  ;;  %v3323_v38 = vadd.f32 %v3239_v5, %v7312_v44  ;;  %v3449_v34 = vadd.f32 %v3448_v63, %v3322_v7  ;;  %v3260_v37 = vadd.f32 %v4830_v6, %v4660_v46  ;;  %v4662_v62 = vpop.f32.mrf.mxu0  ;;  %v3490_v24 = vmul.f32 %v3325_v58, %v3325_v58 }
 0x211   : > { %v3517_v42 = vadd.f32 %v3516_v51, %v3486_v29  ;;  %v3251_v43 = vpop.f32.mrf.mxu1  ;;  %v4663_v49 = vadd.f32 %v4662_v62, %v4661_v31 }
 0x212   : > { %3419 = vst [vmem:[%s6717_s12 + $0xc8] sm:$0xff] %v3323_v38  ;;  %v3488_v26 = vmul.f32 %v3323_v38, %v3323_v38  ;;  %v3252_v14 = vadd.f32 %v4654_v59, %v3251_v43  ;;  %v3450_v53 = vadd.f32 %v3449_v34, %v3323_v38  ;;  %v3328_v54 = vadd.f32 %v3260_v37, %v2717_v35 }
 0x213   : > { %v3518_v57 = vadd.f32 %v3517_v42, %v3487_v15  ;;  %v4831_v22 = vpop.f32.mrf.mxu1 }
 0x214   : > { %v3326_v16 = vadd.f32 %v3252_v14, %v7315_v40  ;;  %v3451_v25 = vadd.f32 %v3450_v53, %v3324_v4  ;;  %3424 = vst [vmem:[%s6717_s12 + $0xf0] sm:$0xff] %v3328_v54  ;;  %v3263_v17 = vadd.f32 %v4831_v22, %v4663_v49  ;;  %v3493_v47 = vmul.f32 %v3328_v54, %v3328_v54 }
 0x215   : > { %v3519_v61 = vadd.f32 %v3518_v57, %v3488_v26  ;;  %v3254_v18 = vpop.f32.mrf.mxu1 }
 0x216   : > { %3422 = vst [vmem:[%s6717_s12 + $0xe0] sm:$0xff] %v3326_v16  ;;  %v3255_v55 = vadd.f32 %v4657_v19, %v3254_v18  ;;  %v3452_v60 = vadd.f32 %v3451_v25, %v3325_v58  ;;  %v3329_v27 = vadd.f32 %v3263_v17, %v2718_v12  ;;  %v3491_v45 = vmul.f32 %v3326_v16, %v3326_v16 }
 0x217   : > { %v3520_v56 = vadd.f32 %v3519_v61, %v3489_v28 }
 0x218   : > { %v3327_v41 = vadd.f32 %v3255_v55, %v7317_v0  ;;  %v3453_v1 = vadd.f32 %v3452_v60, %v3326_v16  ;;  %3425 = vst [vmem:[%s6717_s12 + $0xf8] sm:$0xff] %v3329_v27  ;;  %v3494_v50 = vmul.f32 %v3329_v27, %v3329_v27 }
 0x219   : > { %v3521_v10 = vadd.f32 %v3520_v56, %v3490_v24 }
 0x21a   : > { %3423 = vst [vmem:[%s6717_s12 + $0xe8] sm:$0xff] %v3327_v41  ;;  %v3492_v4 = vmul.f32 %v3327_v41, %v3327_v41  ;;  %v3454_v7 = vadd.f32 %v3453_v1, %v3327_v41 }
 0x21b   : > { %v3522_v20 = vadd.f32 %v3521_v10, %v3491_v45 }
 0x21c   : > { %v3455_v39 = vadd.f32 %v3454_v7, %v3328_v54 }
 0x21d   : > { %v3523_v30 = vadd.f32 %v3522_v20, %v3492_v4 }
 0x21e   : > { %v3456_v9 = vadd.f32 %v3455_v39, %v3329_v27 }
 0x21f   : > { %v3524_v11 = vadd.f32 %v3523_v30, %v3493_v47 }
 0x220   : > { %v3457_v21 = vrot.slane %v3456_v9, 4 }
 0x221   : > { %v3525_v13 = vadd.f32 %v3524_v11, %v3494_v50 }
 0x222   : > { %v3458_v33 = vadd.f32 %v3457_v21, %v3456_v9 }
 0x223   : > { %v3526_v2 = vrot.slane %v3525_v13, 4 }
 0x224   : > { %v3459_v36 = vrot.slane %v3458_v33, 2 }
 0x225   : > { %v3527_v3 = vadd.f32 %v3526_v2, %v3525_v13 }
 0x226   : > { %v3460_v58 = vadd.f32 %v3459_v36, %v3458_v33 }
 0x227   : > { %v3528_v5 = vrot.slane %v3527_v3, 2 }
 0x228   : > { %v3461_v29 = vrot.slane %v3460_v58, 1 }
 0x229   : > { %v3529_v51 = vadd.f32 %v3528_v5, %v3527_v3 }
 0x22a   : > { %v3462_v6 = vadd.f32 %v3461_v29, %v3460_v58 }
 0x22b   : > { %v3530_v63 = vrot.slane %v3529_v51, 1 }
 0x22d   : > { %v3531_v8 = vadd.f32 %v3530_v63, %v3529_v51 }
 0x22f   : > { %v3532_v59 = vsel %vm7318_vm8, %v3462_v6, %v3531_v8 }
 0x230   : > { %3533 = vst [vmem:[%s465_s15] sm:$0x3] %v3532_v59 }
 0x231 PF: > { %s18_s26 = sadd.s32 1, %s4969_s26   ;;  %s7319_s24 = smov %s4965_s25 }
 0x232   : > { %p15_p5 = scmp.ge.s32.totalorder %s18_s26, 4   ;;  %s7320_s25 = smov %s7322_s27 }
 0x234   :  { %17 = sbr.rel (!%p15_p5) target bundleno = 2 (0x2), region = 94 }

// kernel: up_forward.3
= control target key start
LH: loop header
LB: loop body
LE: loop exit
PB: predicated region body
PF: predicated region fallthrough
CT: control target
= control target key end

     0   :  { %s8850_s30 = smov 0   ;;  %s8852_s10 = smov 0   ;;  %s12122_s0 = inlined_call_operand.vmem [shape: bf16[2,16,16,128], index: 0, kind: input, shape index: {}, may-alias: {0,1,2}]   ;;  %s12123_s1 = inlined_call_operand.vmem [shape: bf16[2,16,16,128], index: 1, kind: input, shape index: {}, may-alias: {0,1,2}]   ;;  %s12124_s2 = inlined_call_operand.vmem [shape: bf16[2,16,16,128], index: 2, kind: input, shape index: {}, may-alias: {0,1,2}]   ;;  %s12125_s3 = inlined_call_operand.vmem [shape: bf16[2,16,16,128], index: 3, kind: input, shape index: {}, may-alias: {3,4,5}]   ;;  %s12126_s4 = inlined_call_operand.vmem [shape: bf16[2,16,16,128], index: 4, kind: input, shape index: {}, may-alias: {3,4,5}]   ;;  %s12127_s5 = inlined_call_operand.vmem [shape: bf16[2,16,16,128], index: 5, kind: input, shape index: {}, may-alias: {3,4,5}]   ;;  %s12128_s6 = inlined_call_operand.vmem [shape: bf16[3,384,128], index: 6, kind: input, shape index: {}]   ;;  %s12129_s7 = inlined_call_operand.vmem [shape: bf16[3,384,128], index: 7, kind: input, shape index: {}]   ;;  %s12130_s8 = inlined_call_operand.vmem [shape: bf16[2,16,16,128], index: 8, kind: output, shape index: {0}]   ;;  %s12131_s9 = inlined_call_operand.vmem [shape: f32[2,1,2,128], index: 9, kind: output, shape index: {1}]  }
   0x1   :  { %s8854_s11 = smov 0  }
   0x2 LB: > { %s32_s12 = sadd.s32 1, %s8793_s10  ;;  %p6289_p0 = scmp.ge.s32.totalorder %s8797_s11, 1  ;;  %s8797_s11 = sphi %s8854_s11, %s20_s11   ;;  %s8793_s10 = sphi %s8852_s10, %s13247_s10   ;;  %s8789_s30 = sphi %s8850_s30, %s13246_s30  }
   0x3   : > { %p34_p1 = scmp.ge.s32.totalorder %s32_s12, 2  ;;  %p460_p2 = scmp.lt.s32.totalorder %s8797_s11, 3 }
   0x5   : > { %s13249_s12 = smov (%p34_p1, %s32_s12), 0  ;;  %p461_p3 = pnand %p6289_p0, %p460_p2 }
   0x7   : > { %464 = sbr.rel (%p461_p3) target bundleno = 841 (0x349), region = 52 }
   0xc   : > { %v8566_v0 = vld [vmem:[%s12128_s6 + $0x78] sm:$0xff]   ;;  %v1022_v3 = vlaneseq  ;;  %v8569_v4 = vld [vmem:[%s12128_s6 + $0x70] sm:$0xff]   ;;  %v8572_v7 = vld [vmem:[%s12128_s6 + $0x68] sm:$0xff]   ;;  %p579_p4 = scmp.lt.s32.totalorder %s8789_s30, 1  ;;  %vm12132_vm0 = vcmask 1046528   ;;  %vm12139_vm2 = vcmask 1040384  }
   0xd   : > { %v8567_v1 = vld [vmem:[%s12128_s6 + $0xb8] sm:$0xff]   ;;  %7437 = vmatprep.subr.bf16.mxu0 %v8566_v0  ;;  %v8570_v5 = vld [vmem:[%s12128_s6 + $0xb0] sm:$0xff]   ;;  %v8573_v9 = vld [vmem:[%s12128_s6 + $0xa8] sm:$0xff]   ;;  %vm12140_vm7 = vmmov 1  }
   0xe   : > { %v8568_v2 = vld [vmem:[%s12128_s6 + $0x38] sm:$0xff]   ;;  %8253 = vmatprep.subr.bf16.mxu1 %v8567_v1  ;;  %v8571_v6 = vld [vmem:[%s12128_s6 + $0x30] sm:$0xff]   ;;  %v8891_v8 = vshrl.u32 %v1022_v3, 7  ;;  %v8574_v10 = vld [vmem:[%s12128_s6 + $0x28] sm:$0xff]   ;;  %s13251_s30 = smov (!%p579_p4, %s8789_s30), 1 }
   0xf   : > { %7438 = vmatpush3.bf16.msra.mxu0 %v8568_v2  ;;  %8254 = vmatpush3.bf16.msra.mxu1 %v8567_v1  ;;  %v8575_v11 = vld [vmem:[%s12128_s6 + $0x60] sm:$0xff]   ;;  %v8578_v15 = vld [vmem:[%s12128_s6 + $0x58] sm:$0xff]   ;;  %v8581_v21 = vld [vmem:[%s12128_s6 + $0x50] sm:$0xff]   ;;  %s8931_s13 = sshll.u32 %s13251_s30, 7 }
  0x10   : > { %7439 = vmatprep.subr.bf16.mxu0 %v8569_v4  ;;  %8255 = vmatprep.subr.bf16.mxu1 %v8570_v5  ;;  %v8576_v12 = vld [vmem:[%s12128_s6 + $0xa0] sm:$0xff]   ;;  %v1024_v13 = vadd.s32 8, %v8891_v8  ;;  %v8579_v16 = vld [vmem:[%s12128_s6 + $0x98] sm:$0xff]   ;;  %v1026_v18 = vadd.s32 24, %v8891_v8  ;;  %v1028_v20 = vadd.s32 40, %v8891_v8  ;;  %v8582_v22 = vld [vmem:[%s12128_s6 + $0x90] sm:$0xff]   ;;  %s587_s22 = scalar_lea.vmem %s12122_s0, %s8931_s13  ;;  %s8956_s25 = scalar_lea.vmem %s12123_s1, %s8931_s13 }
  0x11   : > { %v8577_v14 = vld [vmem:[%s12128_s6 + $0x20] sm:$0xff]   ;;  %v8580_v19 = vld [vmem:[%s12128_s6 + $0x18] sm:$0xff]   ;;  %v1063_v23 = vand.u32 15, %v8891_v8  ;;  %v8583_v25 = vld [vmem:[%s12128_s6 + $0x10] sm:$0xff]   ;;  %v1025_v29 = vadd.s32 16, %v8891_v8  ;;  %v8959_v31 = vadd.s32 56, %v8891_v8  ;;  %s632_s20 = scalar_lea.vmem %s12125_s3, %s8931_s13  ;;  %s10274_s24 = scalar_lea.vmem %s12126_s4, %s8931_s13 }
  0x12   : > { %v1070_v17 = vand.u32 15, %v1024_v13  ;;  %v1084_v24 = vand.u32 15, %v1026_v18  ;;  %v1098_v27 = vand.u32 15, %v1028_v20  ;;  %v8584_v28 = vld [vmem:[%s12128_s6 + $0x48] sm:$0xff]   ;;  %v8587_v36 = vld [vmem:[%s12128_s6 + $0x40] sm:$0xff]   ;;  %v8984_v41 = vadd.s32 72, %v8891_v8  ;;  %s12000_s17 = scalar_lea.vmem %s12130_s8, %s8931_s13 }
  0x13   : > { %7440 = vmatpush3.bf16.msra.mxu0 %v8571_v6  ;;  %8256 = vmatpush3.bf16.msra.mxu1 %v8570_v5  ;;  %v8585_v30 = vld [vmem:[%s12128_s6 + $0x88] sm:$0xff]   ;;  %vm8961_vm3 = vcmp.gt.s32.totalorder %v1063_v23, 0  ;;  %v7325_v37 = vld [vmem:[%s587_s22] sm:$0xff]   ;;  %v1077_v39 = vand.u32 15, %v1025_v29  ;;  %v1112_v40 = vand.u32 15, %v8959_v31  ;;  %v8999_v50 = vadd.s32 32, %v8891_v8 }
  0x14   : > { %7441 = vmatprep.subr.bf16.mxu0 %v8572_v7  ;;  %8257 = vmatprep.subr.bf16.mxu1 %v8573_v9  ;;  %vm8937_vm1 = vcmp.lt.s32.totalorder %v1070_v17, 15  ;;  %vm8965_vm4 = vcmp.lt.s32.totalorder %v1084_v24, 15  ;;  %v8586_v34 = vld [vmem:[%s12128_s6 + $0x8] sm:$0xff]   ;;  %vm8972_vm5 = vcmp.lt.s32.totalorder %v1098_v27, 15  ;;  %v8980_v38 = vld [vmem:[%s8956_s25] sm:$0xff]   ;;  %v7326_v43 = vunpack.c.l.bf16 %v7325_v37  ;;  %v8590_v56 = vld [vmem:[%s12128_s6 + $0x178] sm:$0xff]  }
  0x15   : > { %v8588_v42 = vld [vmem:[%s12128_s6 + $0x80] sm:$0xff]   ;;  %v7327_v44 = vunpack.c.h.bf16 %v7325_v37  ;;  %v720_v45 = vunpack.c.l.bf16 %v8980_v38  ;;  %v8991_v46 = vld [vmem:[%s8956_s25 + $0x8] sm:$0xff]   ;;  %v721_v47 = vunpack.c.h.bf16 %v8980_v38  ;;  %v9002_v51 = vadd.s32 88, %v8891_v8  ;;  %v8591_v61 = vld [vmem:[%s12128_s6 + $0x138] sm:$0xff]   ;;  %s7286_s23 = sadd.s32 120, %s8931_s13  ;;  %s6304_s13 = sshll.u32 %s13251_s30, 1 }
  0x16   : > { %12463 = vst [vmem:[#allocation3_spill] sm:$0xff] %v8991_v46  ;;  %v8589_v48 = vld [vmem:[%s12128_s6] sm:$0xff]   ;;  %v722_v49 = vunpack.c.l.bf16 %v8991_v46  ;;  %v9005_v52 = vadd.s32 104, %v8891_v8  ;;  %v760_v53 = vmul.f32 0.0, %v7326_v43  ;;  %v723_v57 = vunpack.c.h.bf16 %v8991_v46  ;;  %v9017_v2 = vld [vmem:[%s8956_s25 + $0x10] sm:$0xff]   ;;  %vm9026_vm8 = vmpackc.low %vm8937_vm1, %vm12140_vm7  ;;  %s615_s28 = scalar_lea.vmem %s12124_s2, %s7286_s23  ;;  %s660_s15 = scalar_lea.vmem %s12127_s5, %s7286_s23 }
  0x17   : > { %7442 = vmatpush3.bf16.msra.mxu0 %v8574_v10  ;;  %8258 = vmatpush3.bf16.msra.mxu1 %v8573_v9  ;;  %v761_v54 = vmul.f32 0.0, %v7327_v44  ;;  %v917_v55 = vrot.slane %v720_v45, 1  ;;  %v808_v58 = vrot.slane %v720_v45, 7  ;;  %v919_v59 = vrot.slane %v721_v47, 1  ;;  %12464 = vst [vmem:[#allocation4_spill] sm:$0xff] %v9017_v2  ;;  %v9034_v10 = vld [vmem:[%s8956_s25 + $0x18] sm:$0xff]   ;;  %vm9041_vm9 = vmpackc.low %vm12140_vm7, %vm8961_vm3 }
  0x18   : > { %7443 = vmatprep.subr.bf16.mxu0 %v8575_v11  ;;  %8259 = vmatprep.subr.bf16.mxu1 %v8576_v12  ;;  %v921_v60 = vrot.slane %v722_v49, 1  ;;  %v805_v62 = vrot.slane %v760_v53, 7  ;;  %v914_v1 = vrot.slane %v760_v53, 1  ;;  %vm9019_vm6 = vcmp.gt.s32.totalorder %v1077_v39, 0  ;;  %vm9054_vm10 = vmpackc.low %vm8965_vm4, %vm12140_vm7  ;;  %v9076_v27 = vld [vmem:[%s8956_s25 + $0x20] sm:$0xff]   ;;  %v8594_v31 = vld [vmem:[%s12128_s6 + $0x130] sm:$0xff]  }
  0x19   : > { %v806_v63 = vrot.slane %v761_v54, 7  ;;  %v1636_v0 = vpack.c.bf16 %v761_v54, %v760_v53  ;;  %v915_v4 = vrot.slane %v761_v54, 1  ;;  %v12467_v5 = vmov 0  ;;  %vm9067_vm11 = vmpackc.low %vm8972_vm5, %vm12140_vm7  ;;  %v8597_v37 = vld [vmem:[%s12128_s6 + $0x170] sm:$0xff]  }
  0x1a   : > { %v12468_v5 = vsel %vm9026_vm8, 4294967295, %v12467_v5  ;;  %v920_v6 = vsel %vm12132_vm0, %v917_v55, %v919_v59  ;;  %v922_v7 = vsel %vm12132_vm0, %v919_v59, %v921_v60  ;;  %v724_v9 = vunpack.c.l.bf16 %v9017_v2  ;;  %vm9141_vm14 = vmpackc.low %vm12140_vm7, %vm9019_vm6  ;;  %v9285_v26 = vld [vmem:[%s8956_s25 + $0x50] sm:$0xff]  }
  0x1b   : > { %7444 = vmatpush3.bf16.msra.mxu0 %v8577_v14  ;;  %8260 = vmatpush3.bf16.msra.mxu1 %v8576_v12  ;;  %12469 = vst [vmem:[#allocation5_spill] sm:$0xff] %v12468_v5  ;;  %v807_v11 = vsel %vm12139_vm2, %v805_v62, %v806_v63  ;;  %v912_v12 = vsel %vm12139_vm2, 0.0, %v805_v62  ;;  %v12470_v13 = vmov 0  ;;  %v9045_v14 = vpack.c.bf16 %v922_v7, %v920_v6  ;;  %v8599_v7 = vld [vmem:[%s12128_s6 + $0xe8] sm:$0xff]   ;;  %12509 = vst [vmem:[#allocation17_spill] sm:$0xff] %v9285_v26 }
  0x1c   : > { %7445 = vmatprep.subr.bf16.mxu0 %v8578_v15  ;;  %8261 = vmatprep.subr.bf16.mxu1 %v8579_v16  ;;  %v12471_v13 = vsel %vm9041_vm9, 4294967295, %v12470_v13  ;;  %v923_v15 = vrot.slane %v723_v57, 1  ;;  %v918_v17 = vsel %vm12132_vm0, %v915_v4, %v917_v55  ;;  %v6346_v18 = vpack.c.bf16 %v807_v11, %v912_v12  ;;  %v8601_v12 = vld [vmem:[%s12128_s6 + $0x120] sm:$0xff]  }
  0x1d   : > { %1913 = vmatprep.mubr.bf16.mxu0 %v1636_v0  ;;  %12472 = vst [vmem:[#allocation6_spill] sm:$0xff] %v12471_v13  ;;  %v925_v20 = vrot.slane %v724_v9, 1  ;;  %v12476_v24 = vmov 0  ;;  %vm9071_vm12 = vcmp.lt.s32.totalorder %v1112_v40, 15  ;;  %v725_v29 = vunpack.c.h.bf16 %v9017_v2 }
  0x1e   : > { %v924_v23 = vsel %vm12132_vm0, %v921_v60, %v923_v15  ;;  %v12477_v24 = vsel %vm9067_vm11, 4294967295, %v12476_v24  ;;  %v727_v32 = vunpack.c.h.bf16 %v9034_v10  ;;  %v728_v35 = vunpack.c.l.bf16 %v9076_v27  ;;  %v9136_v60 = vld [vmem:[%s8956_s25 + $0x30] sm:$0xff]   ;;  %vm9153_vm15 = vmpackc.low %vm9071_vm12, %vm12140_vm7 }
  0x1f   : > { %7446 = vmatpush3.bf16.msra.mxu0 %v8580_v19  ;;  %8262 = vmatpush3.bf16.msra.mxu1 %v8579_v16  ;;  %v916_v16 = vsel %vm12132_vm0, %v914_v1, %v915_v4  ;;  %v12473_v19 = vmov 0  ;;  %12478 = vst [vmem:[#allocation8_spill] sm:$0xff] %v12477_v24  ;;  %v927_v40 = vrot.slane %v725_v29, 1  ;;  %v812_v45 = vrot.slane %v722_v49, 7  ;;  %v8598_v49 = vld [vmem:[%s12128_s6 + $0x128] sm:$0xff]  }
  0x20   : > { %7447 = vmatprep.subr.bf16.mxu0 %v8581_v21  ;;  %8263 = vmatprep.subr.bf16.mxu1 %v8582_v22  ;;  %v12474_v19 = vsel %vm9054_vm10, 4294967295, %v12473_v19  ;;  %v6394_v21 = vpack.c.bf16 %v918_v17, %v916_v16  ;;  %v931_v43 = vrot.slane %v727_v32, 1  ;;  %v933_v44 = vrot.slane %v728_v35, 1 }
  0x21   : > { %12475 = vst [vmem:[#allocation7_spill] sm:$0xff] %v12474_v19  ;;  %v1091_v59 = vand.u32 15, %v8999_v50  ;;  %v729_v1 = vunpack.c.h.bf16 %v9076_v27  ;;  %v12486_v50 = vmov 0  ;;  %v1140_v6 = vand.u32 15, %v9002_v51  ;;  %v8652_v19 = vld [vmem:[%s12128_s6 + $0x1c0] sm:$0xff]  }
  0x22   : > { %8269 = vmatprep.mubr.msk.bf16.mxu1 %vm9026_vm8, %v6394_v21  ;;  %v12487_v50 = vsel %vm9153_vm15, 4294967295, %v12486_v50  ;;  %v12146_v16 = vunpack.c.l.bf16 %v9136_v60  ;;  %v1154_v17 = vand.u32 15, %v9005_v52  ;;  %v8604_v21 = vld [vmem:[%s12128_s6 + $0x168] sm:$0xff]  }
  0x23   : > { %7448 = vmatpush3.bf16.msra.mxu0 %v8583_v25  ;;  %8264 = vmatpush3.bf16.msra.mxu1 %v8582_v22  ;;  %v8592_v22 = vld [vmem:[%s12128_s6 + $0xf8] sm:$0xff]   ;;  %v810_v25 = vrot.slane %v721_v47, 7  ;;  %v814_v47 = vrot.slane %v723_v57, 7  ;;  %12488 = vst [vmem:[#allocation10_spill] sm:$0xff] %v12487_v50  ;;  %v935_v51 = vrot.slane %v729_v1, 1  ;;  %vm9190_vm3 = vcmp.gt.s32.totalorder %v1091_v59, 0 }
  0x24   : > { %7449 = vmatprep.subr.bf16.mxu0 %v8584_v28  ;;  %8265 = vmatprep.subr.bf16.mxu1 %v8585_v30  ;;  %v926_v28 = vsel %vm12132_vm0, %v923_v15, %v925_v20  ;;  %v12489_v15 = vmov 0  ;;  %vm9206_vm4 = vcmp.lt.s32.totalorder %v1140_v6, 15  ;;  %vm9217_vm5 = vcmp.lt.s32.totalorder %v1154_v17, 15  ;;  %vm9242_vm6 = vmpackc.low %vm12140_vm7, %vm9190_vm3  ;;  %v8606_v17 = vld [vmem:[%s12128_s6 + $0xd8] sm:$0xff]  }
  0x25   : > { %v9089_v33 = vpack.c.bf16 %v926_v28, %v924_v23  ;;  %v811_v39 = vsel %vm12139_vm2, %v808_v58, %v810_v25  ;;  %v815_v0 = vsel %vm12139_vm2, %v812_v45, %v814_v47  ;;  %v9198_v23 = vrot.slane %v725_v29, 7  ;;  %vm9255_vm12 = vmpackc.low %vm9206_vm4, %vm12140_vm7 }
  0x26   : > { %v941_v28 = vrot.slane %v12146_v16, 1  ;;  %v936_v29 = vsel %vm12132_vm0, %v933_v44, %v935_v51  ;;  %v1048_v16 = vadd.s32 200, %v8891_v8 }
  0x27   : > { %7450 = vmatpush3.bf16.msra.mxu0 %v8586_v34  ;;  %8266 = vmatpush3.bf16.msra.mxu1 %v8585_v30  ;;  %v726_v30 = vunpack.c.l.bf16 %v9034_v10  ;;  %v809_v34 = vsel %vm12139_vm2, %v806_v63, %v808_v58  ;;  %v934_v58 = vsel %vm12132_vm0, %v931_v43, %v933_v44  ;;  %v813_v63 = vsel %vm12139_vm2, %v810_v25, %v812_v45  ;;  %v8605_v44 = vld [vmem:[%s12128_s6 + $0x118] sm:$0xff]  }
  0x28   : > { %7451 = vmatprep.subr.bf16.mxu0 %v8587_v36  ;;  %8267 = vmatprep.subr.bf16.mxu1 %v8588_v42  ;;  %v1126_v36 = vand.u32 15, %v8984_v41  ;;  %v8595_v41 = vld [vmem:[%s12128_s6 + $0xf0] sm:$0xff]   ;;  %v9131_v57 = vpack.c.bf16 %v811_v39, %v809_v34  ;;  %v9204_v25 = vpack.c.bf16 %v815_v0, %v813_v63  ;;  %v9226_v39 = vld [vmem:[%s8956_s25 + $0x40] sm:$0xff]   ;;  %v12502_v63 = vmov 0 }
  0x29   : > { %v12136_v59 = vunpack.c.l.bf16 %v9226_v39  ;;  %v12503_v63 = vsel %vm9255_vm12, 4294967295, %v12502_v63 }
  0x2a   : > { %vm9121_vm13 = vcmp.lt.s32.totalorder %v1126_v36, 15  ;;  %12494 = vst [vmem:[#allocation12_spill] sm:$0xff] %v9204_v25  ;;  %v1029_v36 = vadd.s32 48, %v8891_v8  ;;  %12504 = vst [vmem:[#allocation14_spill] sm:$0xff] %v12503_v63 }
  0x2b   : > { %7452 = vmatpush3.bf16.msra.mxu0 %v8589_v48  ;;  %8268 = vmatpush3.bf16.msra.mxu1 %v8588_v42  ;;  %v929_v42 = vrot.slane %v726_v30, 1  ;;  %v928_v48 = vsel %vm12132_vm0, %v925_v20, %v927_v40  ;;  %vm9171_vm1 = vmpackc.low %vm9121_vm13, %vm12140_vm7  ;;  %v9182_v20 = vld [vmem:[%s8956_s25 + $0x38] sm:$0xff]  }
  0x2c   : > { %8301 = vmatprep.subr.bf16.mxu0 %v8590_v56  ;;  %7573 = vmatprep.subr.bf16.mxu1 %v8591_v61  ;;  %v12483_v61 = vmov 0  ;;  %v12490_v15 = vsel %vm9171_vm1, 4294967295, %v12489_v15  ;;  %vm9273_vm13 = vmpackc.low %vm9217_vm5, %vm12140_vm7 }
  0x2d   : > { %v930_v53 = vsel %vm12132_vm0, %v927_v40, %v929_v42  ;;  %v932_v54 = vsel %vm12132_vm0, %v929_v42, %v931_v43  ;;  %v12484_v61 = vsel %vm9141_vm14, 4294967295, %v12483_v61  ;;  %12491 = vst [vmem:[#allocation11_spill] sm:$0xff] %v12490_v15 }
  0x2e   : > { %6347 = vmatmul.mubr.msk.bf16.vlgmr.msra.gmra.mxu0 %vm9041_vm9, %v6346_v18  ;;  %8270 = vmatmul.mubr.msk.bf16.vlgmr.msra.gmra.mxu1 %vm9054_vm10, %v9045_v14  ;;  %12485 = vst [vmem:[#allocation9_spill] sm:$0xff] %v12484_v61  ;;  %v9145_v62 = vpack.c.bf16 %v930_v53, %v928_v48  ;;  %v9157_v3 = vpack.c.bf16 %v934_v58, %v932_v54  ;;  %v816_v18 = vrot.slane %v724_v9, 7  ;;  %v1105_v48 = vand.u32 15, %v1029_v36 }
  0x2f   : > { %8302 = vmatpush3.bf16.msra.mxu0 %v8590_v56  ;;  %7574 = vmatpush3.bf16.msra.mxu1 %v8592_v22  ;;  %v9126_v56 = vld [vmem:[%s8956_s25 + $0x28] sm:$0xff]   ;;  %v12144_v53 = vunpack.c.l.bf16 %v9182_v20  ;;  %v1038_v54 = vadd.s32 120, %v8891_v8  ;;  %v12137_v58 = vunpack.c.h.bf16 %v9182_v20  ;;  %v820_v36 = vrot.slane %v726_v30, 7 }
  0x30   : > { %1921 = vmatprep.mubr.bf16.mxu0 %v8980_v38  ;;  %8273 = vmatprep.mubr.msk.bf16.mxu1 %vm9067_vm11, %v9089_v33  ;;  %v12150_v4 = vunpack.c.l.bf16 %v9126_v56  ;;  %v12149_v11 = vunpack.c.h.bf16 %v9126_v56  ;;  %v817_v43 = vsel %vm12139_vm2, %v814_v47, %v816_v18  ;;  %v819_v45 = vsel %vm12139_vm2, %v816_v18, %v9198_v23 }
  0x31   : > { %7575 = vmatprep.subr.bf16.mxu1 %v8594_v31  ;;  %8303 = vmatprep.subr.bf16.mxu0 %v8597_v37  ;;  %v12499_v47 = vmov 0  ;;  %v945_v6 = vrot.slane %v12144_v53, 1  ;;  %v12506_v18 = vmov 0  ;;  %vm9293_vm3 = vcmp.gt.s32.totalorder %v1105_v48, 0 }
  0x32   : > { %v937_v52 = vrot.slane %v12150_v4, 1  ;;  %v939_v9 = vrot.slane %v12149_v11, 1  ;;  %v12500_v47 = vsel %vm9242_vm6, 4294967295, %v12499_v47  ;;  %v12507_v18 = vsel %vm9273_vm13, 4294967295, %v12506_v18 }
  0x33   : > { %8304 = vmatpush3.bf16.msra.mxu0 %v8597_v37  ;;  %7576 = vmatpush3.bf16.msra.mxu1 %v8595_v41  ;;  %v8602_v37 = vld [vmem:[%s12128_s6 + $0xe0] sm:$0xff]   ;;  %v12145_v41 = vunpack.c.h.bf16 %v9136_v60  ;;  %12501 = vst [vmem:[#allocation13_spill] sm:$0xff] %v12500_v47  ;;  %12508 = vst [vmem:[#allocation16_spill] sm:$0xff] %v12507_v18  ;;  %v9314_v30 = vrot.slane %v727_v32, 7  ;;  %v1046_v53 = vadd.s32 184, %v8891_v8  ;;  %v12538_v11 = vmov 0 }
  0x34   : > { %7577 = vmatprep.subr.bf16.mxu1 %v8598_v49  ;;  %v938_v31 = vsel %vm12132_vm0, %v935_v51, %v937_v52  ;;  %v940_v40 = vsel %vm12132_vm0, %v937_v52, %v939_v9  ;;  %v942_v42 = vsel %vm12132_vm0, %v939_v9, %v941_v28  ;;  %8305 = vmatprep.subr.bf16.mxu0 %v8604_v21  ;;  %v9265_v51 = vld [vmem:[%s8956_s25 + $0x48] sm:$0xff]   ;;  %v947_v52 = vrot.slane %v12137_v58, 1 }
  0x35   : > { %v9246_v55 = vpack.c.bf16 %v938_v31, %v936_v29  ;;  %v943_v49 = vrot.slane %v12145_v41, 1  ;;  %v9259_v0 = vpack.c.bf16 %v942_v42, %v940_v40  ;;  %12505 = vst [vmem:[#allocation15_spill] sm:$0xff] %v9265_v51  ;;  %v949_v9 = vrot.slane %v12136_v59, 1  ;;  %v8608_v29 = vld [vmem:[%s12128_s6 + $0x110] sm:$0xff]   ;;  %v8611_v40 = vld [vmem:[%s12128_s6 + $0x160] sm:$0xff]  }
  0x36   : > { %6350 = vmatmul.mubr.msk.bf16.gmra.mxu0 %vm9141_vm14, %v9131_v57  ;;  %8274 = vmatmul.mubr.msk.bf16.gmra.mxu1 %vm9153_vm15, %v9145_v62  ;;  %v948_v42 = vsel %vm12132_vm0, %v945_v6, %v947_v52  ;;  %v12520_v31 = vmov 0  ;;  %v9382_v59 = vld [vmem:[%s8956_s25 + $0x60] sm:$0xff]   ;;  %v12640_v61 = vmov 0 }
  0x37   : > { %1929 = vmatprep.mubr.bf16.mxu0 %v8991_v46  ;;  %8277 = vmatprep.mubr.msk.bf16.mxu1 %vm9171_vm1, %v9157_v3  ;;  %v944_v22 = vsel %vm12132_vm0, %v941_v28, %v943_v49  ;;  %v946_v28 = vsel %vm12132_vm0, %v943_v49, %v945_v6  ;;  %v12134_v6 = vunpack.c.h.bf16 %v9226_v39  ;;  %12529 = vst [vmem:[#allocation23_spill] sm:$0xff] %v9382_v59 }
  0x38   : > { %7578 = vmatpush3.bf16.msra.mxu1 %v8599_v7  ;;  %8306 = vmatpush3.bf16.msra.mxu0 %v8604_v21  ;;  %v1168_v7 = vand.u32 15, %v1038_v54  ;;  %v9277_v21 = vpack.c.bf16 %v819_v45, %v817_v43  ;;  %v950_v43 = vsel %vm12132_vm0, %v947_v52, %v949_v9  ;;  %v9324_v48 = vpack.c.bf16 %v946_v28, %v944_v22  ;;  %vm9340_vm0 = vmpackc.low %vm12140_vm7, %vm9293_vm3  ;;  %v8613_v54 = vld [vmem:[%s12128_s6 + $0xc8] sm:$0xff]  }
  0x39   : > { %7579 = vmatprep.subr.bf16.mxu1 %v8601_v12  ;;  %v1040_v12 = vadd.s32 136, %v8891_v8  ;;  %v9330_v49 = vpack.c.bf16 %v950_v43, %v948_v42  ;;  %8307 = vmatprep.subr.bf16.mxu0 %v8611_v40  ;;  %v12517_v22 = vmov 0  ;;  %v1042_v52 = vadd.s32 152, %v8891_v8 }
  0x3a   : > { %vm9320_vm4 = vcmp.lt.s32.totalorder %v1168_v7, 15  ;;  %v8612_v7 = vld [vmem:[%s12128_s6 + $0x108] sm:$0xff]   ;;  %v12518_v22 = vsel %vm9340_vm0, 4294967295, %v12517_v22  ;;  %v12138_v28 = vunpack.c.l.bf16 %v9285_v26  ;;  %v1044_v43 = vadd.s32 168, %v8891_v8 }
  0x3b   : > { %v1182_v34 = vand.u32 15, %v1040_v12  ;;  %12516 = vst [vmem:[#allocation18_spill] sm:$0xff] %v9330_v49  ;;  %v12135_v12 = vunpack.c.l.bf16 %v9265_v51  ;;  %12519 = vst [vmem:[#allocation19_spill] sm:$0xff] %v12518_v22 }
  0x3c   : > { %7580 = vmatpush3.bf16.msra.mxu1 %v8602_v37  ;;  %v8609_v37 = vld [vmem:[%s12128_s6 + $0xd0] sm:$0xff]   ;;  %8308 = vmatpush3.bf16.msra.mxu0 %v8611_v40  ;;  %vm9352_vm8 = vmpackc.low %vm9320_vm4, %vm12140_vm7  ;;  %v12524_v40 = vmov 0  ;;  %v1210_v58 = vand.u32 15, %v1044_v43  ;;  %v8618_v43 = vld [vmem:[%s12128_s6 + $0x158] sm:$0xff]  }
  0x3d   : > { %7581 = vmatprep.subr.bf16.mxu1 %v8605_v44  ;;  %v1031_v44 = vadd.s32 64, %v8891_v8  ;;  %vm9326_vm5 = vcmp.lt.s32.totalorder %v1182_v34, 15  ;;  %v12521_v31 = vsel %vm9352_vm8, 4294967295, %v12520_v31  ;;  %v823_v34 = vsel %vm12139_vm2, %v820_v36, %v9314_v30  ;;  %8309 = vmatprep.subr.bf16.mxu0 %v8618_v43 }
  0x3e   : > { %6353 = vmatmul.mubr.msk.bf16.gmra.mxu0 %vm9242_vm6, %v9204_v25  ;;  %8278 = vmatmul.mubr.msk.bf16.gmra.mxu1 %vm9255_vm12, %v9246_v55  ;;  %12522 = vst [vmem:[#allocation20_spill] sm:$0xff] %v12521_v31  ;;  %v953_v42 = vrot.slane %v12135_v12, 1  ;;  %vm9369_vm3 = vmpackc.low %vm9326_vm5, %vm12140_vm7  ;;  %v957_v12 = vrot.slane %v12138_v28, 1  ;;  %vm12530_vm5 = vcmask 1046528   ;;  %v824_v28 = vrot.slane %v728_v35, 7 }
  0x3f   : > { %1937 = vmatprep.mubr.bf16.mxu0 %v9017_v2  ;;  %8281 = vmatprep.mubr.msk.bf16.mxu1 %vm9273_vm13, %v9259_v0  ;;  %v1119_v32 = vand.u32 15, %v1031_v44  ;;  %v9364_v44 = vld [vmem:[%s8956_s25 + $0x58] sm:$0xff]   ;;  %v12525_v40 = vsel %vm9369_vm3, 4294967295, %v12524_v40  ;;  %v9413_v35 = vrot.slane %v729_v1, 7  ;;  %vm9418_vm9 = vcmp.lt.s32.totalorder %v1210_v58, 15  ;;  %v8616_v1 = vld [vmem:[%s12128_s6 + $0xc0] sm:$0xff]  }
  0x40   : > { %7582 = vmatpush3.bf16.msra.mxu1 %v8606_v17  ;;  %v821_v17 = vsel %vm12139_vm2, %v9198_v23, %v820_v36  ;;  %v951_v23 = vrot.slane %v12134_v6, 1  ;;  %12523 = vst [vmem:[#allocation21_spill] sm:$0xff] %v9364_v44  ;;  %12526 = vst [vmem:[#allocation22_spill] sm:$0xff] %v12525_v40  ;;  %v1196_v36 = vand.u32 15, %v1042_v52  ;;  %8310 = vmatpush3.bf16.msra.mxu0 %v8618_v43  ;;  %v12548_v43 = vmov 0 }
  0x41   : > { %7583 = vmatprep.subr.bf16.mxu1 %v8608_v29  ;;  %v12143_v29 = vunpack.c.h.bf16 %v9265_v51  ;;  %vm9373_vm4 = vcmp.gt.s32.totalorder %v1119_v32, 0  ;;  %v8615_v32 = vld [vmem:[%s12128_s6 + $0x100] sm:$0xff]   ;;  %v9393_v52 = vpack.c.bf16 %v823_v34, %v821_v17  ;;  %vm12531_vm2 = vmmov %vm12530_vm5  ;;  %v8626_v34 = vld [vmem:[%s12128_s6 + $0x148] sm:$0xff]   ;;  %vm12583_vm12 = vcmask 1046528  }
  0x42   : > { %vm9406_vm7 = vcmp.lt.s32.totalorder %v1196_v36, 15  ;;  %v12154_v36 = vunpack.c.h.bf16 %v9285_v26  ;;  %vm12584_vm1 = vmmov %vm12583_vm12 }
  0x43   : > { %v955_v6 = vrot.slane %v12143_v29, 1  ;;  %v12155_v29 = vunpack.c.l.bf16 %v9364_v44 }
  0x44   : > { %7584 = vmatpush3.bf16.msra.mxu1 %v8609_v37  ;;  %v952_v37 = vsel %vm12530_vm5, %v949_v9, %v951_v23  ;;  %vm12534_vm5 = vmmov %vm12531_vm2 }
  0x45   : > { %7585 = vmatprep.subr.bf16.mxu1 %v8612_v7  ;;  %v954_v7 = vsel %vm12531_vm2, %v951_v23, %v953_v42  ;;  %v956_v9 = vsel %vm12534_vm5, %v953_v42, %v955_v6  ;;  %v1033_v23 = vadd.s32 80, %v8891_v8  ;;  %v9431_v42 = vld [vmem:[%s12128_s6 + $0x238] sm:$0xff]   ;;  %v958_v58 = vsel %vm12531_vm2, %v955_v6, %v957_v12 }
  0x46   : > { %6356 = vmatmul.mubr.msk.bf16.gmra.mxu0 %vm9340_vm0, %v9277_v21  ;;  %8282 = vmatmul.mubr.msk.bf16.gmra.mxu1 %vm9352_vm8, %v9324_v48  ;;  %vm12537_vm5 = vmmov 1   ;;  %v9447_v6 = vpack.c.bf16 %v954_v7, %v952_v37  ;;  %vm12542_vm2 = vcmask 1040384   ;;  %v959_v37 = vrot.slane %v12154_v36, 1  ;;  %v9466_v7 = vld [vmem:[%s8956_s25 + $0x68] sm:$0xff]  }
  0x47   : > { %1945 = vmatprep.mubr.bf16.mxu0 %v9034_v10  ;;  %8285 = vmatprep.mubr.msk.bf16.mxu1 %vm9369_vm3, %v9330_v49  ;;  %vm9443_vm3 = vmpackc.low %vm12537_vm5, %vm9373_vm4  ;;  %v825_v4 = vsel %vm12542_vm2, %v9314_v30, %v824_v28  ;;  %v1133_v41 = vand.u32 15, %v1033_v23  ;;  %v961_v30 = vrot.slane %v12155_v29, 1  ;;  %12547 = vst [vmem:[#allocation27_spill] sm:$0xff] %v9466_v7  ;;  %v9475_v17 = vpack.c.bf16 %v958_v58, %v956_v9  ;;  %v9491_v58 = vld [vmem:[%s8956_s25 + $0x70] sm:$0xff]   ;;  %v9549_v49 = vld [vmem:[%s8956_s25 + $0x78] sm:$0xf] }
  0x48   : > { %7586 = vmatpush3.bf16.msra.mxu1 %v8613_v54  ;;  %v8622_v54 = vld [vmem:[%s12128_s6 + $0x150] sm:$0xff]   ;;  %v12539_v11 = vsel %vm9443_vm3, 4294967295, %v12538_v11  ;;  %12541 = vst [vmem:[#allocation25_spill] sm:$0xff] %v9447_v6  ;;  %vm9455_vm8 = vmpackc.low %vm9406_vm7, %vm12537_vm5  ;;  %v12552_v23 = vunpack.c.h.bf16 %v9364_v44  ;;  %v12553_v36 = vunpack.c.l.bf16 %v9382_v59 }
  0x49   : > { %7587 = vmatprep.subr.bf16.mxu1 %v8615_v32  ;;  %12540 = vst [vmem:[#allocation24_spill] sm:$0xff] %v12539_v11  ;;  %v12543_v32 = vmov 0  ;;  %vm12546_vm4 = vmmov %vm12542_vm2  ;;  %8311 = vmatprep.subr.bf16.mxu0 %v8622_v54  ;;  %vm12557_vm2 = vcmask 1046528  }
  0x4a   : > { %v12544_v32 = vsel %vm9455_vm8, 4294967295, %v12543_v32  ;;  %v827_v45 = vsel %vm12546_vm4, %v824_v28, %v9413_v35  ;;  %vm9471_vm7 = vmpackc.low %vm9418_vm9, %vm12537_vm5  ;;  %12551 = vst [vmem:[#allocation29_spill] sm:$0xff] %v9475_v17  ;;  %v1224_v28 = vand.u32 15, %v1046_v53  ;;  %v963_v5 = vrot.slane %v12552_v23, 1  ;;  %8312 = vmatpush3.bf16.msra.mxu0 %v8622_v54 }
  0x4b   : > { %12545 = vst [vmem:[#allocation26_spill] sm:$0xff] %v12544_v32  ;;  %v12549_v43 = vsel %vm9471_vm7, 4294967295, %v12548_v43  ;;  %v965_v29 = vrot.slane %v12553_v36, 1  ;;  %v9488_v9 = vpack.c.bf16 %v827_v45, %v825_v4  ;;  %v1238_v53 = vand.u32 15, %v1048_v16  ;;  %12554 = vst [vmem:[#allocation30_spill] sm:$0xff] %v9491_v58  ;;  %8313 = vmatprep.subr.bf16.mxu0 %v8626_v34 }
  0x4c   : > { %12550 = vst [vmem:[#allocation28_spill] sm:$0xff] %v12549_v43  ;;  %7588 = vmatpush3.bf16.msra.mxu1 %v8616_v1  ;;  %vm9497_vm9 = vcmp.gt.s32.totalorder %v1133_v41, 0  ;;  %v960_v1 = vsel %vm12557_vm2, %v957_v12, %v959_v37  ;;  %v1035_v23 = vadd.s32 96, %v8891_v8  ;;  %vm12558_vm4 = vmmov %vm12557_vm2  ;;  %vm9508_vm13 = vcmp.lt.s32.totalorder %v1224_v28, 15 }
  0x4d   : > { %8349 = vmatprep.subr.bf16.mxu1 %v9431_v42  ;;  %v962_v16 = vsel %vm12558_vm4, %v959_v37, %v961_v30  ;;  %v966_v12 = vsel %vm12557_vm2, %v963_v5, %v965_v29  ;;  %v1050_v32 = vadd.s32 216, %v8891_v8  ;;  %v8630_v37 = vld [vmem:[%s12128_s6 + $0x140] sm:$0xff]   ;;  %vm1588_vm4 = vcmp.lt.s32.totalorder %v1238_v53, 15  ;;  %12573 = vst [vmem:[#allocation34_spill] sm:$0xff] %v9549_v49 }
  0x4e   : > { %6359 = vmatmul.mubr.msk.bf16.gmra.mxu0 %vm9443_vm3, %v9393_v52  ;;  %8286 = vmatmul.mubr.msk.bf16.gmra.mxu1 %vm9455_vm8, %v9447_v6  ;;  %vm12561_vm8 = vmmov %vm12557_vm2  ;;  %v12563_v54 = vunpack.c.h.bf16 %v9126_v56  ;;  %v12564_v4 = vmov 0  ;;  %v9533_v43 = vpack.c.bf16 %v962_v16, %v960_v1  ;;  %v12568_v53 = vunpack.c.h.bf16 %v9382_v59 }
  0x4f   : > { %1953 = vmatprep.mubr.bf16.mxu0 %v9076_v27  ;;  %8289 = vmatprep.mubr.msk.bf16.mxu1 %vm9471_vm7, %v9475_v17  ;;  %v964_v41 = vsel %vm12561_vm8, %v961_v30, %v963_v5  ;;  %v12562_v30 = vunpack.c.l.bf16 %v9126_v56  ;;  %v1052_v5 = vadd.s32 232, %v8891_v8  ;;  %vm9529_vm8 = vmpackc.low %vm12537_vm5, %vm9497_vm9  ;;  %v1147_v17 = vand.u32 15, %v1035_v23 }
  0x50   : > { %v830_v13 = vrot.slane %v12563_v54, 7  ;;  %v12565_v4 = vsel %vm9529_vm8, 4294967295, %v12564_v4  ;;  %12567 = vst [vmem:[#allocation32_spill] sm:$0xff] %v9533_v43  ;;  %v967_v6 = vrot.slane %v12568_v53, 1  ;;  %vm9540_vm2 = vmpackc.low %vm9508_vm13, %vm12537_vm5  ;;  %v9544_v54 = vpack.c.bf16 %v966_v12, %v964_v41  ;;  %8314 = vmatpush3.bf16.msra.mxu0 %v8626_v34  ;;  %v8633_v41 = vld [vmem:[%s12128_s6 + $0x1f8] sm:$0xff]  }
  0x51   : > { %v828_v28 = vrot.slane %v12562_v30, 7  ;;  %12566 = vst [vmem:[#allocation31_spill] sm:$0xff] %v12565_v4  ;;  %v12569_v30 = vmov 0  ;;  %v12572_v36 = vunpack.c.l.bf16 %v9466_v7  ;;  %vm9552_vm9 = vmpackc.low %vm1588_vm4, %vm12537_vm5  ;;  %v12574_v1 = vmov 0  ;;  %8315 = vmatprep.subr.bf16.mxu0 %v8630_v37 }
  0x52   : > { %v12570_v30 = vsel %vm9540_vm2, 4294967295, %v12569_v30  ;;  %v12575_v1 = vsel %vm9552_vm9, 4294967295, %v12574_v1  ;;  %v1252_v23 = vand.u32 15, %v1050_v32  ;;  %v12577_v16 = vunpack.c.h.bf16 %v9466_v7 }
  0x53   : > { %12571 = vst [vmem:[#allocation33_spill] sm:$0xff] %v12570_v30  ;;  %v969_v40 = vrot.slane %v12572_v36, 1  ;;  %12576 = vst [vmem:[#allocation35_spill] sm:$0xff] %v12575_v1  ;;  %v12578_v53 = vunpack.c.l.bf16 %v9491_v58  ;;  %v1266_v34 = vand.u32 15, %v1052_v5  ;;  %vm12579_vm13 = vcmask 1040384  }
  0x54   : > { %v971_v45 = vrot.slane %v12577_v16, 1  ;;  %v829_v32 = vsel %vm12579_vm13, %v9413_v35, %v828_v28  ;;  %vm12580_vm4 = vmmov %vm12579_vm13  ;;  %vm9573_vm7 = vcmp.gt.s32.totalorder %v1147_v17, 0  ;;  %v968_v16 = vsel %vm12583_vm12, %v965_v29, %v967_v6  ;;  %8316 = vmatpush3.bf16.msra.mxu0 %v8630_v37 }
  0x55   : > { %v973_v31 = vrot.slane %v12578_v53, 1  ;;  %v831_v12 = vsel %vm12580_vm4, %v828_v28, %v830_v13  ;;  %v970_v5 = vsel %vm12584_vm1, %v967_v6, %v969_v40  ;;  %v1037_v53 = vadd.s32 112, %v8891_v8  ;;  %vm12585_vm4 = vmmov %vm12584_vm1  ;;  %7709 = vmatprep.subr.bf16.mxu0 %v8633_v41 }
  0x56   : > { %6362 = vmatmul.mubr.msk.bf16.gmra.mxu0 %vm9529_vm8, %v9488_v9  ;;  %8290 = vmatmul.mubr.msk.bf16.gmra.mxu1 %vm9540_vm2, %v9533_v43  ;;  %v749_v30 = vunpack.c.h.bf16 %v9491_v58  ;;  %v750_v35 = vunpack.c.l.bf16 %v9549_v49  ;;  %vm1590_vm13 = vcmp.lt.s32.totalorder %v1252_v23, 15  ;;  %v972_v17 = vsel %vm12585_vm4, %v969_v40, %v971_v45  ;;  %vm12586_vm2 = vmmov %vm12584_vm1 }
  0x57   : > { %1961 = vmatprep.mubr.bf16.mxu0 %v9126_v56  ;;  %8293 = vmatprep.mubr.msk.bf16.mxu1 %vm9552_vm9, %v9544_v54  ;;  %v974_v28 = vsel %vm12586_vm2, %v971_v45, %v973_v31  ;;  %v1054_v29 = vadd.s32 248, %v8891_v8  ;;  %v9588_v43 = vpack.c.bf16 %v831_v12, %v829_v32  ;;  %vm1592_vm12 = vcmp.lt.s32.totalorder %v1266_v34, 15  ;;  %vm9593_vm1 = vmpackc.low %vm12537_vm5, %vm9573_vm7 }
  0x58   : > { %v12587_v6 = vmov 0  ;;  %v9597_v49 = vpack.c.bf16 %v970_v5, %v968_v16  ;;  %v12591_v37 = vunpack.c.l.bf16 %v9136_v60  ;;  %v12592_v23 = vunpack.c.h.bf16 %v9136_v60  ;;  %vm9604_vm2 = vmpackc.low %vm1590_vm13, %vm12537_vm5 }
  0x59   : > { %v12588_v6 = vsel %vm9593_vm1, 4294967295, %v12587_v6  ;;  %v12593_v41 = vmov 0  ;;  %v9608_v34 = vpack.c.bf16 %v974_v28, %v972_v17  ;;  %v1161_v32 = vand.u32 15, %v1037_v53  ;;  %vm9613_vm7 = vmpackc.low %vm1592_vm12, %vm12537_vm5 }
  0x5a   : > { %12589 = vst [vmem:[#allocation36_spill] sm:$0xff] %v12588_v6  ;;  %12590 = vst [vmem:[#allocation37_spill] sm:$0xff] %v9597_v49  ;;  %v832_v40 = vrot.slane %v12591_v37, 7  ;;  %v834_v45 = vrot.slane %v12592_v23, 7  ;;  %v12594_v41 = vsel %vm9604_vm2, 4294967295, %v12593_v41  ;;  %v975_v12 = vrot.slane %v749_v30, 1 }
  0x5b   : > { %12595 = vst [vmem:[#allocation38_spill] sm:$0xff] %v12594_v41  ;;  %12596 = vst [vmem:[#allocation39_spill] sm:$0xff] %v9608_v34  ;;  %v9610_v36 = vrot.slane %v750_v35, 1  ;;  %v12598_v16 = vmov 0  ;;  %v1280_v5 = vand.u32 15, %v1054_v29  ;;  %v1039_v37 = vadd.s32 128, %v8891_v8 }
  0x5c   : > { %v12599_v16 = vsel %vm9613_vm7, 4294967295, %v12598_v16  ;;  %vm12601_vm13 = vcmask 1040384   ;;  %vm1505_vm12 = vcmp.gt.s32.totalorder %v1161_v32, 0  ;;  %vm12603_vm9 = vcmask 1046528  }
  0x5d   : > { %12597 = vst [vmem:[#allocation40_spill] sm:$0xff] %v9610_v36  ;;  %12600 = vst [vmem:[#allocation41_spill] sm:$0xff] %v12599_v16  ;;  %v833_v53 = vsel %vm12601_vm13, %v830_v13, %v832_v40  ;;  %v976_v28 = vsel %vm12603_vm9, %v973_v31, %v975_v12  ;;  %vm1594_vm11 = vcmp.lt.s32.totalorder %v1280_v5, 15  ;;  %v12605_v41 = vunpack.c.l.bf16 %v9182_v20 }
  0x5e   : > { %6365 = vmatmul.mubr.msk.bf16.gmra.mxu0 %vm9593_vm1, %v9588_v43  ;;  %8294 = vmatmul.mubr.msk.bf16.gmra.mxu1 %vm9604_vm2, %v9597_v49  ;;  %vm12602_vm4 = vmmov %vm12601_vm13  ;;  %v12606_v13 = vmov 0  ;;  %v12610_v32 = vunpack.c.h.bf16 %v9182_v20  ;;  %v1175_v31 = vand.u32 15, %v1039_v37  ;;  %v1041_v37 = vadd.s32 144, %v8891_v8 }
  0x5f   : > { %1969 = vmatprep.mubr.bf16.mxu0 %v9136_v60  ;;  %v835_v17 = vsel %vm12602_vm4, %v832_v40, %v834_v45  ;;  %8297 = vmatprep.mubr.msk.bf16.mxu1 %vm9613_vm7, %v9608_v34  ;;  %vm12604_vm15 = vmmov %vm12603_vm9  ;;  %v836_v49 = vrot.slane %v12605_v41, 7  ;;  %v8623_v34 = vld [vmem:[%s12128_s6 + $0x230] sm:$0xff]  }
  0x60   : > { %v978_v29 = vsel %vm12604_vm15, %v975_v12, %v9610_v36  ;;  %v9633_v23 = vpack.c.bf16 %v835_v17, %v833_v53  ;;  %vm9638_vm13 = vmpackc.low %vm12537_vm5, %vm1505_vm12  ;;  %v838_v16 = vrot.slane %v12610_v32, 7  ;;  %v12611_v12 = vmov 0 }
  0x61   : > { %v12607_v13 = vsel %vm9638_vm13, 4294967295, %v12606_v13  ;;  %v9642_v40 = vpack.c.bf16 %v978_v29, %v976_v28  ;;  %vm9647_vm9 = vmpackc.low %vm1594_vm11, %vm12537_vm5  ;;  %vm1507_vm12 = vcmp.gt.s32.totalorder %v1175_v31, 0  ;;  %v12615_v53 = vunpack.c.h.bf16 %v9466_v7 }
  0x62   : > { %12608 = vst [vmem:[#allocation42_spill] sm:$0xff] %v12607_v13  ;;  %v12612_v12 = vsel %vm9647_vm9, 4294967295, %v12611_v12  ;;  %vm12614_vm15 = vmmov %vm12602_vm4  ;;  %v839_v5 = vsel %vm12602_vm4, %v836_v49, %v838_v16  ;;  %v12616_v28 = vunpack.c.l.bf16 %v9491_v58  ;;  %v866_v32 = vrot.slane %v749_v30, 7 }
  0x63   : > { %12609 = vst [vmem:[#allocation43_spill] sm:$0xff] %v9642_v40  ;;  %12613 = vst [vmem:[#allocation44_spill] sm:$0xff] %v12612_v12  ;;  %v837_v41 = vsel %vm12614_vm15, %v834_v45, %v836_v49  ;;  %v9664_v17 = vrot.slane %v12615_v53, 7  ;;  %v12617_v12 = vunpack.c.l.bf16 %v9226_v39  ;;  %v12618_v49 = vunpack.c.h.bf16 %v9226_v39 }
  0x64   : > { %v864_v29 = vrot.slane %v12616_v28, 7  ;;  %v9668_v36 = vpack.c.bf16 %v839_v5, %v837_v41  ;;  %vm12619_vm11 = vmmov %vm12602_vm4  ;;  %v12620_v53 = vmov 0  ;;  %v1189_v28 = vand.u32 15, %v1041_v37 }
  0x65   : > { %v840_v45 = vrot.slane %v12617_v12, 7  ;;  %v842_v31 = vrot.slane %v12618_v49, 7  ;;  %vm9680_vm15 = vmpackc.low %vm12537_vm5, %vm1507_vm12  ;;  %v1043_v30 = vadd.s32 160, %v8891_v8  ;;  %v868_v49 = vrot.slane %v750_v35, 7 }
  0x66   : > { %6368 = vmatmul.mubr.msk.bf16.gmra.mxu0 %vm9638_vm13, %v9633_v23  ;;  %8298 = vmatmul.mubr.msk.bf16.gmra.mxu1 %vm9647_vm9, %v9642_v40  ;;  %v865_v40 = vsel %vm12619_vm11, %v9664_v17, %v864_v29  ;;  %v12621_v53 = vsel %vm9680_vm15, 4294967295, %v12620_v53  ;;  %v867_v41 = vsel %vm12602_vm4, %v864_v29, %v866_v32  ;;  %vm12624_vm12 = vmmov %vm12602_vm4  ;;  %vm1509_vm9 = vcmp.gt.s32.totalorder %v1189_v28, 0 }
  0x67   : > { %1977 = vmatprep.mubr.bf16.mxu0 %v9182_v20  ;;  %2460 = vmatprep.mubr.bf16.mxu1 %v8980_v38  ;;  %v9677_v38 = vld [vmem:[%s8956_s25 + $0x7c] sm:$0xf]  ;;  %12622 = vst [vmem:[#allocation45_spill] sm:$0xff] %v12621_v53  ;;  %v9687_v5 = vpack.c.bf16 %v867_v41, %v865_v40  ;;  %v841_v37 = vsel %vm12624_vm12, %v838_v16, %v840_v45  ;;  %vm12625_vm11 = vmmov %vm12602_vm4  ;;  %v1203_v40 = vand.u32 15, %v1043_v30  ;;  %v12629_v30 = vunpack.c.h.bf16 %v9265_v51 }
  0x68   : > { %v12213_v12 = vunpack.c.l.bf16 %v9677_v38  ;;  %v869_v29 = vsel %vm12625_vm11, %v866_v32, %v868_v49  ;;  %v843_v35 = vsel %vm12602_vm4, %v840_v45, %v842_v31  ;;  %vm12626_vm7 = vmmov %vm12602_vm4  ;;  %v12628_v45 = vunpack.c.l.bf16 %v9265_v51 }
  0x69   : > { %12623 = vst [vmem:[#allocation46_spill] sm:$0xff] %v9687_v5  ;;  %v9715_v32 = vpack.c.bf16 %v843_v35, %v841_v37  ;;  %vm9726_vm12 = vcmp.gt.s32.totalorder %v1203_v40, 0  ;;  %v12636_v37 = vunpack.c.h.bf16 %v9285_v26  ;;  %vm12638_vm11 = vmmov %vm12602_vm4 }
  0x6a   : > { %v9694_v1 = vrot.slane %v12213_v12, 7  ;;  %v844_v28 = vrot.slane %v12628_v45, 7  ;;  %v846_v12 = vrot.slane %v12629_v30, 7  ;;  %v1045_v45 = vadd.s32 176, %v8891_v8  ;;  %v8631_v30 = vld [vmem:[%s12128_s6 + $0x220] sm:$0xff]  }
  0x6b   : > { %12627 = vst [vmem:[#allocation47_spill] sm:$0xff] %v9715_v32  ;;  %v850_v35 = vrot.slane %v12636_v37, 7  ;;  %v8635_v37 = vld [vmem:[%s12128_s6 + $0x218] sm:$0xff]  }
  0x6c   : > { %v871_v41 = vsel %vm12626_vm7, %v868_v49, %v9694_v1  ;;  %vm9722_vm7 = vmpackc.low %vm12537_vm5, %vm1509_vm9 }
  0x6d   : > { %v9710_v16 = vpack.c.bf16 %v871_v41, %v869_v29  ;;  %v12635_v29 = vunpack.c.l.bf16 %v9285_v26  ;;  %vm12637_vm9 = vmmov %vm12602_vm4 }
  0x6e   : > { %6371 = vmatmul.mubr.msk.bf16.gmra.mxu0 %vm9680_vm15, %v9668_v36  ;;  %6515 = vmatmul.mubr.msk.bf16.vlgmr.msra.gmra.mxu1 %vm9141_vm14, %v9131_v57  ;;  %v8627_v57 = vld [vmem:[%s12128_s6 + $0x228] sm:$0xff]   ;;  %v845_v40 = vsel %vm12637_vm9, %v842_v31, %v844_v28  ;;  %vm9756_vm4 = vmpackc.low %vm12537_vm5, %vm9726_vm12  ;;  %v1217_v31 = vand.u32 15, %v1045_v45 }
  0x6f   : > { %1985 = vmatprep.mubr.bf16.mxu0 %v9226_v39  ;;  %8350 = vmatpush3.bf16.msra.mxu1 %v9431_v42  ;;  %v12630_v42 = vmov 0  ;;  %v848_v41 = vrot.slane %v12635_v29, 7  ;;  %v847_v29 = vsel %vm12638_vm11, %v844_v28, %v846_v12  ;;  %v12641_v61 = vsel %vm9756_vm4, 4294967295, %v12640_v61  ;;  %vm12645_vm12 = vmmov %vm12637_vm9 }
  0x70   : > { %2468 = vmatprep.mubr.bf16.mxu1 %v8991_v46  ;;  %8351 = vmatprep.subr.bf16.mxu1 %v8623_v34  ;;  %v12631_v42 = vsel %vm9722_vm7, 4294967295, %v12630_v42  ;;  %12642 = vst [vmem:[#allocation50_spill] sm:$0xff] %v12641_v61  ;;  %v12643_v28 = vunpack.c.l.bf16 %v9364_v44  ;;  %vm1513_vm11 = vcmp.gt.s32.totalorder %v1217_v31, 0  ;;  %v12701_v61 = vld [vmem:[#allocation34_spill] sm:$0xff] }
  0x71   : > { %12632 = vst [vmem:[#allocation48_spill] sm:$0xff] %v12631_v42  ;;  %v851_v49 = vsel %vm12637_vm9, %v848_v41, %v850_v35  ;;  %vm9784_vm14 = vmpackc.low %vm12537_vm5, %vm1513_vm11  ;;  %v12706_v42 = vld [vmem:[#allocation44_spill] sm:$0xff] }
  0x72   : > { %v852_v47 = vrot.slane %v12643_v28, 7  ;;  %vm12652_vm11 = vmmov %vm12637_vm9  ;;  %v8655_v28 = vld [vmem:[%s12129_s7 + $0x78] sm:$0xff]  }
  0x73   : > { %8352 = vmatpush3.bf16.msra.mxu1 %v8623_v34  ;;  %v9751_v34 = vpack.c.bf16 %v847_v29, %v845_v40  ;;  %v12647_v29 = vmov 0 }
  0x74   : > { %8353 = vmatprep.subr.bf16.mxu1 %v8627_v57  ;;  %v12648_v29 = vsel %vm9784_vm14, 4294967295, %v12647_v29 }
  0x75   : > { %12639 = vst [vmem:[#allocation49_spill] sm:$0xff] %v9751_v34  ;;  %12649 = vst [vmem:[#allocation52_spill] sm:$0xff] %v12648_v29  ;;  %v12688_v29 = vld [vmem:[#allocation26_spill] sm:$0xff] }
  0x76   : > { %6374 = vmatmul.mubr.msk.bf16.gmra.mxu0 %vm9722_vm7, %v9715_v32  ;;  %6518 = vmatmul.mubr.msk.bf16.gmra.mxu1 %vm9242_vm6, %v9204_v25  ;;  %v12644_v25 = vunpack.c.h.bf16 %v9364_v44 }
  0x77   : > { %1993 = vmatprep.mubr.bf16.mxu0 %v9265_v51  ;;  %2476 = vmatprep.mubr.bf16.mxu1 %v9017_v2  ;;  %v1047_v2 = vadd.s32 192, %v8891_v8 }
  0x78   : > { %8354 = vmatpush3.bf16.msra.mxu1 %v8627_v57  ;;  %v854_v46 = vrot.slane %v12644_v25, 7  ;;  %v8640_v57 = vld [vmem:[%s12128_s6 + $0x210] sm:$0xff]   ;;  %v849_v25 = vsel %vm12645_vm12, %v846_v12, %v848_v41  ;;  %v8650_v41 = vld [vmem:[%s12128_s6 + $0x200] sm:$0xff]  }
  0x79   : > { %8355 = vmatprep.subr.bf16.mxu1 %v8631_v30  ;;  %v1231_v45 = vand.u32 15, %v1047_v2  ;;  %v9781_v40 = vpack.c.bf16 %v851_v49, %v849_v25  ;;  %v1049_v2 = vadd.s32 208, %v8891_v8  ;;  %v12654_v25 = vmov 0 }
  0x7a   : > { %v855_v31 = vsel %vm12652_vm11, %v852_v47, %v854_v46  ;;  %v12658_v49 = vunpack.c.h.bf16 %v9382_v59 }
  0x7b   : > { %12646 = vst [vmem:[#allocation51_spill] sm:$0xff] %v9781_v40  ;;  %vm9788_vm12 = vcmp.gt.s32.totalorder %v1231_v45, 0  ;;  %v1245_v11 = vand.u32 15, %v1049_v2 }
  0x7c   : > { %8356 = vmatpush3.bf16.msra.mxu1 %v8631_v30  ;;  %v8645_v30 = vld [vmem:[%s12128_s6 + $0x208] sm:$0xff]   ;;  %v858_v45 = vrot.slane %v12658_v49, 7 }
  0x7d   : > { %8357 = vmatprep.subr.bf16.mxu1 %v8635_v37  ;;  %vm1517_vm11 = vcmp.gt.s32.totalorder %v1245_v11, 0  ;;  %v1053_v11 = vadd.s32 240, %v8891_v8 }
  0x7e   : > { %6377 = vmatmul.mubr.msk.bf16.gmra.mxu0 %vm9756_vm4, %v9751_v34  ;;  %6521 = vmatmul.mubr.msk.bf16.gmra.mxu1 %vm9340_vm0, %v9277_v21  ;;  %vm9842_vm0 = vmpackc.low %vm12537_vm5, %vm1517_vm11 }
  0x7f   : > { %2001 = vmatprep.mubr.bf16.mxu0 %v9285_v26  ;;  %2484 = vmatprep.mubr.bf16.mxu1 %v9034_v10  ;;  %vm12665_vm11 = vmmov %vm12637_vm9 }
  0x80   : > { %8358 = vmatpush3.bf16.msra.mxu1 %v8635_v37  ;;  %v853_v37 = vsel %vm12637_vm9, %v850_v35, %v852_v47  ;;  %v12657_v47 = vunpack.c.l.bf16 %v9382_v59 }
  0x81   : > { %8359 = vmatprep.subr.bf16.mxu1 %v8640_v57 }
  0x82   : > { %v856_v35 = vrot.slane %v12657_v47, 7  ;;  %v7329_v47 = vld [vmem:[%s615_s28] sm:$0xff]  }
  0x84   : > { %8360 = vmatpush3.bf16.msra.mxu1 %v8640_v57  ;;  %v9810_v57 = vpack.c.bf16 %v855_v31, %v853_v37  ;;  %v859_v37 = vsel %vm12637_vm9, %v856_v35, %v858_v45  ;;  %v12661_v31 = vmov 0 }
  0x85   : > { %8361 = vmatprep.subr.bf16.mxu1 %v8645_v30  ;;  %v12662_v31 = vsel %vm9842_vm0, 4294967295, %v12661_v31 }
  0x86   : > { %6380 = vmatmul.mubr.msk.bf16.gmra.mxu0 %vm9784_vm14, %v9781_v40  ;;  %6524 = vmatmul.mubr.msk.bf16.gmra.mxu1 %vm9443_vm3, %v9393_v52  ;;  %12653 = vst [vmem:[#allocation53_spill] sm:$0xff] %v9810_v57  ;;  %vm9815_vm3 = vmpackc.low %vm12537_vm5, %vm9788_vm12 }
  0x87   : > { %2009 = vmatprep.mubr.bf16.mxu0 %v9364_v44  ;;  %2492 = vmatprep.mubr.bf16.mxu1 %v9076_v27  ;;  %v12655_v25 = vsel %vm9815_vm3, 4294967295, %v12654_v25  ;;  %vm12659_vm12 = vmmov %vm12637_vm9  ;;  %12663 = vst [vmem:[#allocation56_spill] sm:$0xff] %v12662_v31  ;;  %v1056_v31 = vadd.s32 264, %v8891_v8 }
  0x88   : > { %8362 = vmatpush3.bf16.msra.mxu1 %v8645_v30  ;;  %12656 = vst [vmem:[#allocation54_spill] sm:$0xff] %v12655_v25  ;;  %v1051_v30 = vadd.s32 224, %v8891_v8  ;;  %v857_v12 = vsel %vm12659_vm12, %v854_v46, %v856_v35  ;;  %v12664_v46 = vunpack.c.l.bf16 %v9466_v7  ;;  %v12690_v25 = vld [vmem:[#allocation29_spill] sm:$0xff] }
  0x89   : > { %8363 = vmatprep.subr.bf16.mxu1 %v8650_v41 }
  0x8a   : > { %v1259_v2 = vand.u32 15, %v1051_v30  ;;  %v7330_v30 = vunpack.c.l.bf16 %v7329_v47 }
  0x8c   : > { %8364 = vmatpush3.bf16.msra.mxu1 %v8650_v41  ;;  %v9839_v41 = vpack.c.bf16 %v859_v37, %v857_v12  ;;  %vm1519_vm12 = vcmp.gt.s32.totalorder %v1259_v2, 0  ;;  %v12667_v37 = vmov 0  ;;  %v1273_v2 = vand.u32 15, %v1053_v11 }
  0x8d   : > { %7845 = vmatprep.subr.bf16.mxu1 %v8655_v28  ;;  %v860_v28 = vrot.slane %v12664_v46, 7  ;;  %v9867_v46 = vmul.f32 0.0, %v7330_v30  ;;  %v8641_v30 = vld [vmem:[%s12128_s6 + $0x1e0] sm:$0xff]  }
  0x8e   : > { %6383 = vmatmul.mubr.msk.bf16.gmra.mxu0 %vm9815_vm3, %v9810_v57  ;;  %6527 = vmatmul.mubr.msk.bf16.gmra.mxu1 %vm9529_vm8, %v9488_v9  ;;  %12660 = vst [vmem:[#allocation55_spill] sm:$0xff] %v9839_v41  ;;  %vm9863_vm8 = vmpackc.low %vm12537_vm5, %vm1519_vm12  ;;  %vm1521_vm12 = vcmp.gt.s32.totalorder %v1273_v2, 0  ;;  %v8634_v2 = vld [vmem:[%s12128_s6 + $0x1b8] sm:$0xff]  }
  0x8f   : > { %2017 = vmatprep.mubr.bf16.mxu0 %v9382_v59  ;;  %2500 = vmatprep.mubr.bf16.mxu1 %v9126_v56  ;;  %v861_v35 = vsel %vm12637_vm9, %v858_v45, %v860_v28  ;;  %v863_v49 = vsel %vm12665_vm11, %v860_v28, %v9664_v17  ;;  %v12668_v37 = vsel %vm9863_vm8, 4294967295, %v12667_v37  ;;  %v7331_v45 = vunpack.c.h.bf16 %v7329_v47  ;;  %vm9882_vm9 = vmpackc.low %vm12537_vm5, %vm1521_vm12 }
  0x90   : > { %v9860_v12 = vpack.c.bf16 %v863_v49, %v861_v35  ;;  %12669 = vst [vmem:[#allocation58_spill] sm:$0xff] %v12668_v37  ;;  %v12235_v28 = vrot.slane %v9867_v46, 1  ;;  %v12670_v35 = vmov 0  ;;  %vm12673_vm11 = vcmask 1046528  }
  0x91   : > { %v9877_v17 = vmul.f32 0.0, %v7331_v45  ;;  %v12671_v35 = vsel %vm9882_vm9, 4294967295, %v12670_v35  ;;  %v8636_v45 = vld [vmem:[%s12128_s6 + $0x1f0] sm:$0xff]   ;;  %vm12678_vm12 = vnez %v12487_v50 }
  0x92   : > { %12666 = vst [vmem:[#allocation57_spill] sm:$0xff] %v9860_v12  ;;  %12672 = vst [vmem:[#allocation59_spill] sm:$0xff] %v12671_v35 }
  0x93   : > { %v983_v11 = vrot.slane %v9877_v17, 1  ;;  %v874_v35 = vrot.slane %v9877_v17, 7 }
  0x95   : > { %v9889_v47 = vsel %vm12673_vm11, %v12235_v28, %v983_v11  ;;  %v8646_v28 = vld [vmem:[%s12128_s6 + $0x1d0] sm:$0xff]  }
  0x96   : > { %6386 = vmatmul.mubr.msk.bf16.gmra.mxu0 %vm9842_vm0, %v9839_v41  ;;  %6530 = vmatmul.mubr.msk.bf16.gmra.mxu1 %vm9593_vm1, %v9588_v43  ;;  %12674 = vst [vmem:[#allocation60_spill] sm:$0xff] %v9889_v47  ;;  %v12703_v47 = vld [vmem:[#allocation41_spill] sm:$0xff] }
  0x97   : > { %2025 = vmatprep.mubr.bf16.mxu0 %v9466_v7  ;;  %2508 = vmatprep.mubr.bf16.mxu1 %v9136_v60 }
  0x9e   : > { %6389 = vmatmul.mubr.msk.bf16.gmra.mxu0 %vm9863_vm8, %v9860_v12  ;;  %6533 = vmatmul.mubr.msk.bf16.gmra.mxu1 %vm9638_vm13, %v9633_v23  ;;  %vm12675_vm13 = vmmov %vm12673_vm11  ;;  %vm12679_vm11 = vnez %v12490_v15 }
  0x9f   : > { %2033 = vmatprep.mubr.bf16.mxu0 %v9491_v58  ;;  %2516 = vmatprep.mubr.bf16.mxu1 %v9182_v20  ;;  %v9892_v49 = vsel %vm12675_vm13, %v983_v11, 0.0  ;;  %vm12677_vm13 = vnez %v12477_v24  ;;  %v8638_v11 = vld [vmem:[%s12128_s6 + $0x1e8] sm:$0xff]   ;;  %v8658_v24 = vld [vmem:[%s12129_s7 + $0x30] sm:$0xff]  }
  0xa0   : > { %12676 = vst [vmem:[#allocation61_spill] sm:$0xff] %v9892_v49  ;;  %v12705_v49 = vld [vmem:[#allocation43_spill] sm:$0xff] }
  0xa6   : > { %6392 = vmatmul.mubr.msk.bf16.gmra.mxu0 %vm9882_vm9, %v9687_v5  ;;  %6536 = vmatmul.mubr.msk.bf16.gmra.mxu1 %vm9680_vm15, %v9668_v36  ;;  %vm12689_vm15 = vnez %v12688_v29 }
  0xa7   : > { %8317 = vmatprep.mubr.msk.bf16.mxu0 %vm9054_vm10, %v9045_v14  ;;  %2524 = vmatprep.mubr.bf16.mxu1 %v9226_v39  ;;  %v8637_v14 = vld [vmem:[%s12128_s6 + $0x1b0] sm:$0xff]   ;;  %vm12680_vm10 = vnez %v12503_v63 }
  0xae   : > { %8318 = vmatmul.mubr.msk.bf16.vlgmr.msra.gmra.mxu0 %vm12677_vm13, %v9089_v33  ;;  %6539 = vmatmul.mubr.msk.bf16.gmra.mxu1 %vm9722_vm7, %v9715_v32  ;;  %v12714_v32 = vmov 0 }
  0xaf   : > { %7710 = vmatpush3.bf16.msra.mxu0 %v8634_v2  ;;  %2532 = vmatprep.mubr.bf16.mxu1 %v9265_v51  ;;  %v8639_v2 = vld [vmem:[%s12128_s6 + $0x1a8] sm:$0xff]   ;;  %v1294_v51 = vand.u32 15, %v1056_v31 }
  0xb0   : > { %8321 = vmatprep.mubr.msk.bf16.mxu0 %vm12678_vm12, %v9145_v62  ;;  %7711 = vmatprep.subr.bf16.mxu0 %v8636_v45  ;;  %v8642_v45 = vld [vmem:[%s12128_s6 + $0x1a0] sm:$0xff]  }
  0xb3   : > { %7712 = vmatpush3.bf16.msra.mxu0 %v8637_v14  ;;  %v8643_v14 = vld [vmem:[%s12128_s6 + $0x1d8] sm:$0xff]  }
  0xb4   : > { %7713 = vmatprep.subr.bf16.mxu0 %v8638_v11  ;;  %v8644_v11 = vld [vmem:[%s12128_s6 + $0x198] sm:$0xff]  }
  0xb6   : > { %8322 = vmatmul.mubr.msk.bf16.gmra.mxu0 %vm12679_vm11, %v9157_v3  ;;  %6542 = vmatmul.mubr.msk.bf16.gmra.mxu1 %vm9756_vm4, %v9751_v34  ;;  %vm12681_vm4 = vnez %v12507_v18  ;;  %v10020_v34 = vcombine.low %v12701_v61, %v9677_v38  ;;  %v10438_v18 = vld [vmem:[%s10274_s24 + $0x18] sm:$0xff]  }
  0xb7   : > { %8325 = vmatprep.mubr.msk.bf16.mxu0 %vm12680_vm10, %v9246_v55  ;;  %2540 = vmatprep.mubr.bf16.mxu1 %v9285_v26  ;;  %12795 = vst [vmem:[#allocation69_spill] sm:$0xff] %v10438_v18 }
  0xb8   : > { %7714 = vmatpush3.bf16.msra.mxu0 %v8639_v2  ;;  %v8647_v2 = vld [vmem:[%s12128_s6 + $0x190] sm:$0xff]  }
  0xb9   : > { %7715 = vmatprep.subr.bf16.mxu0 %v8641_v30  ;;  %v12682_v30 = vld [vmem:[#allocation20_spill] sm:$0xff] }
  0xba   : > { %vm12683_vm7 = vnez %v12682_v30 }
  0xbc   : > { %7716 = vmatpush3.bf16.msra.mxu0 %v8642_v45  ;;  %v8648_v45 = vld [vmem:[%s12128_s6 + $0x1c8] sm:$0xff]  }
  0xbd   : > { %7717 = vmatprep.subr.bf16.mxu0 %v8643_v14  ;;  %v8649_v14 = vld [vmem:[%s12128_s6 + $0x188] sm:$0xff]  }
  0xbe   : > { %8326 = vmatmul.mubr.msk.bf16.gmra.mxu0 %vm12681_vm4, %v9259_v0  ;;  %6545 = vmatmul.mubr.msk.bf16.gmra.mxu1 %vm9784_vm14, %v9781_v40  ;;  %v12699_v40 = vld [vmem:[#allocation38_spill] sm:$0xff] }
  0xbf   : > { %8329 = vmatprep.mubr.msk.bf16.mxu0 %vm12683_vm7, %v9324_v48  ;;  %2548 = vmatprep.mubr.bf16.mxu1 %v9364_v44  ;;  %v12685_v44 = vld [vmem:[#allocation22_spill] sm:$0xff] }
  0xc0   : > { %7718 = vmatpush3.bf16.msra.mxu0 %v8644_v11  ;;  %v12684_v11 = vld [vmem:[#allocation18_spill] sm:$0xff]  ;;  %vm12686_vm14 = vnez %v12685_v44 }
  0xc1   : > { %7719 = vmatprep.subr.bf16.mxu0 %v8646_v28  ;;  %v12687_v28 = vld [vmem:[#allocation25_spill] sm:$0xff] }
  0xc4   : > { %7720 = vmatpush3.bf16.msra.mxu0 %v8647_v2  ;;  %v8653_v2 = vld [vmem:[%s12128_s6 + $0x180] sm:$0xff]  }
  0xc5   : > { %7721 = vmatprep.subr.bf16.mxu0 %v8648_v45  ;;  %v8654_v45 = vld [vmem:[%s12129_s7 + $0xb8] sm:$0xff]  }
  0xc6   : > { %8330 = vmatmul.mubr.msk.bf16.gmra.mxu0 %vm12686_vm14, %v12684_v11  ;;  %6548 = vmatmul.mubr.msk.bf16.gmra.mxu1 %vm9815_vm3, %v9810_v57  ;;  %v12691_v57 = vld [vmem:[#allocation28_spill] sm:$0xff] }
  0xc7   : > { %8333 = vmatprep.mubr.msk.bf16.mxu0 %vm12689_vm15, %v12687_v28  ;;  %2556 = vmatprep.mubr.bf16.mxu1 %v9382_v59  ;;  %vm12692_vm3 = vnez %v12691_v57  ;;  %v12694_v59 = vld [vmem:[#allocation33_spill] sm:$0xff] }
  0xc8   : > { %7722 = vmatpush3.bf16.msra.mxu0 %v8649_v14  ;;  %v12693_v14 = vld [vmem:[#allocation32_spill] sm:$0xff]  ;;  %vm12695_vm1 = vnez %v12694_v59 }
  0xc9   : > { %7723 = vmatprep.subr.bf16.mxu0 %v8652_v19  ;;  %v12696_v19 = vld [vmem:[#allocation35_spill] sm:$0xff] }
  0xca   : > { %vm12697_vm15 = vnez %v12696_v19 }
  0xcc   : > { %7724 = vmatpush3.bf16.msra.mxu0 %v8653_v2  ;;  %v12698_v2 = vld [vmem:[#allocation37_spill] sm:$0xff] }
  0xcd   : > { %8397 = vmatprep.subr.bf16.mxu0 %v8654_v45 }
  0xce   : > { %8334 = vmatmul.mubr.msk.bf16.gmra.mxu0 %vm12692_vm3, %v12690_v25  ;;  %6551 = vmatmul.mubr.msk.bf16.gmra.mxu1 %vm9842_vm0, %v9839_v41  ;;  %v1055_v41 = vadd.s32 256, %v8891_v8  ;;  %vm12707_vm0 = vnez %v12706_v42 }
  0xcf   : > { %8337 = vmatprep.mubr.msk.bf16.mxu0 %vm12695_vm1, %v12693_v14  ;;  %2564 = vmatprep.mubr.bf16.mxu1 %v9466_v7  ;;  %v12700_v7 = vunpack.c.l.bf16 %v9677_v38  ;;  %v12710_v38 = vrot.slane %v9867_v46, 1 }
  0xd0   : > { %v1287_v37 = vand.u32 15, %v1055_v41 }
  0xd1   : > { %v979_v26 = vrot.slane %v12700_v7, 1  ;;  %v12708_v7 = vld [vmem:[#allocation40_spill] sm:$0xff] }
  0xd2   : > { %vm1523_vm1 = vcmp.gt.s32.totalorder %v1287_v37, 0  ;;  %v12722_v37 = vld [vmem:[#allocation3_spill] sm:$0xff] }
  0xd6   : > { %8338 = vmatmul.mubr.msk.bf16.gmra.mxu0 %vm12697_vm15, %v9544_v54  ;;  %6554 = vmatmul.mubr.msk.bf16.gmra.mxu1 %vm9863_vm8, %v9860_v12  ;;  %v12702_v12 = vld [vmem:[#allocation39_spill] sm:$0xff]  ;;  %vm12704_vm8 = vnez %v12703_v47 }
  0xd7   : > { %8341 = vmatprep.mubr.msk.bf16.mxu0 %vm9604_vm2, %v12698_v2  ;;  %2572 = vmatprep.mubr.bf16.mxu1 %v9491_v58  ;;  %v872_v58 = vrot.slane %v9867_v46, 7  ;;  %vm12709_vm2 = vcmask 1046528  }
  0xd8   : > { %v980_v61 = vsel %vm12709_vm2, %v12708_v7, %v979_v26  ;;  %vm12711_vm15 = vmmov %vm12709_vm2 }
  0xd9   : > { %v982_v41 = vsel %vm12711_vm15, %v979_v26, %v12710_v38  ;;  %vm10051_vm2 = vmpackc.low %vm12537_vm5, %vm1523_vm1  ;;  %v12717_v26 = vmov 0 }
  0xda   : > { %v10038_v31 = vpack.c.bf16 %v982_v41, %v980_v61  ;;  %v12718_v26 = vsel %vm10051_vm2, 4294967295, %v12717_v26  ;;  %v12723_v61 = vld [vmem:[#allocation12_spill] sm:$0xff]  ;;  %v8659_v41 = vld [vmem:[%s12129_s7 + $0xb0] sm:$0xff]  }
  0xdb   : > { %12719 = vst [vmem:[#allocation29_spill] sm:$0xff] %v12718_v26 }
  0xde   : > { %8342 = vmatmul.mubr.msk.bf16.gmra.mxu0 %vm12704_vm8, %v12702_v12  ;;  %6557 = vmatmul.mubr.msk.bf16.gmra.mxu1 %vm9882_vm9, %v9687_v5  ;;  %vm1596_vm8 = vcmp.lt.s32.totalorder %v1294_v51, 15  ;;  %vm12712_vm9 = vcmask 1040384  }
  0xdf   : > { %8345 = vmatprep.mubr.msk.bf16.mxu0 %vm12707_vm0, %v12705_v49  ;;  %2580 = vmatprep.mubr.bf16.mxu1 %v10020_v34  ;;  %v10043_v5 = vsel %vm12712_vm9, %v9694_v1, %v872_v58  ;;  %vm10046_vm0 = vmpackc.low %vm1596_vm8, %vm12537_vm5  ;;  %v12725_v1 = vld [vmem:[#allocation4_spill] sm:$0xff]  ;;  %vm12726_vm8 = vnez %v12518_v22 }
  0xe0   : > { %12713 = vst [vmem:[#allocation18_spill] sm:$0xff] %v10043_v5  ;;  %v12715_v32 = vsel %vm10046_vm0, 4294967295, %v12714_v32  ;;  %vm12720_vm15 = vmmov %vm12712_vm9  ;;  %vm12729_vm9 = vnez %v12565_v4 }
  0xe1   : > { %12716 = vst [vmem:[#allocation25_spill] sm:$0xff] %v12715_v32  ;;  %v10056_v51 = vsel %vm12720_vm15, %v872_v58, %v874_v35  ;;  %v8656_v58 = vld [vmem:[%s12129_s7 + $0x38] sm:$0xff]   ;;  %v8657_v35 = vld [vmem:[%s12129_s7 + $0x70] sm:$0xff]   ;;  %vm12730_vm15 = vnez %v12688_v29 }
  0xe2   : > { %12721 = vst [vmem:[#allocation32_spill] sm:$0xff] %v10056_v51  ;;  %v12755_v29 = vld [vmem:[#allocation61_spill] sm:$0xff] }
  0xe6   : > { %8346 = vmatmul.mubr.msk.bf16.gmra.mxu0 %vm10046_vm0, %v10038_v31  ;;  %6560 = vmatmul.mubr.msk.bf16.gmra.mxu1 %vm10051_vm2, %v9710_v16 }
  0xe7   : > { %3071 = vmatprep.mubr.bf16.mxu0 %v12722_v37  ;;  %8365 = vmatprep.mubr.msk.bf16.mxu1 %vm12677_vm13, %v9089_v33 }
  0xee   : > { %v7453_v7 = vpop.f32.mrf.mxu0  ;;  %6683 = vmatmul.mubr.msk.bf16.vlgmr.msra.gmra.mxu0 %vm9242_vm6, %v12723_v61  ;;  %v8271_v37 = vpop.f32.mrf.mxu1  ;;  %8366 = vmatmul.mubr.msk.bf16.vlgmr.msra.gmra.mxu1 %vm12678_vm12, %v9145_v62  ;;  %v8664_v61 = vld [vmem:[%s12129_s7 + $0xa8] sm:$0xff]  }
  0xef   : > { %8398 = vmatpush3.bf16.msra.mxu0 %v8654_v45  ;;  %7846 = vmatpush3.bf16.msra.mxu1 %v8656_v58  ;;  %v8660_v62 = vld [vmem:[%s12129_s7 + $0x68] sm:$0xff]  }
  0xf0   : > { %v7454_v33 = vpop.f32.mrf.mxu0  ;;  %3079 = vmatprep.mubr.bf16.mxu0 %v12725_v1  ;;  %v2076_v51 = vpop.f32.mrf.mxu1  ;;  %8369 = vmatprep.mubr.msk.bf16.mxu1 %vm12679_vm11, %v9157_v3 }
  0xf1   : > { %v7455_v5 = vadd.f32 %v7454_v33, %v7453_v7  ;;  %7847 = vmatprep.subr.bf16.mxu1 %v8657_v35  ;;  %8399 = vmatprep.subr.bf16.mxu0 %v8659_v41  ;;  %v8661_v7 = vld [vmem:[%s12129_s7 + $0x28] sm:$0xff]   ;;  %v8662_v35 = vld [vmem:[%s12129_s7 + $0x60] sm:$0xff]  }
  0xf2   : > { %v7456_v45 = vpop.f32.mrf.mxu0  ;;  %v8272_v58 = vpop.f32.mrf.mxu1 }
  0xf3   : > { %v10098_v1 = vadd.f32 %v7455_v5, %v2076_v51  ;;  %8400 = vmatpush3.bf16.msra.mxu0 %v8659_v41  ;;  %7848 = vmatpush3.bf16.msra.mxu1 %v8658_v24  ;;  %v8669_v24 = vld [vmem:[%s12129_s7 + $0xa0] sm:$0xff]  }
  0xf4   : > { %v7457_v50 = vpop.f32.mrf.mxu0  ;;  %8401 = vmatprep.subr.bf16.mxu0 %v8664_v61  ;;  %v2079_v3 = vpop.f32.mrf.mxu1  ;;  %7849 = vmatprep.subr.bf16.mxu1 %v8660_v62 }
  0xf5   : > { %v7458_v33 = vadd.f32 %v7457_v50, %v7456_v45 }
  0xf6   : > { %v7459_v15 = vpop.f32.mrf.mxu0  ;;  %6686 = vmatmul.mubr.msk.bf16.gmra.mxu0 %vm12726_vm8, %v9277_v21  ;;  %v10114_v51 = vpop.f32.mrf.mxu1  ;;  %8370 = vmatmul.mubr.msk.bf16.gmra.mxu1 %vm12680_vm10, %v9246_v55  ;;  %v8663_v21 = vld [vmem:[%s12129_s7 + $0x20] sm:$0xff]   ;;  %v8665_v55 = vld [vmem:[%s12129_s7 + $0x58] sm:$0xff]  }
  0xf7   : > { %v10112_v5 = vadd.f32 %v7458_v33, %v2079_v3  ;;  %3087 = vmatprep.mubr.bf16.mxu0 %v9034_v10  ;;  %8373 = vmatprep.mubr.msk.bf16.mxu1 %vm12681_vm4, %v9259_v0  ;;  %v8674_v10 = vld [vmem:[%s12129_s7 + $0x98] sm:$0xff]  }
  0xf8   : > { %v7460_v50 = vpop.f32.mrf.mxu0  ;;  %7850 = vmatpush3.bf16.msra.mxu1 %v8661_v7  ;;  %v2092_v62 = vpop.f32.mrf.mxu1  ;;  %8402 = vmatpush3.bf16.msra.mxu0 %v8664_v61 }
  0xf9   : > { %v7461_v41 = vadd.f32 %v7460_v50, %v7459_v15  ;;  %7851 = vmatprep.subr.bf16.mxu1 %v8662_v35  ;;  %8403 = vmatprep.subr.bf16.mxu0 %v8669_v24  ;;  %v8666_v15 = vld [vmem:[%s12129_s7 + $0x18] sm:$0xff]   ;;  %v8667_v35 = vld [vmem:[%s12129_s7 + $0x50] sm:$0xff]  }
  0xfa   : > { %v7462_v45 = vpop.f32.mrf.mxu0  ;;  %v10134_v7 = vpop.f32.mrf.mxu1 }
  0xfb   : > { %v10132_v0 = vadd.f32 %v8271_v37, %v7461_v41  ;;  %v12727_v37 = vld [vmem:[#allocation24_spill] sm:$0xff] }
  0xfc   : > { %v7463_v33 = vpop.f32.mrf.mxu0  ;;  %7852 = vmatpush3.bf16.msra.mxu1 %v8663_v21  ;;  %v2095_v3 = vpop.f32.mrf.mxu1  ;;  %8404 = vmatpush3.bf16.msra.mxu0 %v8669_v24  ;;  %vm12728_vm1 = vnez %v12727_v37  ;;  %v8678_v21 = vld [vmem:[%s12129_s7 + $0x90] sm:$0xff]  }
  0xfd   : > { %v7464_v61 = vadd.f32 %v7463_v33, %v7462_v45  ;;  %7853 = vmatprep.subr.bf16.mxu1 %v8665_v55  ;;  %8405 = vmatprep.subr.bf16.mxu0 %v8674_v10  ;;  %v8670_v33 = vld [vmem:[%s12129_s7 + $0x48] sm:$0xff]  }
  0xfe   : > { %v7465_v50 = vpop.f32.mrf.mxu0  ;;  %6689 = vmatmul.mubr.msk.bf16.gmra.mxu0 %vm12728_vm1, %v9393_v52  ;;  %v10150_v45 = vpop.f32.mrf.mxu1  ;;  %8374 = vmatmul.mubr.msk.bf16.gmra.mxu1 %vm12683_vm7, %v9324_v48  ;;  %v8668_v52 = vld [vmem:[%s12129_s7 + $0x10] sm:$0xff]   ;;  %vm12738_vm7 = vnez %v12703_v47 }
  0xff   : > { %v10148_v41 = vadd.f32 %v8272_v58, %v7464_v61  ;;  %3095 = vmatprep.mubr.bf16.mxu0 %v9076_v27  ;;  %8377 = vmatprep.mubr.msk.bf16.mxu1 %vm12686_vm14, %v12684_v11  ;;  %v8682_v27 = vld [vmem:[%s12129_s7 + $0x88] sm:$0xff]   ;;  %vm12733_vm14 = vnez %v12696_v19 }
 0x100   : > { %v7466_v24 = vpop.f32.mrf.mxu0  ;;  %7854 = vmatpush3.bf16.msra.mxu1 %v8666_v15  ;;  %v2108_v55 = vpop.f32.mrf.mxu1  ;;  %8406 = vmatpush3.bf16.msra.mxu0 %v8674_v10  ;;  %v8672_v10 = vld [vmem:[%s12129_s7 + $0x40] sm:$0xff]   ;;  %v12751_v19 = vld [vmem:[#allocation48_spill] sm:$0xff] }
 0x101   : > { %v7467_v58 = vadd.f32 %v7466_v24, %v7465_v50  ;;  %7855 = vmatprep.subr.bf16.mxu1 %v8667_v35  ;;  %8407 = vmatprep.subr.bf16.mxu0 %v8678_v21  ;;  %v8671_v35 = vld [vmem:[%s12129_s7 + $0x8] sm:$0xff]  }
 0x102   : > { %v7468_v48 = vpop.f32.mrf.mxu0  ;;  %v10170_v15 = vpop.f32.mrf.mxu1 }
 0x103   : > { %v10168_v11 = vadd.f32 %v7467_v58, %v2092_v62  ;;  %v8686_v62 = vld [vmem:[%s12129_s7 + $0x80] sm:$0xff]  }
 0x104   : > { %v7469_v61 = vpop.f32.mrf.mxu0  ;;  %7856 = vmatpush3.bf16.msra.mxu1 %v8668_v52  ;;  %v2111_v24 = vpop.f32.mrf.mxu1  ;;  %8408 = vmatpush3.bf16.msra.mxu0 %v8678_v21 }
 0x105   : > { %v7470_v50 = vadd.f32 %v7469_v61, %v7468_v48  ;;  %7857 = vmatprep.subr.bf16.mxu1 %v8670_v33  ;;  %8409 = vmatprep.subr.bf16.mxu0 %v8682_v27 }
 0x106   : > { %v7471_v44 = vpop.f32.mrf.mxu0  ;;  %6692 = vmatmul.mubr.msk.bf16.gmra.mxu0 %vm12729_vm9, %v9488_v9  ;;  %v10186_v58 = vpop.f32.mrf.mxu1  ;;  %8378 = vmatmul.mubr.msk.bf16.gmra.mxu1 %vm12730_vm15, %v12687_v28  ;;  %v8673_v9 = vld [vmem:[%s12129_s7] sm:$0xff]   ;;  %v10203_v28 = vld [vmem:[%s12129_s7 + $0x178] sm:$0xff]   ;;  %vm12732_vm15 = vnez %v12694_v59 }
 0x107   : > { %v10184_v52 = vadd.f32 %v7470_v50, %v2095_v3  ;;  %3103 = vmatprep.mubr.bf16.mxu0 %v9126_v56  ;;  %8381 = vmatprep.mubr.msk.bf16.mxu1 %vm12692_vm3, %v12690_v25  ;;  %v8690_v25 = vld [vmem:[%s12129_s7 + $0x138] sm:$0xff]   ;;  %vm12731_vm3 = vnez %v12588_v6 }
 0x108   : > { %v7472_v21 = vpop.f32.mrf.mxu0  ;;  %7858 = vmatpush3.bf16.msra.mxu1 %v8671_v35  ;;  %v10198_v33 = vpop.f32.mrf.mxu1  ;;  %8410 = vmatpush3.bf16.msra.mxu0 %v8682_v27 }
 0x109   : > { %v7473_v3 = vadd.f32 %v7472_v21, %v7471_v44  ;;  %7859 = vmatprep.subr.bf16.mxu1 %v8672_v10  ;;  %8411 = vmatprep.subr.bf16.mxu0 %v8686_v62 }
 0x10a   : > { %v7474_v56 = vpop.f32.mrf.mxu0  ;;  %v10211_v61 = vpop.f32.mrf.mxu1 }
 0x10b   : > { %v10209_v48 = vadd.f32 %v10114_v51, %v7473_v3 }
 0x10c   : > { %v7475_v44 = vpop.f32.mrf.mxu0  ;;  %7860 = vmatpush3.bf16.msra.mxu1 %v8673_v9  ;;  %v10213_v50 = vpop.f32.mrf.mxu1  ;;  %8412 = vmatpush3.bf16.msra.mxu0 %v8686_v62 }
 0x10d   : > { %v7476_v35 = vadd.f32 %v7475_v44, %v7474_v56  ;;  %8445 = vmatprep.subr.bf16.mxu1 %v10203_v28  ;;  %7981 = vmatprep.subr.bf16.mxu0 %v8690_v25 }
 0x10e   : > { %v7477_v27 = vpop.f32.mrf.mxu0  ;;  %6695 = vmatmul.mubr.msk.bf16.gmra.mxu0 %vm12731_vm3, %v9588_v43  ;;  %v10222_v51 = vpop.f32.mrf.mxu1  ;;  %8382 = vmatmul.mubr.msk.bf16.gmra.mxu1 %vm12732_vm15, %v12693_v14  ;;  %vm12735_vm15 = vnez %v12607_v13 }
 0x10f   : > { %v10220_v10 = vadd.f32 %v10134_v7, %v7476_v35  ;;  %3111 = vmatprep.mubr.bf16.mxu0 %v9136_v60  ;;  %8385 = vmatprep.mubr.msk.bf16.mxu1 %vm12733_vm14, %v9544_v54  ;;  %vm12737_vm14 = vnez %v12699_v40 }
 0x110   : > { %v7478_v21 = vpop.f32.mrf.mxu0  ;;  %v10231_v43 = vpop.f32.mrf.mxu1 }
 0x111   : > { %v7479_v62 = vadd.f32 %v7478_v21, %v7477_v27  ;;  %v7333_v27 = vld [vmem:[%s632_s20] sm:$0xff]   ;;  %s682_s20 = scalar_lea.vmem %s12131_s9, %s6304_s13 }
 0x112   : > { %v7480_v9 = vpop.f32.mrf.mxu0  ;;  %v10235_v3 = vpop.f32.mrf.mxu1 }
 0x113   : > { %v10233_v7 = vadd.f32 %v7479_v62, %v2108_v55 }
 0x114   : > { %v7481_v56 = vpop.f32.mrf.mxu0  ;;  %v10237_v44 = vpop.f32.mrf.mxu1 }
 0x115   : > { %12734 = vst [vmem:[#allocation37_spill] sm:$0xff] %v10233_v7  ;;  %v7482_v25 = vadd.f32 %v7481_v56, %v7480_v9  ;;  %v7335_v56 = vunpack.c.h.bf16 %v7333_v27 }
 0x116   : > { %v7483_v14 = vpop.f32.mrf.mxu0  ;;  %6698 = vmatmul.mubr.msk.bf16.gmra.mxu0 %vm12735_vm15, %v9633_v23  ;;  %v10248_v54 = vpop.f32.mrf.mxu1  ;;  %8386 = vmatmul.mubr.msk.bf16.gmra.mxu1 %vm12737_vm14, %v12698_v2  ;;  %vm12742_vm14 = vnez %v12706_v42  ;;  %v12750_v42 = vld [vmem:[#allocation47_spill] sm:$0xff] }
 0x117   : > { %v10246_v60 = vadd.f32 %v7482_v25, %v2111_v24  ;;  %3119 = vmatprep.mubr.bf16.mxu0 %v9182_v20  ;;  %8389 = vmatprep.mubr.msk.bf16.mxu1 %vm12738_vm7, %v12702_v12  ;;  %v1058_v24 = vadd.s32 280, %v8891_v8  ;;  %v7334_v20 = vunpack.c.l.bf16 %v7333_v27  ;;  %vm12740_vm7 = vnez %v12621_v53 }
 0x118   : > { %v7484_v55 = vpop.f32.mrf.mxu0  ;;  %v10257_v35 = vpop.f32.mrf.mxu1 }
 0x119   : > { %12736 = vst [vmem:[#allocation34_spill] sm:$0xff] %v10246_v60  ;;  %v7485_v23 = vadd.f32 %v7484_v55, %v7483_v14  ;;  %v1308_v12 = vand.u32 15, %v1058_v24  ;;  %v10293_v24 = vld [vmem:[%s10274_s24 + $0x70] sm:$0xff]  }
 0x11a   : > { %v7486_v21 = vpop.f32.mrf.mxu0  ;;  %v10263_v9 = vpop.f32.mrf.mxu1  ;;  %12743 = vst [vmem:[#allocation40_spill] sm:$0xff] %v10293_v24 }
 0x11b   : > { %v10261_v62 = vadd.f32 %v10150_v45, %v7485_v23  ;;  %v10290_v23 = vmul.f32 0.0, %v7335_v56  ;;  %vm1598_vm4 = vcmp.lt.s32.totalorder %v1308_v12, 15  ;;  %v12746_v56 = vmov 0 }
 0x11c   : > { %v7487_v2 = vpop.f32.mrf.mxu0  ;;  %v10265_v40 = vpop.f32.mrf.mxu1 }
 0x11d   : > { %12739 = vst [vmem:[#allocation39_spill] sm:$0xff] %v10261_v62  ;;  %v7488_v25 = vadd.f32 %v7487_v2, %v7486_v21  ;;  %v10401_v62 = vld [vmem:[%s10274_s24 + $0x10] sm:$0xff]  }
 0x11e   : > { %v7489_v47 = vpop.f32.mrf.mxu0  ;;  %6701 = vmatmul.mubr.msk.bf16.gmra.mxu0 %vm12740_vm7, %v9668_v36  ;;  %v10279_v14 = vpop.f32.mrf.mxu1  ;;  %8390 = vmatmul.mubr.msk.bf16.gmra.mxu1 %vm12742_vm14, %v12705_v49  ;;  %v10288_v36 = vmul.f32 0.0, %v7334_v20  ;;  %v10298_v49 = vld [vmem:[%s10274_s24 + $0x78] sm:$0xff]   ;;  %vm12763_vm14 = vcmask 1040384   ;;  %12782 = vst [vmem:[#allocation67_spill] sm:$0xff] %v10401_v62  ;;  %v12850_v26 = vunpack.c.l.bf16 %v10401_v62 }
 0x11f   : > { %v10277_v45 = vadd.f32 %v10170_v15, %v7488_v25  ;;  %3127 = vmatprep.mubr.bf16.mxu0 %v9226_v39  ;;  %8393 = vmatprep.mubr.msk.bf16.mxu1 %vm10046_vm0, %v10038_v31  ;;  %12744 = vst [vmem:[#allocation3_spill] sm:$0xff] %v10298_v49  ;;  %vm10307_vm0 = vmpackc.low %vm1598_vm4, %vm12537_vm5  ;;  %v3570_v25 = vrot.slane %v10290_v23, 7  ;;  %vm12752_vm4 = vnez %v12751_v19  ;;  %v12761_v30 = vunpack.c.l.bf16 %v10298_v49 }
 0x120   : > { %v7490_v55 = vpop.f32.mrf.mxu0  ;;  %v10295_v27 = vpop.f32.mrf.mxu1  ;;  %v12747_v56 = vsel %vm10307_vm0, 4294967295, %v12746_v56  ;;  %v3858_v12 = vpack.c.bf16 %v10290_v23, %v10288_v36  ;;  %vm12764_vm10 = vmmov %vm12763_vm14  ;;  %v3688_v6 = vrot.slane %v12850_v26, 1  ;;  %v12857_v26 = vld [vmem:[#allocation5_spill] sm:$0xff] }
 0x121   : > { %12741 = vst [vmem:[#allocation43_spill] sm:$0xff] %v10277_v45  ;;  %v7491_v15 = vadd.f32 %v7490_v55, %v7489_v47  ;;  %12748 = vst [vmem:[#allocation4_spill] sm:$0xff] %v12747_v56  ;;  %v3569_v47 = vrot.slane %v10288_v36, 7  ;;  %v10366_v45 = vld [vmem:[%s10274_s24 + $0x8] sm:$0xff]  }
 0x122   : > { %v7492_v21 = vpop.f32.mrf.mxu0  ;;  %v10303_v2 = vpop.f32.mrf.mxu1  ;;  %12769 = vst [vmem:[#allocation66_spill] sm:$0xff] %v10366_v45  ;;  %vm12777_vm11 = vmmov %vm12763_vm14 }
 0x123   : > { %v10301_v39 = vadd.f32 %v7491_v15, %v10198_v33  ;;  %v10318_v15 = vld [vmem:[%s10274_s24] sm:$0xff]  }
 0x124   : > { %v7493_v20 = vpop.f32.mrf.mxu0  ;;  %v10315_v33 = vpop.f32.mrf.mxu1  ;;  %12749 = vst [vmem:[#allocation62_spill] sm:$0xff] %v10318_v15 }
 0x125   : > { %12745 = vst [vmem:[#allocation12_spill] sm:$0xff] %v10301_v39  ;;  %v7494_v55 = vadd.f32 %v7493_v20, %v7492_v21  ;;  %v12756_v39 = vld [vmem:[#allocation60_spill] sm:$0xff]  ;;  %v12758_v21 = vld [vmem:[#allocation15_spill] sm:$0xff]  ;;  %v12759_v20 = vunpack.c.h.bf16 %v10293_v24 }
 0x126   : > { %v7495_v32 = vpop.f32.mrf.mxu0  ;;  %6704 = vmatmul.mubr.msk.bf16.gmra.mxu0 %vm12752_vm4, %v12750_v42  ;;  %v10327_v57 = vpop.f32.mrf.mxu1  ;;  %v12757_v60 = vpack.c.bf16 %v12755_v29, %v12756_v39  ;;  %v10341_v42 = vrot.slane %v12761_v30, 7  ;;  %v12317_v29 = vunpack.c.l.bf16 %v10318_v15 }
 0x127   : > { %v10325_v59 = vadd.f32 %v7494_v55, %v10213_v50  ;;  %12754 = vst [vmem:[#allocation63_spill] sm:$0xff] %v10327_v57  ;;  %3135 = vmatprep.mubr.bf16.mxu0 %v12758_v21  ;;  %v10337_v31 = vrot.slane %v12759_v20, 7  ;;  %v3571_v55 = vsel %vm12763_vm14, %v3569_v47, %v3570_v25  ;;  %v3676_v57 = vsel %vm12764_vm10, 0.0, %v3569_v47 }
 0x128   : > { %8394 = vmatmul.mubr.msk.bf16.gmra.mxu1 %vm10307_vm0, %v12757_v60  ;;  %12762 = vst [vmem:[#allocation60_spill] sm:$0xff] %v10341_v42  ;;  %v7496_v50 = vpop.f32.mrf.mxu0  ;;  %v12318_v60 = vunpack.c.h.bf16 %v10318_v15  ;;  %v10347_v21 = vpop.f32.mrf.mxu1  ;;  %vm12765_vm0 = vmmov %vm12764_vm10  ;;  %v6818_v47 = vpack.c.bf16 %v3571_v55, %v3676_v57  ;;  %v3572_v24 = vrot.slane %v12317_v29, 7  ;;  %v12774_v29 = vld [vmem:[#allocation6_spill] sm:$0xff] }
 0x129   : > { %12753 = vst [vmem:[#allocation47_spill] sm:$0xff] %v10325_v59  ;;  %12760 = vst [vmem:[#allocation61_spill] sm:$0xff] %v10337_v31  ;;  %4135 = vmatprep.mubr.bf16.mxu1 %v3858_v12  ;;  %v7497_v39 = vadd.f32 %v7496_v50, %v7495_v32  ;;  %v10352_v20 = vsel %vm12765_vm0, %v10337_v31, %v10341_v42  ;;  %vm12775_vm10 = vnez %v12774_v29  ;;  %v8683_v29 = vld [vmem:[%s12129_s7 + $0x168] sm:$0xff]  }
 0x12a   : > { %12766 = vst [vmem:[#allocation15_spill] sm:$0xff] %v10352_v20  ;;  %v7498_v30 = vpop.f32.mrf.mxu0  ;;  %v10357_v49 = vpop.f32.mrf.mxu1  ;;  %v3574_v32 = vrot.slane %v12318_v60, 7  ;;  %v12770_v20 = vld [vmem:[#allocation49_spill] sm:$0xff]  ;;  %v3573_v60 = vsel %vm12763_vm14, %v3570_v25, %v3572_v24 }
 0x12b   : > { %v10355_v56 = vadd.f32 %v10186_v58, %v7497_v39  ;;  %12768 = vst [vmem:[#allocation65_spill] sm:$0xff] %v10357_v49  ;;  %v8679_v58 = vld [vmem:[%s12129_s7 + $0x170] sm:$0xff]   ;;  %v12771_v49 = vld [vmem:[#allocation50_spill] sm:$0xff] }
 0x12c   : > { %v7499_v12 = vpop.f32.mrf.mxu0  ;;  %v10363_v59 = vpop.f32.mrf.mxu1  ;;  %vm12772_vm0 = vnez %v12771_v49  ;;  %v3575_v42 = vsel %vm12777_vm11, %v3572_v24, %v3574_v32 }
 0x12d   : > { %12767 = vst [vmem:[#allocation64_spill] sm:$0xff] %v10355_v56  ;;  %v7500_v50 = vadd.f32 %v7499_v12, %v7498_v30  ;;  %v12776_v30 = vld [vmem:[#allocation17_spill] sm:$0xff] }
 0x12e   : > { %v7501_v39 = vpop.f32.mrf.mxu0  ;;  %6707 = vmatmul.mubr.msk.bf16.gmra.mxu0 %vm12772_vm0, %v12770_v20  ;;  %v7589_v55 = vpop.f32.mrf.mxu1  ;;  %vm12790_vm0 = vmmov %vm12763_vm14 }
 0x12f   : > { %v10375_v57 = vadd.f32 %v10211_v61, %v7500_v50  ;;  %3143 = vmatprep.mubr.bf16.mxu0 %v12776_v30  ;;  %v10394_v30 = vpack.c.bf16 %v3575_v42, %v3573_v60  ;;  %v12780_v61 = vunpack.c.l.bf16 %v10366_v45  ;;  %v12783_v60 = vld [vmem:[#allocation51_spill] sm:$0xff] }
 0x130   : > { %6819 = vmatmul.mubr.msk.bf16.vlgmr.msra.gmra.mxu1 %vm12775_vm10, %v6818_v47  ;;  %v7502_v12 = vpop.f32.mrf.mxu0  ;;  %v7590_v31 = vpop.f32.mrf.mxu1 }
 0x131   : > { %12773 = vst [vmem:[#allocation49_spill] sm:$0xff] %v10375_v57  ;;  %8446 = vmatpush3.bf16.msra.mxu1 %v10203_v28  ;;  %4143 = vmatprep.mubr.bf16.mxu1 %v10318_v15  ;;  %v7503_v50 = vadd.f32 %v7502_v12, %v7501_v39  ;;  %v10389_v47 = vadd.f32 %v7590_v31, %v7589_v55  ;;  %12779 = vst [vmem:[#allocation17_spill] sm:$0xff] %v10394_v30  ;;  %v3576_v57 = vrot.slane %v12780_v61, 7  ;;  %v12784_v55 = vld [vmem:[#allocation52_spill] sm:$0xff] }
 0x132   : > { %8447 = vmatprep.subr.bf16.mxu1 %v8679_v58  ;;  %v7504_v28 = vpop.f32.mrf.mxu0  ;;  %v7592_v24 = vpop.f32.mrf.mxu1  ;;  %v12781_v39 = vunpack.c.h.bf16 %v10366_v45  ;;  %vm12785_vm11 = vnez %v12784_v55 }
 0x133   : > { %v10392_v25 = vadd.f32 %v7503_v50, %v10231_v43  ;;  %v8687_v43 = vld [vmem:[%s12129_s7 + $0x160] sm:$0xff]   ;;  %v12789_v50 = vld [vmem:[#allocation21_spill] sm:$0xff] }
 0x134   : > { %v7505_v20 = vpop.f32.mrf.mxu0  ;;  %v3578_v12 = vrot.slane %v12781_v39, 7  ;;  %v7593_v7 = vpop.f32.mrf.mxu1  ;;  %v3577_v39 = vsel %vm12763_vm14, %v3574_v32, %v3576_v57 }
 0x135   : > { %12778 = vst [vmem:[#allocation6_spill] sm:$0xff] %v10392_v25  ;;  %8448 = vmatpush3.bf16.msra.mxu1 %v8679_v58  ;;  %v7506_v56 = vadd.f32 %v7505_v20, %v7504_v28  ;;  %v10406_v31 = vadd.f32 %v7593_v7, %v7592_v24  ;;  %v12787_v20 = vld [vmem:[#allocation9_spill] sm:$0xff] }
 0x136   : > { %8449 = vmatprep.subr.bf16.mxu1 %v8683_v29  ;;  %v7507_v42 = vpop.f32.mrf.mxu0  ;;  %6710 = vmatmul.mubr.msk.bf16.gmra.mxu0 %vm12785_vm11, %v12783_v60  ;;  %v7595_v58 = vpop.f32.mrf.mxu1  ;;  %vm12788_vm10 = vnez %v12787_v20  ;;  %v3579_v7 = vsel %vm12790_vm0, %v3576_v57, %v3578_v12 }
 0x137   : > { %v10412_v61 = vadd.f32 %v7506_v56, %v10237_v44  ;;  %3151 = vmatprep.mubr.bf16.mxu0 %v12789_v50  ;;  %v8692_v50 = vld [vmem:[%s12129_s7 + $0x158] sm:$0xff]  }
 0x138   : > { %6822 = vmatmul.mubr.msk.bf16.gmra.mxu1 %vm12788_vm10, %v10394_v30  ;;  %v7508_v28 = vpop.f32.mrf.mxu0  ;;  %v7596_v56 = vpop.f32.mrf.mxu1  ;;  %vm12801_vm10 = vmmov %vm12763_vm14 }
 0x139   : > { %12786 = vst [vmem:[#allocation51_spill] sm:$0xff] %v10412_v61  ;;  %4151 = vmatprep.mubr.bf16.mxu1 %v10366_v45  ;;  %8450 = vmatpush3.bf16.msra.mxu1 %v8683_v29  ;;  %v7509_v44 = vadd.f32 %v7508_v28, %v7507_v42  ;;  %v10426_v20 = vadd.f32 %v7596_v56, %v7595_v58  ;;  %v12793_v29 = vunpack.c.l.bf16 %v10401_v62  ;;  %v12794_v42 = vunpack.c.h.bf16 %v10401_v62 }
 0x13a   : > { %8451 = vmatprep.subr.bf16.mxu1 %v8687_v43  ;;  %v7510_v32 = vpop.f32.mrf.mxu0  ;;  %v7598_v30 = vpop.f32.mrf.mxu1  ;;  %v10431_v61 = vpack.c.bf16 %v3579_v7, %v3577_v39  ;;  %v12796_v7 = vld [vmem:[#allocation53_spill] sm:$0xff] }
 0x13b   : > { %v10429_v57 = vadd.f32 %v10222_v51, %v7509_v44  ;;  %v3580_v60 = vrot.slane %v12793_v29, 7  ;;  %v3582_v28 = vrot.slane %v12794_v42, 7  ;;  %v8699_v51 = vld [vmem:[%s12129_s7 + $0x150] sm:$0xff]   ;;  %v12797_v44 = vld [vmem:[#allocation54_spill] sm:$0xff] }
 0x13c   : > { %12792 = vst [vmem:[#allocation68_spill] sm:$0xff] %v10431_v61  ;;  %v7511_v24 = vpop.f32.mrf.mxu0  ;;  %v7599_v55 = vpop.f32.mrf.mxu1  ;;  %vm12798_vm0 = vnez %v12797_v44  ;;  %v10475_v44 = vld [vmem:[%s10274_s24 + $0x20] sm:$0xff]  }
 0x13d   : > { %12791 = vst [vmem:[#allocation21_spill] sm:$0xff] %v10429_v57  ;;  %8452 = vmatpush3.bf16.msra.mxu1 %v8687_v43  ;;  %v7512_v25 = vadd.f32 %v7511_v24, %v7510_v32  ;;  %v10443_v58 = vadd.f32 %v7599_v55, %v7598_v30  ;;  %v12800_v24 = vld [vmem:[#allocation23_spill] sm:$0xff]  ;;  %v3581_v29 = vsel %vm12763_vm14, %v3578_v12, %v3580_v60  ;;  %12806 = vst [vmem:[#allocation71_spill] sm:$0xff] %v10475_v44 }
 0x13e   : > { %8453 = vmatprep.subr.bf16.mxu1 %v8692_v50  ;;  %v7513_v39 = vpop.f32.mrf.mxu0  ;;  %6713 = vmatmul.mubr.msk.bf16.gmra.mxu0 %vm12798_vm0, %v12796_v7  ;;  %v7601_v43 = vpop.f32.mrf.mxu1  ;;  %v3583_v30 = vsel %vm12801_vm10, %v3580_v60, %v3582_v28  ;;  %v8706_v7 = vld [vmem:[%s12129_s7 + $0x148] sm:$0xff]  }
 0x13f   : > { %v10449_v56 = vadd.f32 %v10235_v3, %v7512_v25  ;;  %3159 = vmatprep.mubr.bf16.mxu0 %v12800_v24 }
 0x140   : > { %6825 = vmatmul.mubr.msk.bf16.gmra.mxu1 %vm9242_vm6, %v10431_v61  ;;  %v7514_v32 = vpop.f32.mrf.mxu0  ;;  %v7602_v25 = vpop.f32.mrf.mxu1  ;;  %v10468_v61 = vpack.c.bf16 %v3583_v30, %v3581_v29  ;;  %v12807_v30 = vld [vmem:[#allocation55_spill] sm:$0xff]  ;;  %vm12812_vm6 = vmmov %vm12763_vm14 }
 0x141   : > { %12799 = vst [vmem:[#allocation53_spill] sm:$0xff] %v10449_v56  ;;  %4159 = vmatprep.mubr.bf16.mxu1 %v10401_v62  ;;  %8454 = vmatpush3.bf16.msra.mxu1 %v8692_v50  ;;  %v7515_v3 = vadd.f32 %v7514_v32, %v7513_v39  ;;  %v10463_v24 = vadd.f32 %v7602_v25, %v7601_v43  ;;  %v12804_v50 = vunpack.c.l.bf16 %v10438_v18  ;;  %v12805_v39 = vunpack.c.h.bf16 %v10438_v18 }
 0x142   : > { %8455 = vmatprep.subr.bf16.mxu1 %v8699_v51  ;;  %v7516_v12 = vpop.f32.mrf.mxu0  ;;  %v7604_v38 = vpop.f32.mrf.mxu1  ;;  %12803 = vst [vmem:[#allocation70_spill] sm:$0xff] %v10468_v61 }
 0x143   : > { %v10466_v60 = vadd.f32 %v7515_v3, %v10257_v35  ;;  %v3584_v42 = vrot.slane %v12804_v50, 7  ;;  %v3586_v32 = vrot.slane %v12805_v39, 7  ;;  %v8713_v35 = vld [vmem:[%s12129_s7 + $0x140] sm:$0xff]   ;;  %v12808_v3 = vld [vmem:[#allocation56_spill] sm:$0xff] }
 0x144   : > { %v7517_v55 = vpop.f32.mrf.mxu0  ;;  %v7605_v57 = vpop.f32.mrf.mxu1  ;;  %vm12809_vm10 = vnez %v12808_v3  ;;  %v10508_v50 = vld [vmem:[%s10274_s24 + $0x28] sm:$0xff]   ;;  %v12828_v3 = vld [vmem:[#allocation59_spill] sm:$0xff] }
 0x145   : > { %12802 = vst [vmem:[#allocation23_spill] sm:$0xff] %v10466_v60  ;;  %8456 = vmatpush3.bf16.msra.mxu1 %v8699_v51  ;;  %v7518_v56 = vadd.f32 %v7517_v55, %v7516_v12  ;;  %v10480_v43 = vadd.f32 %v7605_v57, %v7604_v38  ;;  %v12811_v55 = vld [vmem:[#allocation27_spill] sm:$0xff]  ;;  %v3585_v38 = vsel %vm12763_vm14, %v3582_v28, %v3584_v42  ;;  %12815 = vst [vmem:[#allocation73_spill] sm:$0xff] %v10508_v50 }
 0x146   : > { %8457 = vmatprep.subr.bf16.mxu1 %v8706_v7  ;;  %v7519_v29 = vpop.f32.mrf.mxu0  ;;  %6716 = vmatmul.mubr.msk.bf16.gmra.mxu0 %vm12809_vm10, %v12807_v30  ;;  %v7607_v51 = vpop.f32.mrf.mxu1  ;;  %v3587_v57 = vsel %vm12812_vm6, %v3584_v42, %v3586_v32  ;;  %v8718_v30 = vld [vmem:[%s12129_s7 + $0x1f8] sm:$0xff]  }
 0x147   : > { %v10486_v25 = vadd.f32 %v7518_v56, %v10265_v40  ;;  %3167 = vmatprep.mubr.bf16.mxu0 %v12811_v55 }
 0x148   : > { %6828 = vmatmul.mubr.msk.bf16.gmra.mxu1 %vm12726_vm8, %v10468_v61  ;;  %v7520_v12 = vpop.f32.mrf.mxu0  ;;  %v7608_v39 = vpop.f32.mrf.mxu1  ;;  %v10505_v61 = vpack.c.bf16 %v3587_v57, %v3585_v38  ;;  %v12339_v38 = vunpack.c.l.bf16 %v10508_v50  ;;  %vm12823_vm8 = vmmov %vm12763_vm14 }
 0x149   : > { %12810 = vst [vmem:[#allocation55_spill] sm:$0xff] %v10486_v25  ;;  %4167 = vmatprep.mubr.bf16.mxu1 %v10438_v18  ;;  %8458 = vmatpush3.bf16.msra.mxu1 %v8706_v7  ;;  %v7521_v56 = vadd.f32 %v7520_v12, %v7519_v29  ;;  %v10500_v55 = vadd.f32 %v7608_v39, %v7607_v51  ;;  %v12816_v7 = vunpack.c.l.bf16 %v10475_v44  ;;  %v12817_v12 = vunpack.c.h.bf16 %v10475_v44 }
 0x14a   : > { %8459 = vmatprep.subr.bf16.mxu1 %v8713_v35  ;;  %v7522_v22 = vpop.f32.mrf.mxu0  ;;  %v7610_v42 = vpop.f32.mrf.mxu1  ;;  %12814 = vst [vmem:[#allocation72_spill] sm:$0xff] %v10505_v61 }
 0x14b   : > { %v10503_v28 = vadd.f32 %v10248_v54, %v7521_v56  ;;  %v3588_v29 = vrot.slane %v12816_v7, 7  ;;  %v3590_v25 = vrot.slane %v12817_v12, 7  ;;  %v12818_v56 = vld [vmem:[#allocation57_spill] sm:$0xff] }
 0x14c   : > { %v7523_v40 = vpop.f32.mrf.mxu0  ;;  %v7611_v51 = vpop.f32.mrf.mxu1 }
 0x14d   : > { %12813 = vst [vmem:[#allocation27_spill] sm:$0xff] %v10503_v28  ;;  %8460 = vmatpush3.bf16.msra.mxu1 %v8713_v35  ;;  %v7524_v60 = vadd.f32 %v7523_v40, %v7522_v22  ;;  %v10514_v39 = vadd.f32 %v7611_v51, %v7610_v42  ;;  %v12819_v28 = vld [vmem:[#allocation58_spill] sm:$0xff]  ;;  %v3591_v42 = vsel %vm12823_vm8, %v3588_v29, %v3590_v25 }
 0x14e   : > { %8117 = vmatprep.subr.bf16.mxu1 %v8718_v30  ;;  %v7525_v54 = vpop.f32.mrf.mxu0  ;;  %vm12820_vm6 = vnez %v12819_v28  ;;  %v7613_v7 = vpop.f32.mrf.mxu1  ;;  %v12822_v22 = vld [vmem:[#allocation30_spill] sm:$0xff]  ;;  %v3589_v30 = vsel %vm12763_vm14, %v3586_v32, %v3588_v29  ;;  %v12825_v32 = vunpack.c.h.bf16 %v10508_v50  ;;  %v10543_v29 = vld [vmem:[%s10274_s24 + $0x30] sm:$0xff]   ;;  %vm12829_vm8 = vnez %v12828_v3 }
 0x14f   : > { %6719 = vmatmul.mubr.msk.bf16.gmra.mxu0 %vm12820_vm6, %v12818_v56  ;;  %v10521_v57 = vadd.f32 %v10263_v9, %v7524_v60  ;;  %v3592_v56 = vrot.slane %v12339_v38, 7  ;;  %v10538_v35 = vpack.c.bf16 %v3591_v42, %v3589_v30  ;;  %12826 = vst [vmem:[#allocation74_spill] sm:$0xff] %v10543_v29  ;;  %v12342_v30 = vunpack.c.l.bf16 %v10543_v29 }
 0x150   : > { %6831 = vmatmul.mubr.msk.bf16.gmra.mxu1 %vm12728_vm1, %v10505_v61  ;;  %3175 = vmatprep.mubr.bf16.mxu0 %v12822_v22  ;;  %v7526_v40 = vpop.f32.mrf.mxu0  ;;  %v7614_v9 = vpop.f32.mrf.mxu1  ;;  %v3594_v61 = vrot.slane %v12825_v32, 7  ;;  %vm12830_vm1 = vmmov %vm12763_vm14 }
 0x151   : > { %12821 = vst [vmem:[#allocation57_spill] sm:$0xff] %v10521_v57  ;;  %4175 = vmatprep.mubr.bf16.mxu1 %v10475_v44  ;;  %v7527_v12 = vadd.f32 %v7526_v40, %v7525_v54  ;;  %v10531_v60 = vadd.f32 %v7614_v9, %v7613_v7  ;;  %12824 = vst [vmem:[#allocation30_spill] sm:$0xff] %v10538_v35  ;;  %v12827_v57 = vld [vmem:[#allocation46_spill] sm:$0xff] }
 0x152   : > { %v7528_v51 = vpop.f32.mrf.mxu0  ;;  %v7616_v22 = vpop.f32.mrf.mxu1 }
 0x153   : > { %v10536_v37 = vadd.f32 %v7527_v12, %v10295_v27  ;;  %v3593_v27 = vsel %vm12763_vm14, %v3590_v25, %v3592_v56  ;;  %vm12834_vm14 = vmmov %vm12830_vm1 }
 0x154   : > { %v7529_v28 = vpop.f32.mrf.mxu0  ;;  %v7617_v40 = vpop.f32.mrf.mxu1 }
 0x155   : > { %v7530_v54 = vadd.f32 %v7529_v28, %v7528_v51  ;;  %v10545_v7 = vadd.f32 %v7617_v40, %v7616_v22  ;;  %v3595_v28 = vsel %vm12830_vm1, %v3592_v56, %v3594_v61  ;;  %v12348_v51 = vunpack.c.h.bf16 %v10543_v29 }
 0x156   : > { %v7531_v9 = vpop.f32.mrf.mxu0  ;;  %v7619_v12 = vpop.f32.mrf.mxu1  ;;  %v10565_v40 = vpack.c.bf16 %v3595_v28, %v3593_v27  ;;  %v3677_v27 = vrot.slane %v10288_v36, 1  ;;  %v3678_v28 = vrot.slane %v10290_v23, 1 }
 0x157   : > { %6722 = vmatmul.mubr.msk.bf16.gmra.mxu0 %vm12829_vm8, %v12827_v57  ;;  %v10553_v42 = vadd.f32 %v7530_v54, %v10315_v33  ;;  %v1057_v57 = vadd.s32 272, %v8891_v8  ;;  %v1687_v8 = vpack.c.bf16 %v9877_v17, %v9867_v46 }
 0x158   : > { %6834 = vmatmul.mubr.msk.bf16.gmra.mxu1 %vm12729_vm9, %v10538_v35  ;;  %3183 = vmatprep.mubr.bf16.mxu0 %v10020_v34  ;;  %v7532_v22 = vpop.f32.mrf.mxu0  ;;  %v7620_v32 = vpop.f32.mrf.mxu1  ;;  %12831 = vst [vmem:[#allocation46_spill] sm:$0xff] %v10565_v40  ;;  %v3596_v34 = vrot.slane %v12342_v30, 7 }
 0x159   : > { %4183 = vmatprep.mubr.bf16.mxu1 %v10508_v50  ;;  %v7533_v25 = vadd.f32 %v7532_v22, %v7531_v9  ;;  %v10563_v33 = vadd.f32 %v7620_v32, %v7619_v12  ;;  %v3598_v9 = vrot.slane %v12348_v51, 7  ;;  %v1301_v22 = vand.u32 15, %v1057_v57 }
 0x15a   : > { %v7534_v54 = vpop.f32.mrf.mxu0  ;;  %v7622_v38 = vpop.f32.mrf.mxu1  ;;  %v12832_v12 = vunpack.c.l.bf16 %v10318_v15 }
 0x15b   : > { %v10570_v56 = vadd.f32 %v10279_v14, %v7533_v25  ;;  %v10581_v14 = vld [vmem:[%s10274_s24 + $0x38] sm:$0xff]   ;;  %v3599_v36 = vsel %vm12834_vm14, %v3596_v34, %v3598_v9  ;;  %vm10596_vm9 = vcmp.gt.s32.totalorder %v1301_v22, 0  ;;  %vm12859_vm14 = vmmov %vm12830_vm1 }
 0x15c   : > { %v3680_v32 = vrot.slane %v12832_v12, 1  ;;  %v7535_v4 = vpop.f32.mrf.mxu0  ;;  %v7623_v35 = vpop.f32.mrf.mxu1  ;;  %12833 = vst [vmem:[#allocation75_spill] sm:$0xff] %v10581_v14  ;;  %v12840_v12 = vunpack.c.l.bf16 %v10366_v45 }
 0x15d   : > { %v7536_v30 = vadd.f32 %v7535_v4, %v7534_v54  ;;  %v10583_v25 = vadd.f32 %v7623_v35, %v7622_v38  ;;  %v3597_v4 = vsel %vm12830_vm1, %v3594_v61, %v3596_v34  ;;  %v12839_v54 = vunpack.c.h.bf16 %v10318_v15 }
 0x15e   : > { %v7537_v3 = vpop.f32.mrf.mxu0  ;;  %v7625_v17 = vpop.f32.mrf.mxu1  ;;  %v3684_v51 = vrot.slane %v12840_v12, 1 }
 0x15f   : > { %6725 = vmatmul.mubr.msk.bf16.gmra.mxu0 %vm10051_vm2, %v9710_v16  ;;  %v10589_v46 = vadd.f32 %v10303_v2, %v7536_v30  ;;  %vm12837_vm2 = vcmask 1046528   ;;  %v3682_v34 = vrot.slane %v12839_v54, 1  ;;  %v12847_v54 = vunpack.c.h.bf16 %v10581_v14 }
 0x160   : > { %6837 = vmatmul.mubr.msk.bf16.gmra.mxu1 %vm12731_vm3, %v10565_v40  ;;  %3191 = vmatprep.mubr.bf16.mxu0 %v1687_v8  ;;  %v7538_v38 = vpop.f32.mrf.mxu0  ;;  %v3679_v35 = vsel %vm12837_vm2, %v3677_v27, %v3678_v28  ;;  %vm12838_vm8 = vmmov %vm12837_vm2  ;;  %v7626_v61 = vpop.f32.mrf.mxu1  ;;  %v12842_v27 = vmov 0 }
 0x161   : > { %4191 = vmatprep.mubr.bf16.mxu1 %v10543_v29  ;;  %v3681_v30 = vsel %vm12838_vm8, %v3678_v28, %v3680_v32  ;;  %v7539_v57 = vadd.f32 %v7538_v38, %v7537_v3  ;;  %v10607_v8 = vadd.f32 %v7626_v61, %v7625_v17  ;;  %vm10617_vm2 = vmpackc.low %vm12537_vm5, %vm10596_vm9  ;;  %v10621_v3 = vpack.c.bf16 %v3599_v36, %v3597_v4 }
 0x162   : > { %v7540_v22 = vpop.f32.mrf.mxu0  ;;  %v7628_v2 = vpop.f32.mrf.mxu1  ;;  %v12843_v27 = vsel %vm10617_vm2, 4294967295, %v12842_v27  ;;  %v6866_v28 = vpack.c.bf16 %v3681_v30, %v3679_v35  ;;  %v12846_v38 = vunpack.c.l.bf16 %v10581_v14  ;;  %v3602_v12 = vrot.slane %v12847_v54, 7  ;;  %vm12851_vm5 = vmmov %vm12838_vm8  ;;  %v12852_v30 = vld [vmem:[#allocation32_spill] sm:$0xff] }
 0x163   : > { %v10612_v16 = vadd.f32 %v7539_v57, %v10347_v21  ;;  %12844 = vst [vmem:[#allocation77_spill] sm:$0xff] %v12843_v27  ;;  %12845 = vst [vmem:[#allocation78_spill] sm:$0xff] %v10621_v3  ;;  %v10628_v21 = vld [vmem:[%s10274_s24 + $0x40] sm:$0xff]   ;;  %v12849_v57 = vunpack.c.h.bf16 %v10366_v45  ;;  %v3683_v4 = vsel %vm12851_vm5, %v3680_v32, %v3682_v34  ;;  %vm12858_vm8 = vnez %v12857_v26 }
 0x164   : > { %v7541_v17 = vpop.f32.mrf.mxu0  ;;  %v3600_v61 = vrot.slane %v12846_v38, 7  ;;  %12848 = vst [vmem:[#allocation79_spill] sm:$0xff] %v10628_v21  ;;  %v12853_v38 = vld [vmem:[#allocation18_spill] sm:$0xff]  ;;  %vm12855_vm9 = vmmov %vm12851_vm5  ;;  %v12863_v26 = vunpack.c.l.bf16 %v10438_v18 }
 0x165   : > { %12841 = vst [vmem:[#allocation76_spill] sm:$0xff] %v10612_v16  ;;  %v3686_v23 = vrot.slane %v12849_v57, 1  ;;  %v7542_v40 = vadd.f32 %v7541_v17, %v7540_v22  ;;  %v7629_v16 = vpop.f32.mrf.mxu1  ;;  %v12854_v15 = vpack.c.bf16 %v12852_v30, %v12853_v38  ;;  %v3685_v54 = vsel %vm12855_vm9, %v3682_v34, %v3684_v51  ;;  %vm12861_vm9 = vmmov %vm12851_vm5 }
 0x166   : > { %v10635_v36 = vadd.f32 %v7629_v16, %v7628_v2  ;;  %v7543_v35 = vpop.f32.mrf.mxu0  ;;  %v3603_v34 = vsel %vm12859_vm14, %v3600_v61, %v3602_v12  ;;  %v12862_v30 = vunpack.c.h.bf16 %v10401_v62 }
 0x167   : > { %6728 = vmatmul.mubr.msk.bf16.gmra.mxu0 %vm10617_vm2, %v12854_v15  ;;  %v10644_v57 = vadd.f32 %v7542_v40, %v10363_v59  ;;  %v7631_v45 = vpop.f32.mrf.mxu1  ;;  %v3601_v15 = vsel %vm12830_vm1, %v3598_v9, %v3600_v61  ;;  %v3687_v22 = vsel %vm12851_vm5, %v3684_v51, %v3686_v23  ;;  %v3689_v17 = vsel %vm12861_vm9, %v3686_v23, %v3688_v6  ;;  %v8691_v51 = vld [vmem:[%s12129_s7 + $0xf8] sm:$0xff]   ;;  %vm12873_vm1 = vmmov %vm12851_vm5 }
 0x168   : > { %6840 = vmatmul.mubr.msk.bf16.gmra.mxu1 %vm12735_vm15, %v10621_v3  ;;  %8413 = vmatprep.mubr.msk.bf16.mxu0 %vm12858_vm8, %v6866_v28  ;;  %v7544_v2 = vpop.f32.mrf.mxu0  ;;  %v10660_v28 = vpack.c.bf16 %v3685_v54, %v3683_v4  ;;  %v3690_v38 = vrot.slane %v12862_v30, 1  ;;  %v3692_v9 = vrot.slane %v12863_v26, 1  ;;  %v10668_v27 = vpack.c.bf16 %v3603_v34, %v3601_v15  ;;  %vm12872_vm8 = vmmov %vm12851_vm5 }
 0x169   : > { %12856 = vst [vmem:[#allocation32_spill] sm:$0xff] %v10644_v57  ;;  %4199 = vmatprep.mubr.bf16.mxu1 %v10581_v14  ;;  %v10656_v59 = vadd.f32 %v7544_v2, %v7543_v35  ;;  %v7632_v40 = vpop.f32.mrf.mxu1  ;;  %v12865_v23 = vunpack.c.l.bf16 %v10628_v21  ;;  %v12866_v35 = vunpack.c.h.bf16 %v10628_v21  ;;  %v10678_v2 = vld [vmem:[%s10274_s24 + $0x48] sm:$0xff]   ;;  %v12868_v30 = vunpack.c.h.bf16 %v10438_v18  ;;  %v12874_v18 = vld [vmem:[#allocation7_spill] sm:$0xff] }
 0x16a   : > { %v10666_v16 = vadd.f32 %v7632_v40, %v7631_v45  ;;  %v7546_v61 = vpop.f32.mrf.mxu0  ;;  %12864 = vst [vmem:[#allocation5_spill] sm:$0xff] %v10668_v27  ;;  %12867 = vst [vmem:[#allocation80_spill] sm:$0xff] %v10678_v2  ;;  %v12869_v40 = vunpack.c.l.bf16 %v10475_v44  ;;  %v10684_v34 = vpack.c.bf16 %v3689_v17, %v3687_v22  ;;  %v3693_v62 = vsel %vm12873_vm1, %v3690_v38, %v3692_v9 }
 0x16b   : > { %12860 = vst [vmem:[#allocation18_spill] sm:$0xff] %v10656_v59  ;;  %v7634_v32 = vpop.f32.mrf.mxu1  ;;  %v3604_v4 = vrot.slane %v12865_v23, 7  ;;  %v3606_v54 = vrot.slane %v12866_v35, 7  ;;  %v3694_v45 = vrot.slane %v12868_v30, 1  ;;  %v8694_v23 = vld [vmem:[%s12129_s7 + $0x130] sm:$0xff]   ;;  %v3691_v35 = vsel %vm12872_vm8, %v3688_v6, %v3690_v38  ;;  %vm12879_vm8 = vmmov %vm12873_vm1 }
 0x16c   : > { %v3696_v26 = vrot.slane %v12869_v40, 1  ;;  %v7547_v15 = vpop.f32.mrf.mxu0  ;;  %12870 = vst [vmem:[#allocation81_spill] sm:$0xff] %v10684_v34  ;;  %vm12875_vm14 = vnez %v12874_v18  ;;  %vm12876_vm5 = vcmask 1040384   ;;  %v12881_v38 = vunpack.c.l.bf16 %v10508_v50 }
 0x16d   : > { %v10686_v13 = vadd.f32 %v7547_v15, %v7546_v61  ;;  %v7635_v3 = vpop.f32.mrf.mxu1  ;;  %v3605_v6 = vsel %vm12876_vm5, %v3602_v12, %v3604_v4  ;;  %vm12877_vm9 = vmmov %vm12876_vm5  ;;  %v3695_v15 = vsel %vm12879_vm8, %v3692_v9, %v3694_v45  ;;  %v8697_v12 = vld [vmem:[%s12129_s7 + $0x128] sm:$0xff]   ;;  %vm12893_vm8 = vcmask 1040384  }
 0x16e   : > { %v10693_v57 = vadd.f32 %v7635_v3, %v7634_v32  ;;  %v8319_v30 = vpop.f32.mrf.mxu0  ;;  %v3607_v3 = vsel %vm12877_vm9, %v3604_v4, %v3606_v54  ;;  %v8695_v32 = vld [vmem:[%s12129_s7 + $0xf0] sm:$0xff]   ;;  %v12880_v4 = vunpack.c.h.bf16 %v10475_v44  ;;  %v3700_v22 = vrot.slane %v12881_v38, 1  ;;  %vm12890_vm5 = vmmov %vm12873_vm1 }
 0x16f   : > { %12871 = vst [vmem:[#allocation82_spill] sm:$0xff] %v10686_v13  ;;  %8414 = vmatmul.mubr.msk.bf16.vlgmr.msra.gmra.mxu0 %vm12875_vm14, %v10660_v28  ;;  %v7637_v17 = vpop.f32.mrf.mxu1  ;;  %v2632_v61 = vadd.f32 %v8319_v30, %v10426_v20  ;;  %v10728_v20 = vpack.c.bf16 %v3607_v3, %v3605_v6  ;;  %vm12891_vm9 = vmmov %vm12873_vm1  ;;  %vm12913_vm2 = vcmask 1040384   ;;  %vm12948_vm15 = vcmask 1046528  }
 0x170   : > { %6843 = vmatmul.mubr.msk.bf16.gmra.mxu1 %vm12740_vm7, %v10668_v27  ;;  %7982 = vmatpush3.bf16.msra.mxu0 %v8691_v51  ;;  %v2623_v40 = vpop.f32.mrf.mxu0  ;;  %v3697_v51 = vsel %vm12873_vm1, %v3694_v45, %v3696_v26  ;;  %v3698_v30 = vrot.slane %v12880_v4, 1  ;;  %v12884_v4 = vunpack.c.l.bf16 %v10678_v2  ;;  %vm12894_vm1 = vmmov %vm12893_vm8 }
 0x171   : > { %4207 = vmatprep.mubr.bf16.mxu1 %v10628_v21  ;;  %8417 = vmatprep.mubr.msk.bf16.mxu0 %vm12677_vm13, %v10684_v34  ;;  %v10723_v53 = vadd.f32 %v2632_v61, %v10132_v0  ;;  %v7638_v27 = vpop.f32.mrf.mxu1  ;;  %v2624_v13 = vadd.f32 %v10389_v47, %v2623_v40  ;;  %12882 = vst [vmem:[#allocation7_spill] sm:$0xff] %v10728_v20  ;;  %v12885_v47 = vunpack.c.h.bf16 %v10678_v2  ;;  %v12889_v61 = vunpack.c.l.bf16 %v10543_v29  ;;  %vm12949_vm3 = vmmov %vm12948_vm15 }
 0x172   : > { %7983 = vmatprep.subr.bf16.mxu0 %v8694_v23  ;;  %v10726_v9 = vadd.f32 %v7638_v27, %v7637_v17  ;;  %v8320_v45 = vpop.f32.mrf.mxu0  ;;  %v10730_v34 = vpack.c.bf16 %v3693_v62, %v3691_v35  ;;  %v3608_v44 = vrot.slane %v12884_v4, 7  ;;  %v10742_v27 = vpack.c.bf16 %v3697_v51, %v3695_v15  ;;  %v10745_v17 = vld [vmem:[%s10274_s24 + $0x50] sm:$0xff]   ;;  %v8701_v15 = vld [vmem:[%s12129_s7 + $0x120] sm:$0xff]  }
 0x173   : > { %v10735_v38 = vadd.f32 %v2624_v13, %v10098_v1  ;;  %v7640_v59 = vpop.f32.mrf.mxu1  ;;  %v2635_v0 = vadd.f32 %v8320_v45, %v10443_v58  ;;  %v10740_v23 = vrot.slane %v12885_v47, 7  ;;  %12887 = vst [vmem:[#allocation85_spill] sm:$0xff] %v10745_v17  ;;  %v12888_v62 = vunpack.c.h.bf16 %v10508_v50  ;;  %v8698_v1 = vld [vmem:[%s12129_s7 + $0xe8] sm:$0xff]  }
 0x174   : > { %12883 = vst [vmem:[#allocation83_spill] sm:$0xff] %v10730_v34  ;;  %7984 = vmatpush3.bf16.msra.mxu0 %v8695_v32  ;;  %12886 = vst [vmem:[#allocation84_spill] sm:$0xff] %v10742_v27  ;;  %v3704_v6 = vrot.slane %v12889_v61, 1  ;;  %v2626_v13 = vpop.f32.mrf.mxu0  ;;  %v3699_v58 = vsel %vm12890_vm5, %v3696_v26, %v3698_v30  ;;  %v3701_v51 = vsel %vm12891_vm9, %v3698_v30, %v3700_v22  ;;  %v12895_v30 = vld [vmem:[#allocation11_spill] sm:$0xff]  ;;  %v10960_v50 = vld [vmem:[%s10274_s24 + $0x68] sm:$0xff]  }
 0x175   : > { %v3702_v35 = vrot.slane %v12888_v62, 1  ;;  %7985 = vmatprep.subr.bf16.mxu0 %v8697_v12  ;;  %v10756_v3 = vadd.f32 %v2635_v0, %v10148_v41  ;;  %v7641_v32 = vpop.f32.mrf.mxu1  ;;  %v2627_v40 = vadd.f32 %v10406_v31, %v2626_v13  ;;  %v3609_v26 = vsel %vm12893_vm8, %v3606_v54, %v3608_v44  ;;  %vm12897_vm8 = vmmov %vm12891_vm9  ;;  %v8702_v61 = vld [vmem:[%s12129_s7 + $0xe0] sm:$0xff]   ;;  %12958 = vst [vmem:[#allocation100_spill] sm:$0xff] %v10960_v50 }
 0x176   : > { %v10763_v45 = vadd.f32 %v7641_v32, %v7640_v59  ;;  %v8323_v12 = vpop.f32.mrf.mxu0  ;;  %v3611_v59 = vsel %vm12894_vm1, %v3608_v44, %v10740_v23  ;;  %vm12896_vm5 = vnez %v12895_v30  ;;  %v12898_v44 = vunpack.c.h.bf16 %v10543_v29  ;;  %vm12910_vm1 = vmmov %vm12897_vm8 }
 0x177   : > { %8418 = vmatmul.mubr.msk.bf16.gmra.mxu0 %vm12678_vm12, %v10730_v34  ;;  %v10771_v0 = vadd.f32 %v2627_v40, %v10112_v5  ;;  %v7643_v31 = vpop.f32.mrf.mxu1  ;;  %v2648_v47 = vadd.f32 %v8323_v12, %v10500_v55  ;;  %v3703_v5 = vsel %vm12891_vm9, %v3700_v22, %v3702_v35  ;;  %v3705_v55 = vsel %vm12897_vm8, %v3702_v35, %v3704_v6  ;;  %v8704_v22 = vld [vmem:[%s12129_s7 + $0x118] sm:$0xff]   ;;  %vm12911_vm9 = vmmov %vm12910_vm1 }
 0x178   : > { %6846 = vmatmul.mubr.msk.bf16.gmra.mxu1 %vm12752_vm4, %v10728_v20  ;;  %8421 = vmatprep.mubr.msk.bf16.mxu0 %vm12896_vm5, %v10742_v27  ;;  %v2639_v62 = vpop.f32.mrf.mxu0  ;;  %v3706_v13 = vrot.slane %v12898_v44, 1  ;;  %v12899_v32 = vunpack.c.l.bf16 %v10581_v14  ;;  %v10802_v19 = vpack.c.bf16 %v3611_v59, %v3609_v26  ;;  %v10804_v44 = vpack.c.bf16 %v3701_v51, %v3699_v58 }
 0x179   : > { %4215 = vmatprep.mubr.bf16.mxu1 %v10678_v2  ;;  %7986 = vmatpush3.bf16.msra.mxu0 %v8698_v1  ;;  %v10794_v12 = vadd.f32 %v2648_v47, %v10209_v48  ;;  %v7644_v54 = vpop.f32.mrf.mxu1  ;;  %v2640_v1 = vadd.f32 %v10463_v24, %v2639_v62  ;;  %v12904_v62 = vunpack.c.h.bf16 %v10745_v17  ;;  %v12906_v26 = vunpack.c.h.bf16 %v10581_v14 }
 0x17a   : > { %v3708_v40 = vrot.slane %v12899_v32, 1  ;;  %7987 = vmatprep.subr.bf16.mxu0 %v8701_v15  ;;  %v10800_v35 = vadd.f32 %v7644_v54, %v7643_v31  ;;  %v8324_v41 = vpop.f32.mrf.mxu0  ;;  %12901 = vst [vmem:[#allocation87_spill] sm:$0xff] %v10802_v19  ;;  %12902 = vst [vmem:[#allocation88_spill] sm:$0xff] %v10804_v44  ;;  %v12903_v32 = vunpack.c.l.bf16 %v10745_v17  ;;  %v10816_v31 = vpack.c.bf16 %v3705_v55, %v3703_v5  ;;  %v8708_v55 = vld [vmem:[%s12129_s7 + $0x110] sm:$0xff]  }
 0x17b   : > { %12900 = vst [vmem:[#allocation86_spill] sm:$0xff] %v10794_v12  ;;  %v10809_v47 = vadd.f32 %v2640_v1, %v10168_v11  ;;  %v7646_v24 = vpop.f32.mrf.mxu1  ;;  %v2651_v15 = vadd.f32 %v8324_v41, %v10514_v39  ;;  %v10814_v20 = vrot.slane %v12904_v62, 7  ;;  %v3710_v59 = vrot.slane %v12906_v26, 1  ;;  %v8705_v11 = vld [vmem:[%s12129_s7 + $0xd8] sm:$0xff]  }
 0x17c   : > { %v3612_v48 = vrot.slane %v12903_v32, 7  ;;  %12905 = vst [vmem:[#allocation89_spill] sm:$0xff] %v10816_v31  ;;  %v12907_v58 = vunpack.c.l.bf16 %v10628_v21  ;;  %v2642_v54 = vpop.f32.mrf.mxu0  ;;  %v10823_v32 = vld [vmem:[%s10274_s24 + $0x58] sm:$0xff]   ;;  %v3707_v1 = vsel %vm12910_vm1, %v3704_v6, %v3706_v13  ;;  %vm12912_vm8 = vnez %v12503_v63 }
 0x17d   : > { %7988 = vmatpush3.bf16.msra.mxu0 %v8702_v61  ;;  %12908 = vst [vmem:[#allocation90_spill] sm:$0xff] %v10823_v32  ;;  %v10829_v39 = vadd.f32 %v2651_v15, %v10220_v10  ;;  %v7647_v41 = vpop.f32.mrf.mxu1  ;;  %v2643_v5 = vadd.f32 %v10480_v43, %v2642_v54  ;;  %v3709_v61 = vsel %vm12911_vm9, %v3706_v13, %v3708_v40  ;;  %vm12916_vm9 = vmmov %vm12913_vm2  ;;  %v12917_v13 = vld [vmem:[#allocation16_spill] sm:$0xff]  ;;  %v12921_v54 = vunpack.c.h.bf16 %v10628_v21 }
 0x17e   : > { %v3712_v51 = vrot.slane %v12907_v58, 1  ;;  %7989 = vmatprep.subr.bf16.mxu0 %v8704_v22  ;;  %v10837_v62 = vadd.f32 %v7647_v41, %v7646_v24  ;;  %v8327_v26 = vpop.f32.mrf.mxu0  ;;  %v3613_v10 = vsel %vm12913_vm2, %v10740_v23, %v3612_v48  ;;  %vm12915_vm1 = vnez %v12771_v49 }
 0x17f   : > { %12909 = vst [vmem:[#allocation91_spill] sm:$0xff] %v10829_v39  ;;  %8422 = vmatmul.mubr.msk.bf16.gmra.mxu0 %vm12912_vm8, %v10804_v44  ;;  %v10845_v43 = vadd.f32 %v2643_v5, %v10184_v52  ;;  %v7649_v22 = vpop.f32.mrf.mxu1  ;;  %v2664_v15 = vadd.f32 %v8327_v26, %v10563_v33  ;;  %v3615_v6 = vsel %vm12916_vm9, %v3612_v48, %v10814_v20  ;;  %v3515_v24 = vunpack.c.l.bf16 %v10823_v32  ;;  %v8709_v48 = vld [vmem:[%s12129_s7 + $0xd0] sm:$0xff]   ;;  %v12922_v5 = vld [vmem:[#allocation39_spill] sm:$0xff] }
 0x180   : > { %6849 = vmatmul.mubr.msk.bf16.gmra.mxu1 %vm12915_vm1, %v10802_v19  ;;  %vm12918_vm4 = vnez %v12917_v13  ;;  %v2655_v23 = vpop.f32.mrf.mxu0  ;;  %vm12919_vm2 = vcmask 1046528   ;;  %v3714_v41 = vrot.slane %v12921_v54, 1  ;;  %v10877_v29 = vpack.c.bf16 %v3615_v6, %v3613_v10 }
 0x181   : > { %12914 = vst [vmem:[#allocation92_spill] sm:$0xff] %v10845_v43  ;;  %8425 = vmatprep.mubr.msk.bf16.mxu0 %vm12918_vm4, %v10816_v31  ;;  %4223 = vmatprep.mubr.bf16.mxu1 %v10745_v17  ;;  %v3711_v33 = vsel %vm12919_vm2, %v3708_v40, %v3710_v59  ;;  %vm12920_vm7 = vmmov %vm12919_vm2  ;;  %v10867_v26 = vadd.f32 %v2664_v15, %v12922_v5  ;;  %v7650_v49 = vpop.f32.mrf.mxu1  ;;  %v8711_v40 = vld [vmem:[%s12129_s7 + $0x108] sm:$0xff]   ;;  %v10882_v15 = vld [vmem:[%s10274_s24 + $0x60] sm:$0xff]   ;;  %v12932_v10 = vunpack.c.l.bf16 %v10745_v17 }
 0x182   : > { %v3713_v58 = vsel %vm12920_vm7, %v3710_v59, %v3712_v51  ;;  %7990 = vmatpush3.bf16.msra.mxu0 %v8705_v11  ;;  %v2656_v19 = vadd.f32 %v10531_v60, %v2655_v23  ;;  %v12924_v59 = vunpack.c.l.bf16 %v10678_v2  ;;  %v10875_v52 = vadd.f32 %v7650_v49, %v7649_v22  ;;  %v8328_v14 = vpop.f32.mrf.mxu0  ;;  %12925 = vst [vmem:[#allocation93_spill] sm:$0xff] %v10877_v29  ;;  %v12928_v5 = vld [vmem:[#allocation37_spill] sm:$0xff]  ;;  %vm12936_vm7 = vmmov %vm12919_vm2 }
 0x183   : > { %12923 = vst [vmem:[#allocation39_spill] sm:$0xff] %v10867_v26  ;;  %7991 = vmatprep.subr.bf16.mxu0 %v8708_v55  ;;  %v10879_v54 = vpack.c.bf16 %v3709_v61, %v3707_v1  ;;  %12927 = vst [vmem:[#allocation95_spill] sm:$0xff] %v10882_v15  ;;  %v7652_v60 = vpop.f32.mrf.mxu1  ;;  %v2667_v55 = vadd.f32 %v8328_v14, %v10583_v25  ;;  %v3616_v23 = vrot.slane %v3515_v24, 7  ;;  %v3720_v6 = vrot.slane %v12932_v10, 1 }
 0x184   : > { %v3716_v11 = vrot.slane %v12924_v59, 1  ;;  %v10885_v21 = vadd.f32 %v2656_v19, %v12928_v5  ;;  %v10888_v26 = vpack.c.bf16 %v3713_v58, %v3711_v33  ;;  %v12931_v59 = vunpack.c.h.bf16 %v10678_v2  ;;  %v2658_v22 = vpop.f32.mrf.mxu0  ;;  %v8712_v19 = vld [vmem:[%s12129_s7 + $0xc8] sm:$0xff]   ;;  %v12934_v5 = vld [vmem:[#allocation43_spill] sm:$0xff]  ;;  %vm12937_vm9 = vmmov %vm12919_vm2 }
 0x185   : > { %12926 = vst [vmem:[#allocation94_spill] sm:$0xff] %v10879_v54  ;;  %v12933_v1 = vunpack.c.h.bf16 %v10823_v32  ;;  %v10900_v14 = vadd.f32 %v2667_v55, %v12934_v5  ;;  %v7653_v25 = vpop.f32.mrf.mxu1  ;;  %v2659_v33 = vadd.f32 %v10545_v7, %v2658_v22  ;;  %v3517_v58 = vunpack.c.l.bf16 %v10882_v15  ;;  %v12938_v55 = vld [vmem:[#allocation20_spill] sm:$0xff]  ;;  %v12940_v22 = vld [vmem:[#allocation34_spill] sm:$0xff] }
 0x186   : > { %12929 = vst [vmem:[#allocation37_spill] sm:$0xff] %v10885_v21  ;;  %12930 = vst [vmem:[#allocation96_spill] sm:$0xff] %v10888_v26  ;;  %v3718_v49 = vrot.slane %v12931_v59, 1  ;;  %7992 = vmatpush3.bf16.msra.mxu0 %v8709_v48  ;;  %v8715_v59 = vld [vmem:[%s12129_s7 + $0x100] sm:$0xff]   ;;  %v3715_v10 = vsel %vm12936_vm7, %v3712_v51, %v3714_v41  ;;  %v3717_v48 = vsel %vm12937_vm9, %v3714_v41, %v3716_v11  ;;  %v8331_v2 = vpop.f32.mrf.mxu0  ;;  %vm12939_vm2 = vnez %v12938_v55  ;;  %v12944_v41 = vld [vmem:[#allocation22_spill] sm:$0xff] }
 0x187   : > { %v3618_v61 = vrot.slane %v12933_v1, 7  ;;  %12935 = vst [vmem:[#allocation43_spill] sm:$0xff] %v10900_v14  ;;  %7993 = vmatprep.subr.bf16.mxu0 %v8711_v40  ;;  %v10909_v1 = vadd.f32 %v7653_v25, %v7652_v60  ;;  %8426 = vmatmul.mubr.msk.bf16.gmra.mxu0 %vm12939_vm2, %v10879_v54  ;;  %v10916_v5 = vadd.f32 %v2659_v33, %v12940_v22  ;;  %v7655_v40 = vpop.f32.mrf.mxu1  ;;  %vm12943_vm7 = vcmask 1040384   ;;  %v12950_v22 = vld [vmem:[#allocation64_spill] sm:$0xff] }
 0x188   : > { %v2680_v14 = vadd.f32 %v8331_v2, %v10666_v16  ;;  %6852 = vmatmul.mubr.msk.bf16.gmra.mxu1 %vm12785_vm11, %v10877_v29  ;;  %v3617_v51 = vsel %vm12943_vm7, %v10814_v20, %v3616_v23  ;;  %vm12945_vm9 = vnez %v12944_v41  ;;  %v12946_v60 = vunpack.c.h.bf16 %v10745_v17  ;;  %v2671_v7 = vpop.f32.mrf.mxu0  ;;  %vm12947_vm1 = vmmov %vm12943_vm7  ;;  %v8716_v20 = vld [vmem:[%s12129_s7 + $0xc0] sm:$0xff]  }
 0x189   : > { %12941 = vst [vmem:[#allocation34_spill] sm:$0xff] %v10916_v5  ;;  %8429 = vmatprep.mubr.msk.bf16.mxu0 %vm12945_vm9, %v10888_v26  ;;  %v3619_v33 = vsel %vm12947_vm1, %v3616_v23, %v3618_v61  ;;  %4231 = vmatprep.mubr.bf16.mxu1 %v10823_v32  ;;  %v3719_v16 = vsel %vm12948_vm15, %v3716_v11, %v3718_v49  ;;  %v7656_v29 = vpop.f32.mrf.mxu1  ;;  %v3724_v17 = vrot.slane %v3515_v24, 1  ;;  %v3620_v23 = vrot.slane %v3517_v58, 7  ;;  %v10943_v11 = vld [vmem:[%s12129_s7 + $0x238] sm:$0xff]   ;;  %vm12962_vm15 = vmmov %vm12949_vm3 }
 0x18a   : > { %v3722_v25 = vrot.slane %v12946_v60, 1  ;;  %v3721_v2 = vsel %vm12949_vm3, %v3718_v49, %v3720_v6  ;;  %7994 = vmatpush3.bf16.msra.mxu0 %v8712_v19  ;;  %v10937_v21 = vadd.f32 %v2680_v14, %v12950_v22  ;;  %v2672_v60 = vadd.f32 %v10607_v8, %v2671_v7  ;;  %v8332_v19 = vpop.f32.mrf.mxu0 }
 0x18b   : > { %7995 = vmatprep.subr.bf16.mxu0 %v8715_v59  ;;  %v10945_v49 = vadd.f32 %v7656_v29, %v7655_v40  ;;  %v10947_v5 = vpack.c.bf16 %v3717_v48, %v3715_v10  ;;  %v12953_v14 = vunpack.c.h.bf16 %v10882_v15  ;;  %v7658_v8 = vpop.f32.mrf.mxu1  ;;  %v2683_v24 = vadd.f32 %v8332_v19, %v10693_v57  ;;  %v12966_v19 = vld [vmem:[#allocation47_spill] sm:$0xff] }
 0x18c   : > { %12951 = vst [vmem:[#allocation64_spill] sm:$0xff] %v10937_v21  ;;  %v12954_v21 = vld [vmem:[#allocation12_spill] sm:$0xff]  ;;  %v10955_v59 = vpack.c.bf16 %v3619_v33, %v3617_v51  ;;  %v10957_v7 = vpack.c.bf16 %v3721_v2, %v3719_v16  ;;  %v3723_v29 = vsel %vm12949_vm3, %v3720_v6, %v3722_v25  ;;  %v2674_v40 = vpop.f32.mrf.mxu0  ;;  %v12959_v10 = vunpack.c.h.bf16 %v10823_v32  ;;  %v12963_v2 = vld [vmem:[#allocation26_spill] sm:$0xff]  ;;  %vm12965_vm3 = vmmov %vm12947_vm1 }
 0x18d   : > { %12952 = vst [vmem:[#allocation97_spill] sm:$0xff] %v10947_v5  ;;  %v3622_v22 = vrot.slane %v12953_v14, 7  ;;  %v10952_v39 = vadd.f32 %v2672_v60, %v12954_v21  ;;  %v3728_v12 = vrot.slane %v3517_v58, 1  ;;  %v12960_v14 = vld [vmem:[#allocation49_spill] sm:$0xff]  ;;  %v7659_v60 = vpop.f32.mrf.mxu1  ;;  %v2675_v57 = vadd.f32 %v10635_v36, %v2674_v40  ;;  %v12969_v40 = vld [vmem:[#allocation28_spill] sm:$0xff] }
 0x18e   : > { %12956 = vst [vmem:[#allocation98_spill] sm:$0xff] %v10955_v59  ;;  %12957 = vst [vmem:[#allocation99_spill] sm:$0xff] %v10957_v7  ;;  %v3726_v48 = vrot.slane %v12959_v10, 1  ;;  %7996 = vmatpush3.bf16.msra.mxu0 %v8716_v20  ;;  %v10966_v21 = vadd.f32 %v2683_v24, %v12960_v14  ;;  %v3725_v51 = vsel %vm12962_vm15, %v3722_v25, %v3724_v17  ;;  %v8335_v16 = vpop.f32.mrf.mxu0  ;;  %vm12964_vm7 = vnez %v12963_v2 }
 0x18f   : > { %12955 = vst [vmem:[#allocation12_spill] sm:$0xff] %v10952_v39  ;;  %v3621_v33 = vsel %vm12947_vm1, %v3618_v61, %v3620_v23  ;;  %8493 = vmatprep.subr.bf16.mxu0 %v10943_v11  ;;  %v10972_v6 = vadd.f32 %v7659_v60, %v7658_v8  ;;  %8430 = vmatmul.mubr.msk.bf16.gmra.mxu0 %vm12964_vm7, %v10947_v5  ;;  %v3519_v20 = vunpack.c.l.bf16 %v10960_v50  ;;  %v3520_v36 = vunpack.c.h.bf16 %v10960_v50  ;;  %v7661_v61 = vpop.f32.mrf.mxu1  ;;  %v10994_v60 = vld [vmem:[%s10274_s24 + $0x70] sm:$0xff]  }
 0x190   : > { %12961 = vst [vmem:[#allocation49_spill] sm:$0xff] %v10966_v21  ;;  %v3623_v58 = vsel %vm12965_vm3, %v3620_v23, %v3622_v22  ;;  %v10981_v25 = vadd.f32 %v2675_v57, %v12966_v19  ;;  %v2696_v24 = vadd.f32 %v8335_v16, %v10800_v35  ;;  %6855 = vmatmul.mubr.msk.bf16.gmra.mxu1 %vm12798_vm0, %v10955_v59  ;;  %v2687_v10 = vpop.f32.mrf.mxu0  ;;  %vm12971_vm1 = vcmask 1046528   ;;  %12973 = vst [vmem:[#allocation101_spill] sm:$0xff] %v10994_v60  ;;  %v12974_v35 = vld [vmem:[#allocation21_spill] sm:$0xff] }
 0x191   : > { %vm12970_vm15 = vnez %v12969_v40  ;;  %4239 = vmatprep.mubr.bf16.mxu1 %v10882_v15  ;;  %v3727_v23 = vsel %vm12971_vm1, %v3724_v17, %v3726_v48  ;;  %vm12972_vm3 = vmmov %vm12971_vm1  ;;  %v3521_v57 = vunpack.c.l.bf16 %v10994_v60  ;;  %v7662_v19 = vpop.f32.mrf.mxu1  ;;  %v2688_v8 = vadd.f32 %v10726_v9, %v2687_v10 }
 0x192   : > { %12967 = vst [vmem:[#allocation47_spill] sm:$0xff] %v10981_v25  ;;  %8433 = vmatprep.mubr.msk.bf16.mxu0 %vm12970_vm15, %v10957_v7  ;;  %v3729_v14 = vsel %vm12972_vm3, %v3726_v48, %v3728_v12  ;;  %v10998_v16 = vadd.f32 %v2696_v24, %v12974_v35  ;;  %v11001_v59 = vpack.c.bf16 %v3623_v58, %v3621_v33  ;;  %v8336_v25 = vpop.f32.mrf.mxu0  ;;  %v12978_v17 = vunpack.c.h.bf16 %v10882_v15  ;;  %v12979_v7 = vld [vmem:[#allocation6_spill] sm:$0xff]  ;;  %v12981_v58 = vld [vmem:[#allocation53_spill] sm:$0xff] }
 0x193   : > { %v11003_v32 = vpack.c.bf16 %v3725_v51, %v3723_v29  ;;  %v11005_v21 = vadd.f32 %v7662_v19, %v7661_v61  ;;  %v3624_v39 = vrot.slane %v3519_v20, 7  ;;  %v3626_v40 = vrot.slane %v3520_v36, 7  ;;  %v7664_v24 = vpop.f32.mrf.mxu1  ;;  %v12983_v15 = vld [vmem:[#allocation33_spill] sm:$0xff] }
 0x194   : > { %12975 = vst [vmem:[#allocation21_spill] sm:$0xff] %v10998_v16  ;;  %12976 = vst [vmem:[#allocation102_spill] sm:$0xff] %v11001_v59  ;;  %v3730_v48 = vrot.slane %v12978_v17, 1  ;;  %v11010_v43 = vadd.f32 %v2688_v8, %v12979_v7  ;;  %v2699_v35 = vadd.f32 %v8336_v25, %v10837_v62  ;;  %v3732_v16 = vrot.slane %v3519_v20, 1  ;;  %v2690_v33 = vpop.f32.mrf.mxu0 }
 0x195   : > { %12977 = vst [vmem:[#allocation103_spill] sm:$0xff] %v11003_v32  ;;  %v11013_v9 = vpack.c.bf16 %v3729_v14, %v3727_v23  ;;  %v3734_v29 = vrot.slane %v3520_v36, 1  ;;  %v3736_v51 = vrot.slane %v3521_v57, 1  ;;  %v7665_v10 = vpop.f32.mrf.mxu1  ;;  %v2691_v19 = vadd.f32 %v10763_v45, %v2690_v33  ;;  %v12987_v36 = vld [vmem:[#allocation51_spill] sm:$0xff]  ;;  %v12997_v45 = vld [vmem:[#allocation40_spill] sm:$0xff] }
 0x196   : > { %v11016_v61 = vadd.f32 %v2699_v35, %v12981_v58  ;;  %v11019_v17 = vadd.f32 %v7665_v10, %v7664_v24  ;;  %v3731_v7 = vsel %vm12971_vm1, %v3728_v12, %v3730_v48  ;;  %v8339_v8 = vpop.f32.mrf.mxu0  ;;  %vm12984_vm3 = vnez %v12983_v15  ;;  %v12990_v24 = vld [vmem:[#allocation35_spill] sm:$0xff]  ;;  %v13072_v15 = vld [vmem:[#allocation37_spill] sm:$0xff] }
 0x197   : > { %12980 = vst [vmem:[#allocation6_spill] sm:$0xff] %v11013_v9  ;;  %8434 = vmatmul.mubr.msk.bf16.gmra.mxu0 %vm12984_vm3, %v11003_v32  ;;  %vm12985_vm0 = vcmask 1040384   ;;  %v11028_v25 = vadd.f32 %v2691_v19, %v12987_v36  ;;  %v7667_v23 = vpop.f32.mrf.mxu1  ;;  %v2712_v14 = vadd.f32 %v8339_v8, %v10945_v49  ;;  %v3733_v12 = vsel %vm12971_vm1, %v3730_v48, %v3732_v16  ;;  %v12994_v33 = vld [vmem:[#allocation27_spill] sm:$0xff] }
 0x198   : > { %12982 = vst [vmem:[#allocation53_spill] sm:$0xff] %v11016_v61  ;;  %v3625_v62 = vsel %vm12985_vm0, %v3622_v22, %v3624_v39  ;;  %vm12986_vm11 = vmmov %vm12985_vm0  ;;  %6858 = vmatmul.mubr.msk.bf16.gmra.mxu1 %vm12809_vm10, %v11001_v59  ;;  %vm12991_vm15 = vnez %v12990_v24  ;;  %v2703_v35 = vpop.f32.mrf.mxu0  ;;  %v11047_v36 = vpack.c.bf16 %v3733_v12, %v3731_v7  ;;  %v12998_v59 = vunpack.c.h.bf16 %v12997_v45 }
 0x199   : > { %v3627_v20 = vsel %vm12986_vm11, %v3624_v39, %v3626_v40  ;;  %12988 = vst [vmem:[#allocation51_spill] sm:$0xff] %v11028_v25  ;;  %8437 = vmatprep.mubr.msk.bf16.mxu0 %vm12991_vm15, %v11013_v9  ;;  %4247 = vmatprep.mubr.bf16.mxu1 %v10960_v50  ;;  %vm12992_vm11 = vmmov %vm12971_vm1  ;;  %v11042_v58 = vadd.f32 %v2712_v14, %v12994_v33  ;;  %v7668_v49 = vpop.f32.mrf.mxu1  ;;  %v12999_v50 = vld [vmem:[#allocation23_spill] sm:$0xff] }
 0x19a   : > { %v3735_v39 = vsel %vm12992_vm11, %v3732_v16, %v3734_v29  ;;  %vm12993_vm0 = vmmov %vm12971_vm1  ;;  %v2704_v10 = vadd.f32 %v10875_v52, %v2703_v35  ;;  %v7669_v19 = vadd.f32 %v7668_v49, %v7667_v23  ;;  %v8340_v8 = vpop.f32.mrf.mxu0  ;;  %v11045_v48 = vpack.c.bf16 %v3627_v20, %v3625_v62  ;;  %12996 = vst [vmem:[#allocation104_spill] sm:$0xff] %v11047_v36  ;;  %v13000_v14 = vld [vmem:[#allocation3_spill] sm:$0xff]  ;;  %v13003_v20 = vld [vmem:[#allocation57_spill] sm:$0xff] }
 0x19b   : > { %v3737_v22 = vsel %vm12993_vm0, %v3734_v29, %v3736_v51  ;;  %12995 = vst [vmem:[#allocation27_spill] sm:$0xff] %v11042_v58  ;;  %v3738_v61 = vrot.slane %v12998_v59, 1  ;;  %v7670_v16 = vpop.f32.mrf.mxu1  ;;  %v2715_v29 = vadd.f32 %v8340_v8, %v10972_v6  ;;  %v13001_v33 = vunpack.c.l.bf16 %v13000_v14  ;;  %v13004_v35 = vld [vmem:[#allocation38_spill] sm:$0xff]  ;;  %vm13006_vm11 = vmmov %vm12993_vm0  ;;  %v13007_v49 = vld [vmem:[#allocation55_spill] sm:$0xff] }
 0x19c   : > { %v11052_v25 = vadd.f32 %v2704_v10, %v12999_v50  ;;  %v11059_v52 = vpack.c.bf16 %v3737_v22, %v3735_v39  ;;  %v2706_v23 = vpop.f32.mrf.mxu0  ;;  %v3628_v62 = vrot.slane %v3521_v57, 7  ;;  %vm13005_vm1 = vnez %v13004_v35  ;;  %v13009_v8 = vld [vmem:[#allocation41_spill] sm:$0xff] }
 0x19d   : > { %v11057_v58 = vrot.slane %v13001_v33, 1  ;;  %v11062_v7 = vadd.f32 %v2715_v29, %v13003_v20  ;;  %v7671_v12 = vpop.f32.mrf.mxu1  ;;  %v2707_v59 = vadd.f32 %v10909_v1, %v2706_v23  ;;  %v3739_v6 = vsel %vm13006_vm11, %v3736_v51, %v3738_v61  ;;  %v13012_v51 = vld [vmem:[#allocation61_spill] sm:$0xff] }
 0x19e   : > { %13002 = vst [vmem:[#allocation40_spill] sm:$0xff] %v11059_v52  ;;  %v7672_v50 = vadd.f32 %v7671_v12, %v7670_v16  ;;  %v8343_v45 = vpop.f32.mrf.mxu0  ;;  %vm13010_vm10 = vnez %v13009_v8 }
 0x19f   : > { %8438 = vmatmul.mubr.msk.bf16.gmra.mxu0 %vm13005_vm1, %v11047_v36  ;;  %v11070_v39 = vadd.f32 %v2707_v59, %v13007_v49  ;;  %v7673_v22 = vpop.f32.mrf.mxu1  ;;  %v2728_v57 = vadd.f32 %v8343_v45, %v7669_v19  ;;  %v3741_v1 = vsel %vm12993_vm0, %v3738_v61, %v11057_v58  ;;  %vm13011_vm1 = vcmask 1040384   ;;  %v11085_v19 = vld [vmem:[%s10274_s24 + $0x78] sm:$0xff]  }
 0x1a0   : > { %6861 = vmatmul.mubr.msk.bf16.gmra.mxu1 %vm12820_vm6, %v11045_v48  ;;  %8441 = vmatprep.mubr.msk.bf16.mxu0 %vm13010_vm10, %v11059_v52  ;;  %v2719_v16 = vpop.f32.mrf.mxu0  ;;  %v3629_v29 = vsel %vm13011_vm1, %v3626_v40, %v3628_v62  ;;  %vm13013_vm11 = vmmov %vm13011_vm1  ;;  %v12417_v33 = vunpack.c.h.bf16 %v11085_v19  ;;  %v11092_v45 = vpack.c.bf16 %v3741_v1, %v3739_v6 }
 0x1a1   : > { %v3631_v14 = vsel %vm13013_vm11, %v3628_v62, %v13012_v51  ;;  %4255 = vmatprep.mubr.bf16.mxu1 %v10994_v60  ;;  %v11089_v23 = vadd.f32 %v2728_v57, %v10570_v56  ;;  %v7674_v61 = vpop.f32.mrf.mxu1  ;;  %v2720_v20 = vadd.f32 %v11005_v21, %v2719_v16  ;;  %v13016_v57 = vld [vmem:[#allocation60_spill] sm:$0xff]  ;;  %v13018_v16 = vld [vmem:[#allocation15_spill] sm:$0xff] }
 0x1a2   : > { %v7675_v12 = vadd.f32 %v7674_v61, %v7673_v22  ;;  %v8344_v59 = vpop.f32.mrf.mxu0  ;;  %13014 = vst [vmem:[#allocation23_spill] sm:$0xff] %v11092_v45  ;;  %v11096_v40 = vrot.slane %v12417_v33, 7  ;;  %v11101_v60 = vpack.c.bf16 %v3631_v14, %v3629_v29 }
 0x1a3   : > { %v11099_v62 = vadd.f32 %v2720_v20, %v10536_v37  ;;  %v7676_v49 = vpop.f32.mrf.mxu1  ;;  %v2731_v51 = vadd.f32 %v8344_v59, %v7672_v50  ;;  %v13020_v50 = vld [vmem:[#allocation44_spill] sm:$0xff]  ;;  %v13022_v59 = vld [vmem:[#allocation59_spill] sm:$0xff] }
 0x1a4   : > { %13015 = vst [vmem:[#allocation3_spill] sm:$0xff] %v11096_v40  ;;  %v2722_v56 = vpop.f32.mrf.mxu0  ;;  %v3635_v21 = vsel %vm13011_vm1, %v13016_v57, %v11096_v40  ;;  %vm13021_vm0 = vnez %v13020_v50  ;;  %vm13023_vm11 = vnez %v13022_v59 }
 0x1a5   : > { %v11107_v22 = vadd.f32 %v2731_v51, %v10589_v46  ;;  %v7677_v6 = vpop.f32.mrf.mxu1  ;;  %v2723_v1 = vadd.f32 %v11019_v17, %v2722_v56  ;;  %v11111_v61 = vpack.c.bf16 %v3635_v21, %v13018_v16  ;;  %v13024_v46 = vld [vmem:[#allocation62_spill] sm:$0xff]  ;;  %v13025_v21 = vld [vmem:[#allocation76_spill] sm:$0xff]  ;;  %v13028_v16 = vld [vmem:[#allocation63_spill] sm:$0xff] }
 0x1a6   : > { %v7678_v37 = vadd.f32 %v7677_v6, %v7676_v49  ;;  %v8347_v20 = vpop.f32.mrf.mxu0 }
 0x1a7   : > { %13017 = vst [vmem:[#allocation57_spill] sm:$0xff] %v11107_v22  ;;  %13019 = vst [vmem:[#allocation55_spill] sm:$0xff] %v11111_v61  ;;  %8442 = vmatmul.mubr.msk.bf16.gmra.mxu0 %vm13021_vm0, %v11092_v45  ;;  %v11117_v29 = vadd.f32 %v2723_v1, %v10553_v42  ;;  %v7679_v14 = vpop.f32.mrf.mxu1  ;;  %v13027_v1 = vld [vmem:[#allocation18_spill] sm:$0xff] }
 0x1a8   : > { %6864 = vmatmul.mubr.msk.bf16.gmra.mxu1 %vm13023_vm11, %v11101_v60  ;;  %4746 = vmatprep.mubr.bf16.mxu0 %v13024_v46  ;;  %v2735_v17 = vpop.f32.mrf.mxu0  ;;  %v2197_v33 = vadd.f32 %v13028_v16, %v13027_v1  ;;  %v8719_v46 = vld [vmem:[%s12129_s7 + $0x1b8] sm:$0xff]  }
 0x1a9   : > { %8461 = vmatprep.mubr.msk.bf16.mxu1 %vm12875_vm14, %v10660_v28  ;;  %v7680_v49 = vpop.f32.mrf.mxu1  ;;  %v2736_v51 = vadd.f32 %v7675_v12, %v2735_v17  ;;  %v8720_v28 = vld [vmem:[%s12129_s7 + $0x1f0] sm:$0xff]  }
 0x1aa   : > { %v7681_v56 = vadd.f32 %v7680_v49, %v7679_v14  ;;  %v8348_v57 = vpop.f32.mrf.mxu0  ;;  %v13030_v49 = vld [vmem:[#allocation17_spill] sm:$0xff] }
 0x1ab   : > { %v11127_v6 = vadd.f32 %v2736_v51, %v13025_v21  ;;  %v7682_v42 = vpop.f32.mrf.mxu1  ;;  %v13031_v51 = vld [vmem:[#allocation9_spill] sm:$0xff] }
 0x1ac   : > { %v2744_v40 = vadd.f32 %v8347_v20, %v7681_v56  ;;  %v2738_v61 = vpop.f32.mrf.mxu0  ;;  %vm13032_vm14 = vnez %v13031_v51  ;;  %v8722_v20 = vld [vmem:[%s12129_s7 + $0x230] sm:$0xff]   ;;  %v13033_v56 = vld [vmem:[#allocation32_spill] sm:$0xff] }
 0x1ad   : > { %13026 = vst [vmem:[#allocation58_spill] sm:$0xff] %v11127_v6  ;;  %v7683_v22 = vpop.f32.mrf.mxu1  ;;  %v2739_v18 = vadd.f32 %v7678_v37, %v2738_v61  ;;  %v13035_v37 = vld [vmem:[#allocation81_spill] sm:$0xff]  ;;  %v8727_v51 = vld [vmem:[%s12129_s7 + $0x228] sm:$0xff]  }
 0x1ae   : > { %v11137_v12 = vadd.f32 %v2744_v40, %v2197_v33  ;;  %v7684_v14 = vadd.f32 %v7683_v22, %v7682_v42  ;;  %v7725_v17 = vpop.f32.mrf.mxu0  ;;  %v13037_v33 = vld [vmem:[#allocation82_spill] sm:$0xff]  ;;  %v13038_v40 = vld [vmem:[#allocation65_spill] sm:$0xff] }
 0x1af   : > { %6987 = vmatmul.mubr.msk.bf16.vlgmr.msra.gmra.mxu0 %vm13032_vm14, %v13030_v49  ;;  %v11146_v21 = vadd.f32 %v2739_v18, %v13033_v56  ;;  %v8367_v61 = vpop.f32.mrf.mxu1  ;;  %v2200_v22 = vadd.f32 %v13038_v40, %v13037_v33  ;;  %v13039_v49 = vld [vmem:[#allocation66_spill] sm:$0xff]  ;;  %v8721_v18 = vld [vmem:[%s12129_s7 + $0x1b0] sm:$0xff]  }
 0x1b0   : > { %13029 = vst [vmem:[#allocation61_spill] sm:$0xff] %v11137_v12  ;;  %8462 = vmatmul.mubr.msk.bf16.vlgmr.msra.gmra.mxu1 %vm12677_vm13, %v13035_v37  ;;  %8494 = vmatpush3.bf16.msra.mxu0 %v10943_v11  ;;  %v2747_v42 = vadd.f32 %v8348_v57, %v7684_v14  ;;  %v7726_v16 = vpop.f32.mrf.mxu0  ;;  %v8723_v11 = vld [vmem:[%s12129_s7 + $0x1e8] sm:$0xff]  }
 0x1b1   : > { %13034 = vst [vmem:[#allocation60_spill] sm:$0xff] %v11146_v21  ;;  %8118 = vmatpush3.bf16.msra.mxu1 %v8719_v46  ;;  %4754 = vmatprep.mubr.bf16.mxu0 %v13039_v49  ;;  %v7727_v56 = vadd.f32 %v7726_v16, %v7725_v17  ;;  %v3234_v12 = vpop.f32.mrf.mxu1  ;;  %v8724_v17 = vld [vmem:[%s12129_s7 + $0x1a8] sm:$0xff]  }
 0x1b2   : > { %8465 = vmatprep.mubr.msk.bf16.mxu1 %vm12678_vm12, %v10730_v34  ;;  %8119 = vmatprep.subr.bf16.mxu1 %v8720_v28  ;;  %v11167_v57 = vadd.f32 %v2747_v42, %v2200_v22  ;;  %v7728_v46 = vpop.f32.mrf.mxu0  ;;  %v8725_v22 = vld [vmem:[%s12129_s7 + $0x1e0] sm:$0xff]   ;;  %v13042_v42 = vld [vmem:[#allocation68_spill] sm:$0xff] }
 0x1b3   : > { %8495 = vmatprep.subr.bf16.mxu0 %v8722_v20  ;;  %v3235_v14 = vadd.f32 %v7727_v56, %v3234_v12  ;;  %v8368_v33 = vpop.f32.mrf.mxu1  ;;  %v13075_v21 = vld [vmem:[#allocation36_spill] sm:$0xff] }
 0x1b4   : > { %13040 = vst [vmem:[#allocation15_spill] sm:$0xff] %v11167_v57  ;;  %8496 = vmatpush3.bf16.msra.mxu0 %v8722_v20  ;;  %v7729_v40 = vpop.f32.mrf.mxu0  ;;  %v13043_v20 = vld [vmem:[#allocation13_spill] sm:$0xff] }
 0x1b5   : > { %8120 = vmatpush3.bf16.msra.mxu1 %v8721_v18  ;;  %8497 = vmatprep.subr.bf16.mxu0 %v8727_v51  ;;  %v11173_v28 = vadd.f32 %v3235_v14, %v10735_v38  ;;  %v7730_v16 = vadd.f32 %v7729_v40, %v7728_v46  ;;  %v3237_v4 = vpop.f32.mrf.mxu1  ;;  %vm13044_vm1 = vnez %v13043_v20  ;;  %v8732_v18 = vld [vmem:[%s12129_s7 + $0x220] sm:$0xff]  }
 0x1b6   : > { %8121 = vmatprep.subr.bf16.mxu1 %v8723_v11  ;;  %v7731_v12 = vpop.f32.mrf.mxu0  ;;  %v13045_v38 = vld [vmem:[#allocation67_spill] sm:$0xff] }
 0x1b7   : > { %13041 = vst [vmem:[#allocation59_spill] sm:$0xff] %v11173_v28  ;;  %6990 = vmatmul.mubr.msk.bf16.gmra.mxu0 %vm13044_vm1, %v13042_v42  ;;  %v3238_v56 = vadd.f32 %v7730_v16, %v3237_v4  ;;  %v11184_v57 = vpop.f32.mrf.mxu1  ;;  %v8726_v46 = vld [vmem:[%s12129_s7 + $0x1a0] sm:$0xff]   ;;  %v8728_v16 = vld [vmem:[%s12129_s7 + $0x1d8] sm:$0xff]  }
 0x1b8   : > { %8466 = vmatmul.mubr.msk.bf16.gmra.mxu1 %vm12896_vm5, %v10742_v27  ;;  %4762 = vmatprep.mubr.bf16.mxu0 %v13045_v38  ;;  %v7732_v11 = vpop.f32.mrf.mxu0 }
 0x1b9   : > { %8469 = vmatprep.mubr.msk.bf16.mxu1 %vm12912_vm8, %v10804_v44  ;;  %8122 = vmatpush3.bf16.msra.mxu1 %v8724_v17  ;;  %v11197_v4 = vadd.f32 %v3238_v56, %v10771_v0  ;;  %v7733_v14 = vadd.f32 %v7732_v11, %v7731_v12  ;;  %v3250_v40 = vpop.f32.mrf.mxu1  ;;  %v8737_v17 = vld [vmem:[%s12129_s7 + $0x218] sm:$0xff]   ;;  %v8730_v12 = vld [vmem:[%s12129_s7 + $0x1d0] sm:$0xff]  }
 0x1ba   : > { %8123 = vmatprep.subr.bf16.mxu1 %v8725_v22  ;;  %8498 = vmatpush3.bf16.msra.mxu0 %v8727_v51  ;;  %v7734_v28 = vpop.f32.mrf.mxu0  ;;  %v8729_v0 = vld [vmem:[%s12129_s7 + $0x198] sm:$0xff]  }
 0x1bb   : > { %13046 = vst [vmem:[#allocation62_spill] sm:$0xff] %v11197_v4  ;;  %8499 = vmatprep.subr.bf16.mxu0 %v8732_v18  ;;  %v3243_v63 = vadd.f32 %v8367_v61, %v7733_v14  ;;  %v11205_v44 = vpop.f32.mrf.mxu1  ;;  %v13048_v11 = vld [vmem:[#allocation70_spill] sm:$0xff]  ;;  %v13049_v14 = vld [vmem:[#allocation19_spill] sm:$0xff]  ;;  %v13055_v4 = vld [vmem:[#allocation24_spill] sm:$0xff] }
 0x1bc   : > { %v7735_v30 = vpop.f32.mrf.mxu0  ;;  %vm13050_vm14 = vnez %v13049_v14 }
 0x1bd   : > { %8124 = vmatpush3.bf16.msra.mxu1 %v8726_v46  ;;  %v7736_v51 = vadd.f32 %v7735_v30, %v7734_v28  ;;  %v3253_v22 = vpop.f32.mrf.mxu1  ;;  %v11214_v56 = vadd.f32 %v3243_v63, %v10723_v53  ;;  %v8738_v30 = vld [vmem:[%s12129_s7 + $0x210] sm:$0xff]  }
 0x1be   : > { %8125 = vmatprep.subr.bf16.mxu1 %v8728_v16  ;;  %8500 = vmatpush3.bf16.msra.mxu0 %v8732_v18  ;;  %v7737_v61 = vpop.f32.mrf.mxu0  ;;  %v13051_v18 = vld [vmem:[#allocation69_spill] sm:$0xff] }
 0x1bf   : > { %13047 = vst [vmem:[#allocation76_spill] sm:$0xff] %v11214_v56  ;;  %6993 = vmatmul.mubr.msk.bf16.gmra.mxu0 %vm13050_vm14, %v13048_v11  ;;  %8501 = vmatprep.subr.bf16.mxu0 %v8737_v17  ;;  %v3246_v28 = vadd.f32 %v8368_v33, %v7736_v51  ;;  %v11222_v46 = vpop.f32.mrf.mxu1  ;;  %v8731_v53 = vld [vmem:[%s12129_s7 + $0x190] sm:$0xff]   ;;  %v8733_v51 = vld [vmem:[%s12129_s7 + $0x1c8] sm:$0xff]   ;;  %v13063_v56 = vld [vmem:[#allocation31_spill] sm:$0xff] }
 0x1c0   : > { %8470 = vmatmul.mubr.msk.bf16.gmra.mxu1 %vm12918_vm4, %v10816_v31  ;;  %4770 = vmatprep.mubr.bf16.mxu0 %v13051_v18  ;;  %v7738_v63 = vpop.f32.mrf.mxu0 }
 0x1c1   : > { %8473 = vmatprep.mubr.msk.bf16.mxu1 %vm12939_vm2, %v10879_v54  ;;  %8126 = vmatpush3.bf16.msra.mxu1 %v8729_v0  ;;  %v7739_v16 = vadd.f32 %v7738_v63, %v7737_v61  ;;  %v3266_v33 = vpop.f32.mrf.mxu1  ;;  %v11238_v13 = vadd.f32 %v3246_v28, %v10756_v3  ;;  %v8739_v0 = vld [vmem:[%s12129_s7 + $0x208] sm:$0xff]   ;;  %v8735_v3 = vld [vmem:[%s12129_s7 + $0x1c0] sm:$0xff]   ;;  %vm13056_vm2 = vnez %v13055_v4 }
 0x1c2   : > { %8127 = vmatprep.subr.bf16.mxu1 %v8730_v12  ;;  %8502 = vmatpush3.bf16.msra.mxu0 %v8737_v17  ;;  %v7740_v31 = vpop.f32.mrf.mxu0  ;;  %v8734_v12 = vld [vmem:[%s12129_s7 + $0x188] sm:$0xff]  }
 0x1c3   : > { %13052 = vst [vmem:[#allocation18_spill] sm:$0xff] %v11238_v13  ;;  %8503 = vmatprep.subr.bf16.mxu0 %v8738_v30  ;;  %v3251_v55 = vadd.f32 %v7739_v16, %v3250_v40  ;;  %v11243_v54 = vpop.f32.mrf.mxu1  ;;  %v13054_v16 = vld [vmem:[#allocation72_spill] sm:$0xff] }
 0x1c4   : > { %v7741_v61 = vpop.f32.mrf.mxu0 }
 0x1c5   : > { %8128 = vmatpush3.bf16.msra.mxu1 %v8731_v53  ;;  %v7742_v63 = vadd.f32 %v7741_v61, %v7740_v31  ;;  %v3269_v17 = vpop.f32.mrf.mxu1  ;;  %v11252_v28 = vadd.f32 %v3251_v55, %v10809_v47  ;;  %v8740_v31 = vld [vmem:[%s12129_s7 + $0x200] sm:$0xff]  }
 0x1c6   : > { %8129 = vmatprep.subr.bf16.mxu1 %v8733_v51  ;;  %8504 = vmatpush3.bf16.msra.mxu0 %v8738_v30  ;;  %v7743_v40 = vpop.f32.mrf.mxu0  ;;  %v13057_v30 = vld [vmem:[#allocation71_spill] sm:$0xff] }
 0x1c7   : > { %13053 = vst [vmem:[#allocation63_spill] sm:$0xff] %v11252_v28  ;;  %6996 = vmatmul.mubr.msk.bf16.gmra.mxu0 %vm13056_vm2, %v13054_v16  ;;  %8505 = vmatprep.subr.bf16.mxu0 %v8739_v0  ;;  %v3254_v53 = vadd.f32 %v7742_v63, %v3253_v22  ;;  %v11260_v51 = vpop.f32.mrf.mxu1  ;;  %v8736_v55 = vld [vmem:[%s12129_s7 + $0x180] sm:$0xff]   ;;  %v13058_v63 = vld [vmem:[#allocation92_spill] sm:$0xff] }
 0x1c8   : > { %8474 = vmatmul.mubr.msk.bf16.gmra.mxu1 %vm12945_vm9, %v10888_v26  ;;  %4778 = vmatprep.mubr.bf16.mxu0 %v13057_v30  ;;  %v7744_v47 = vpop.f32.mrf.mxu0 }
 0x1c9   : > { %8477 = vmatprep.mubr.msk.bf16.mxu1 %vm12964_vm7, %v10947_v5  ;;  %8130 = vmatpush3.bf16.msra.mxu1 %v8734_v12  ;;  %v7745_v61 = vadd.f32 %v7744_v47, %v7743_v40  ;;  %v11272_v22 = vpop.f32.mrf.mxu1  ;;  %v11275_v41 = vadd.f32 %v3254_v53, %v13058_v63  ;;  %v13060_v40 = vld [vmem:[#allocation86_spill] sm:$0xff]  ;;  %vm13064_vm7 = vnez %v13063_v56 }
 0x1ca   : > { %8131 = vmatprep.subr.bf16.mxu1 %v8735_v3  ;;  %8506 = vmatpush3.bf16.msra.mxu0 %v8739_v0  ;;  %v7746_v26 = vpop.f32.mrf.mxu0  ;;  %v13062_v0 = vld [vmem:[#allocation30_spill] sm:$0xff] }
 0x1cb   : > { %13059 = vst [vmem:[#allocation17_spill] sm:$0xff] %v11275_v41  ;;  %8507 = vmatprep.subr.bf16.mxu0 %v8740_v31  ;;  %v3259_v28 = vadd.f32 %v11184_v57, %v7745_v61  ;;  %v11278_v2 = vpop.f32.mrf.mxu1 }
 0x1cc   : > { %v7747_v12 = vpop.f32.mrf.mxu0 }
 0x1cd   : > { %8132 = vmatpush3.bf16.msra.mxu1 %v8736_v55  ;;  %v7748_v5 = vadd.f32 %v7747_v12, %v7746_v26  ;;  %v11280_v13 = vpop.f32.mrf.mxu1  ;;  %v11283_v47 = vadd.f32 %v3259_v28, %v13060_v40  ;;  %v13065_v26 = vld [vmem:[#allocation99_spill] sm:$0xff]  ;;  %v13066_v55 = vld [vmem:[#allocation28_spill] sm:$0xff]  ;;  %v13068_v28 = vld [vmem:[#allocation73_spill] sm:$0xff] }
 0x1ce   : > { %8508 = vmatpush3.bf16.msra.mxu0 %v8740_v31  ;;  %v7749_v3 = vpop.f32.mrf.mxu0  ;;  %vm13067_vm9 = vnez %v13066_v55  ;;  %v11305_v12 = vld [vmem:[%s660_s15] sm:$0xff]  }
 0x1cf   : > { %13061 = vst [vmem:[#allocation9_spill] sm:$0xff] %v11283_v47  ;;  %6999 = vmatmul.mubr.msk.bf16.gmra.mxu0 %vm13064_vm7, %v13062_v0  ;;  %v3262_v57 = vadd.f32 %v11205_v44, %v7748_v5  ;;  %v11294_v53 = vpop.f32.mrf.mxu1  ;;  %13069 = vst [vmem:[#allocation32_spill] sm:$0xff] %v11305_v12  ;;  %v13070_v40 = vld [vmem:[#allocation91_spill] sm:$0xff] }
 0x1d0   : > { %8478 = vmatmul.mubr.msk.bf16.gmra.mxu1 %vm13067_vm9, %v13065_v26  ;;  %4786 = vmatprep.mubr.bf16.mxu0 %v13068_v28  ;;  %v7750_v31 = vpop.f32.mrf.mxu0  ;;  %v7338_v26 = vunpack.c.l.bf16 %v11305_v12  ;;  %vm13078_vm9 = vnez %v13004_v35 }
 0x1d1   : > { %8481 = vmatprep.mubr.msk.bf16.mxu1 %vm12984_vm3, %v11003_v32  ;;  %v7751_v61 = vadd.f32 %v7750_v31, %v7749_v3  ;;  %v11303_v63 = vpop.f32.mrf.mxu1  ;;  %v11308_v44 = vadd.f32 %v3262_v57, %v13070_v40  ;;  %v13074_v31 = vld [vmem:[#allocation46_spill] sm:$0xff]  ;;  %vm13076_vm3 = vnez %v13075_v21 }
 0x1d2   : > { %v7752_v5 = vpop.f32.mrf.mxu0 }
 0x1d3   : > { %13071 = vst [vmem:[#allocation82_spill] sm:$0xff] %v11308_v44  ;;  %v3267_v41 = vadd.f32 %v7751_v61, %v3266_v33  ;;  %v11310_v47 = vpop.f32.mrf.mxu1  ;;  %v13077_v33 = vld [vmem:[#allocation74_spill] sm:$0xff] }
 0x1d4   : > { %v7753_v55 = vpop.f32.mrf.mxu0 }
 0x1d5   : > { %v7754_v27 = vadd.f32 %v7753_v55, %v7752_v5  ;;  %v11313_v34 = vpop.f32.mrf.mxu1  ;;  %v11316_v32 = vadd.f32 %v3267_v41, %v13072_v15  ;;  %v11330_v15 = vmul.f32 0.0, %v7338_v26  ;;  %v13080_v5 = vld [vmem:[#allocation34_spill] sm:$0xff] }
 0x1d6   : > { %v7755_v3 = vpop.f32.mrf.mxu0 }
 0x1d7   : > { %13073 = vst [vmem:[#allocation65_spill] sm:$0xff] %v11316_v32  ;;  %7002 = vmatmul.mubr.msk.bf16.gmra.mxu0 %vm13076_vm3, %v13074_v31  ;;  %v3270_v57 = vadd.f32 %v7754_v27, %v3269_v17  ;;  %v11321_v40 = vpop.f32.mrf.mxu1  ;;  %13079 = vst [vmem:[#allocation66_spill] sm:$0xff] %v11330_v15  ;;  %v13082_v32 = vunpack.c.h.bf16 %v11085_v19  ;;  %v12453_v35 = vrot.slane %v11330_v15, 1  ;;  %v13094_v15 = vld [vmem:[#allocation12_spill] sm:$0xff] }
 0x1d8   : > { %8482 = vmatmul.mubr.msk.bf16.gmra.mxu1 %vm12991_vm15, %v11013_v9  ;;  %4794 = vmatprep.mubr.bf16.mxu0 %v13077_v33  ;;  %v7756_v55 = vpop.f32.mrf.mxu0  ;;  %vm13089_vm15 = vcmask 1046528  }
 0x1d9   : > { %8485 = vmatprep.mubr.msk.bf16.mxu1 %vm13078_vm9, %v11047_v36  ;;  %v7757_v41 = vadd.f32 %v7756_v55, %v7755_v3  ;;  %v11332_v61 = vpop.f32.mrf.mxu1  ;;  %v11335_v27 = vadd.f32 %v3270_v57, %v13080_v5  ;;  %v3742_v44 = vrot.slane %v13082_v32, 1  ;;  %v13083_v3 = vld [vmem:[#allocation39_spill] sm:$0xff]  ;;  %v13085_v57 = vld [vmem:[#allocation78_spill] sm:$0xff]  ;;  %vm13090_vm4 = vmmov %vm13089_vm15 }
 0x1da   : > { %v7758_v17 = vpop.f32.mrf.mxu0  ;;  %v13086_v5 = vld [vmem:[#allocation42_spill] sm:$0xff]  ;;  %v13088_v32 = vld [vmem:[#allocation75_spill] sm:$0xff] }
 0x1db   : > { %13081 = vst [vmem:[#allocation68_spill] sm:$0xff] %v11335_v27  ;;  %v3275_v12 = vadd.f32 %v11222_v46, %v7757_v41  ;;  %v11338_v24 = vpop.f32.mrf.mxu1  ;;  %vm13087_vm9 = vnez %v13086_v5 }
 0x1dc   : > { %v7759_v9 = vpop.f32.mrf.mxu0 }
 0x1dd   : > { %v7760_v36 = vadd.f32 %v7759_v9, %v7758_v17  ;;  %v11343_v26 = vpop.f32.mrf.mxu1  ;;  %v11346_v55 = vadd.f32 %v3275_v12, %v13083_v3  ;;  %v3743_v12 = vsel %vm13089_vm15, %v11057_v58, %v3742_v44  ;;  %v13091_v3 = vld [vmem:[#allocation43_spill] sm:$0xff] }
 0x1de   : > { %v7761_v1 = vpop.f32.mrf.mxu0 }
 0x1df   : > { %13084 = vst [vmem:[#allocation13_spill] sm:$0xff] %v11346_v55  ;;  %7005 = vmatmul.mubr.msk.bf16.gmra.mxu0 %vm13087_vm9, %v13085_v57  ;;  %v3278_v46 = vadd.f32 %v11243_v54, %v7760_v36  ;;  %v11352_v41 = vpop.f32.mrf.mxu1  ;;  %v3745_v54 = vsel %vm13090_vm4, %v3742_v44, %v12453_v35  ;;  %v13096_v44 = vld [vmem:[#allocation5_spill] sm:$0xff] }
 0x1e0   : > { %8486 = vmatmul.mubr.msk.bf16.gmra.mxu1 %vm13010_vm10, %v11059_v52  ;;  %4802 = vmatprep.mubr.bf16.mxu0 %v13088_v32  ;;  %v7762_v9 = vpop.f32.mrf.mxu0  ;;  %v11374_v50 = vpack.c.bf16 %v3745_v54, %v3743_v12  ;;  %v13102_v12 = vld [vmem:[#allocation79_spill] sm:$0xff] }
 0x1e1   : > { %8489 = vmatprep.mubr.msk.bf16.mxu1 %vm13021_vm0, %v11092_v45  ;;  %v7763_v36 = vadd.f32 %v7762_v9, %v7761_v1  ;;  %v11366_v17 = vpop.f32.mrf.mxu1  ;;  %v11369_v8 = vadd.f32 %v3278_v46, %v13091_v3  ;;  %v13097_v9 = vld [vmem:[#allocation45_spill] sm:$0xff] }
 0x1e2   : > { %v7764_v52 = vpop.f32.mrf.mxu0  ;;  %13093 = vst [vmem:[#allocation70_spill] sm:$0xff] %v11374_v50  ;;  %vm13098_vm4 = vnez %v13097_v9 }
 0x1e3   : > { %13092 = vst [vmem:[#allocation67_spill] sm:$0xff] %v11369_v8  ;;  %v3283_v27 = vadd.f32 %v7763_v36, %v11272_v22  ;;  %v11372_v55 = vpop.f32.mrf.mxu1  ;;  %v13100_v22 = vld [vmem:[#allocation25_spill] sm:$0xff] }
 0x1e4   : > { %v7765_v45 = vpop.f32.mrf.mxu0  ;;  %vm13101_vm15 = vnez %v13100_v22 }
 0x1e5   : > { %v7766_v37 = vadd.f32 %v7765_v45, %v7764_v52  ;;  %v11376_v58 = vpop.f32.mrf.mxu1  ;;  %v11379_v6 = vadd.f32 %v3283_v27, %v13094_v15  ;;  %v13103_v27 = vld [vmem:[#allocation47_spill] sm:$0xff] }
 0x1e6   : > { %v7767_v1 = vpop.f32.mrf.mxu0 }
 0x1e7   : > { %13095 = vst [vmem:[#allocation19_spill] sm:$0xff] %v11379_v6  ;;  %7008 = vmatmul.mubr.msk.bf16.gmra.mxu0 %vm13098_vm4, %v13096_v44  ;;  %v3286_v46 = vadd.f32 %v7766_v37, %v11280_v13 }
 0x1e8   : > { %v11385_v3 = vpop.f32.mrf.mxu1  ;;  %8490 = vmatmul.mubr.msk.bf16.gmra.mxu1 %vm13101_vm15, %v11374_v50  ;;  %4810 = vmatprep.mubr.bf16.mxu0 %v13102_v12  ;;  %v7768_v52 = vpop.f32.mrf.mxu0  ;;  %v13106_v50 = vld [vmem:[#allocation64_spill] sm:$0xff] }
 0x1e9   : > { %13099 = vst [vmem:[#allocation69_spill] sm:$0xff] %v11385_v3  ;;  %5357 = vmatprep.mubr.bf16.mxu1 %v13039_v49  ;;  %v7769_v45 = vadd.f32 %v7768_v52, %v7767_v1  ;;  %v11395_v54 = vadd.f32 %v3286_v46, %v13103_v27  ;;  %v13108_v49 = vld [vmem:[#allocation7_spill] sm:$0xff]  ;;  %v13109_v1 = vld [vmem:[#allocation48_spill] sm:$0xff]  ;;  %v13112_v27 = vld [vmem:[#allocation49_spill] sm:$0xff] }
 0x1ea   : > { %v11392_v15 = vpop.f32.mrf.mxu1  ;;  %v7770_v36 = vpop.f32.mrf.mxu0  ;;  %vm13110_vm15 = vnez %v13109_v1 }
 0x1eb   : > { %13104 = vst [vmem:[#allocation72_spill] sm:$0xff] %v11395_v54  ;;  %v3291_v13 = vadd.f32 %v11260_v51, %v7769_v45  ;;  %v13111_v51 = vld [vmem:[#allocation80_spill] sm:$0xff] }
 0x1ec   : > { %v11398_v37 = vpop.f32.mrf.mxu1  ;;  %v7771_v35 = vpop.f32.mrf.mxu0 }
 0x1ed   : > { %13105 = vst [vmem:[#allocation24_spill] sm:$0xff] %v11398_v37  ;;  %v7772_v6 = vadd.f32 %v7771_v35, %v7770_v36  ;;  %v11403_v8 = vadd.f32 %v3291_v13, %v13106_v50 }
 0x1ee   : > { %v11400_v22 = vpop.f32.mrf.mxu1  ;;  %v7773_v3 = vpop.f32.mrf.mxu0 }
 0x1ef   : > { %13107 = vst [vmem:[#allocation71_spill] sm:$0xff] %v11403_v8  ;;  %7011 = vmatmul.mubr.msk.bf16.gmra.mxu0 %vm13110_vm15, %v13108_v49  ;;  %v3294_v46 = vadd.f32 %v11278_v2, %v7772_v6 }
 0x1f0   : > { %v7861_v52 = vpop.f32.mrf.mxu1  ;;  %7155 = vmatmul.mubr.msk.bf16.vlgmr.msra.gmra.mxu1 %vm13044_vm1, %v13042_v42  ;;  %4818 = vmatprep.mubr.bf16.mxu0 %v13111_v51  ;;  %v7774_v35 = vpop.f32.mrf.mxu0 }
 0x1f1   : > { %5365 = vmatprep.mubr.bf16.mxu1 %v13045_v38  ;;  %v7775_v45 = vadd.f32 %v7774_v35, %v7773_v3  ;;  %v11415_v36 = vadd.f32 %v3294_v46, %v13112_v27  ;;  %v13115_v3 = vld [vmem:[#allocation87_spill] sm:$0xff]  ;;  %v13116_v35 = vld [vmem:[#allocation50_spill] sm:$0xff] }
 0x1f2   : > { %v7862_v50 = vpop.f32.mrf.mxu1  ;;  %v7776_v54 = vpop.f32.mrf.mxu0  ;;  %vm13117_vm1 = vnez %v13116_v35 }
 0x1f3   : > { %13113 = vst [vmem:[#allocation92_spill] sm:$0xff] %v11415_v36  ;;  %v11417_v13 = vadd.f32 %v7862_v50, %v7861_v52  ;;  %v3299_v2 = vadd.f32 %v7775_v45, %v11303_v63  ;;  %v13118_v63 = vld [vmem:[#allocation85_spill] sm:$0xff]  ;;  %v13119_v45 = vld [vmem:[#allocation51_spill] sm:$0xff] }
 0x1f4   : > { %v7864_v6 = vpop.f32.mrf.mxu1  ;;  %v7777_v8 = vpop.f32.mrf.mxu0 }
 0x1f5   : > { %v7778_v37 = vadd.f32 %v7777_v8, %v7776_v54  ;;  %v11421_v42 = vadd.f32 %v3299_v2, %v11010_v43 }
 0x1f6   : > { %v7865_v20 = vpop.f32.mrf.mxu1  ;;  %v7779_v38 = vpop.f32.mrf.mxu0 }
 0x1f7   : > { %13114 = vst [vmem:[#allocation86_spill] sm:$0xff] %v11421_v42  ;;  %v11423_v51 = vadd.f32 %v7865_v20, %v7864_v6  ;;  %7014 = vmatmul.mubr.msk.bf16.gmra.mxu0 %vm13117_vm1, %v13115_v3  ;;  %v3302_v46 = vadd.f32 %v7778_v37, %v11313_v34 }
 0x1f8   : > { %v7867_v52 = vpop.f32.mrf.mxu1  ;;  %7158 = vmatmul.mubr.msk.bf16.gmra.mxu1 %vm13050_vm14, %v13048_v11  ;;  %4826 = vmatprep.mubr.bf16.mxu0 %v13118_v63  ;;  %v7780_v8 = vpop.f32.mrf.mxu0  ;;  %v13121_v11 = vld [vmem:[#allocation21_spill] sm:$0xff] }
 0x1f9   : > { %5373 = vmatprep.mubr.bf16.mxu1 %v13051_v18  ;;  %v7781_v43 = vadd.f32 %v7780_v8, %v7779_v38  ;;  %v11435_v50 = vadd.f32 %v3302_v46, %v13119_v45  ;;  %v13122_v38 = vld [vmem:[#allocation93_spill] sm:$0xff]  ;;  %v13123_v8 = vld [vmem:[#allocation52_spill] sm:$0xff] }
 0x1fa   : > { %v7868_v54 = vpop.f32.mrf.mxu1  ;;  %v7782_v2 = vpop.f32.mrf.mxu0  ;;  %vm13124_vm14 = vnez %v13123_v8 }
 0x1fb   : > { %13120 = vst [vmem:[#allocation30_spill] sm:$0xff] %v11435_v50  ;;  %v11437_v27 = vadd.f32 %v7868_v54, %v7867_v52  ;;  %v3307_v34 = vadd.f32 %v11294_v53, %v7781_v43  ;;  %v13125_v53 = vld [vmem:[#allocation90_spill] sm:$0xff] }
 0x1fc   : > { %v7870_v37 = vpop.f32.mrf.mxu1  ;;  %v7783_v6 = vpop.f32.mrf.mxu0 }
 0x1fd   : > { %v7784_v20 = vadd.f32 %v7783_v6, %v7782_v2  ;;  %v11441_v42 = vadd.f32 %v3307_v34, %v13121_v11  ;;  %v13126_v2 = vld [vmem:[#allocation53_spill] sm:$0xff] }
 0x1fe   : > { %v7871_v14 = vpop.f32.mrf.mxu1  ;;  %v7785_v18 = vpop.f32.mrf.mxu0 }
 0x1ff   : > { %v11443_v36 = vadd.f32 %v7871_v14, %v7870_v37  ;;  %7017 = vmatmul.mubr.msk.bf16.gmra.mxu0 %vm13124_vm14, %v13122_v38  ;;  %v3310_v46 = vadd.f32 %v11310_v47, %v7784_v20 }
 0x200   : > { %v7873_v52 = vpop.f32.mrf.mxu1  ;;  %7161 = vmatmul.mubr.msk.bf16.gmra.mxu1 %vm13056_vm2, %v13054_v16  ;;  %4834 = vmatprep.mubr.bf16.mxu0 %v13125_v53  ;;  %v7786_v43 = vpop.f32.mrf.mxu0 }
 0x201   : > { %5381 = vmatprep.mubr.bf16.mxu1 %v13057_v30  ;;  %v7787_v54 = vadd.f32 %v7786_v43, %v7785_v18  ;;  %v11455_v34 = vadd.f32 %v3310_v46, %v13126_v2  ;;  %v13128_v18 = vld [vmem:[#allocation98_spill] sm:$0xff] }
 0x202   : > { %v7874_v45 = vpop.f32.mrf.mxu1  ;;  %v7788_v6 = vpop.f32.mrf.mxu0  ;;  %v13129_v43 = vld [vmem:[#allocation54_spill] sm:$0xff] }
 0x203   : > { %v11457_v37 = vadd.f32 %v7874_v45, %v7873_v52  ;;  %v3315_v47 = vadd.f32 %v7787_v54, %v11332_v61  ;;  %vm13130_vm2 = vnez %v13129_v43  ;;  %v13131_v61 = vld [vmem:[#allocation95_spill] sm:$0xff] }
 0x204   : > { %v7876_v20 = vpop.f32.mrf.mxu1  ;;  %v7789_v14 = vpop.f32.mrf.mxu0 }
 0x205   : > { %v7790_v11 = vadd.f32 %v7789_v14, %v7788_v6  ;;  %v11461_v16 = vadd.f32 %v3315_v47, %v11052_v25 }
 0x206   : > { %v7877_v4 = vpop.f32.mrf.mxu1  ;;  %v7791_v30 = vpop.f32.mrf.mxu0 }
 0x207   : > { %13127 = vst [vmem:[#allocation31_spill] sm:$0xff] %v11461_v16  ;;  %v11463_v50 = vadd.f32 %v7877_v4, %v7876_v20  ;;  %7020 = vmatmul.mubr.msk.bf16.gmra.mxu0 %vm13130_vm2, %v13128_v18  ;;  %v3318_v46 = vadd.f32 %v7790_v11, %v11343_v26 }
 0x208   : > { %v7879_v52 = vpop.f32.mrf.mxu1  ;;  %7164 = vmatmul.mubr.msk.bf16.gmra.mxu1 %vm13064_vm7, %v13062_v0  ;;  %4842 = vmatprep.mubr.bf16.mxu0 %v13131_v61  ;;  %v7792_v54 = vpop.f32.mrf.mxu0  ;;  %v13132_v0 = vld [vmem:[#allocation27_spill] sm:$0xff] }
 0x209   : > { %5389 = vmatprep.mubr.bf16.mxu1 %v13068_v28  ;;  %v7793_v25 = vadd.f32 %v7792_v54, %v7791_v30  ;;  %v11475_v2 = vadd.f32 %v3318_v46, %v11070_v39  ;;  %v13133_v30 = vld [vmem:[#allocation102_spill] sm:$0xff]  ;;  %v13134_v54 = vld [vmem:[#allocation56_spill] sm:$0xff] }
 0x20a   : > { %v7880_v45 = vpop.f32.mrf.mxu1  ;;  %v7794_v47 = vpop.f32.mrf.mxu0  ;;  %vm13135_vm7 = vnez %v13134_v54 }
 0x20b   : > { %v11477_v6 = vadd.f32 %v7880_v45, %v7879_v52  ;;  %v3323_v26 = vadd.f32 %v11321_v40, %v7793_v25  ;;  %v13136_v40 = vld [vmem:[#allocation100_spill] sm:$0xff] }
 0x20c   : > { %v7882_v20 = vpop.f32.mrf.mxu1  ;;  %v7795_v14 = vpop.f32.mrf.mxu0 }
 0x20d   : > { %v7796_v11 = vadd.f32 %v7795_v14, %v7794_v47  ;;  %v11481_v4 = vadd.f32 %v3323_v26, %v13132_v0 }
 0x20e   : > { %v7883_v56 = vpop.f32.mrf.mxu1 }
 0x20f   : > { %v11483_v16 = vadd.f32 %v7883_v56, %v7882_v20  ;;  %v7797_v28 = vpop.f32.mrf.mxu0  ;;  %7023 = vmatmul.mubr.msk.bf16.gmra.mxu0 %vm13135_vm7, %v13133_v30  ;;  %v3326_v39 = vadd.f32 %v11338_v24, %v7796_v11 }
 0x210   : > { %v7885_v46 = vpop.f32.mrf.mxu1  ;;  %7167 = vmatmul.mubr.msk.bf16.gmra.mxu1 %vm13076_vm3, %v13074_v31  ;;  %4850 = vmatprep.mubr.bf16.mxu0 %v13136_v40 }
 0x211   : > { %v7798_v52 = vpop.f32.mrf.mxu0  ;;  %5397 = vmatprep.mubr.bf16.mxu1 %v13077_v33  ;;  %v11495_v47 = vadd.f32 %v3326_v39, %v11062_v7 }
 0x212   : > { %v7799_v25 = vadd.f32 %v7798_v52, %v7797_v28  ;;  %v7886_v45 = vpop.f32.mrf.mxu1 }
 0x213   : > { %v11497_v26 = vadd.f32 %v7886_v45, %v7885_v46  ;;  %v7800_v20 = vpop.f32.mrf.mxu0 }
 0x214   : > { %v3331_v24 = vadd.f32 %v7799_v25, %v11366_v17  ;;  %v7888_v14 = vpop.f32.mrf.mxu1  ;;  %v13137_v17 = vld [vmem:[#allocation101_spill] sm:$0xff] }
 0x215   : > { %v7801_v11 = vpop.f32.mrf.mxu0 }
 0x216   : > { %v7802_v56 = vadd.f32 %v7801_v11, %v7800_v20  ;;  %v7889_v21 = vpop.f32.mrf.mxu1  ;;  %v11501_v31 = vadd.f32 %v3331_v24, %v11099_v62 }
 0x217   : > { %v11503_v0 = vadd.f32 %v7889_v21, %v7888_v14  ;;  %v7803_v33 = vpop.f32.mrf.mxu0  ;;  %7026 = vmatmul.mubr.msk.bf16.gmra.mxu0 %vm12820_vm6, %v11045_v48 }
 0x218   : > { %v3334_v7 = vadd.f32 %v7802_v56, %v11376_v58  ;;  %v7891_v28 = vpop.f32.mrf.mxu1  ;;  %7170 = vmatmul.mubr.msk.bf16.gmra.mxu1 %vm13087_vm9, %v13085_v57  ;;  %4858 = vmatprep.mubr.bf16.mxu0 %v13137_v17 }
 0x219   : > { %v7804_v39 = vpop.f32.mrf.mxu0  ;;  %5405 = vmatprep.mubr.bf16.mxu1 %v13088_v32 }
 0x21a   : > { %v7805_v62 = vadd.f32 %v7804_v39, %v7803_v33  ;;  %v7892_v46 = vpop.f32.mrf.mxu1  ;;  %v11515_v52 = vadd.f32 %v3334_v7, %v11117_v29  ;;  %v13138_v33 = vld [vmem:[#allocation57_spill] sm:$0xff] }
 0x21b   : > { %v11517_v25 = vadd.f32 %v7892_v46, %v7891_v28  ;;  %v7806_v45 = vpop.f32.mrf.mxu0 }
 0x21c   : > { %v3339_v58 = vadd.f32 %v11352_v41, %v7805_v62  ;;  %v7894_v20 = vpop.f32.mrf.mxu1 }
 0x21d   : > { %v7807_v24 = vpop.f32.mrf.mxu0 }
 0x21e   : > { %v7808_v14 = vadd.f32 %v7807_v24, %v7806_v45  ;;  %v7895_v5 = vpop.f32.mrf.mxu1  ;;  %v11521_v57 = vadd.f32 %v3339_v58, %v11089_v23  ;;  %v13140_v24 = vld [vmem:[#allocation55_spill] sm:$0xff] }
 0x21f   : > { %v11523_v11 = vadd.f32 %v7895_v5, %v7894_v20  ;;  %v7809_v32 = vpop.f32.mrf.mxu0  ;;  %7029 = vmatmul.mubr.msk.bf16.gmra.mxu0 %vm13023_vm11, %v11101_v60 }
 0x220   : > { %v3342_v29 = vadd.f32 %v11372_v55, %v7808_v14  ;;  %v7897_v56 = vpop.f32.mrf.mxu1  ;;  %7173 = vmatmul.mubr.msk.bf16.gmra.mxu1 %vm13098_vm4, %v13096_v44  ;;  %4866 = vmatprep.mubr.bf16.mxu0 %v11085_v19  ;;  %v13139_v44 = vld [vmem:[#allocation58_spill] sm:$0xff]  ;;  %v13141_v14 = vld [vmem:[#allocation29_spill] sm:$0xff] }
 0x221   : > { %v7810_v41 = vpop.f32.mrf.mxu0  ;;  %5413 = vmatprep.mubr.bf16.mxu1 %v13102_v12  ;;  %vm13142_vm9 = vnez %v13141_v14 }
 0x222   : > { %v7811_v23 = vadd.f32 %v7810_v41, %v7809_v32  ;;  %v7898_v21 = vpop.f32.mrf.mxu1  ;;  %v11535_v7 = vadd.f32 %v3342_v29, %v13138_v33  ;;  %v13145_v41 = vld [vmem:[#allocation80_spill] sm:$0xff] }
 0x223   : > { %v11537_v28 = vadd.f32 %v7898_v21, %v7897_v56  ;;  %v7812_v39 = vpop.f32.mrf.mxu0  ;;  %v13146_v33 = vld [vmem:[#allocation60_spill] sm:$0xff] }
 0x224   : > { %v3347_v55 = vadd.f32 %v7811_v23, %v11392_v15  ;;  %v7900_v62 = vpop.f32.mrf.mxu1  ;;  %v13143_v15 = vld [vmem:[#allocation81_spill] sm:$0xff] }
 0x225   : > { %v7813_v46 = vpop.f32.mrf.mxu0 }
 0x226   : > { %v7814_v45 = vadd.f32 %v7813_v46, %v7812_v39  ;;  %v7901_v9 = vpop.f32.mrf.mxu1  ;;  %v11541_v58 = vadd.f32 %v3347_v55, %v13139_v44 }
 0x227   : > { %v11543_v20 = vadd.f32 %v7901_v9, %v7900_v62  ;;  %v7815_v12 = vpop.f32.mrf.mxu0  ;;  %7032 = vmatmul.mubr.msk.bf16.gmra.mxu0 %vm13142_vm9, %v13140_v24  ;;  %v13147_v62 = vld [vmem:[#allocation69_spill] sm:$0xff] }
 0x228   : > { %v3350_v5 = vadd.f32 %v7814_v45, %v11400_v22  ;;  %v7903_v32 = vpop.f32.mrf.mxu1  ;;  %7176 = vmatmul.mubr.msk.bf16.gmra.mxu1 %vm13110_vm15, %v13108_v49  ;;  %8509 = vmatprep.mubr.msk.bf16.mxu0 %vm12677_vm13, %v13143_v15  ;;  %v13148_v49 = vld [vmem:[#allocation61_spill] sm:$0xff] }
 0x229   : > { %v7816_v56 = vpop.f32.mrf.mxu0  ;;  %5421 = vmatprep.mubr.bf16.mxu1 %v13145_v41 }
 0x22a   : > { %v7817_v23 = vadd.f32 %v7816_v56, %v7815_v12  ;;  %v7904_v21 = vpop.f32.mrf.mxu1  ;;  %v11557_v39 = vadd.f32 %v3350_v5, %v13146_v33  ;;  %v13149_v12 = vld [vmem:[#allocation83_spill] sm:$0xff]  ;;  %v13151_v5 = vld [vmem:[#allocation24_spill] sm:$0xff] }
 0x22b   : > { %v11559_v55 = vadd.f32 %v7904_v21, %v7903_v32  ;;  %v7818_v22 = vpop.f32.mrf.mxu0 }
 0x22c   : > { %v3355_v46 = vadd.f32 %v13147_v62, %v7817_v23  ;;  %v7906_v45 = vpop.f32.mrf.mxu1  ;;  %v13152_v23 = vld [vmem:[#allocation84_spill] sm:$0xff] }
 0x22d   : > { %v7819_v1 = vpop.f32.mrf.mxu0 }
 0x22e   : > { %v11563_v9 = vadd.f32 %v3355_v46, %v13148_v49  ;;  %v7820_v44 = vadd.f32 %v7819_v1, %v7818_v22  ;;  %v7907_v15 = vpop.f32.mrf.mxu1  ;;  %v13154_v46 = vld [vmem:[#allocation15_spill] sm:$0xff]  ;;  %v13155_v1 = vld [vmem:[#allocation76_spill] sm:$0xff] }
 0x22f   : > { %v11565_v29 = vadd.f32 %v7907_v15, %v7906_v45  ;;  %v8415_v41 = vpop.f32.mrf.mxu0  ;;  %8510 = vmatmul.mubr.msk.bf16.vlgmr.msra.gmra.mxu0 %vm12678_vm12, %v13149_v12 }
 0x230   : > { %v3358_v32 = vadd.f32 %v13151_v5, %v7820_v44  ;;  %v7909_v21 = vpop.f32.mrf.mxu1  ;;  %v4307_v33 = vadd.f32 %v8415_v41, %v11437_v27  ;;  %7179 = vmatmul.mubr.msk.bf16.gmra.mxu1 %vm13117_vm1, %v13115_v3  ;;  %8513 = vmatprep.mubr.msk.bf16.mxu0 %vm12896_vm5, %v13152_v23  ;;  %v13156_v3 = vld [vmem:[#allocation59_spill] sm:$0xff] }
 0x231   : > { %v4298_v22 = vpop.f32.mrf.mxu0  ;;  %5429 = vmatprep.mubr.bf16.mxu1 %v13118_v63  ;;  %v13157_v63 = vld [vmem:[#allocation18_spill] sm:$0xff] }
 0x232   : > { %v11580_v45 = vadd.f32 %v3358_v32, %v13154_v46  ;;  %v11583_v49 = vadd.f32 %v4307_v33, %v13155_v1  ;;  %v7910_v44 = vpop.f32.mrf.mxu1  ;;  %v4299_v27 = vadd.f32 %v11417_v13, %v4298_v22  ;;  %v13158_v13 = vld [vmem:[#allocation88_spill] sm:$0xff]  ;;  %v13160_v22 = vld [vmem:[#allocation62_spill] sm:$0xff] }
 0x233   : > { %v11586_v15 = vadd.f32 %v7910_v44, %v7909_v21  ;;  %v8416_v35 = vpop.f32.mrf.mxu0 }
 0x234   : > { %v11589_v41 = vadd.f32 %v4299_v27, %v13156_v3  ;;  %v7912_v12 = vpop.f32.mrf.mxu1  ;;  %v4310_v56 = vadd.f32 %v8416_v35, %v11443_v36  ;;  %v13161_v27 = vld [vmem:[#allocation89_spill] sm:$0xff]  ;;  %v13162_v35 = vld [vmem:[#allocation16_spill] sm:$0xff] }
 0x235   : > { %v4301_v5 = vpop.f32.mrf.mxu0  ;;  %vm13163_vm13 = vnez %v13162_v35  ;;  %v13164_v3 = vld [vmem:[#allocation9_spill] sm:$0xff]  ;;  %v13167_v35 = vld [vmem:[#allocation94_spill] sm:$0xff] }
 0x236   : > { %v11593_v23 = vadd.f32 %v4310_v56, %v13157_v63  ;;  %v7913_v32 = vpop.f32.mrf.mxu1  ;;  %v4302_v33 = vadd.f32 %v11423_v51, %v4301_v5 }
 0x237   : > { %v11596_v62 = vadd.f32 %v7913_v32, %v7912_v12  ;;  %v8419_v46 = vpop.f32.mrf.mxu0  ;;  %8514 = vmatmul.mubr.msk.bf16.gmra.mxu0 %vm12912_vm8, %v13158_v13  ;;  %v13166_v13 = vld [vmem:[#allocation82_spill] sm:$0xff] }
 0x238   : > { %v11602_v1 = vadd.f32 %v4302_v33, %v13160_v22  ;;  %v7915_v44 = vpop.f32.mrf.mxu1  ;;  %v4323_v36 = vadd.f32 %v8419_v46, %v11477_v6  ;;  %7182 = vmatmul.mubr.msk.bf16.gmra.mxu1 %vm13124_vm14, %v13122_v38  ;;  %8517 = vmatprep.mubr.msk.bf16.mxu0 %vm13163_vm13, %v13161_v27  ;;  %v13165_v6 = vld [vmem:[#allocation63_spill] sm:$0xff] }
 0x239   : > { %v4314_v51 = vpop.f32.mrf.mxu0  ;;  %5437 = vmatprep.mubr.bf16.mxu1 %v13125_v53 }
 0x23a   : > { %v11613_v12 = vadd.f32 %v4323_v36, %v13164_v3  ;;  %v7916_v56 = vpop.f32.mrf.mxu1  ;;  %v4315_v5 = vadd.f32 %v11457_v37, %v4314_v51  ;;  %v13168_v3 = vld [vmem:[#allocation20_spill] sm:$0xff]  ;;  %v13170_v37 = vld [vmem:[#allocation17_spill] sm:$0xff] }
 0x23b   : > { %v7917_v63 = vadd.f32 %v7916_v56, %v7915_v44  ;;  %v8420_v32 = vpop.f32.mrf.mxu0  ;;  %vm13169_vm12 = vnez %v13168_v3 }
 0x23c   : > { %v11617_v33 = vadd.f32 %v4315_v5, %v13165_v6  ;;  %v7918_v8 = vpop.f32.mrf.mxu1  ;;  %v4326_v38 = vadd.f32 %v8420_v32, %v11483_v16  ;;  %v13171_v16 = vld [vmem:[#allocation96_spill] sm:$0xff]  ;;  %v13172_v5 = vld [vmem:[#allocation22_spill] sm:$0xff]  ;;  %v13174_v32 = vld [vmem:[#allocation13_spill] sm:$0xff] }
 0x23d   : > { %v4317_v46 = vpop.f32.mrf.mxu0  ;;  %vm13173_vm5 = vnez %v13172_v5 }
 0x23e   : > { %v11621_v21 = vadd.f32 %v4326_v38, %v13166_v13  ;;  %v7919_v22 = vpop.f32.mrf.mxu1  ;;  %v4318_v53 = vadd.f32 %v11463_v50, %v4317_v46  ;;  %v13175_v13 = vld [vmem:[#allocation65_spill] sm:$0xff] }
 0x23f   : > { %v7920_v36 = vadd.f32 %v7919_v22, %v7918_v8  ;;  %v8423_v27 = vpop.f32.mrf.mxu0  ;;  %8518 = vmatmul.mubr.msk.bf16.gmra.mxu0 %vm13169_vm12, %v13167_v35 }
 0x240   : > { %v11628_v44 = vadd.f32 %v4318_v53, %v13170_v37  ;;  %v7921_v51 = vpop.f32.mrf.mxu1  ;;  %v4339_v56 = vadd.f32 %v8423_v27, %v11517_v25  ;;  %7185 = vmatmul.mubr.msk.bf16.gmra.mxu1 %vm13130_vm2, %v13128_v18  ;;  %8521 = vmatprep.mubr.msk.bf16.mxu0 %vm13173_vm5, %v13171_v16  ;;  %v13176_v27 = vld [vmem:[#allocation67_spill] sm:$0xff]  ;;  %v13180_v16 = vld [vmem:[#allocation68_spill] sm:$0xff] }
 0x241   : > { %v4330_v50 = vpop.f32.mrf.mxu0  ;;  %5445 = vmatprep.mubr.bf16.mxu1 %v13131_v61 }
 0x242   : > { %v11639_v6 = vadd.f32 %v4339_v56, %v13174_v32  ;;  %v7922_v8 = vpop.f32.mrf.mxu1  ;;  %v4331_v38 = vadd.f32 %v11497_v26, %v4330_v50  ;;  %v13177_v26 = vld [vmem:[#allocation97_spill] sm:$0xff]  ;;  %v13181_v32 = vld [vmem:[#allocation99_spill] sm:$0xff] }
 0x243   : > { %v11642_v46 = vadd.f32 %v7922_v8, %v7921_v51  ;;  %v8424_v25 = vpop.f32.mrf.mxu0  ;;  %v13178_v51 = vld [vmem:[#allocation26_spill] sm:$0xff]  ;;  %v13182_v8 = vld [vmem:[#allocation28_spill] sm:$0xff] }
 0x244   : > { %v11645_v22 = vadd.f32 %v4331_v38, %v13175_v13  ;;  %v7924_v18 = vpop.f32.mrf.mxu1  ;;  %v4342_v43 = vadd.f32 %v8424_v25, %v11523_v11  ;;  %vm13179_vm8 = vnez %v13178_v51  ;;  %vm13183_vm3 = vnez %v13182_v8  ;;  %v13184_v38 = vld [vmem:[#allocation71_spill] sm:$0xff] }
 0x245   : > { %v4333_v53 = vpop.f32.mrf.mxu0 }
 0x246   : > { %v11649_v35 = vadd.f32 %v4342_v43, %v13176_v27  ;;  %v7925_v61 = vpop.f32.mrf.mxu1  ;;  %v4334_v3 = vadd.f32 %v11503_v0, %v4333_v53 }
 0x247   : > { %v11652_v37 = vadd.f32 %v7925_v61, %v7924_v18  ;;  %v8427_v56 = vpop.f32.mrf.mxu0  ;;  %8522 = vmatmul.mubr.msk.bf16.gmra.mxu0 %vm13179_vm8, %v13177_v26 }
 0x248   : > { %v11658_v5 = vadd.f32 %v4334_v3, %v13180_v16  ;;  %v7927_v50 = vpop.f32.mrf.mxu1  ;;  %v4355_v11 = vadd.f32 %v8427_v56, %v11559_v55  ;;  %7188 = vmatmul.mubr.msk.bf16.gmra.mxu1 %vm13135_vm7, %v13133_v30  ;;  %8525 = vmatprep.mubr.msk.bf16.mxu0 %vm13183_vm3, %v13181_v32  ;;  %v13185_v55 = vld [vmem:[#allocation19_spill] sm:$0xff]  ;;  %v13186_v3 = vld [vmem:[#allocation92_spill] sm:$0xff]  ;;  %v13188_v32 = vld [vmem:[#allocation33_spill] sm:$0xff] }
 0x249   : > { %v4346_v0 = vpop.f32.mrf.mxu0  ;;  %5453 = vmatprep.mubr.bf16.mxu1 %v13136_v40  ;;  %vm13189_vm4 = vnez %v13188_v32  ;;  %v13196_v32 = vld [vmem:[#allocation104_spill] sm:$0xff] }
 0x24a   : > { %v11669_v25 = vadd.f32 %v4355_v11, %v13184_v38  ;;  %v7928_v13 = vpop.f32.mrf.mxu1  ;;  %v4347_v18 = vadd.f32 %v11537_v28, %v4346_v0  ;;  %v13187_v11 = vld [vmem:[#allocation103_spill] sm:$0xff]  ;;  %v13190_v28 = vld [vmem:[#allocation72_spill] sm:$0xff] }
 0x24b   : > { %v7929_v43 = vadd.f32 %v7928_v13, %v7927_v50  ;;  %v8428_v53 = vpop.f32.mrf.mxu0  ;;  %v13192_v38 = vld [vmem:[#allocation35_spill] sm:$0xff] }
 0x24c   : > { %v11673_v27 = vadd.f32 %v4347_v18, %v13185_v55  ;;  %v7930_v54 = vpop.f32.mrf.mxu1  ;;  %v4358_v30 = vadd.f32 %v8428_v53, %v11565_v29  ;;  %v13191_v29 = vld [vmem:[#allocation6_spill] sm:$0xff]  ;;  %vm13193_vm15 = vnez %v13192_v38 }
 0x24d   : > { %v4349_v61 = vpop.f32.mrf.mxu0 }
 0x24e   : > { %v11677_v56 = vadd.f32 %v4358_v30, %v13186_v3  ;;  %v7931_v26 = vpop.f32.mrf.mxu1  ;;  %v4350_v40 = vadd.f32 %v11543_v20, %v4349_v61  ;;  %v13195_v61 = vld [vmem:[#allocation32_spill] sm:$0xff] }
 0x24f   : > { %v7932_v51 = vadd.f32 %v7931_v26, %v7930_v54  ;;  %v8431_v16 = vpop.f32.mrf.mxu0  ;;  %8526 = vmatmul.mubr.msk.bf16.gmra.mxu0 %vm13189_vm4, %v13187_v11  ;;  %v7339_v3 = vunpack.c.h.bf16 %v13195_v61 }
 0x250   : > { %v11684_v50 = vadd.f32 %v4350_v40, %v13190_v28  ;;  %v7933_v8 = vpop.f32.mrf.mxu1  ;;  %v4371_v0 = vadd.f32 %v8431_v16, %v7917_v63  ;;  %7191 = vmatmul.mubr.msk.bf16.gmra.mxu1 %vm12820_vm6, %v11045_v48  ;;  %8529 = vmatprep.mubr.msk.bf16.mxu0 %vm13193_vm15, %v13191_v29  ;;  %v13194_v63 = vld [vmem:[#allocation86_spill] sm:$0xff] }
 0x251   : > { %v4362_v20 = vpop.f32.mrf.mxu0  ;;  %5461 = vmatprep.mubr.bf16.mxu1 %v13137_v17  ;;  %v13199_v28 = vld [vmem:[#allocation30_spill] sm:$0xff] }
 0x252   : > { %v11694_v13 = vadd.f32 %v4371_v0, %v11441_v42  ;;  %v7934_v18 = vpop.f32.mrf.mxu1  ;;  %v4363_v53 = vadd.f32 %v11586_v15, %v4362_v20  ;;  %v13197_v15 = vld [vmem:[#allocation38_spill] sm:$0xff] }
 0x253   : > { %v7935_v55 = vadd.f32 %v7934_v18, %v7933_v8  ;;  %v8432_v54 = vpop.f32.mrf.mxu0  ;;  %vm13198_vm6 = vnez %v13197_v15  ;;  %v13204_v15 = vld [vmem:[#allocation23_spill] sm:$0xff] }
 0x254   : > { %v11698_v30 = vadd.f32 %v4363_v53, %v13194_v63  ;;  %v7936_v10 = vpop.f32.mrf.mxu1  ;;  %v4374_v48 = vadd.f32 %v8432_v54, %v7920_v36  ;;  %v13202_v63 = vld [vmem:[#allocation31_spill] sm:$0xff] }
 0x255   : > { %v4365_v26 = vpop.f32.mrf.mxu0 }
 0x256   : > { %v11702_v40 = vadd.f32 %v4374_v48, %v11455_v34  ;;  %v7937_v17 = vpop.f32.mrf.mxu1  ;;  %v4366_v42 = vadd.f32 %v11596_v62, %v4365_v26  ;;  %v13200_v34 = vld [vmem:[#allocation40_spill] sm:$0xff]  ;;  %v3532_v62 = vmul.f32 0.0, %v7339_v3  ;;  %v13203_v3 = vld [vmem:[#allocation66_spill] sm:$0xff] }
 0x257   : > { %v7938_v16 = vadd.f32 %v7937_v17, %v7936_v10  ;;  %v8435_v11 = vpop.f32.mrf.mxu0  ;;  %8530 = vmatmul.mubr.msk.bf16.gmra.mxu0 %vm13198_vm6, %v13196_v32 }
 0x258   : > { %v11709_v8 = vadd.f32 %v4366_v42, %v13199_v28  ;;  %v7939_v0 = vpop.f32.mrf.mxu1  ;;  %v4387_v36 = vadd.f32 %v8435_v11, %v7929_v43  ;;  %7194 = vmatmul.mubr.msk.bf16.gmra.mxu1 %vm13023_vm11, %v11101_v60  ;;  %8533 = vmatprep.mubr.msk.bf16.mxu0 %vm13010_vm10, %v13200_v34  ;;  %v3746_v48 = vrot.slane %v3532_v62, 1  ;;  %v3638_v26 = vrot.slane %v3532_v62, 7  ;;  %v13207_v34 = vld [vmem:[#allocation25_spill] sm:$0xff] }
 0x259   : > { %v4378_v38 = vpop.f32.mrf.mxu0  ;;  %5469 = vmatprep.mubr.bf16.mxu1 %v11085_v19  ;;  %v3909_v17 = vpack.c.bf16 %v3532_v62, %v13203_v3  ;;  %v3636_v19 = vrot.slane %v13203_v3, 7  ;;  %vm13208_vm10 = vnez %v13207_v34  ;;  %vm13210_vm11 = vcmask 1046528  }
 0x25a   : > { %v11719_v20 = vadd.f32 %v4387_v36, %v11481_v4  ;;  %v7940_v18 = vpop.f32.mrf.mxu1  ;;  %v4379_v53 = vadd.f32 %v11642_v46, %v4378_v38  ;;  %vm13211_vm1 = vmmov %vm13210_vm11 }
 0x25b   : > { %v7941_v54 = vadd.f32 %v7940_v18, %v7939_v0  ;;  %v8436_v43 = vpop.f32.mrf.mxu0  ;;  %v3784_v62 = vsel %vm13211_vm1, %v3746_v48, 0.0 }
 0x25c   : > { %v11723_v10 = vadd.f32 %v4379_v53, %v13202_v63  ;;  %v7942_v60 = vpop.f32.mrf.mxu1  ;;  %v4390_v59 = vadd.f32 %v8436_v43, %v7932_v51 }
 0x25d   : > { %v4381_v61 = vpop.f32.mrf.mxu0 }
 0x25e   : > { %v11728_v4 = vadd.f32 %v4390_v59, %v11495_v47  ;;  %v7943_v42 = vpop.f32.mrf.mxu1  ;;  %v4382_v46 = vadd.f32 %v11652_v37, %v4381_v61  ;;  %v13206_v47 = vld [vmem:[#allocation70_spill] sm:$0xff]  ;;  %v13209_v37 = vrot.slane %v13203_v3, 1 }
 0x25f   : > { %v7944_v11 = vadd.f32 %v7943_v42, %v7942_v60  ;;  %v8439_v32 = vpop.f32.mrf.mxu0  ;;  %8534 = vmatmul.mubr.msk.bf16.gmra.mxu0 %vm13021_vm0, %v13204_v15  ;;  %vm13213_vm0 = vcmask 1040384  }
 0x260   : > { %v11735_v51 = vadd.f32 %v4382_v46, %v11475_v2  ;;  %v7945_v0 = vpop.f32.mrf.mxu1  ;;  %v4403_v36 = vadd.f32 %v8439_v32, %v7941_v54  ;;  %7197 = vmatmul.mubr.msk.bf16.gmra.mxu1 %vm13142_vm9, %v13140_v24  ;;  %8537 = vmatprep.mubr.msk.bf16.mxu0 %vm13208_vm10, %v13206_v47  ;;  %v3747_v29 = vsel %vm13210_vm11, %v13209_v37, %v3746_v48  ;;  %v13212_v2 = vld [vmem:[#allocation3_spill] sm:$0xff]  ;;  %vm13214_vm14 = vmmov %vm13213_vm0  ;;  %v13215_v32 = vld [vmem:[#allocation4_spill] sm:$0xff] }
 0x261   : > { %v4394_v38 = vpop.f32.mrf.mxu0  ;;  %5477 = vmatprep.mubr.bf16.mxu1 %v3909_v17  ;;  %v3637_v18 = vsel %vm13213_vm0, %v13212_v2, %v3636_v19  ;;  %v3639_v53 = vsel %vm13214_vm14, %v3636_v19, %v3638_v26  ;;  %v7247_v60 = vpack.c.bf16 %v3784_v62, %v3747_v29  ;;  %vm13216_vm2 = vnez %v13215_v32  ;;  %vm13245_vm9 = vmmov %vm13213_vm0 }
 0x262   : > { %v11751_v14 = vadd.f32 %v4403_v36, %v11521_v57  ;;  %v7946_v24 = vpop.f32.mrf.mxu1  ;;  %v4395_v54 = vadd.f32 %v7935_v55, %v4394_v38  ;;  %v7199_v3 = vpack.c.bf16 %v3639_v53, %v3637_v18 }
 0x263   : > { %v7947_v43 = vadd.f32 %v7946_v24, %v7945_v0  ;;  %v8440_v63 = vpop.f32.mrf.mxu0 }
 0x264   : > { %v11754_v59 = vadd.f32 %v4395_v54, %v11501_v31  ;;  %v7948_v61 = vpop.f32.mrf.mxu1  ;;  %v4406_v48 = vadd.f32 %v8440_v63, %v7944_v11  ;;  %v13217_v31 = vld [vmem:[#allocation77_spill] sm:$0xff] }
 0x265   : > { %v4397_v17 = vpop.f32.mrf.mxu0  ;;  %vm13218_vm7 = vnez %v13217_v31 }
 0x266   : > { %v11757_v42 = vadd.f32 %v4406_v48, %v11535_v7  ;;  %v7949_v46 = vpop.f32.mrf.mxu1  ;;  %v4398_v26 = vadd.f32 %v7938_v16, %v4397_v17 }
 0x267   : > { %v7950_v19 = vadd.f32 %v7949_v46, %v7948_v61  ;;  %v8443_v57 = vpop.f32.mrf.mxu0  ;;  %8538 = vmatmul.mubr.msk.bf16.gmra.mxu0 %vm13216_vm2, %v7247_v60 }
 0x268   : > { %v11762_v55 = vadd.f32 %v4398_v26, %v11515_v52  ;;  %v7951_v15 = vpop.f32.mrf.mxu1  ;;  %7200 = vmatmul.mubr.msk.bf16.gmra.mxu1 %vm13218_vm7, %v7199_v3 }
 0x269   : > { %v4410_v11 = vpop.f32.mrf.mxu0 }
 0x26a   : > { %v7952_v28 = vpop.f32.mrf.mxu1  ;;  %v4411_v0 = vadd.f32 %v7947_v43, %v4410_v11 }
 0x26b   : > { %v7953_v36 = vadd.f32 %v7952_v28, %v7951_v15  ;;  %v8444_v7 = vpop.f32.mrf.mxu0 }
 0x26c   : > { %v11767_v47 = vadd.f32 %v4411_v0, %v11541_v58  ;;  %v7954_v16 = vpop.f32.mrf.mxu1 }
 0x26d   : > { %v4419_v34 = vadd.f32 %v8443_v57, %v7953_v36  ;;  %v4413_v37 = vpop.f32.mrf.mxu0 }
 0x26e   : > { %v7955_v29 = vpop.f32.mrf.mxu1  ;;  %v4414_v62 = vadd.f32 %v7950_v19, %v4413_v37 }
 0x26f   : > { %v11770_v52 = vadd.f32 %v4419_v34, %v11563_v9  ;;  %v7956_v38 = vadd.f32 %v7955_v29, %v7954_v16  ;;  %v7997_v2 = vpop.f32.mrf.mxu0 }
 0x270   : > { %v11773_v18 = vadd.f32 %v4414_v62, %v11557_v39  ;;  %v8463_v53 = vpop.f32.mrf.mxu1 }
 0x271   : > { %v4422_v24 = vadd.f32 %v8444_v7, %v7956_v38  ;;  %v7998_v54 = vpop.f32.mrf.mxu0 }
 0x272   : > { %v7999_v43 = vadd.f32 %v7998_v54, %v7997_v2  ;;  %v4909_v63 = vpop.f32.mrf.mxu1 }
 0x273   : > { %v11776_v58 = vadd.f32 %v4422_v24, %v11580_v45  ;;  %v8000_v60 = vpop.f32.mrf.mxu0 }
 0x274   : > { %v4910_v61 = vadd.f32 %v7999_v43, %v4909_v63  ;;  %v8464_v48 = vpop.f32.mrf.mxu1 }
 0x275   : > { %v8001_v3 = vpop.f32.mrf.mxu0 }
 0x276   : > { %v11779_v9 = vadd.f32 %v4910_v61, %v11589_v41  ;;  %v8002_v17 = vadd.f32 %v8001_v3, %v8000_v60  ;;  %v4912_v46 = vpop.f32.mrf.mxu1 }
 0x277   : > { %v8003_v26 = vpop.f32.mrf.mxu0 }
 0x278   : > { %v4913_v39 = vadd.f32 %v8002_v17, %v4912_v46  ;;  %v8467_v19 = vpop.f32.mrf.mxu1 }
 0x279   : > { %v8004_v57 = vpop.f32.mrf.mxu0 }
 0x27a   : > { %v11782_v32 = vadd.f32 %v4913_v39, %v11602_v1  ;;  %v8005_v15 = vadd.f32 %v8004_v57, %v8003_v26  ;;  %v4925_v31 = vpop.f32.mrf.mxu1 }
 0x27b   : > { %v8006_v45 = vpop.f32.mrf.mxu0 }
 0x27c   : > { %v4918_v11 = vadd.f32 %v8463_v53, %v8005_v15  ;;  %v8468_v28 = vpop.f32.mrf.mxu1 }
 0x27d   : > { %v8007_v0 = vpop.f32.mrf.mxu0 }
 0x27e   : > { %v8008_v36 = vadd.f32 %v8007_v0, %v8006_v45  ;;  %v4928_v7 = vpop.f32.mrf.mxu1  ;;  %v11785_v41 = vadd.f32 %v4918_v11, %v11583_v49 }
 0x27f   : > { %v8009_v16 = vpop.f32.mrf.mxu0 }
 0x280   : > { %v4921_v34 = vadd.f32 %v8464_v48, %v8008_v36  ;;  %v8471_v37 = vpop.f32.mrf.mxu1 }
 0x281   : > { %v8010_v29 = vpop.f32.mrf.mxu0 }
 0x282   : > { %v8011_v62 = vadd.f32 %v8010_v29, %v8009_v16  ;;  %v4941_v38 = vpop.f32.mrf.mxu1  ;;  %v11788_v1 = vadd.f32 %v4921_v34, %v11593_v23 }
 0x283   : > { %v8012_v2 = vpop.f32.mrf.mxu0 }
 0x284   : > { %v4926_v24 = vadd.f32 %v8011_v62, %v4925_v31  ;;  %v8472_v54 = vpop.f32.mrf.mxu1 }
 0x285   : > { %v8013_v53 = vpop.f32.mrf.mxu0 }
 0x286   : > { %v8014_v43 = vadd.f32 %v8013_v53, %v8012_v2  ;;  %v4944_v63 = vpop.f32.mrf.mxu1  ;;  %v11791_v60 = vadd.f32 %v4926_v24, %v11617_v33 }
 0x287   : > { %v8015_v49 = vpop.f32.mrf.mxu0 }
 0x288   : > { %v4929_v61 = vadd.f32 %v8014_v43, %v4928_v7  ;;  %v8475_v3 = vpop.f32.mrf.mxu1 }
 0x289   : > { %v8016_v48 = vpop.f32.mrf.mxu0 }
 0x28a   : > { %v8017_v17 = vadd.f32 %v8016_v48, %v8015_v49  ;;  %v4957_v46 = vpop.f32.mrf.mxu1  ;;  %v11794_v26 = vadd.f32 %v4929_v61, %v11628_v44 }
 0x28b   : > { %v8018_v23 = vpop.f32.mrf.mxu0 }
 0x28c   : > { %v4934_v39 = vadd.f32 %v8467_v19, %v8017_v17  ;;  %v8476_v57 = vpop.f32.mrf.mxu1 }
 0x28d   : > { %v8019_v15 = vpop.f32.mrf.mxu0 }
 0x28e   : > { %v8020_v31 = vadd.f32 %v8019_v15, %v8018_v23  ;;  %v4960_v45 = vpop.f32.mrf.mxu1  ;;  %v11797_v11 = vadd.f32 %v4934_v39, %v11613_v12 }
 0x28f   : > { %v8021_v33 = vpop.f32.mrf.mxu0 }
 0x290   : > { %v4937_v0 = vadd.f32 %v8468_v28, %v8020_v31  ;;  %v11799_v36 = vpop.f32.mrf.mxu1 }
 0x291   : > { %v8022_v7 = vpop.f32.mrf.mxu0 }
 0x292   : > { %v8023_v16 = vadd.f32 %v8022_v7, %v8021_v33  ;;  %v4973_v34 = vpop.f32.mrf.mxu1  ;;  %v11802_v29 = vadd.f32 %v4937_v0, %v11621_v21 }
 0x293   : > { %v8024_v44 = vpop.f32.mrf.mxu0 }
 0x294   : > { %v4942_v62 = vadd.f32 %v8023_v16, %v4941_v38  ;;  %v11804_v19 = vpop.f32.mrf.mxu1 }
 0x295   : > { %v8025_v2 = vpop.f32.mrf.mxu0 }
 0x296   : > { %v8026_v24 = vadd.f32 %v8025_v2, %v8024_v44  ;;  %v4976_v53 = vpop.f32.mrf.mxu1  ;;  %v11807_v12 = vadd.f32 %v4942_v62, %v11645_v22 }
 0x297   : > { %v8027_v43 = vpop.f32.mrf.mxu0 }
 0x298   : > { %v4945_v28 = vadd.f32 %v8026_v24, %v4944_v63  ;;  %v11809_v49 = vpop.f32.mrf.mxu1 }
 0x299   : > { %v8028_v61 = vpop.f32.mrf.mxu0 }
 0x29a   : > { %v8029_v48 = vadd.f32 %v8028_v61, %v8027_v43  ;;  %v11811_v17 = vpop.f32.mrf.mxu1  ;;  %v11814_v21 = vadd.f32 %v4945_v28, %v11658_v5 }
 0x29b   : > { %v8030_v38 = vpop.f32.mrf.mxu0 }
 0x29c   : > { %v4950_v23 = vadd.f32 %v8471_v37, %v8029_v48  ;;  %v11816_v39 = vpop.f32.mrf.mxu1 }
 0x29d   : > { %v8031_v15 = vpop.f32.mrf.mxu0 }
 0x29e   : > { %v8032_v31 = vadd.f32 %v8031_v15, %v8030_v38  ;;  %v11818_v33 = vpop.f32.mrf.mxu1  ;;  %v11821_v22 = vadd.f32 %v4950_v23, %v11639_v6 }
 0x29f   : > { %v8033_v63 = vpop.f32.mrf.mxu0 }
 0x2a0   : > { %v4953_v0 = vadd.f32 %v8472_v54, %v8032_v31  ;;  %v11823_v7 = vpop.f32.mrf.mxu1 }
 0x2a1   : > { %v8034_v16 = vpop.f32.mrf.mxu0 }
 0x2a2   : > { %v8035_v44 = vadd.f32 %v8034_v16, %v8033_v63  ;;  %v11825_v62 = vpop.f32.mrf.mxu1  ;;  %v11828_v5 = vadd.f32 %v4953_v0, %v11649_v35 }
 0x2a3   : > { %v8036_v37 = vpop.f32.mrf.mxu0 }
 0x2a4   : > { %v4958_v2 = vadd.f32 %v8035_v44, %v4957_v46  ;;  %v11830_v24 = vpop.f32.mrf.mxu1 }
 0x2a5   : > { %v8037_v43 = vpop.f32.mrf.mxu0 }
 0x2a6   : > { %v8038_v28 = vadd.f32 %v8037_v43, %v8036_v37  ;;  %v11832_v61 = vpop.f32.mrf.mxu1  ;;  %v11835_v6 = vadd.f32 %v4958_v2, %v11673_v27 }
 0x2a7   : > { %v8039_v54 = vpop.f32.mrf.mxu0 }
 0x2a8   : > { %13219 = vst [vmem:[#allocation73_spill] sm:$0xff] %v11835_v6  ;;  %v4961_v48 = vadd.f32 %v8038_v28, %v4960_v45  ;;  %v11837_v38 = vpop.f32.mrf.mxu1 }
 0x2a9   : > { %v8040_v23 = vpop.f32.mrf.mxu0 }
 0x2aa   : > { %v8041_v15 = vadd.f32 %v8040_v23, %v8039_v54  ;;  %v11839_v31 = vpop.f32.mrf.mxu1  ;;  %v11842_v35 = vadd.f32 %v4961_v48, %v11684_v50 }
 0x2ab   : > { %v8042_v46 = vpop.f32.mrf.mxu0 }
 0x2ac   : > { %13220 = vst [vmem:[#allocation91_spill] sm:$0xff] %v11842_v35  ;;  %v4966_v63 = vadd.f32 %v8475_v3, %v8041_v15  ;;  %v11844_v0 = vpop.f32.mrf.mxu1 }
 0x2ad   : > { %v8043_v16 = vpop.f32.mrf.mxu0 }
 0x2ae   : > { %v8044_v44 = vadd.f32 %v8043_v16, %v8042_v46  ;;  %v11846_v37 = vpop.f32.mrf.mxu1  ;;  %v11849_v27 = vadd.f32 %v4966_v63, %v11669_v25 }
 0x2af   : > { %v8045_v45 = vpop.f32.mrf.mxu0 }
 0x2b0   : > { %v4969_v2 = vadd.f32 %v8476_v57, %v8044_v44  ;;  %v8133_v43 = vpop.f32.mrf.mxu1 }
 0x2b1   : > { %v8046_v28 = vpop.f32.mrf.mxu0 }
 0x2b2   : > { %v8047_v54 = vadd.f32 %v8046_v28, %v8045_v45  ;;  %v8134_v23 = vpop.f32.mrf.mxu1  ;;  %v11852_v50 = vadd.f32 %v4969_v2, %v11677_v56 }
 0x2b3   : > { %v11854_v48 = vadd.f32 %v8134_v23, %v8133_v43  ;;  %v8048_v3 = vpop.f32.mrf.mxu0 }
 0x2b4   : > { %v4974_v15 = vadd.f32 %v8047_v54, %v4973_v34  ;;  %v11856_v35 = vpop.f32.mrf.mxu1 }
 0x2b5   : > { %v8049_v46 = vpop.f32.mrf.mxu0 }
 0x2b6   : > { %v8050_v16 = vadd.f32 %v8049_v46, %v8048_v3  ;;  %v11858_v6 = vpop.f32.mrf.mxu1  ;;  %v11861_v25 = vadd.f32 %v4974_v15, %v11698_v30 }
 0x2b7   : > { %v8051_v57 = vpop.f32.mrf.mxu0 }
 0x2b8   : > { %v4977_v63 = vadd.f32 %v8050_v16, %v4976_v53  ;;  %v11863_v44 = vpop.f32.mrf.mxu1 }
 0x2b9   : > { %v8052_v45 = vpop.f32.mrf.mxu0 }
 0x2ba   : > { %v8053_v56 = vadd.f32 %v8052_v45, %v8051_v57  ;;  %v11865_v2 = vpop.f32.mrf.mxu1  ;;  %v11868_v43 = vadd.f32 %v4977_v63, %v11709_v8 }
 0x2bb   : > { %v8054_v34 = vpop.f32.mrf.mxu0 }
 0x2bc   : > { %13221 = vst [vmem:[#allocation37_spill] sm:$0xff] %v11868_v43  ;;  %v4982_v28 = vadd.f32 %v11799_v36, %v8053_v56  ;;  %v11871_v54 = vpop.f32.mrf.mxu1 }
 0x2bd   : > { %v8055_v23 = vpop.f32.mrf.mxu0 }
 0x2be   : > { %v8056_v3 = vadd.f32 %v8055_v23, %v8054_v34  ;;  %v11873_v30 = vpop.f32.mrf.mxu1  ;;  %v11876_v53 = vadd.f32 %v4982_v28, %v11694_v13 }
 0x2bf   : > { %v8057_v15 = vpop.f32.mrf.mxu0 }
 0x2c0   : > { %v4985_v46 = vadd.f32 %v11804_v19, %v8056_v3  ;;  %v11879_v16 = vpop.f32.mrf.mxu1 }
 0x2c1   : > { %v8058_v57 = vpop.f32.mrf.mxu0 }
 0x2c2   : > { %v8059_v8 = vadd.f32 %v8058_v57, %v8057_v15  ;;  %v11881_v63 = vpop.f32.mrf.mxu1  ;;  %v11884_v36 = vadd.f32 %v4985_v46, %v11702_v40 }
 0x2c3   : > { %v8060_v45 = vpop.f32.mrf.mxu0 }
 0x2c4   : > { %13222 = vst [vmem:[#allocation46_spill] sm:$0xff] %v11884_v36  ;;  %v4990_v56 = vadd.f32 %v8059_v8, %v11811_v17  ;;  %v11887_v34 = vpop.f32.mrf.mxu1 }
 0x2c5   : > { %v8061_v23 = vpop.f32.mrf.mxu0 }
 0x2c6   : > { %v8062_v13 = vadd.f32 %v8061_v23, %v8060_v45  ;;  %v11889_v28 = vpop.f32.mrf.mxu1  ;;  %v11892_v19 = vadd.f32 %v4990_v56, %v11723_v10 }
 0x2c7   : > { %v8063_v3 = vpop.f32.mrf.mxu0 }
 0x2c8   : > { %13223 = vst [vmem:[#allocation36_spill] sm:$0xff] %v11892_v19  ;;  %v4993_v15 = vadd.f32 %v8062_v13, %v11818_v33  ;;  %v11895_v57 = vpop.f32.mrf.mxu1 }
 0x2c9   : > { %v8064_v43 = vpop.f32.mrf.mxu0 }
 0x2ca   : > { %v8065_v40 = vadd.f32 %v8064_v43, %v8063_v3  ;;  %v11897_v46 = vpop.f32.mrf.mxu1  ;;  %v11900_v17 = vadd.f32 %v4993_v15, %v11735_v51 }
 0x2cb   : > { %v8066_v8 = vpop.f32.mrf.mxu0 }
 0x2cc   : > { %13224 = vst [vmem:[#allocation74_spill] sm:$0xff] %v11900_v17  ;;  %v4998_v45 = vadd.f32 %v11809_v49, %v8065_v40  ;;  %v11903_v23 = vpop.f32.mrf.mxu1 }
 0x2cd   : > { %v8067_v36 = vpop.f32.mrf.mxu0 }
 0x2ce   : > { %v8068_v10 = vadd.f32 %v8067_v36, %v8066_v8  ;;  %v11905_v56 = vpop.f32.mrf.mxu1  ;;  %v11908_v33 = vadd.f32 %v4998_v45, %v11719_v20 }
 0x2cf   : > { %v8069_v13 = vpop.f32.mrf.mxu0 }
 0x2d0   : > { %13225 = vst [vmem:[#allocation34_spill] sm:$0xff] %v11908_v33  ;;  %v5001_v43 = vadd.f32 %v11816_v39, %v8068_v10  ;;  %v11911_v3 = vpop.f32.mrf.mxu1 }
 0x2d1   : > { %v8070_v19 = vpop.f32.mrf.mxu0 }
 0x2d2   : > { %v8071_v51 = vadd.f32 %v8070_v19, %v8069_v13  ;;  %v11913_v15 = vpop.f32.mrf.mxu1  ;;  %v11916_v49 = vadd.f32 %v5001_v43, %v11728_v4 }
 0x2d3   : > { %v8072_v40 = vpop.f32.mrf.mxu0 }
 0x2d4   : > { %13226 = vst [vmem:[#allocation39_spill] sm:$0xff] %v11916_v49  ;;  %v5006_v36 = vadd.f32 %v8071_v51, %v11825_v62  ;;  %v11919_v8 = vpop.f32.mrf.mxu1 }
 0x2d5   : > { %v8073_v17 = vpop.f32.mrf.mxu0 }
 0x2d6   : > { %v8074_v20 = vadd.f32 %v8073_v17, %v8072_v40  ;;  %v11921_v45 = vpop.f32.mrf.mxu1  ;;  %v11924_v39 = vadd.f32 %v5006_v36, %v11754_v59 }
 0x2d7   : > { %v8075_v10 = vpop.f32.mrf.mxu0 }
 0x2d8   : > { %13227 = vst [vmem:[#allocation78_spill] sm:$0xff] %v11924_v39  ;;  %v5009_v19 = vadd.f32 %v8074_v20, %v11832_v61  ;;  %v11927_v13 = vpop.f32.mrf.mxu1 }
 0x2d9   : > { %v8076_v33 = vpop.f32.mrf.mxu0 }
 0x2da   : > { %v8077_v4 = vadd.f32 %v8076_v33, %v8075_v10  ;;  %v11929_v43 = vpop.f32.mrf.mxu1  ;;  %v11932_v62 = vadd.f32 %v5009_v19, %v11762_v55 }
 0x2db   : > { %v8078_v51 = vpop.f32.mrf.mxu0 }
 0x2dc   : > { %13228 = vst [vmem:[#allocation42_spill] sm:$0xff] %v11932_v62  ;;  %v5014_v17 = vadd.f32 %v11823_v7, %v8077_v4  ;;  %v11935_v40 = vpop.f32.mrf.mxu1 }
 0x2dd   : > { %v8079_v49 = vpop.f32.mrf.mxu0 }
 0x2de   : > { %v8080_v59 = vadd.f32 %v8079_v49, %v8078_v51  ;;  %v11937_v36 = vpop.f32.mrf.mxu1  ;;  %v11940_v61 = vadd.f32 %v5014_v17, %v11751_v14 }
 0x2df   : > { %v8081_v20 = vpop.f32.mrf.mxu0 }
 0x2e0   : > { %13229 = vst [vmem:[#allocation75_spill] sm:$0xff] %v11940_v61  ;;  %v5017_v33 = vadd.f32 %v11830_v24, %v8080_v59  ;;  %v11943_v10 = vpop.f32.mrf.mxu1 }
 0x2e1   : > { %v8082_v39 = vpop.f32.mrf.mxu0 }
 0x2e2   : > { %v8083_v55 = vadd.f32 %v8082_v39, %v8081_v20  ;;  %v11945_v19 = vpop.f32.mrf.mxu1  ;;  %v11948_v7 = vadd.f32 %v5017_v33, %v11757_v42 }
 0x2e3   : > { %v8084_v4 = vpop.f32.mrf.mxu0 }
 0x2e4   : > { %13230 = vst [vmem:[#allocation43_spill] sm:$0xff] %v11948_v7  ;;  %v5022_v49 = vadd.f32 %v8083_v55, %v11839_v31  ;;  %v11951_v51 = vpop.f32.mrf.mxu1 }
 0x2e5   : > { %v8085_v62 = vpop.f32.mrf.mxu0 }
 0x2e6   : > { %v8086_v14 = vadd.f32 %v8085_v62, %v8084_v4  ;;  %v11953_v17 = vpop.f32.mrf.mxu1  ;;  %v11956_v24 = vadd.f32 %v5022_v49, %v11767_v47 }
 0x2e7   : > { %v8087_v59 = vpop.f32.mrf.mxu0 }
 0x2e8   : > { %v5025_v39 = vadd.f32 %v8086_v14, %v11846_v37  ;;  %v11959_v20 = vpop.f32.mrf.mxu1 }
 0x2e9   : > { %v8088_v61 = vpop.f32.mrf.mxu0 }
 0x2ea   : > { %v8089_v42 = vadd.f32 %v8088_v61, %v8087_v59  ;;  %v11961_v33 = vpop.f32.mrf.mxu1  ;;  %v11964_v31 = vadd.f32 %v5025_v39, %v11773_v18  ;;  %v8141_v61 = vadd.f32 %v11865_v2, %v11863_v44  ;;  %v8138_v44 = vadd.f32 %v11858_v6, %v11856_v35 }
 0x2eb   : > { %v8090_v55 = vpop.f32.mrf.mxu0 }
 0x2ec   : > { %v5030_v62 = vadd.f32 %v11837_v38, %v8089_v42  ;;  %v11967_v4 = vpop.f32.mrf.mxu1  ;;  %v8144_v38 = vadd.f32 %v11873_v30, %v11871_v54 }
 0x2ed   : > { %v8091_v7 = vpop.f32.mrf.mxu0 }
 0x2ee   : > { %v11970_v47 = vadd.f32 %v5030_v62, %v11770_v52  ;;  %v8092_v49 = vadd.f32 %v8091_v7, %v8090_v55  ;;  %v11972_v37 = vpop.f32.mrf.mxu1 }
 0x2ef   : > { %v8511_v14 = vpop.f32.mrf.mxu0 }
 0x2f0   : > { %13231 = vst [vmem:[#allocation12_spill] sm:$0xff] %v11970_v47  ;;  %v5033_v59 = vadd.f32 %v11844_v0, %v8092_v49  ;;  %v11977_v18 = vpop.f32.mrf.mxu1  ;;  %v5529_v52 = vadd.f32 %v8511_v14, %v8141_v61 }
 0x2f1   : > { %v5520_v39 = vpop.f32.mrf.mxu0 }
 0x2f2   : > { %v11982_v42 = vadd.f32 %v5033_v59, %v11776_v58  ;;  %v11984_v7 = vpop.f32.mrf.mxu1  ;;  %v5521_v55 = vadd.f32 %v11854_v48, %v5520_v39  ;;  %v5681_v54 = vadd.f32 %v5529_v52, %v11785_v41 }
 0x2f3   : > { %v8512_v62 = vpop.f32.mrf.mxu0 }
 0x2f4   : > { %v5679_v0 = vadd.f32 %v5521_v55, %v11779_v9  ;;  %v11990_v2 = vpop.f32.mrf.mxu1  ;;  %v5532_v49 = vadd.f32 %v8512_v62, %v8144_v38  ;;  %v8153_v9 = vadd.f32 %v11897_v46, %v11895_v57 }
 0x2f5   : > { %v5523_v47 = vpop.f32.mrf.mxu0 }
 0x2f6   : > { %v5682_v58 = vadd.f32 %v5532_v49, %v11788_v1  ;;  %v11994_v30 = vpop.f32.mrf.mxu1  ;;  %v5524_v14 = vadd.f32 %v8138_v44, %v5523_v47  ;;  %v8147_v1 = vadd.f32 %v11881_v63, %v11879_v16  ;;  %v8156_v47 = vadd.f32 %v11905_v56, %v11903_v23 }
 0x2f7   : > { %v8515_v6 = vpop.f32.mrf.mxu0  ;;  %v5972_v39 = vmul.f32 %v5679_v0, %v5679_v0  ;;  %v5974_v44 = vmul.f32 %v5681_v54, %v5681_v54 }
 0x2f8   : > { %v7348_v35 = vpack.c.bf16 %v5682_v58, %v5681_v54  ;;  %v5680_v48 = vadd.f32 %v5524_v14, %v11782_v32  ;;  %v12005_v41 = vpop.f32.mrf.mxu1  ;;  %v5545_v61 = vadd.f32 %v8515_v6, %v8153_v9  ;;  %v8150_v32 = vadd.f32 %v11889_v28, %v11887_v34 }
 0x2f9   : > { %v5536_v59 = vpop.f32.mrf.mxu0  ;;  %v5975_v56 = vmul.f32 %v5682_v58, %v5682_v58 }
 0x2fa   : > { %7422 = vst [vmem:[%s12000_s17 + $0x8] sm:$0xff] %v7348_v35   ;;  %v7343_v38 = vpack.c.bf16 %v5680_v48, %v5679_v0  ;;  %v5935_v52 = vadd.f32 %v5680_v48, %v5679_v0  ;;  %v5973_v57 = vmul.f32 %v5680_v48, %v5680_v48  ;;  %v12012_v46 = vpop.f32.mrf.mxu1  ;;  %v5537_v55 = vadd.f32 %v8147_v1, %v5536_v59 }
 0x2fb   : > { %v8516_v62 = vpop.f32.mrf.mxu0  ;;  %v5685_v14 = vadd.f32 %v5545_v61, %v11797_v11  ;;  %v8165_v1 = vadd.f32 %v11929_v43, %v11927_v13 }
 0x2fc   : > { %7344 = vst [vmem:[%s12000_s17] sm:$0xff] %v7343_v38   ;;  %v5936_v16 = vadd.f32 %v5935_v52, %v5681_v54  ;;  %v6004_v63 = vadd.f32 %v5973_v57, %v5972_v39  ;;  %v12017_v49 = vpop.f32.mrf.mxu1  ;;  %v5548_v23 = vadd.f32 %v8516_v62, %v8156_v47  ;;  %v5683_v0 = vadd.f32 %v5537_v55, %v11791_v60 }
 0x2fd   : > { %v5539_v9 = vpop.f32.mrf.mxu0  ;;  %v8159_v54 = vadd.f32 %v11913_v15, %v11911_v3  ;;  %v8168_v38 = vadd.f32 %v11937_v36, %v11935_v40  ;;  %v8162_v62 = vadd.f32 %v11921_v45, %v11919_v8 }
 0x2fe   : > { %v6005_v6 = vadd.f32 %v6004_v63, %v5974_v44  ;;  %v5937_v35 = vadd.f32 %v5936_v16, %v5682_v58  ;;  %v5686_v34 = vadd.f32 %v5548_v23, %v11802_v29  ;;  %v12022_v28 = vpop.f32.mrf.mxu1  ;;  %v5540_v48 = vadd.f32 %v8150_v32, %v5539_v9 }
 0x2ff   : > { %v8519_v47 = vpop.f32.mrf.mxu0  ;;  %v5976_v11 = vmul.f32 %v5683_v0, %v5683_v0  ;;  %v5978_v16 = vmul.f32 %v5685_v14, %v5685_v14 }
 0x300   : > { %v5938_v59 = vadd.f32 %v5937_v35, %v5683_v0  ;;  %v6006_v61 = vadd.f32 %v6005_v6, %v5975_v56  ;;  %v7358_v60 = vpack.c.bf16 %v5686_v34, %v5685_v14  ;;  %v12028_v39 = vpop.f32.mrf.mxu1  ;;  %v5684_v58 = vadd.f32 %v5540_v48, %v11794_v26 }
 0x301   : > { %v5552_v29 = vpop.f32.mrf.mxu0  ;;  %v5561_v3 = vadd.f32 %v8519_v47, %v8165_v1  ;;  %v5979_v35 = vmul.f32 %v5686_v34, %v5686_v34 }
 0x302   : > { %v6007_v52 = vadd.f32 %v6006_v61, %v5976_v11  ;;  %7424 = vst [vmem:[%s12000_s17 + $0x18] sm:$0xff] %v7358_v60   ;;  %v12034_v15 = vpop.f32.mrf.mxu1  ;;  %v5553_v13 = vadd.f32 %v8159_v54, %v5552_v29  ;;  %v7353_v43 = vpack.c.bf16 %v5684_v58, %v5683_v0  ;;  %v5939_v57 = vadd.f32 %v5938_v59, %v5684_v58 }
 0x303   : > { %v5977_v32 = vmul.f32 %v5684_v58, %v5684_v58  ;;  %v8520_v55 = vpop.f32.mrf.mxu0  ;;  %v5689_v56 = vadd.f32 %v5561_v3, %v11821_v22  ;;  %v8171_v54 = vadd.f32 %v11945_v19, %v11943_v10 }
 0x304   : > { %v12038_v44 = vpop.f32.mrf.mxu1  ;;  %v5564_v26 = vadd.f32 %v8520_v55, %v8168_v38  ;;  %7423 = vst [vmem:[%s12000_s17 + $0x10] sm:$0xff] %v7353_v43   ;;  %v5940_v63 = vadd.f32 %v5939_v57, %v5685_v14  ;;  %v5687_v36 = vadd.f32 %v5553_v13, %v11807_v12  ;;  %v8177_v14 = vadd.f32 %v11961_v33, %v11959_v20  ;;  %v13232_v13 = vld [vmem:[#allocation73_spill] sm:$0xff] }
 0x305   : > { %v6008_v40 = vadd.f32 %v6007_v52, %v5977_v32  ;;  %v5555_v23 = vpop.f32.mrf.mxu0 }
 0x306   : > { %v5690_v0 = vadd.f32 %v5564_v26, %v11828_v5  ;;  %v12044_v9 = vpop.f32.mrf.mxu1  ;;  %v5556_v6 = vadd.f32 %v8162_v62, %v5555_v23  ;;  %v5941_v45 = vadd.f32 %v5940_v63, %v5686_v34  ;;  %v8180_v5 = vadd.f32 %v11972_v37, %v11967_v4 }
 0x307   : > { %v6009_v8 = vadd.f32 %v6008_v40, %v5978_v16  ;;  %v8523_v48 = vpop.f32.mrf.mxu0  ;;  %v5980_v59 = vmul.f32 %v5687_v36, %v5687_v36  ;;  %v5982_v4 = vmul.f32 %v5689_v56, %v5689_v56 }
 0x308   : > { %v7368_v12 = vpack.c.bf16 %v5690_v0, %v5689_v56  ;;  %v5688_v1 = vadd.f32 %v5556_v6, %v11814_v21  ;;  %v12051_v22 = vpop.f32.mrf.mxu1  ;;  %v5942_v47 = vadd.f32 %v5941_v45, %v5687_v36  ;;  %v5577_v10 = vadd.f32 %v8523_v48, %v8177_v14 }
 0x309   : > { %v6010_v11 = vadd.f32 %v6009_v8, %v5979_v35  ;;  %v5568_v34 = vpop.f32.mrf.mxu0  ;;  %v8174_v21 = vadd.f32 %v11953_v17, %v11951_v51  ;;  %v5983_v16 = vmul.f32 %v5690_v0, %v5690_v0  ;;  %v8183_v17 = vadd.f32 %v11984_v7, %v11977_v18 }
 0x30a   : > { %7426 = vst [vmem:[%s12000_s17 + $0x28] sm:$0xff] %v7368_v12   ;;  %v7363_v61 = vpack.c.bf16 %v5688_v1, %v5687_v36  ;;  %v5981_v60 = vmul.f32 %v5688_v1, %v5688_v1  ;;  %v8200_v19 = vpop.f32.mrf.mxu1  ;;  %v5569_v58 = vadd.f32 %v8171_v54, %v5568_v34  ;;  %v5943_v33 = vadd.f32 %v5942_v47, %v5688_v1 }
 0x30b   : > { %v6011_v20 = vadd.f32 %v6010_v11, %v5980_v59  ;;  %v8524_v29 = vpop.f32.mrf.mxu0  ;;  %v5693_v32 = vadd.f32 %v5577_v10, %v11849_v27  ;;  %v8189_v36 = vadd.f32 %v12012_v46, %v12005_v41  ;;  %v8192_v27 = vadd.f32 %v12022_v28, %v12017_v49 }
 0x30c   : > { %7425 = vst [vmem:[%s12000_s17 + $0x20] sm:$0xff] %v7363_v61   ;;  %v8202_v38 = vpop.f32.mrf.mxu1  ;;  %v5580_v52 = vadd.f32 %v8524_v29, %v8180_v5  ;;  %v5944_v37 = vadd.f32 %v5943_v33, %v5689_v56  ;;  %v5691_v43 = vadd.f32 %v5569_v58, %v13232_v13  ;;  %v13233_v56 = vld [vmem:[#allocation91_spill] sm:$0xff]  ;;  %v8186_v1 = vadd.f32 %v11994_v30, %v11990_v2 }
 0x30d   : > { %v6012_v3 = vadd.f32 %v6011_v20, %v5981_v60  ;;  %v5571_v57 = vpop.f32.mrf.mxu0  ;;  %v5986_v28 = vmul.f32 %v5693_v32, %v5693_v32  ;;  %v13234_v60 = vld [vmem:[#allocation46_spill] sm:$0xff] }
 0x30e   : > { %v5694_v55 = vadd.f32 %v5580_v52, %v11852_v50  ;;  %v8203_v62 = vpop.f32.mrf.mxu1  ;;  %v5572_v26 = vadd.f32 %v8174_v21, %v5571_v57  ;;  %v5945_v40 = vadd.f32 %v5944_v37, %v5690_v0  ;;  %v5984_v8 = vmul.f32 %v5691_v43, %v5691_v43  ;;  %v13235_v37 = vld [vmem:[#allocation37_spill] sm:$0xff] }
 0x30f   : > { %v6013_v63 = vadd.f32 %v6012_v3, %v5982_v4  ;;  %v8527_v51 = vpop.f32.mrf.mxu0  ;;  %v8195_v21 = vadd.f32 %v12034_v15, %v12028_v39  ;;  %v8201_v52 = vadd.f32 %v8200_v19, %v12051_v22  ;;  %v8198_v22 = vadd.f32 %v12044_v9, %v12038_v44 }
 0x310   : > { %v7378_v23 = vpack.c.bf16 %v5694_v55, %v5693_v32  ;;  %v5692_v6 = vadd.f32 %v5572_v26, %v13233_v56  ;;  %v12067_v35 = vpop.f32.mrf.mxu1  ;;  %v5946_v50 = vadd.f32 %v5945_v40, %v5691_v43  ;;  %v5593_v18 = vadd.f32 %v8527_v51, %v8189_v36 }
 0x311   : > { %v6014_v45 = vadd.f32 %v6013_v63, %v5983_v16  ;;  %v5584_v0 = vpop.f32.mrf.mxu0  ;;  %v5987_v33 = vmul.f32 %v5694_v55, %v5694_v55 }
 0x312   : > { %7428 = vst [vmem:[%s12000_s17 + $0x38] sm:$0xff] %v7378_v23   ;;  %v7373_v48 = vpack.c.bf16 %v5692_v6, %v5691_v43  ;;  %v5985_v54 = vmul.f32 %v5692_v6, %v5692_v6  ;;  %v8206_v7 = vpop.f32.mrf.mxu1  ;;  %v5585_v14 = vadd.f32 %v8183_v17, %v5584_v0  ;;  %v5947_v46 = vadd.f32 %v5946_v50, %v5692_v6  ;;  %v13236_v23 = vld [vmem:[#allocation36_spill] sm:$0xff] }
 0x313   : > { %v6015_v41 = vadd.f32 %v6014_v45, %v5984_v8  ;;  %v8528_v12 = vpop.f32.mrf.mxu0  ;;  %v5697_v61 = vadd.f32 %v5593_v18, %v11876_v53  ;;  %v8204_v53 = vadd.f32 %v8203_v62, %v8202_v38  ;;  %v13238_v8 = vld [vmem:[#allocation39_spill] sm:$0xff]  ;;  %v8207_v9 = vadd.f32 %v8206_v7, %v12067_v35 }
 0x314   : > { %7427 = vst [vmem:[%s12000_s17 + $0x30] sm:$0xff] %v7373_v48   ;;  %v12075_v5 = vpop.f32.mrf.mxu1  ;;  %v5596_v49 = vadd.f32 %v8528_v12, %v8192_v27  ;;  %v5948_v47 = vadd.f32 %v5947_v46, %v5693_v32  ;;  %v5695_v11 = vadd.f32 %v5585_v14, %v11861_v25  ;;  %v13237_v27 = vld [vmem:[#allocation34_spill] sm:$0xff] }
 0x315   : > { %v6016_v59 = vadd.f32 %v6015_v41, %v5985_v54  ;;  %v5587_v34 = vpop.f32.mrf.mxu0  ;;  %v5990_v38 = vmul.f32 %v5697_v61, %v5697_v61  ;;  %v13239_v12 = vld [vmem:[#allocation74_spill] sm:$0xff] }
 0x316   : > { %v5698_v10 = vadd.f32 %v5596_v49, %v13234_v60  ;;  %v8209_v58 = vpop.f32.mrf.mxu1  ;;  %v5588_v20 = vadd.f32 %v8186_v1, %v5587_v34  ;;  %v5949_v2 = vadd.f32 %v5948_v47, %v5694_v55  ;;  %v5988_v43 = vmul.f32 %v5695_v11, %v5695_v11 }
 0x317   : > { %v6017_v29 = vadd.f32 %v6016_v59, %v5986_v28  ;;  %v8531_v30 = vpop.f32.mrf.mxu0  ;;  %v8210_v7 = vadd.f32 %v8209_v58, %v12075_v5 }
 0x318   : > { %v7388_v4 = vpack.c.bf16 %v5698_v10, %v5697_v61  ;;  %v5696_v25 = vadd.f32 %v5588_v20, %v13235_v37  ;;  %v8211_v3 = vpop.f32.mrf.mxu1  ;;  %v5950_v13 = vadd.f32 %v5949_v2, %v5695_v11  ;;  %v5609_v55 = vadd.f32 %v8531_v30, %v8201_v52 }
 0x319   : > { %v6018_v57 = vadd.f32 %v6017_v29, %v5987_v33  ;;  %v5600_v32 = vpop.f32.mrf.mxu0  ;;  %v5991_v54 = vmul.f32 %v5698_v10, %v5698_v10 }
 0x31a   : > { %7430 = vst [vmem:[%s12000_s17 + $0x48] sm:$0xff] %v7388_v4   ;;  %v7383_v26 = vpack.c.bf16 %v5696_v25, %v5695_v11  ;;  %v5989_v16 = vmul.f32 %v5696_v25, %v5696_v25  ;;  %v8212_v63 = vpop.f32.mrf.mxu1  ;;  %v5601_v40 = vadd.f32 %v8195_v21, %v5600_v32  ;;  %v5951_v39 = vadd.f32 %v5950_v13, %v5696_v25  ;;  %v13240_v25 = vld [vmem:[#allocation78_spill] sm:$0xff]  ;;  %v13241_v13 = vld [vmem:[#allocation75_spill] sm:$0xff] }
 0x31b   : > { %v6019_v51 = vadd.f32 %v6018_v57, %v5988_v43  ;;  %v8532_v15 = vpop.f32.mrf.mxu0  ;;  %v5701_v50 = vadd.f32 %v5609_v55, %v13237_v27  ;;  %v8213_v41 = vadd.f32 %v8212_v63, %v8211_v3  ;;  %v13242_v57 = vld [vmem:[#allocation43_spill] sm:$0xff] }
 0x31c   : > { %7429 = vst [vmem:[%s12000_s17 + $0x40] sm:$0xff] %v7383_v26   ;;  %v8214_v19 = vpop.f32.mrf.mxu1  ;;  %v5612_v17 = vadd.f32 %v8532_v15, %v8204_v53  ;;  %v5952_v62 = vadd.f32 %v5951_v39, %v5697_v61  ;;  %v5699_v56 = vadd.f32 %v5601_v40, %v13236_v23  ;;  %v13243_v39 = vld [vmem:[#allocation42_spill] sm:$0xff] }
 0x31d   : > { %v6020_v36 = vadd.f32 %v6019_v51, %v5989_v16  ;;  %v5603_v6 = vpop.f32.mrf.mxu0  ;;  %v5994_v52 = vmul.f32 %v5701_v50, %v5701_v50 }
 0x31e   : > { %v5702_v45 = vadd.f32 %v5612_v17, %v13238_v8  ;;  %v8215_v0 = vpop.f32.mrf.mxu1  ;;  %v5604_v48 = vadd.f32 %v8198_v22, %v5603_v6  ;;  %v5953_v14 = vadd.f32 %v5952_v62, %v5698_v10  ;;  %v5992_v47 = vmul.f32 %v5699_v56, %v5699_v56 }
 0x31f   : > { %v6021_v18 = vadd.f32 %v6020_v36, %v5990_v38  ;;  %v8535_v44 = vpop.f32.mrf.mxu0  ;;  %v8216_v11 = vadd.f32 %v8215_v0, %v8214_v19 }
 0x320   : > { %v7398_v46 = vpack.c.bf16 %v5702_v45, %v5701_v50  ;;  %v5700_v1 = vadd.f32 %v5604_v48, %v13239_v12  ;;  %v8217_v49 = vpop.f32.mrf.mxu1  ;;  %v5954_v28 = vadd.f32 %v5953_v14, %v5699_v56  ;;  %v5625_v20 = vadd.f32 %v8535_v44, %v8213_v41 }
 0x321   : > { %v6022_v59 = vadd.f32 %v6021_v18, %v5991_v54  ;;  %v5616_v34 = vpop.f32.mrf.mxu0  ;;  %v5995_v55 = vmul.f32 %v5702_v45, %v5702_v45 }
 0x322   : > { %7432 = vst [vmem:[%s12000_s17 + $0x58] sm:$0xff] %v7398_v46   ;;  %v7393_v61 = vpack.c.bf16 %v5700_v1, %v5699_v56  ;;  %v5993_v60 = vmul.f32 %v5700_v1, %v5700_v1  ;;  %v8218_v33 = vpop.f32.mrf.mxu1  ;;  %v5617_v10 = vadd.f32 %v8207_v9, %v5616_v34  ;;  %v5955_v2 = vadd.f32 %v5954_v28, %v5700_v1  ;;  %v13244_v34 = vld [vmem:[#allocation12_spill] sm:$0xff] }
 0x323   : > { %v6023_v29 = vadd.f32 %v6022_v59, %v5992_v47  ;;  %v8536_v35 = vpop.f32.mrf.mxu0  ;;  %v5705_v43 = vadd.f32 %v5625_v20, %v13241_v13  ;;  %v8219_v58 = vadd.f32 %v8218_v33, %v8217_v49 }
 0x324   : > { %7431 = vst [vmem:[%s12000_s17 + $0x50] sm:$0xff] %v7393_v61   ;;  %v8220_v30 = vpop.f32.mrf.mxu1  ;;  %v5628_v21 = vadd.f32 %v8536_v35, %v8216_v11  ;;  %v5956_v4 = vadd.f32 %v5955_v2, %v5701_v50  ;;  %v5703_v3 = vadd.f32 %v5617_v10, %v13240_v25 }
 0x325   : > { %v6024_v37 = vadd.f32 %v6023_v29, %v5993_v60  ;;  %v5619_v53 = vpop.f32.mrf.mxu0  ;;  %v5998_v18 = vmul.f32 %v5705_v43, %v5705_v43 }
 0x326   : > { %v5706_v32 = vadd.f32 %v5628_v21, %v13242_v57  ;;  %v8221_v26 = vpop.f32.mrf.mxu1  ;;  %v5620_v16 = vadd.f32 %v8210_v7, %v5619_v53  ;;  %v5957_v40 = vadd.f32 %v5956_v4, %v5702_v45  ;;  %v5996_v17 = vmul.f32 %v5703_v3, %v5703_v3 }
 0x327   : > { %v6025_v63 = vadd.f32 %v6024_v37, %v5994_v52  ;;  %v8539_v5 = vpop.f32.mrf.mxu0  ;;  %v8222_v0 = vadd.f32 %v8221_v26, %v8220_v30 }
 0x328   : > { %v7408_v51 = vpack.c.bf16 %v5706_v32, %v5705_v43  ;;  %v5704_v15 = vadd.f32 %v5620_v16, %v13243_v39  ;;  %v8223_v22 = vpop.f32.mrf.mxu1  ;;  %v5958_v19 = vadd.f32 %v5957_v40, %v5703_v3  ;;  %v5999_v1 = vmul.f32 %v5706_v32, %v5706_v32 }
 0x329   : > { %v6026_v38 = vadd.f32 %v6025_v63, %v5995_v55  ;;  %v5632_v62 = vpop.f32.mrf.mxu0 }
 0x32a   : > { %7434 = vst [vmem:[%s12000_s17 + $0x68] sm:$0xff] %v7408_v51   ;;  %v7403_v36 = vpack.c.bf16 %v5704_v15, %v5703_v3  ;;  %v5997_v23 = vmul.f32 %v5704_v15, %v5704_v15  ;;  %v8224_v56 = vpop.f32.mrf.mxu1  ;;  %v5633_v6 = vadd.f32 %v8219_v58, %v5632_v62  ;;  %v5959_v50 = vadd.f32 %v5958_v19, %v5704_v15 }
 0x32b   : > { %v6027_v27 = vadd.f32 %v6026_v38, %v5996_v17  ;;  %v8225_v8 = vadd.f32 %v8224_v56, %v8223_v22  ;;  %v8540_v45 = vpop.f32.mrf.mxu0 }
 0x32c   : > { %7433 = vst [vmem:[%s12000_s17 + $0x60] sm:$0xff] %v7403_v36   ;;  %v5707_v48 = vadd.f32 %v5633_v6, %v11956_v24  ;;  %v8226_v54 = vpop.f32.mrf.mxu1  ;;  %v5960_v14 = vadd.f32 %v5959_v50, %v5705_v43 }
 0x32d   : > { %v6028_v44 = vadd.f32 %v6027_v27, %v5997_v23  ;;  %v5641_v9 = vadd.f32 %v8539_v5, %v8225_v8  ;;  %v5635_v41 = vpop.f32.mrf.mxu0 }
 0x32e   : > { %v8227_v46 = vpop.f32.mrf.mxu1  ;;  %v5636_v12 = vadd.f32 %v8222_v0, %v5635_v41  ;;  %v5961_v28 = vadd.f32 %v5960_v14, %v5706_v32  ;;  %v6000_v59 = vmul.f32 %v5707_v48, %v5707_v48 }
 0x32f   : > { %v6029_v49 = vadd.f32 %v6028_v44, %v5998_v18  ;;  %v8228_v47 = vadd.f32 %v8227_v46, %v8226_v54  ;;  %v5709_v61 = vadd.f32 %v5641_v9, %v13244_v34 }
 0x330   : > { %v5708_v11 = vadd.f32 %v5636_v12, %v11964_v31  ;;  %v5962_v24 = vadd.f32 %v5961_v28, %v5707_v48 }
 0x331   : > { %v6030_v60 = vadd.f32 %v6029_v49, %v5999_v1  ;;  %v5644_v20 = vadd.f32 %v8540_v45, %v8228_v47  ;;  %v6002_v7 = vmul.f32 %v5709_v61, %v5709_v61 }
 0x332   : > { %v7413_v33 = vpack.c.bf16 %v5708_v11, %v5707_v48  ;;  %v6001_v10 = vmul.f32 %v5708_v11, %v5708_v11  ;;  %v5963_v35 = vadd.f32 %v5962_v24, %v5708_v11 }
 0x333   : > { %v6031_v29 = vadd.f32 %v6030_v60, %v6000_v59  ;;  %v5710_v2 = vadd.f32 %v5644_v20, %v11982_v42 }
 0x334   : > { %7435 = vst [vmem:[%s12000_s17 + $0x70] sm:$0xff] %v7413_v33   ;;  %v5964_v21 = vadd.f32 %v5963_v35, %v5709_v61 }
 0x335   : > { %v7418_v30 = vpack.c.bf16 %v5710_v2, %v5709_v61  ;;  %v6032_v52 = vadd.f32 %v6031_v29, %v6001_v10  ;;  %v6003_v4 = vmul.f32 %v5710_v2, %v5710_v2 }
 0x336   : > { %v5965_v31 = vadd.f32 %v5964_v21, %v5710_v2 }
 0x337   : > { %7436 = vst [vmem:[%s12000_s17 + $0x78] sm:$0xff] %v7418_v30   ;;  %v6033_v37 = vadd.f32 %v6032_v52, %v6002_v7 }
 0x338   : > { %v5966_v25 = vrot.slane %v5965_v31, 4 }
 0x339   : > { %v6034_v3 = vadd.f32 %v6033_v37, %v6003_v4 }
 0x33a   : > { %v5967_v53 = vadd.f32 %v5966_v25, %v5965_v31 }
 0x33b   : > { %v6035_v13 = vrot.slane %v6034_v3, 4 }
 0x33c   : > { %v5968_v43 = vrot.slane %v5967_v53, 2 }
 0x33d   : > { %v6036_v57 = vadd.f32 %v6035_v13, %v6034_v3 }
 0x33e   : > { %v5969_v32 = vadd.f32 %v5968_v43, %v5967_v53 }
 0x33f   : > { %v6037_v26 = vrot.slane %v6036_v57, 2 }
 0x340   : > { %v5970_v42 = vrot.slane %v5969_v32, 1 }
 0x341   : > { %v6038_v16 = vadd.f32 %v6037_v26, %v6036_v57 }
 0x342   : > { %v5971_v63 = vadd.f32 %v5970_v42, %v5969_v32 }
 0x343   : > { %v6039_v55 = vrot.slane %v6038_v16, 1 }
 0x345   : > { %v6040_v40 = vadd.f32 %v6039_v55, %v6038_v16 }
 0x347   : > { %v6041_v5 = vsel %vm13245_vm9, %v5971_v63, %v6040_v40 }
 0x348   : > { %6042 = vst [vmem:[%s682_s20] sm:$0x3] %v6041_v5 }
 0x349 PF: > { %s20_s11 = sadd.s32 1, %s8797_s11   ;;  %s13246_s30 = smov %s8793_s10 }
 0x34a   : > { %p17_p5 = scmp.ge.s32.totalorder %s20_s11, 4   ;;  %s13247_s10 = smov %s13249_s12 }
 0x34c   :  { %19 = sbr.rel (!%p17_p5) target bundleno = 2 (0x2), region = 113 }

</bundles_post_ra>
